<compile_context>
chip_gen: v5e
topology: v5e:2x2
jax: 0.10.0
libtpu: 0.0.40
codegen_flags: <defaults>
</compile_context>

<pallas_src>
import functools

import jax
import jax.numpy as jnp
from jax.experimental import pallas as pl
from jax.experimental.pallas import tpu as pltpu

Z_DIM = 256
IN_DIM = 784
HID = 1024
NUM_CLASSES = 10

K_PAD = 896      # IN_DIM padded to 7*128 (do NOT round up to 1024)
N_DEC = 128      # decoder output lanes, padded from 10 to 128 (unmasked stores)


def _round_up(n, m):
    return ((n + m - 1) // m) * m


def _default_batch_tile():
    kind = jax.devices()[0].device_kind.lower()
    # v7x: 2 TCs / 64 MiB VMEM -> 256; v5e/v6e: single big TC -> 512
    if "v7" in kind or "7x" in kind:
        return 256
    return 512


def vib_kernel(x_ref, eps_ref,
               w1_ref, b1_ref, w2_ref, b2_ref, w3_ref, b3_ref, wd_ref, bd_ref,
               logits_ref, dist_ref):
    # x_ref: (tb, K_PAD) bf16 — zero-padded K columns contribute nothing.
    x = x_ref[...]

    # Encoder: Linear(784,1024) + ReLU   (bf16 MXU inputs, f32 accumulate)
    h1 = jnp.dot(x, w1_ref[...], preferred_element_type=jnp.float32) + b1_ref[...]
    h1 = jnp.maximum(h1, 0.0).astype(jnp.bfloat16)

    # Linear(1024,1024) + ReLU
    h2 = jnp.dot(h1, w2_ref[...], preferred_element_type=jnp.float32) + b2_ref[...]
    h2 = jnp.maximum(h2, 0.0).astype(jnp.bfloat16)

    # Linear(1024, 2*z_dim) -> dist (mu || logvar), f32
    dist = jnp.dot(h2, w3_ref[...], preferred_element_type=jnp.float32) + b3_ref[...]

    mu = dist[:, :Z_DIM]              # lane-aligned slices (256 = 2*128)
    logvar = dist[:, Z_DIM:]

    # Reparametrize: z = mu + exp(0.5*logvar) * eps   (eps supplied, bf16)
    std = jnp.exp(0.5 * logvar)
    z = mu + std * eps_ref[...].astype(jnp.float32)

    # Decoder: Linear(z_dim, 10) padded to 128 lanes for unmasked stores.
    logits = jnp.dot(z.astype(jnp.bfloat16), wd_ref[...],
                     preferred_element_type=jnp.float32) + bd_ref[...]

    logits_ref[...] = logits
    dist_ref[...] = dist              # single lane-dense 512-wide output stream


def pack_params(params):
    """One-time pre-packing of the f32 master params into the kernel layout
    (bf16 weights, padded K / decoder lanes, f32 biases). Call ONCE and reuse —
    this is deliberately hoisted out of vib_forward."""
    w1, b1, w2, b2, w3, b3, wd, bd = params
    w1_p = jnp.zeros((K_PAD, HID), jnp.bfloat16).at[:IN_DIM].set(
        w1.astype(jnp.bfloat16))
    w2_p = w2.astype(jnp.bfloat16)
    w3_p = w3.astype(jnp.bfloat16)
    wd_p = jnp.zeros((Z_DIM, N_DEC), jnp.bfloat16).at[:, :NUM_CLASSES].set(
        wd.astype(jnp.bfloat16))
    bd_p = jnp.zeros((1, N_DEC), jnp.float32).at[:, :NUM_CLASSES].set(bd)
    return (w1_p, b1, w2_p, b2, w3_p, b3, wd_p, bd_p)


@functools.partial(jax.jit, static_argnames=("tb",))
def _vib_pallas(x, eps, packed, *, tb):
    B = x.shape[0]
    B_pad = _round_up(B, tb)
    w1_p, b1, w2_p, b2, w3_p, b3, wd_p, bd_p = packed

    # Pad / cast per-call inputs only (weights are pre-packed).
    x_p = jnp.zeros((B_pad, K_PAD), jnp.bfloat16).at[:B, :IN_DIM].set(
        x.astype(jnp.bfloat16))
    eps_p = jnp.zeros((B_pad, Z_DIM), jnp.bfloat16).at[:B].set(
        eps.astype(jnp.bfloat16))

    steps = B_pad // tb
    grid = (steps,)
    # With only 1-3 grid steps, splitting across v7x's 2 TCs doubles the weight
    # DMA for no overlap benefit -> keep it on one core ("arbitrary").
    dim_sem = ("parallel",) if steps >= 4 else ("arbitrary",)

    def batch_spec(cols):
        return pl.BlockSpec((tb, cols), lambda i: (i, 0))

    def const_spec(rows, cols):
        # Constant block index -> weight tile stays VMEM-resident across the
        # batch grid (Pallas skips the repeated DMA).
        return pl.BlockSpec((rows, cols), lambda i: (0, 0))

    logits_p, dist_p = pl.pallas_call(
        vib_kernel,
        grid=grid,
        out_shape=(
            jax.ShapeDtypeStruct((B_pad, N_DEC), jnp.float32),      # logits (padded)
            jax.ShapeDtypeStruct((B_pad, 2 * Z_DIM), jnp.float32),  # dist = mu||logvar
        ),
        in_specs=[
            batch_spec(K_PAD),               # x
            batch_spec(Z_DIM),               # eps
            const_spec(K_PAD, HID),          # w1
            const_spec(1, HID),              # b1
            const_spec(HID, HID),            # w2
            const_spec(1, HID),              # b2
            const_spec(HID, 2 * Z_DIM),      # w3
            const_spec(1, 2 * Z_DIM),        # b3
            const_spec(Z_DIM, N_DEC),        # wd
            const_spec(1, N_DEC),            # bd
        ],
        out_specs=(
            batch_spec(N_DEC),
            batch_spec(2 * Z_DIM),
        ),
        compiler_params=pltpu.CompilerParams(
            dimension_semantics=dim_sem,
            vmem_limit_bytes=48 << 20,       # fits v7x's 64 MiB physical VMEM
        ),
    )(x_p, eps_p, w1_p, b1, w2_p, b2, w3_p, b3, wd_p, bd_p)

    logits = logits_p[:B, :NUM_CLASSES]
    mu = dist_p[:B, :Z_DIM]
    logvar = dist_p[:B, Z_DIM:]
    return logits, mu, logvar


def vib_forward(x, eps, packed_params, *, batch_tile=None):
    """x: (B, 784) f32, eps: (B, Z_DIM) float (bf16 preferred),
    packed_params: output of pack_params()."""
    B = x.shape[0]
    if batch_tile is None:
        batch_tile = _default_batch_tile()
    tb = batch_tile if B >= batch_tile else _round_up(max(B, 1), 8)
    return _vib_pallas(x, eps, packed_params, tb=tb)


def init_params(key):
    """Deterministic param init mirroring PyTorch nn.Linear default
    (uniform in +-1/sqrt(fan_in)). Weights stored as [in, out] (f32 master)."""
    def linear(key, fan_in, fan_out):
        kw, kb = jax.random.split(key)
        bound = 1.0 / jnp.sqrt(fan_in)
        w = jax.random.uniform(kw, (fan_in, fan_out), jnp.float32, -bound, bound)
        b = jax.random.uniform(kb, (1, fan_out), jnp.float32, -bound, bound)
        return w, b

    k1, k2, k3, k4 = jax.random.split(key, 4)
    w1, b1 = linear(k1, IN_DIM, HID)
    w2, b2 = linear(k2, HID, HID)
    w3, b3 = linear(k3, HID, 2 * Z_DIM)
    wd, bd = linear(k4, Z_DIM, NUM_CLASSES)
    return (w1, b1, w2, b2, w3, b3, wd, bd)


def vib_reference(x, eps, params):
    """Plain-JAX reference applying the same bf16 casts as the kernel."""
    w1, b1, w2, b2, w3, b3, wd, bd = params
    xb = x.astype(jnp.bfloat16)
    w1b, w2b, w3b, wdb = (w.astype(jnp.bfloat16) for w in (w1, w2, w3, wd))
    h1 = jnp.maximum(jnp.dot(xb, w1b, preferred_element_type=jnp.float32) + b1,
                     0.0).astype(jnp.bfloat16)
    h2 = jnp.maximum(jnp.dot(h1, w2b, preferred_element_type=jnp.float32) + b2,
                     0.0).astype(jnp.bfloat16)
    dist = jnp.dot(h2, w3b, preferred_element_type=jnp.float32) + b3
    mu, logvar = dist[:, :Z_DIM], dist[:, Z_DIM:]
    z = mu + jnp.exp(0.5 * logvar) * eps.astype(jnp.bfloat16).astype(jnp.float32)
    logits = jnp.dot(z.astype(jnp.bfloat16), wdb,
                     preferred_element_type=jnp.float32) + bd
    return logits, mu, logvar


def _check(B, params, packed, kx, ke):
    x = jax.random.normal(jax.random.fold_in(kx, B), (B, IN_DIM), jnp.float32)
    # eps plays the role of torch.randn(std.size()) in reparametrize()
    eps = jax.random.normal(jax.random.fold_in(ke, B), (B, Z_DIM), jnp.bfloat16)

    logits, mu, logvar = vib_forward(x, eps, packed)
    jax.block_until_ready((logits, mu, logvar))

    logits_r, mu_r, logvar_r = vib_reference(x, eps, params)
    assert logits.shape == (B, NUM_CLASSES)
    assert mu.shape == (B, Z_DIM) and logvar.shape == (B, Z_DIM)
    assert jnp.allclose(logits, logits_r, atol=2e-2, rtol=2e-2)
    assert jnp.allclose(mu, mu_r, atol=2e-2, rtol=2e-2)
    assert jnp.allclose(logvar, logvar_r, atol=2e-2, rtol=2e-2)


if __name__ == "__main__":
    key = jax.random.PRNGKey(0)
    kp, kx, ke = jax.random.split(key, 3)

    params = init_params(kp)
    packed = pack_params(params)      # one-time weight pre-pack (hoisted)
    jax.block_until_ready(packed)

    # Small batch: single grid step (block == full padded array), "arbitrary".
    _check(8, params, packed, kx, ke)
    # Large batch: exercises the batch-tiled grid with VMEM-resident weights
    # (2 steps of 512 on v5e/v6e; 4 steps of 256 -> "parallel" on v7x).
    _check(1024, params, packed, kx, ke)

    print("KERNEL_OK")
</pallas_src>

<mosaic_0001>
module attributes {stable_mosaic.version = 11 : i64} {
  func.func @vib_kernel(%arg0: i32, %arg1: memref<8x896xbf16, #tpu.memory_space<vmem>>, %arg2: memref<8x256xbf16, #tpu.memory_space<vmem>>, %arg3: memref<896x1024xbf16, #tpu.memory_space<vmem>>, %arg4: memref<1x1024xf32, #tpu.memory_space<vmem>>, %arg5: memref<1024x1024xbf16, #tpu.memory_space<vmem>>, %arg6: memref<1x1024xf32, #tpu.memory_space<vmem>>, %arg7: memref<1024x512xbf16, #tpu.memory_space<vmem>>, %arg8: memref<1x512xf32, #tpu.memory_space<vmem>>, %arg9: memref<256x128xbf16, #tpu.memory_space<vmem>>, %arg10: memref<1x128xf32, #tpu.memory_space<vmem>>, %arg11: memref<8x128xf32, #tpu.memory_space<vmem>>, %arg12: memref<8x512xf32, #tpu.memory_space<vmem>>) attributes {dimension_semantics = [#tpu.dimension_semantics<arbitrary>], iteration_bounds = array<i64: 1>, scalar_prefetch = 0 : i64, scratch_operands = 0 : i64, tpu.core_type = #tpu.core_type<tc>, window_params = [{transform_indices = @transform_0, window_bounds = array<i64: 8, 896>}, {transform_indices = @transform_1, window_bounds = array<i64: 8, 256>}, {pipeline_mode = #tpu.pipeline_mode<synchronous>, transform_indices = @transform_2, window_bounds = array<i64: 896, 1024>}, {pipeline_mode = #tpu.pipeline_mode<synchronous>, transform_indices = @transform_3, window_bounds = array<i64: 1, 1024>}, {pipeline_mode = #tpu.pipeline_mode<synchronous>, transform_indices = @transform_4, window_bounds = array<i64: 1024, 1024>}, {pipeline_mode = #tpu.pipeline_mode<synchronous>, transform_indices = @transform_5, window_bounds = array<i64: 1, 1024>}, {pipeline_mode = #tpu.pipeline_mode<synchronous>, transform_indices = @transform_6, window_bounds = array<i64: 1024, 512>}, {pipeline_mode = #tpu.pipeline_mode<synchronous>, transform_indices = @transform_7, window_bounds = array<i64: 1, 512>}, {pipeline_mode = #tpu.pipeline_mode<synchronous>, transform_indices = @transform_8, window_bounds = array<i64: 256, 128>}, {pipeline_mode = #tpu.pipeline_mode<synchronous>, transform_indices = @transform_9, window_bounds = array<i64: 1, 128>}, {transform_indices = @transform_10, window_bounds = array<i64: 8, 128>}, {transform_indices = @transform_11, window_bounds = array<i64: 8, 512>}]} {
    %c0 = arith.constant 0 : index
    %c0_0 = arith.constant 0 : index
    %0 = vector.load %arg1[%c0, %c0_0] : memref<8x896xbf16, #tpu.memory_space<vmem>>, vector<8x896xbf16>
    %c0_1 = arith.constant 0 : index
    %c0_2 = arith.constant 0 : index
    %1 = vector.load %arg3[%c0_1, %c0_2] : memref<896x1024xbf16, #tpu.memory_space<vmem>>, vector<896x1024xbf16>
    %cst = arith.constant dense<0.000000e+00> : vector<8x1024xf32>
    %2 = tpu.matmul %0, %1, %cst {dimension_numbers = #tpu.dot_dimension_numbers<[1], [0], [0], [1], [0, 0, 1, 1], [], []>} : vector<8x896xbf16>, vector<896x1024xbf16>, vector<8x1024xf32> -> vector<8x1024xf32>
    %c0_3 = arith.constant 0 : index
    %c0_4 = arith.constant 0 : index
    %3 = vector.load %arg4[%c0_3, %c0_4] : memref<1x1024xf32, #tpu.memory_space<vmem>>, vector<1x1024xf32>
    %4 = vector.broadcast %3 : vector<1x1024xf32> to vector<8x1024xf32>
    %5 = arith.addf %2, %4 : vector<8x1024xf32>
    %cst_5 = arith.constant 0.000000e+00 : f32
    %6 = vector.broadcast %cst_5 : f32 to vector<8x1024xf32>
    %7 = arith.maximumf %5, %6 : vector<8x1024xf32>
    %8 = arith.truncf %7 : vector<8x1024xf32> to vector<8x1024xbf16>
    %c0_6 = arith.constant 0 : index
    %c0_7 = arith.constant 0 : index
    %9 = vector.load %arg5[%c0_6, %c0_7] : memref<1024x1024xbf16, #tpu.memory_space<vmem>>, vector<1024x1024xbf16>
    %cst_8 = arith.constant dense<0.000000e+00> : vector<8x1024xf32>
    %10 = tpu.matmul %8, %9, %cst_8 {dimension_numbers = #tpu.dot_dimension_numbers<[1], [0], [0], [1], [0, 0, 1, 1], [], []>} : vector<8x1024xbf16>, vector<1024x1024xbf16>, vector<8x1024xf32> -> vector<8x1024xf32>
    %c0_9 = arith.constant 0 : index
    %c0_10 = arith.constant 0 : index
    %11 = vector.load %arg6[%c0_9, %c0_10] : memref<1x1024xf32, #tpu.memory_space<vmem>>, vector<1x1024xf32>
    %12 = vector.broadcast %11 : vector<1x1024xf32> to vector<8x1024xf32>
    %13 = arith.addf %10, %12 : vector<8x1024xf32>
    %cst_11 = arith.constant 0.000000e+00 : f32
    %14 = vector.broadcast %cst_11 : f32 to vector<8x1024xf32>
    %15 = arith.maximumf %13, %14 : vector<8x1024xf32>
    %16 = arith.truncf %15 : vector<8x1024xf32> to vector<8x1024xbf16>
    %c0_12 = arith.constant 0 : index
    %c0_13 = arith.constant 0 : index
    %17 = vector.load %arg7[%c0_12, %c0_13] : memref<1024x512xbf16, #tpu.memory_space<vmem>>, vector<1024x512xbf16>
    %cst_14 = arith.constant dense<0.000000e+00> : vector<8x512xf32>
    %18 = tpu.matmul %16, %17, %cst_14 {dimension_numbers = #tpu.dot_dimension_numbers<[1], [0], [0], [1], [0, 0, 1, 1], [], []>} : vector<8x1024xbf16>, vector<1024x512xbf16>, vector<8x512xf32> -> vector<8x512xf32>
    %c0_15 = arith.constant 0 : index
    %c0_16 = arith.constant 0 : index
    %19 = vector.load %arg8[%c0_15, %c0_16] : memref<1x512xf32, #tpu.memory_space<vmem>>, vector<1x512xf32>
    %20 = vector.broadcast %19 : vector<1x512xf32> to vector<8x512xf32>
    %21 = arith.addf %18, %20 : vector<8x512xf32>
    %22 = vector.extract_strided_slice %21 {offsets = [0, 0], sizes = [8, 256], strides = [1, 1]} : vector<8x512xf32> to vector<8x256xf32>
    %23 = vector.extract_strided_slice %21 {offsets = [0, 256], sizes = [8, 256], strides = [1, 1]} : vector<8x512xf32> to vector<8x256xf32>
    %cst_17 = arith.constant 5.000000e-01 : f32
    %24 = vector.broadcast %cst_17 : f32 to vector<8x256xf32>
    %25 = arith.mulf %24, %23 : vector<8x256xf32>
    %26 = math.exp %25 : vector<8x256xf32>
    %c0_18 = arith.constant 0 : index
    %c0_19 = arith.constant 0 : index
    %27 = vector.load %arg2[%c0_18, %c0_19] : memref<8x256xbf16, #tpu.memory_space<vmem>>, vector<8x256xbf16>
    %28 = arith.extf %27 : vector<8x256xbf16> to vector<8x256xf32>
    %29 = arith.mulf %26, %28 : vector<8x256xf32>
    %30 = arith.addf %22, %29 : vector<8x256xf32>
    %31 = arith.truncf %30 : vector<8x256xf32> to vector<8x256xbf16>
    %c0_20 = arith.constant 0 : index
    %c0_21 = arith.constant 0 : index
    %32 = vector.load %arg9[%c0_20, %c0_21] : memref<256x128xbf16, #tpu.memory_space<vmem>>, vector<256x128xbf16>
    %cst_22 = arith.constant dense<0.000000e+00> : vector<8x128xf32>
    %33 = tpu.matmul %31, %32, %cst_22 {dimension_numbers = #tpu.dot_dimension_numbers<[1], [0], [0], [1], [0, 0, 1, 1], [], []>} : vector<8x256xbf16>, vector<256x128xbf16>, vector<8x128xf32> -> vector<8x128xf32>
    %c0_23 = arith.constant 0 : index
    %c0_24 = arith.constant 0 : index
    %34 = vector.load %arg10[%c0_23, %c0_24] : memref<1x128xf32, #tpu.memory_space<vmem>>, vector<1x128xf32>
    %35 = vector.broadcast %34 : vector<1x128xf32> to vector<8x128xf32>
    %36 = arith.addf %33, %35 : vector<8x128xf32>
    %c0_25 = arith.constant 0 : index
    %c0_26 = arith.constant 0 : index
    %37 = vector.load %arg11[%c0_25, %c0_26] : memref<8x128xf32, #tpu.memory_space<vmem>>, vector<8x128xf32>
    tpu.vector_store %arg11[%c0_25, %c0_26], %36 {strides = array<i32>} : memref<8x128xf32, #tpu.memory_space<vmem>>, vector<8x128xf32>,
    %c0_27 = arith.constant 0 : index
    %c0_28 = arith.constant 0 : index
    %38 = vector.load %arg12[%c0_27, %c0_28] : memref<8x512xf32, #tpu.memory_space<vmem>>, vector<8x512xf32>
    tpu.vector_store %arg12[%c0_27, %c0_28], %21 {strides = array<i32>} : memref<8x512xf32, #tpu.memory_space<vmem>>, vector<8x512xf32>,
    return
  }
  func.func @transform_0(%arg0: i32) -> (i32, i32) {
    %c0_i32 = arith.constant 0 : i32
    %c0_i32_0 = arith.constant 0 : i32
    return %arg0, %c0_i32 : i32, i32
  }
  func.func @transform_1(%arg0: i32) -> (i32, i32) {
    %c0_i32 = arith.constant 0 : i32
    %c0_i32_0 = arith.constant 0 : i32
    return %arg0, %c0_i32 : i32, i32
  }
  func.func @transform_2(%arg0: i32) -> (i32, i32) {
    %c0_i32 = arith.constant 0 : i32
    %c0_i32_0 = arith.constant 0 : i32
    %c0_i32_1 = arith.constant 0 : i32
    return %c0_i32, %c0_i32_0 : i32, i32
  }
  func.func @transform_3(%arg0: i32) -> (i32, i32) {
    %c0_i32 = arith.constant 0 : i32
    %c0_i32_0 = arith.constant 0 : i32
    %c0_i32_1 = arith.constant 0 : i32
    return %c0_i32, %c0_i32_0 : i32, i32
  }
  func.func @transform_4(%arg0: i32) -> (i32, i32) {
    %c0_i32 = arith.constant 0 : i32
    %c0_i32_0 = arith.constant 0 : i32
    %c0_i32_1 = arith.constant 0 : i32
    return %c0_i32, %c0_i32_0 : i32, i32
  }
  func.func @transform_5(%arg0: i32) -> (i32, i32) {
    %c0_i32 = arith.constant 0 : i32
    %c0_i32_0 = arith.constant 0 : i32
    %c0_i32_1 = arith.constant 0 : i32
    return %c0_i32, %c0_i32_0 : i32, i32
  }
  func.func @transform_6(%arg0: i32) -> (i32, i32) {
    %c0_i32 = arith.constant 0 : i32
    %c0_i32_0 = arith.constant 0 : i32
    %c0_i32_1 = arith.constant 0 : i32
    return %c0_i32, %c0_i32_0 : i32, i32
  }
  func.func @transform_7(%arg0: i32) -> (i32, i32) {
    %c0_i32 = arith.constant 0 : i32
    %c0_i32_0 = arith.constant 0 : i32
    %c0_i32_1 = arith.constant 0 : i32
    return %c0_i32, %c0_i32_0 : i32, i32
  }
  func.func @transform_8(%arg0: i32) -> (i32, i32) {
    %c0_i32 = arith.constant 0 : i32
    %c0_i32_0 = arith.constant 0 : i32
    %c0_i32_1 = arith.constant 0 : i32
    return %c0_i32, %c0_i32_0 : i32, i32
  }
  func.func @transform_9(%arg0: i32) -> (i32, i32) {
    %c0_i32 = arith.constant 0 : i32
    %c0_i32_0 = arith.constant 0 : i32
    %c0_i32_1 = arith.constant 0 : i32
    return %c0_i32, %c0_i32_0 : i32, i32
  }
  func.func @transform_10(%arg0: i32) -> (i32, i32) {
    %c0_i32 = arith.constant 0 : i32
    %c0_i32_0 = arith.constant 0 : i32
    return %arg0, %c0_i32 : i32, i32
  }
  func.func @transform_11(%arg0: i32) -> (i32, i32) {
    %c0_i32 = arith.constant 0 : i32
    %c0_i32_0 = arith.constant 0 : i32
    return %arg0, %c0_i32 : i32, i32
  }
}

</mosaic_0001>

<bundles_post_ra>
// kernel: _vib_pallas.1
= control target key start
LH: loop header
LB: loop body
LE: loop exit
PB: predicated region body
PF: predicated region fallthrough
CT: control target
= control target key end

     0   :  { %17 = vsyncpa [#allocation3], 0  ;;  %s16833_s0 = inlined_call_operand.vmem [shape: bf16[8,896], index: 0, kind: input, shape index: {}]   ;;  %s16834_s1 = inlined_call_operand.hbm [shape: bf16[8,256], index: 1, kind: input, shape index: {}]   ;;  %s16835_s2 = inlined_call_operand.hbm [shape: bf16[896,1024], index: 2, kind: input, shape index: {}]   ;;  %s16836_s3 = inlined_call_operand.hbm [shape: f32[1,1024], index: 3, kind: input, shape index: {}]   ;;  %s16837_s4 = inlined_call_operand.hbm [shape: bf16[1024,1024], index: 4, kind: input, shape index: {}]   ;;  %s16838_s5 = inlined_call_operand.hbm [shape: f32[1,1024], index: 5, kind: input, shape index: {}]   ;;  %s16839_s6 = inlined_call_operand.hbm [shape: bf16[1024,512], index: 6, kind: input, shape index: {}]   ;;  %s16840_s7 = inlined_call_operand.hbm [shape: f32[1,512], index: 7, kind: input, shape index: {}]   ;;  %s16841_s8 = inlined_call_operand.hbm [shape: bf16[256,128], index: 8, kind: input, shape index: {}]   ;;  %s16842_s9 = inlined_call_operand.hbm [shape: f32[1,128], index: 9, kind: input, shape index: {}]   ;;  %s16843_s10 = inlined_call_operand.hbm [shape: f32[8,128], index: 10, kind: output, shape index: {0}]   ;;  %s16844_s11 = inlined_call_operand.vmem [shape: f32[8,512], index: 11, kind: output, shape index: {1}]  }
   0x1   :  { %18 = vsyncpa [#allocation6], 0 }
   0x2   :  { %19 = vsyncpa [#allocation9], 0 }
   0x3   :  { %20 = vsyncpa [#allocation12], 0 }
   0x4   :  { %21 = vsyncpa [#allocation15], 0  ;;  %s40_s19 = sshll.u32 %s16835_s2, 4  ;;  %s41_s19 = int_to_ptr.hbm [resolvable:$true] %s40_s19 }
   0x5   :  { %22 = vsyncpa [#allocation4], 0  ;;  %s16189_s20 = smov [#allocation5]   ;;  %s64_s24 = sshll.u32 %s16837_s4, 4  ;;  %s65_s24 = int_to_ptr.hbm [resolvable:$true] %s64_s24 }
   0x6   :  { %s42_s21 = sshll.u32 %s16189_s20, 4  ;;  %s16190_s25 = smov 512   ;;  %s43_s21 = int_to_ptr.vmem [resolvable:$true] %s42_s21 }
   0x7   :  { %s16191_s26 = smov 32   ;;  %s16192_s27 = smov [#allocation8]  }
   0x8   :  { %48 = dma.hbm_to_vmem [thread:$0]  %s41_s19, 57344, %s43_s21, [#allocation6], %s16190_s25, %s16190_s25, %s16191_s26  }
   0x9   :  { %s66_s28 = sshll.u32 %s16192_s27, 4  ;;  %s88_s12 = sshll.u32 %s16839_s6, 4  ;;  %s67_s28 = int_to_ptr.vmem [resolvable:$true] %s66_s28  ;;  %s89_s12 = int_to_ptr.hbm [resolvable:$true] %s88_s12 }
   0xa   :  { %72 = dma.hbm_to_vmem [thread:$0]  %s65_s24, 65536, %s67_s28, [#allocation9], %s16190_s25, %s16190_s25, %s16191_s26  }
   0xb   :  { %s16193_s2 = smov [#allocation11]   ;;  %s112_s4 = sshll.u32 %s16841_s8, 4  ;;  %s113_s4 = int_to_ptr.hbm [resolvable:$true] %s112_s4 }
   0xc   :  { %s90_s13 = sshll.u32 %s16193_s2, 4  ;;  %s16194_s16 = smov 256   ;;  %s91_s13 = int_to_ptr.vmem [resolvable:$true] %s90_s13 }
   0xd   :  { %s16195_s17 = smov 16   ;;  %s16196_s18 = smov [#allocation14]  }
   0xe   :  { %96 = dma.hbm_to_vmem [thread:$0]  %s89_s12, 32768, %s91_s13, [#allocation12], %s16194_s16, %s16194_s16, %s16195_s17  }
   0xf   :  { %s114_s19 = sshll.u32 %s16196_s18, 4  ;;  %s16197_s20 = smov 64   ;;  %s115_s19 = int_to_ptr.vmem [resolvable:$true] %s114_s19 }
  0x10   :  { %s16198_s21 = smov 4   ;;  %s30_s23 = sshll.u32 %s16834_s1, 4  ;;  %s31_s23 = int_to_ptr.hbm [resolvable:$true] %s30_s23 }
  0x11   :  { %120 = dma.hbm_to_vmem [thread:$0]  %s113_s4, 2048, %s115_s19, [#allocation15], %s16197_s20, %s16197_s20, %s16198_s21  }
  0x12   :  { %s16199_s24 = smov [#allocation2]   ;;  %s54_s27 = sshll.u32 %s16836_s3, 4  ;;  %s55_s27 = int_to_ptr.hbm [resolvable:$true] %s54_s27 }
  0x13   :  { %s32_s25 = sshll.u32 %s16199_s24, 4  ;;  %s16200_s28 = smov [#allocation7]   ;;  %s33_s25 = int_to_ptr.vmem [resolvable:$true] %s32_s25 }
  0x14   :  { %35 = dma.hbm_to_vmem [thread:$0]  %s31_s23, 128, %s33_s25, [#allocation3]  }
  0x15   :  { %s56_s29 = sshll.u32 %s16200_s28, 4  ;;  %s78_s2 = sshll.u32 %s16838_s5, 4  ;;  %s57_s29 = int_to_ptr.vmem [resolvable:$true] %s56_s29  ;;  %s79_s2 = int_to_ptr.hbm [resolvable:$true] %s78_s2 }
  0x16   :  { %59 = dma.hbm_to_vmem [thread:$0]  %s55_s27, 128, %s57_s29, [#allocation6]  }
  0x17   :  { %s102_s14 = sshll.u32 %s16840_s7, 4  ;;  %s16201_s15 = smov [#allocation10]   ;;  %s103_s14 = int_to_ptr.hbm [resolvable:$true] %s102_s14 }
  0x18   :  { %s80_s4 = sshll.u32 %s16201_s15, 4  ;;  %s16202_s3 = smov [#allocation13]   ;;  %s81_s4 = int_to_ptr.vmem [resolvable:$true] %s80_s4 }
  0x19   :  { %83 = dma.hbm_to_vmem [thread:$0]  %s79_s2, 128, %s81_s4, [#allocation9]  }
  0x1a   :  { %s104_s16 = sshll.u32 %s16202_s3, 4  ;;  %s126_s19 = sshll.u32 %s16842_s9, 4  ;;  %s105_s16 = int_to_ptr.vmem [resolvable:$true] %s104_s16  ;;  %s127_s19 = int_to_ptr.hbm [resolvable:$true] %s126_s19 }
  0x1b   :  { %107 = dma.hbm_to_vmem [thread:$0]  %s103_s14, 64, %s105_s16, [#allocation12]  }
  0x1c   :  { %s16203_s5 = smov [#allocation16]  }
  0x1d   :  { %s128_s20 = sshll.u32 %s16203_s5, 4  ;;  %s129_s20 = int_to_ptr.vmem [resolvable:$true] %s128_s20 }
  0x1e   :  { %131 = dma.hbm_to_vmem [thread:$0]  %s127_s19, 16, %s129_s20, [#allocation15]  }
  0x1f   :  { %16177 = dma.done.wait [#allocation3], 128  }
  0x20   :  { %16178 = vsyncadd [#allocation3], 4294967168 }
  0x21   :  { %16179 = dma.done.wait [#allocation6], 57472  }
  0x22   :  { %16180 = vsyncadd [#allocation6], 4294909824 }
  0x23   :  { %16181 = dma.done.wait [#allocation9], 65664  }
  0x24   :  { %16182 = vsyncadd [#allocation9], 4294901632 }
  0x25   :  { %16183 = dma.done.wait [#allocation12], 32832  }
  0x26   :  { %16184 = vsyncadd [#allocation12], 4294934464 }
  0x27   :  { %16185 = dma.done.wait [#allocation15], 2064  }
  0x28   :  { %16186 = vsyncadd [#allocation15], 4294965232  ;;  %v9976_v0 = vld [vmem:[#allocation5 + $0x1c0] sm:$0xf]  ;;  %s16204_s2 = smov [#allocation17]   ;;  %s9732_s15 = sshll.u32 %s16843_s10, 4  ;;  %s9733_s15 = int_to_ptr.hbm [resolvable:$true] %s9732_s15 }
  0x29   :  { %v14738_v1 = vld [vmem:[#allocation5 + $0x1dc] sm:$0xf0]  ;;  %s9730_s1 = sshll.u32 %s16204_s2, 4  ;;  %s9731_s1 = int_to_ptr.vmem [resolvable:$true] %s9730_s1 }
  0x2a   :  { %v10232_v2 = vld [vmem:[#allocation5 + $0x3c0] sm:$0xf]  ;;  %v9977_v3 = vor.u32 %v14738_v1, %v9976_v0 }
  0x2b   :  { %v14802_v4 = vld [vmem:[#allocation5 + $0x3dc] sm:$0xf0] }
  0x2c   :  { %v10488_v5 = vld [vmem:[#allocation5 + $0x5c0] sm:$0xf]  ;;  %v10233_v7 = vor.u32 %v14802_v4, %v10232_v2  ;;  %2903 = vmatpush.bf16.msra.mxu0 %v9977_v3 }
  0x2d   :  { %v14866_v6 = vld [vmem:[#allocation5 + $0x5dc] sm:$0xf0] }
  0x2e   :  { %v10489_v8 = vor.u32 %v14866_v6, %v10488_v5  ;;  %v10744_v9 = vld [vmem:[#allocation5 + $0x7c0] sm:$0xf]  ;;  %2916 = vmatpush.bf16.msra.mxu1 %v10233_v7 }
  0x2f   :  { %v14930_v10 = vld [vmem:[#allocation5 + $0x7dc] sm:$0xf0] }
  0x30   :  { %v9944_v11 = vld [vmem:[#allocation5 + $0x180] sm:$0xf]  ;;  %v10745_v12 = vor.u32 %v14930_v10, %v10744_v9  ;;  %2929 = vmatpush.bf16.msra.mxu2 %v10489_v8 }
  0x31   :  { %v14730_v13 = vld [vmem:[#allocation5 + $0x19c] sm:$0xf0] }
  0x32   :  { %v10200_v14 = vld [vmem:[#allocation5 + $0x380] sm:$0xf]  ;;  %v9945_v16 = vor.u32 %v14730_v13, %v9944_v11  ;;  %2942 = vmatpush.bf16.msra.mxu3 %v10745_v12 }
  0x33   :  { %v14794_v15 = vld [vmem:[#allocation5 + $0x39c] sm:$0xf0] }
  0x34   :  { %v10201_v17 = vor.u32 %v14794_v15, %v10200_v14  ;;  %v10456_v18 = vld [vmem:[#allocation5 + $0x580] sm:$0xf]  ;;  %2904 = vmatpush.bf16.msra.mxu0 %v9945_v16 }
  0x35   :  { %v14858_v19 = vld [vmem:[#allocation5 + $0x59c] sm:$0xf0] }
  0x36   :  { %v10712_v20 = vld [vmem:[#allocation5 + $0x780] sm:$0xf]  ;;  %v10457_v21 = vor.u32 %v14858_v19, %v10456_v18  ;;  %2917 = vmatpush.bf16.msra.mxu1 %v10201_v17 }
  0x37   :  { %v14922_v22 = vld [vmem:[#allocation5 + $0x79c] sm:$0xf0] }
  0x38   :  { %v9912_v23 = vld [vmem:[#allocation5 + $0x140] sm:$0xf]  ;;  %v10713_v25 = vor.u32 %v14922_v22, %v10712_v20  ;;  %2930 = vmatpush.bf16.msra.mxu2 %v10457_v21 }
  0x39   :  { %v14722_v24 = vld [vmem:[#allocation5 + $0x15c] sm:$0xf0] }
  0x3a   :  { %v10168_v26 = vld [vmem:[#allocation5 + $0x340] sm:$0xf]  ;;  %v9913_v29 = vor.u32 %v14722_v24, %v9912_v23  ;;  %2943 = vmatpush.bf16.msra.mxu3 %v10713_v25 }
  0x3b   :  { %v14786_v27 = vld [vmem:[#allocation5 + $0x35c] sm:$0xf0] }
  0x3c   :  { %v10424_v28 = vld [vmem:[#allocation5 + $0x540] sm:$0xf]  ;;  %v10169_v33 = vor.u32 %v14786_v27, %v10168_v26  ;;  %2905 = vmatpush.bf16.msra.mxu0 %v9913_v29 }
  0x3d   :  { %v14850_v30 = vld [vmem:[#allocation5 + $0x55c] sm:$0xf0] }
  0x3e   :  { %v10680_v31 = vld [vmem:[#allocation5 + $0x740] sm:$0xf]  ;;  %v10425_v34 = vor.u32 %v14850_v30, %v10424_v28  ;;  %2918 = vmatpush.bf16.msra.mxu1 %v10169_v33 }
  0x3f   :  { %v14914_v32 = vld [vmem:[#allocation5 + $0x75c] sm:$0xf0] }
  0x40   :  { %v9880_v35 = vld [vmem:[#allocation5 + $0x100] sm:$0xf]  ;;  %v10681_v38 = vor.u32 %v14914_v32, %v10680_v31  ;;  %2931 = vmatpush.bf16.msra.mxu2 %v10425_v34 }
  0x41   :  { %v14714_v36 = vld [vmem:[#allocation5 + $0x11c] sm:$0xf0] }
  0x42   :  { %v10136_v37 = vld [vmem:[#allocation5 + $0x300] sm:$0xf]  ;;  %v9881_v44 = vor.u32 %v14714_v36, %v9880_v35  ;;  %2944 = vmatpush.bf16.msra.mxu3 %v10681_v38  ;;  %v9978_v38 = vld [vmem:[#allocation5 + $0x1e0] sm:$0xf0] }
  0x43   :  { %v14778_v39 = vld [vmem:[#allocation5 + $0x31c] sm:$0xf0] }
  0x44   :  { %v10392_v40 = vld [vmem:[#allocation5 + $0x500] sm:$0xf]  ;;  %v10137_v45 = vor.u32 %v14778_v39, %v10136_v37  ;;  %2906 = vmatpush.bf16.msra.mxu0 %v9881_v44  ;;  %v14734_v37 = vld [vmem:[#allocation5 + $0x1c4] sm:$0xf] }
  0x45   :  { %v14842_v41 = vld [vmem:[#allocation5 + $0x51c] sm:$0xf0] }
  0x46   :  { %v10648_v42 = vld [vmem:[#allocation5 + $0x700] sm:$0xf]  ;;  %v10393_v46 = vor.u32 %v14842_v41, %v10392_v40  ;;  %2919 = vmatpush.bf16.msra.mxu1 %v10137_v45 }
  0x47   :  { %v14906_v43 = vld [vmem:[#allocation5 + $0x71c] sm:$0xf0] }
  0x48   :  { %v9848_v47 = vld [vmem:[#allocation5 + $0xc0] sm:$0xf]  ;;  %v10649_v50 = vor.u32 %v14906_v43, %v10648_v42  ;;  %2932 = vmatpush.bf16.msra.mxu2 %v10393_v46  ;;  %v9981_v46 = vor.u32 %v14734_v37, %v9978_v38 }
  0x49   :  { %v14706_v48 = vld [vmem:[#allocation5 + $0xdc] sm:$0xf0] }
  0x4a   :  { %v10104_v49 = vld [vmem:[#allocation5 + $0x2c0] sm:$0xf]  ;;  %v9849_v56 = vor.u32 %v14706_v48, %v9848_v47  ;;  %2945 = vmatpush.bf16.msra.mxu3 %v10649_v50  ;;  %v14726_v50 = vld [vmem:[#allocation5 + $0x184] sm:$0xf] }
  0x4b   :  { %v14770_v51 = vld [vmem:[#allocation5 + $0x2dc] sm:$0xf0] }
  0x4c   :  { %v10360_v52 = vld [vmem:[#allocation5 + $0x4c0] sm:$0xf]  ;;  %v10105_v57 = vor.u32 %v14770_v51, %v10104_v49  ;;  %2907 = vmatpush.bf16.msra.mxu0 %v9849_v56  ;;  %v9946_v51 = vld [vmem:[#allocation5 + $0x1a0] sm:$0xf0] }
  0x4d   :  { %v14834_v53 = vld [vmem:[#allocation5 + $0x4dc] sm:$0xf0] }
  0x4e   :  { %v10616_v54 = vld [vmem:[#allocation5 + $0x6c0] sm:$0xf]  ;;  %v10361_v58 = vor.u32 %v14834_v53, %v10360_v52  ;;  %2920 = vmatpush.bf16.msra.mxu1 %v10105_v57 }
  0x4f   :  { %v14898_v55 = vld [vmem:[#allocation5 + $0x6dc] sm:$0xf0] }
  0x50   :  { %v9816_v59 = vld [vmem:[#allocation5 + $0x80] sm:$0xf]  ;;  %v10617_v62 = vor.u32 %v14898_v55, %v10616_v54  ;;  %2933 = vmatpush.bf16.msra.mxu2 %v10361_v58 }
  0x51   :  { %v14698_v60 = vld [vmem:[#allocation5 + $0x9c] sm:$0xf0] }
  0x52   :  { %v10072_v61 = vld [vmem:[#allocation5 + $0x280] sm:$0xf]  ;;  %v9817_v4 = vor.u32 %v14698_v60, %v9816_v59  ;;  %2946 = vmatpush.bf16.msra.mxu3 %v10617_v62  ;;  %v9949_v59 = vor.u32 %v14726_v50, %v9946_v51  ;;  %v14718_v62 = vld [vmem:[#allocation5 + $0x144] sm:$0xf] }
  0x53   :  { %v14762_v63 = vld [vmem:[#allocation5 + $0x29c] sm:$0xf0] }
  0x54   :  { %v10328_v0 = vld [vmem:[#allocation5 + $0x480] sm:$0xf]  ;;  %v10073_v5 = vor.u32 %v14762_v63, %v10072_v61  ;;  %2908 = vmatpush.bf16.msra.mxu0 %v9817_v4  ;;  %v9914_v63 = vld [vmem:[#allocation5 + $0x160] sm:$0xf0] }
  0x55   :  { %v14826_v1 = vld [vmem:[#allocation5 + $0x49c] sm:$0xf0] }
  0x56   :  { %v10584_v2 = vld [vmem:[#allocation5 + $0x680] sm:$0xf]  ;;  %v10329_v6 = vor.u32 %v14826_v1, %v10328_v0  ;;  %2921 = vmatpush.bf16.msra.mxu1 %v10073_v5 }
  0x57   :  { %v14890_v3 = vld [vmem:[#allocation5 + $0x69c] sm:$0xf0] }
  0x58   :  { %v9784_v7 = vld [vmem:[#allocation5 + $0x40] sm:$0xf]  ;;  %v10585_v10 = vor.u32 %v14890_v3, %v10584_v2  ;;  %2934 = vmatpush.bf16.msra.mxu2 %v10329_v6  ;;  %v168_v3 = vld [vmem:[%s16833_s0] sm:$0xff] }
  0x59   :  { %v14690_v8 = vld [vmem:[#allocation5 + $0x5c] sm:$0xf0] }
  0x5a   :  { %v10040_v9 = vld [vmem:[#allocation5 + $0x240] sm:$0xf]  ;;  %v9785_v16 = vor.u32 %v14690_v8, %v9784_v7  ;;  %2947 = vmatpush.bf16.msra.mxu3 %v10585_v10 }
  0x5b   :  { %v14754_v11 = vld [vmem:[#allocation5 + $0x25c] sm:$0xf0] }
  0x5c   :  { %v10296_v12 = vld [vmem:[#allocation5 + $0x440] sm:$0xf]  ;;  %v10041_v19 = vor.u32 %v14754_v11, %v10040_v9  ;;  %2909 = vmatpush.bf16.msra.mxu0 %v9785_v16  ;;  %v642_v9 = vunpack.c.l.b16 %v168_v3  ;;  %v9917_v11 = vor.u32 %v14718_v62, %v9914_v63  ;;  %v14710_v16 = vld [vmem:[#allocation5 + $0x104] sm:$0xf] }
  0x5d   :  { %v14818_v13 = vld [vmem:[#allocation5 + $0x45c] sm:$0xf0] }
  0x5e   :  { %v10552_v14 = vld [vmem:[#allocation5 + $0x640] sm:$0xf]  ;;  %v10297_v20 = vor.u32 %v14818_v13, %v10296_v12  ;;  %2922 = vmatpush.bf16.msra.mxu1 %v10041_v19  ;;  %v16300_v19 = vpack.c.b16 %v642_v9, %v642_v9  ;;  %v10234_v9 = vld [vmem:[#allocation5 + $0x3e0] sm:$0xf0] }
  0x5f   :  { %v14882_v15 = vld [vmem:[#allocation5 + $0x65c] sm:$0xf0] }
  0x60   :  { %v9752_v17 = vld [vmem:[#allocation5] sm:$0xf]  ;;  %v10553_v24 = vor.u32 %v14882_v15, %v10552_v14  ;;  %2935 = vmatpush.bf16.msra.mxu2 %v10297_v20  ;;  %v643_v15 = vunpack.c.h.b16 %v168_v3  ;;  %v171_v3 = vld [vmem:[%s16833_s0 + $0x18] sm:$0xf] }
  0x61   :  { %v14682_v18 = vld [vmem:[#allocation5 + $0x1c] sm:$0xf0] }
  0x62   :  { %v10008_v21 = vld [vmem:[#allocation5 + $0x200] sm:$0xf]  ;;  %v9753_v31 = vor.u32 %v14682_v18, %v9752_v17  ;;  %2948 = vmatpush.bf16.msra.mxu3 %v10553_v24  ;;  %v9882_v17 = vld [vmem:[#allocation5 + $0x120] sm:$0xf0] }
  0x63   :  { %v14746_v22 = vld [vmem:[#allocation5 + $0x21c] sm:$0xf0] }
  0x64   :  { %v10264_v23 = vld [vmem:[#allocation5 + $0x400] sm:$0xf]  ;;  %v10009_v35 = vor.u32 %v14746_v22, %v10008_v21  ;;  %2910 = vmatpush.bf16.msra.mxu0 %v9753_v31  ;;  %v16304_v22 = vpack.c.b16 %v643_v15, %v643_v15  ;;  %v648_v15 = vunpack.c.l.b16 %v171_v3 }
  0x65   :  { %v14810_v25 = vld [vmem:[#allocation5 + $0x41c] sm:$0xf0] }
  0x66   :  { %v10520_v26 = vld [vmem:[#allocation5 + $0x600] sm:$0xf]  ;;  %v10265_v36 = vor.u32 %v14810_v25, %v10264_v23  ;;  %2923 = vmatpush.bf16.msra.mxu1 %v10009_v35 }
  0x67   :  { %v14874_v27 = vld [vmem:[#allocation5 + $0x61c] sm:$0xf0]  ;;  %2911 = vmatmul.bf16.vlgmr.msra.gmra.mxu0 %v16300_v19 }
  0x68   :  { %v11000_v28 = vld [vmem:[#allocation5 + $0x9c0] sm:$0xf]  ;;  %v10521_v39 = vor.u32 %v14874_v27, %v10520_v26  ;;  %2936 = vmatpush.bf16.msra.mxu2 %v10265_v36 }
  0x69   :  { %v14994_v29 = vld [vmem:[#allocation5 + $0x9dc] sm:$0xf0]  ;;  %2924 = vmatmul.bf16.vlgmr.msra.gmra.mxu1 %v16304_v22 }
  0x6a   :  { %v11256_v30 = vld [vmem:[#allocation5 + $0xbc0] sm:$0xf]  ;;  %v11001_v40 = vor.u32 %v14994_v29, %v11000_v28  ;;  %2949 = vmatpush.bf16.msra.mxu3 %v10521_v39  ;;  %v9885_v28 = vor.u32 %v14710_v16, %v9882_v17 }
  0x6b   :  { %v15058_v32 = vld [vmem:[#allocation5 + $0xbdc] sm:$0xf0] }
  0x6c   :  { %v11512_v33 = vld [vmem:[#allocation5 + $0xdc0] sm:$0xf]  ;;  %v11257_v41 = vor.u32 %v15058_v32, %v11256_v30  ;;  %2955 = vmatpush.bf16.msrb.mxu0 %v11001_v40  ;;  %v14702_v32 = vld [vmem:[#allocation5 + $0xc4] sm:$0xf] }
  0x6d   :  { %v15122_v34 = vld [vmem:[#allocation5 + $0xddc] sm:$0xf0] }
  0x6e   :  { %v11513_v42 = vor.u32 %v15122_v34, %v11512_v33  ;;  %v10968_v43 = vld [vmem:[#allocation5 + $0x980] sm:$0xf]  ;;  %2968 = vmatpush.bf16.msrb.mxu1 %v11257_v41  ;;  %2994 = vmatpush.bf16.msrb.mxu3 %v9981_v46  ;;  %v9850_v33 = vld [vmem:[#allocation5 + $0xe0] sm:$0xf0] }
  0x6f   :  { %v14986_v44 = vld [vmem:[#allocation5 + $0x99c] sm:$0xf0]  ;;  %v9853_v40 = vor.u32 %v14702_v32, %v9850_v33  ;;  %v14854_v32 = vld [vmem:[#allocation5 + $0x584] sm:$0xf] }
  0x70   :  { %v11224_v45 = vld [vmem:[#allocation5 + $0xb80] sm:$0xf]  ;;  %v10969_v52 = vor.u32 %v14986_v44, %v10968_v43  ;;  %2981 = vmatpush.bf16.msrb.mxu2 %v11513_v42  ;;  %v14694_v44 = vld [vmem:[#allocation5 + $0x84] sm:$0xf] }
  0x71   :  { %v15050_v47 = vld [vmem:[#allocation5 + $0xb9c] sm:$0xf0] }
  0x72   :  { %v11480_v48 = vld [vmem:[#allocation5 + $0xd80] sm:$0xf]  ;;  %v11225_v54 = vor.u32 %v15050_v47, %v11224_v45  ;;  %2956 = vmatpush.bf16.msrb.mxu0 %v10969_v52  ;;  %2995 = vmatpush.bf16.msrb.mxu3 %v9949_v59  ;;  %v9818_v45 = vld [vmem:[#allocation5 + $0xa0] sm:$0xf0] }
  0x73   :  { %v15114_v49 = vld [vmem:[#allocation5 + $0xd9c] sm:$0xf0]  ;;  %v9821_v52 = vor.u32 %v14694_v44, %v9818_v45  ;;  %v14782_v45 = vld [vmem:[#allocation5 + $0x344] sm:$0xf] }
  0x74   :  { %v10936_v53 = vld [vmem:[#allocation5 + $0x940] sm:$0xf]  ;;  %v11481_v55 = vor.u32 %v15114_v49, %v11480_v48  ;;  %2969 = vmatpush.bf16.msrb.mxu1 %v11225_v54 }
  0x75   :  { %v14978_v56 = vld [vmem:[#allocation5 + $0x95c] sm:$0xf0] }
  0x76   :  { %v11192_v57 = vld [vmem:[#allocation5 + $0xb40] sm:$0xf]  ;;  %v10937_v0 = vor.u32 %v14978_v56, %v10936_v53  ;;  %2982 = vmatpush.bf16.msrb.mxu2 %v11481_v55  ;;  %2996 = vmatpush.bf16.msrb.mxu3 %v9917_v11  ;;  %v14686_v56 = vld [vmem:[#allocation5 + $0x44] sm:$0xf] }
  0x77   :  { %v15042_v58 = vld [vmem:[#allocation5 + $0xb5c] sm:$0xf0] }
  0x78   :  { %v11448_v60 = vld [vmem:[#allocation5 + $0xd40] sm:$0xf]  ;;  %v11193_v1 = vor.u32 %v15042_v58, %v11192_v57  ;;  %2957 = vmatpush.bf16.msrb.mxu0 %v10937_v0  ;;  %v9786_v57 = vld [vmem:[#allocation5 + $0x60] sm:$0xf0] }
  0x79   :  { %v15106_v61 = vld [vmem:[#allocation5 + $0xd5c] sm:$0xf0] }
  0x7a   :  { %v169_v2 = vld [vmem:[%s16833_s0 + $0x8] sm:$0xff]  ;;  %v11449_v4 = vor.u32 %v15106_v61, %v11448_v60  ;;  %2970 = vmatpush.bf16.msrb.mxu1 %v11193_v1  ;;  %2997 = vmatpush.bf16.msrb.mxu3 %v9885_v28 }
  0x7b   :  { %v10904_v5 = vld [vmem:[#allocation5 + $0x900] sm:$0xf]  ;;  %v644_v8 = vunpack.c.l.b16 %v169_v2  ;;  %v645_v10 = vunpack.c.h.b16 %v169_v2 }
  0x7c   :  { %v14970_v6 = vld [vmem:[#allocation5 + $0x91c] sm:$0xf0]  ;;  %2983 = vmatpush.bf16.msrb.mxu2 %v11449_v4  ;;  %v9789_v4 = vor.u32 %v14686_v56, %v9786_v57  ;;  %v14774_v57 = vld [vmem:[#allocation5 + $0x304] sm:$0xf] }
  0x7d   :  { %v11160_v7 = vld [vmem:[#allocation5 + $0xb00] sm:$0xf]  ;;  %v16298_v18 = vpack.c.b16 %v644_v8, %v644_v8  ;;  %v16302_v20 = vpack.c.b16 %v645_v10, %v645_v10  ;;  %v10905_v21 = vor.u32 %v14970_v6, %v10904_v5  ;;  %v14678_v5 = vld [vmem:[#allocation5 + $0x4] sm:$0xf] }
  0x7e   :  { %v15034_v12 = vld [vmem:[#allocation5 + $0xb1c] sm:$0xf0]  ;;  %2998 = vmatpush.bf16.msrb.mxu3 %v9853_v40  ;;  %v9754_v6 = vld [vmem:[#allocation5 + $0x20] sm:$0xf0] }
  0x7f   :  { %v11416_v13 = vld [vmem:[#allocation5 + $0xd00] sm:$0xf]  ;;  %v11161_v23 = vor.u32 %v15034_v12, %v11160_v7  ;;  %2937 = vmatmul.bf16.vlgmr.msra.gmra.mxu2 %v16298_v18  ;;  %2950 = vmatmul.bf16.vlgmr.msra.gmra.mxu3 %v16302_v20  ;;  %v170_v7 = vld [vmem:[%s16833_s0 + $0x10] sm:$0xff]  ;;  %v14798_v8 = vld [vmem:[#allocation5 + $0x3c4] sm:$0xf] }
  0x80   :  { %v15098_v14 = vld [vmem:[#allocation5 + $0xd1c] sm:$0xf0]  ;;  %2958 = vmatpush.bf16.msrb.mxu0 %v10905_v21  ;;  %v14862_v10 = vld [vmem:[#allocation5 + $0x5c4] sm:$0xf] }
  0x81   :  { %v11417_v24 = vor.u32 %v15098_v14, %v11416_v13  ;;  %v10872_v25 = vld [vmem:[#allocation5 + $0x8c0] sm:$0xf]  ;;  %2971 = vmatpush.bf16.msrb.mxu1 %v11161_v23  ;;  %v10490_v12 = vld [vmem:[#allocation5 + $0x5e0] sm:$0xf0] }
  0x82   :  { %v14962_v26 = vld [vmem:[#allocation5 + $0x8dc] sm:$0xf0]  ;;  %2999 = vmatpush.bf16.msrb.mxu3 %v9821_v52  ;;  %v14926_v13 = vld [vmem:[#allocation5 + $0x7c4] sm:$0xf]  ;;  %v10493_v28 = vor.u32 %v14862_v10, %v10490_v12 }
  0x83   :  { %v11128_v27 = vld [vmem:[#allocation5 + $0xac0] sm:$0xf]  ;;  %v10873_v34 = vor.u32 %v14962_v26, %v10872_v25  ;;  %2984 = vmatpush.bf16.msrb.mxu2 %v11417_v24  ;;  %v10746_v14 = vld [vmem:[#allocation5 + $0x7e0] sm:$0xf0]  ;;  %v646_v24 = vunpack.c.l.b16 %v170_v7  ;;  %v647_v25 = vunpack.c.h.b16 %v170_v7  ;;  %v9757_v26 = vor.u32 %v14678_v5, %v9754_v6 }
  0x84   :  { %v15026_v29 = vld [vmem:[#allocation5 + $0xadc] sm:$0xf0]  ;;  %v14990_v21 = vld [vmem:[#allocation5 + $0x9c4] sm:$0xf] }
  0x85   :  { %v11384_v30 = vld [vmem:[#allocation5 + $0xcc0] sm:$0xf]  ;;  %v11129_v35 = vor.u32 %v15026_v29, %v11128_v27  ;;  %2959 = vmatpush.bf16.msrb.mxu0 %v10873_v34  ;;  %v11002_v23 = vld [vmem:[#allocation5 + $0x9e0] sm:$0xf0]  ;;  %v10237_v27 = vor.u32 %v14798_v8, %v10234_v9  ;;  %v10749_v29 = vor.u32 %v14926_v13, %v10746_v14  ;;  %v16318_v40 = vpack.c.b16 %v646_v24, %v646_v24 }
  0x86   :  { %v15090_v31 = vld [vmem:[#allocation5 + $0xcdc] sm:$0xf0]  ;;  %3000 = vmatpush.bf16.msrb.mxu3 %v9789_v4  ;;  %v11005_v33 = vor.u32 %v14990_v21, %v11002_v23  ;;  %v10458_v34 = vld [vmem:[#allocation5 + $0x5a0] sm:$0xf0] }
  0x87   :  { %v11385_v36 = vor.u32 %v15090_v31, %v11384_v30  ;;  %v10840_v37 = vld [vmem:[#allocation5 + $0x880] sm:$0xf]  ;;  %2972 = vmatpush.bf16.msrb.mxu1 %v11129_v35  ;;  %v14790_v30 = vld [vmem:[#allocation5 + $0x384] sm:$0xf] }
  0x88   :  { %v14954_v38 = vld [vmem:[#allocation5 + $0x89c] sm:$0xf0]  ;;  %v10202_v31 = vld [vmem:[#allocation5 + $0x3a0] sm:$0xf0] }
  0x89   :  { %v11096_v39 = vld [vmem:[#allocation5 + $0xa80] sm:$0xf]  ;;  %v10841_v46 = vor.u32 %v14954_v38, %v10840_v37  ;;  %2985 = vmatpush.bf16.msrb.mxu2 %v11385_v36  ;;  %v14918_v35 = vld [vmem:[#allocation5 + $0x784] sm:$0xf]  ;;  %v16316_v37 = vpack.c.b16 %v648_v15, %v648_v15 }
  0x8a   :  { %v15018_v41 = vld [vmem:[#allocation5 + $0xa9c] sm:$0xf0]  ;;  %v10714_v36 = vld [vmem:[#allocation5 + $0x7a0] sm:$0xf0]  ;;  %3001 = vmatpush.bf16.msrb.mxu3 %v9757_v26 }
  0x8b   :  { %v11352_v42 = vld [vmem:[#allocation5 + $0xc80] sm:$0xf]  ;;  %v11097_v47 = vor.u32 %v15018_v41, %v11096_v39  ;;  %2960 = vmatpush.bf16.msrb.mxu0 %v10841_v46  ;;  %v14982_v38 = vld [vmem:[#allocation5 + $0x984] sm:$0xf]  ;;  %v16320_v41 = vpack.c.b16 %v647_v25, %v647_v25  ;;  %v10717_v44 = vor.u32 %v14918_v35, %v10714_v36 }
  0x8c   :  { %v15082_v43 = vld [vmem:[#allocation5 + $0xc9c] sm:$0xf0]  ;;  %v10970_v39 = vld [vmem:[#allocation5 + $0x9a0] sm:$0xf0] }
  0x8d   :  { %v11353_v48 = vor.u32 %v15082_v43, %v11352_v42  ;;  %v10808_v49 = vld [vmem:[#allocation5 + $0x840] sm:$0xf]  ;;  %2973 = vmatpush.bf16.msrb.mxu1 %v11097_v47  ;;  %v10205_v42 = vor.u32 %v14790_v30, %v10202_v31  ;;  %v10461_v43 = vor.u32 %v14854_v32, %v10458_v34  ;;  %v10170_v46 = vld [vmem:[#allocation5 + $0x360] sm:$0xf0] }
  0x8e   :  { %v14946_v50 = vld [vmem:[#allocation5 + $0x85c] sm:$0xf0]  ;;  %v14846_v47 = vld [vmem:[#allocation5 + $0x544] sm:$0xf]  ;;  %3046 = vmatpush.bf16.msra.mxu3 %v11005_v33 }
  0x8f   :  { %v11064_v51 = vld [vmem:[#allocation5 + $0xa40] sm:$0xf]  ;;  %v10809_v59 = vor.u32 %v14946_v50, %v10808_v49  ;;  %2986 = vmatpush.bf16.msrb.mxu2 %v11353_v48  ;;  %v10973_v48 = vor.u32 %v14982_v38, %v10970_v39  ;;  %v10426_v49 = vld [vmem:[#allocation5 + $0x560] sm:$0xf0]  ;;  %3002 = vmatmul.bf16.vlgmr.msrb.gmra.mxu3 %v16300_v19 }
  0x90   :  { %v15010_v53 = vld [vmem:[#allocation5 + $0xa5c] sm:$0xf0]  ;;  %v14910_v50 = vld [vmem:[#allocation5 + $0x744] sm:$0xf] }
  0x91   :  { %v11320_v54 = vld [vmem:[#allocation5 + $0xc40] sm:$0xf]  ;;  %v11065_v63 = vor.u32 %v15010_v53, %v11064_v51  ;;  %2961 = vmatpush.bf16.msrb.mxu0 %v10809_v59  ;;  %v10682_v51 = vld [vmem:[#allocation5 + $0x760] sm:$0xf0] }
  0x92   :  { %v15074_v55 = vld [vmem:[#allocation5 + $0xc5c] sm:$0xf0]  ;;  %v14974_v52 = vld [vmem:[#allocation5 + $0x944] sm:$0xf]  ;;  %v10685_v56 = vor.u32 %v14910_v50, %v10682_v51  ;;  %3047 = vmatpush.bf16.msra.mxu3 %v10973_v48 }
  0x93   :  { %v10776_v58 = vld [vmem:[#allocation5 + $0x800] sm:$0xf]  ;;  %v11321_v0 = vor.u32 %v15074_v55, %v11320_v54  ;;  %2974 = vmatpush.bf16.msrb.mxu1 %v11065_v63  ;;  %v10938_v53 = vld [vmem:[#allocation5 + $0x960] sm:$0xf0]  ;;  %v10173_v54 = vor.u32 %v14782_v45, %v10170_v46  ;;  %v10429_v55 = vor.u32 %v14846_v47, %v10426_v49 }
  0x94   :  { %v14938_v60 = vld [vmem:[#allocation5 + $0x81c] sm:$0xf0]  ;;  %v14838_v59 = vld [vmem:[#allocation5 + $0x504] sm:$0xf] }
  0x95   :  { %v11032_v61 = vld [vmem:[#allocation5 + $0xa00] sm:$0xf]  ;;  %v10777_v11 = vor.u32 %v14938_v60, %v10776_v58  ;;  %2987 = vmatpush.bf16.msrb.mxu2 %v11321_v0  ;;  %v10138_v58 = vld [vmem:[#allocation5 + $0x320] sm:$0xf0]  ;;  %v10941_v60 = vor.u32 %v14974_v52, %v10938_v53 }
  0x96   :  { %v15002_v62 = vld [vmem:[#allocation5 + $0xa1c] sm:$0xf0]  ;;  %v10650_v63 = vld [vmem:[#allocation5 + $0x720] sm:$0xf0] }
  0x97   :  { %v11288_v1 = vld [vmem:[#allocation5 + $0xc00] sm:$0xf]  ;;  %v11033_v16 = vor.u32 %v15002_v62, %v11032_v61  ;;  %2962 = vmatpush.bf16.msrb.mxu0 %v10777_v11  ;;  %v10394_v61 = vld [vmem:[#allocation5 + $0x520] sm:$0xf0]  ;;  %3048 = vmatpush.bf16.msra.mxu3 %v10941_v60 }
  0x98   :  { %v15066_v2 = vld [vmem:[#allocation5 + $0xc1c] sm:$0xf0]  ;;  %v14902_v62 = vld [vmem:[#allocation5 + $0x704] sm:$0xf]  ;;  %v10397_v3 = vor.u32 %v14838_v59, %v10394_v61 }
  0x99   :  { %v11289_v17 = vor.u32 %v15066_v2, %v11288_v1  ;;  %2975 = vmatpush.bf16.msrb.mxu1 %v11033_v16  ;;  %v14966_v0 = vld [vmem:[#allocation5 + $0x904] sm:$0xf]  ;;  %v10141_v2 = vor.u32 %v14774_v57, %v10138_v58  ;;  %v10653_v4 = vor.u32 %v14902_v62, %v10650_v63  ;;  %v9984_v62 = vld [vmem:[#allocation5 + $0x1c8] sm:$0xf] }
  0x9a   :  { %2963 = vmatmul.bf16.vlgmr.msrb.gmra.mxu0 %v16318_v40  ;;  %v10906_v1 = vld [vmem:[#allocation5 + $0x920] sm:$0xf0]  ;;  %v14739_v63 = vld [vmem:[#allocation5 + $0x1e4] sm:$0xf0] }
  0x9b   :  { %2988 = vmatpush.bf16.msrb.mxu2 %v11289_v17  ;;  %3007 = vmatpush.bf16.msra.mxu0 %v10237_v27  ;;  %v14766_v5 = vld [vmem:[#allocation5 + $0x2c4] sm:$0xf]  ;;  %v10909_v8 = vor.u32 %v14966_v0, %v10906_v1 }
  0x9c   :  { %2976 = vmatmul.bf16.vlgmr.msrb.gmra.mxu1 %v16320_v41  ;;  %v10106_v6 = vld [vmem:[#allocation5 + $0x2e0] sm:$0xf0] }
  0x9d   :  { %3020 = vmatpush.bf16.msra.mxu1 %v10493_v28  ;;  %v14830_v7 = vld [vmem:[#allocation5 + $0x4c4] sm:$0xf]  ;;  %v10109_v14 = vor.u32 %v14766_v5, %v10106_v6  ;;  %3049 = vmatpush.bf16.msra.mxu3 %v10909_v8 }
  0x9e   :  { %2989 = vmatmul.bf16.vlgmr.msrb.gmra.mxu2 %v16316_v37  ;;  %v10362_v9 = vld [vmem:[#allocation5 + $0x4e0] sm:$0xf0] }
  0x9f   :  { %3033 = vmatpush.bf16.msra.mxu2 %v10749_v29  ;;  %3008 = vmatpush.bf16.msra.mxu0 %v10205_v42  ;;  %v14894_v10 = vld [vmem:[#allocation5 + $0x6c4] sm:$0xf]  ;;  %v10365_v15 = vor.u32 %v14830_v7, %v10362_v9  ;;  %v9985_v7 = vor.u32 %v14739_v63, %v9984_v62 }
  0xa0   :  { %v10618_v11 = vld [vmem:[#allocation5 + $0x6e0] sm:$0xf0] }
  0xa1   :  { %3021 = vmatpush.bf16.msra.mxu1 %v10461_v43  ;;  %v14958_v12 = vld [vmem:[#allocation5 + $0x8c4] sm:$0xf]  ;;  %v10621_v16 = vor.u32 %v14894_v10, %v10618_v11 }
  0xa2   :  { %v10874_v13 = vld [vmem:[#allocation5 + $0x8e0] sm:$0xf0] }
  0xa3   :  { %3034 = vmatpush.bf16.msra.mxu2 %v10717_v44  ;;  %3009 = vmatpush.bf16.msra.mxu0 %v10173_v54  ;;  %v14758_v17 = vld [vmem:[#allocation5 + $0x284] sm:$0xf]  ;;  %v10877_v24 = vor.u32 %v14958_v12, %v10874_v13  ;;  %v9952_v13 = vld [vmem:[#allocation5 + $0x188] sm:$0xf] }
  0xa4   :  { %v10074_v21 = vld [vmem:[#allocation5 + $0x2a0] sm:$0xf0] }
  0xa5   :  { %3022 = vmatpush.bf16.msra.mxu1 %v10429_v55  ;;  %v14822_v23 = vld [vmem:[#allocation5 + $0x484] sm:$0xf]  ;;  %v10077_v30 = vor.u32 %v14758_v17, %v10074_v21  ;;  %3050 = vmatpush.bf16.msra.mxu3 %v10877_v24 }
  0xa6   :  { %v10330_v25 = vld [vmem:[#allocation5 + $0x4a0] sm:$0xf0] }
  0xa7   :  { %3035 = vmatpush.bf16.msra.mxu2 %v10685_v56  ;;  %3010 = vmatpush.bf16.msra.mxu0 %v10141_v2  ;;  %v14886_v26 = vld [vmem:[#allocation5 + $0x684] sm:$0xf]  ;;  %v10333_v31 = vor.u32 %v14822_v23, %v10330_v25  ;;  %v10240_v2 = vld [vmem:[#allocation5 + $0x3c8] sm:$0xf] }
  0xa8   :  { %v10586_v27 = vld [vmem:[#allocation5 + $0x6a0] sm:$0xf0] }
  0xa9   :  { %3023 = vmatpush.bf16.msra.mxu1 %v10397_v3  ;;  %v14950_v28 = vld [vmem:[#allocation5 + $0x884] sm:$0xf]  ;;  %v10589_v32 = vor.u32 %v14886_v26, %v10586_v27  ;;  %v14803_v3 = vld [vmem:[#allocation5 + $0x3e4] sm:$0xf0] }
  0xaa   :  { %v10842_v29 = vld [vmem:[#allocation5 + $0x8a0] sm:$0xf0]  ;;  %v10241_v11 = vor.u32 %v14803_v3, %v10240_v2 }
  0xab   :  { %3036 = vmatpush.bf16.msra.mxu2 %v10653_v4  ;;  %3011 = vmatpush.bf16.msra.mxu0 %v10109_v14  ;;  %v14750_v33 = vld [vmem:[#allocation5 + $0x244] sm:$0xf]  ;;  %v10845_v36 = vor.u32 %v14950_v28, %v10842_v29  ;;  %v14731_v14 = vld [vmem:[#allocation5 + $0x1a4] sm:$0xf0] }
  0xac   :  { %v10042_v34 = vld [vmem:[#allocation5 + $0x260] sm:$0xf0]  ;;  %v9953_v23 = vor.u32 %v14731_v14, %v9952_v13  ;;  %v9920_v29 = vld [vmem:[#allocation5 + $0x148] sm:$0xf] }
  0xad   :  { %3024 = vmatpush.bf16.msra.mxu1 %v10365_v15  ;;  %v14814_v35 = vld [vmem:[#allocation5 + $0x444] sm:$0xf]  ;;  %v10045_v45 = vor.u32 %v14750_v33, %v10042_v34  ;;  %3051 = vmatpush.bf16.msra.mxu3 %v10845_v36  ;;  %v10208_v15 = vld [vmem:[#allocation5 + $0x388] sm:$0xf] }
  0xae   :  { %v10298_v38 = vld [vmem:[#allocation5 + $0x460] sm:$0xf0] }
  0xaf   :  { %3037 = vmatpush.bf16.msra.mxu2 %v10621_v16  ;;  %v14878_v39 = vld [vmem:[#allocation5 + $0x644] sm:$0xf]  ;;  %3012 = vmatpush.bf16.msra.mxu0 %v10077_v30  ;;  %v10301_v48 = vor.u32 %v14814_v35, %v10298_v38  ;;  %v14795_v16 = vld [vmem:[#allocation5 + $0x3a4] sm:$0xf0] }
  0xb0   :  { %v10554_v42 = vld [vmem:[#allocation5 + $0x660] sm:$0xf0]  ;;  %v10209_v27 = vor.u32 %v14795_v16, %v10208_v15  ;;  %v14723_v30 = vld [vmem:[#allocation5 + $0x164] sm:$0xf0] }
  0xb1   :  { %v14942_v43 = vld [vmem:[#allocation5 + $0x844] sm:$0xf]  ;;  %3025 = vmatpush.bf16.msra.mxu1 %v10333_v31  ;;  %v10557_v49 = vor.u32 %v14878_v39, %v10554_v42  ;;  %v10176_v31 = vld [vmem:[#allocation5 + $0x348] sm:$0xf]  ;;  %v9921_v35 = vor.u32 %v14723_v30, %v9920_v29 }
  0xb2   :  { %v10810_v44 = vld [vmem:[#allocation5 + $0x860] sm:$0xf0]  ;;  %v9792_v16 = vld [vmem:[#allocation5 + $0x48] sm:$0xf] }
  0xb3   :  { %v14742_v46 = vld [vmem:[#allocation5 + $0x204] sm:$0xf]  ;;  %3038 = vmatpush.bf16.msra.mxu2 %v10589_v32  ;;  %v10813_v53 = vor.u32 %v14942_v43, %v10810_v44  ;;  %3013 = vmatpush.bf16.msra.mxu0 %v10045_v45  ;;  %v14787_v32 = vld [vmem:[#allocation5 + $0x364] sm:$0xf0] }
  0xb4   :  { %v10010_v47 = vld [vmem:[#allocation5 + $0x220] sm:$0xf0]  ;;  %v10177_v42 = vor.u32 %v14787_v32, %v10176_v31  ;;  %v9888_v44 = vld [vmem:[#allocation5 + $0x108] sm:$0xf] }
  0xb5   :  { %v14806_v50 = vld [vmem:[#allocation5 + $0x404] sm:$0xf]  ;;  %v10013_v60 = vor.u32 %v14742_v46, %v10010_v47  ;;  %3026 = vmatpush.bf16.msra.mxu1 %v10301_v48  ;;  %3052 = vmatpush.bf16.msra.mxu3 %v10813_v53  ;;  %v14715_v45 = vld [vmem:[#allocation5 + $0x124] sm:$0xf0] }
  0xb6   :  { %v10266_v51 = vld [vmem:[#allocation5 + $0x420] sm:$0xf0]  ;;  %v10144_v46 = vld [vmem:[#allocation5 + $0x308] sm:$0xf] }
  0xb7   :  { %v14870_v52 = vld [vmem:[#allocation5 + $0x604] sm:$0xf]  ;;  %3039 = vmatpush.bf16.msra.mxu2 %v10557_v49  ;;  %v10269_v0 = vor.u32 %v14806_v50, %v10266_v51  ;;  %3014 = vmatpush.bf16.msra.mxu0 %v10013_v60  ;;  %v14779_v47 = vld [vmem:[#allocation5 + $0x324] sm:$0xf0]  ;;  %v9889_v50 = vor.u32 %v14715_v45, %v9888_v44 }
  0xb8   :  { %v10522_v54 = vld [vmem:[#allocation5 + $0x620] sm:$0xf0]  ;;  %v9760_v31 = vld [vmem:[#allocation5 + $0x8] sm:$0xf] }
  0xb9   :  { %v14934_v55 = vld [vmem:[#allocation5 + $0x804] sm:$0xf]  ;;  %v10525_v1 = vor.u32 %v14870_v52, %v10522_v54  ;;  %3027 = vmatpush.bf16.msra.mxu1 %v10269_v0  ;;  %v10145_v54 = vor.u32 %v14779_v47, %v10144_v46  ;;  %v11008_v44 = vld [vmem:[#allocation5 + $0x9c8] sm:$0xf] }
  0xba   :  { %v10778_v56 = vld [vmem:[#allocation5 + $0x820] sm:$0xf0]  ;;  %3015 = vmatmul.bf16.vlgmr.msra.gmra.mxu0 %v16304_v22  ;;  %v14995_v45 = vld [vmem:[#allocation5 + $0x9e4] sm:$0xf0] }
  0xbb   :  { %v15054_v57 = vld [vmem:[#allocation5 + $0xbc4] sm:$0xf]  ;;  %v10781_v4 = vor.u32 %v14934_v55, %v10778_v56  ;;  %3040 = vmatpush.bf16.msra.mxu2 %v10525_v1  ;;  %v9856_v56 = vld [vmem:[#allocation5 + $0xc8] sm:$0xf] }
  0xbc   :  { %v11258_v58 = vld [vmem:[#allocation5 + $0xbe0] sm:$0xf0]  ;;  %3028 = vmatmul.bf16.vlgmr.msra.gmra.mxu1 %v16298_v18 }
  0xbd   :  { %v15118_v59 = vld [vmem:[#allocation5 + $0xdc4] sm:$0xf]  ;;  %v11261_v5 = vor.u32 %v15054_v57, %v11258_v58  ;;  %3053 = vmatpush.bf16.msra.mxu3 %v10781_v4  ;;  %v14707_v57 = vld [vmem:[#allocation5 + $0xe4] sm:$0xf0] }
  0xbe   :  { %v11514_v61 = vld [vmem:[#allocation5 + $0xde0] sm:$0xf0]  ;;  %3041 = vmatmul.bf16.vlgmr.msra.gmra.mxu2 %v16302_v20  ;;  %v10112_v58 = vld [vmem:[#allocation5 + $0x2c8] sm:$0xf]  ;;  %v9857_v62 = vor.u32 %v14707_v57, %v9856_v56 }
  0xbf   :  { %v11517_v6 = vor.u32 %v15118_v59, %v11514_v61  ;;  %v15046_v8 = vld [vmem:[#allocation5 + $0xb84] sm:$0xf]  ;;  %3059 = vmatpush.bf16.msrb.mxu0 %v11261_v5  ;;  %3085 = vmatpush.bf16.msrb.mxu2 %v9985_v7  ;;  %v14771_v59 = vld [vmem:[#allocation5 + $0x2e4] sm:$0xf0] }
  0xc0   :  { %v11226_v9 = vld [vmem:[#allocation5 + $0xba0] sm:$0xf0]  ;;  %3054 = vmatmul.bf16.vlgmr.msra.gmra.mxu3 %v16318_v40  ;;  %v10113_v2 = vor.u32 %v14771_v59, %v10112_v58  ;;  %v9824_v4 = vld [vmem:[#allocation5 + $0x88] sm:$0xf] }
  0xc1   :  { %v15110_v10 = vld [vmem:[#allocation5 + $0xd84] sm:$0xf]  ;;  %v11229_v17 = vor.u32 %v15046_v8, %v11226_v9  ;;  %3072 = vmatpush.bf16.msrb.mxu1 %v11517_v6  ;;  %3098 = vmatpush.bf16.msrb.mxu3 %v10241_v11  ;;  %v14699_v5 = vld [vmem:[#allocation5 + $0xa4] sm:$0xf0] }
  0xc2   :  { %v11482_v12 = vld [vmem:[#allocation5 + $0xda0] sm:$0xf0]  ;;  %v10080_v6 = vld [vmem:[#allocation5 + $0x288] sm:$0xf] }
  0xc3   :  { %v11485_v21 = vor.u32 %v15110_v10, %v11482_v12  ;;  %v15038_v24 = vld [vmem:[#allocation5 + $0xb44] sm:$0xf]  ;;  %3060 = vmatpush.bf16.msrb.mxu0 %v11229_v17  ;;  %3086 = vmatpush.bf16.msrb.mxu2 %v9953_v23  ;;  %v14763_v7 = vld [vmem:[#allocation5 + $0x2a4] sm:$0xf0]  ;;  %v9825_v10 = vor.u32 %v14699_v5, %v9824_v4 }
  0xc4   :  { %v11194_v25 = vld [vmem:[#allocation5 + $0xb60] sm:$0xf0]  ;;  %v10081_v14 = vor.u32 %v14763_v7, %v10080_v6  ;;  %v14691_v17 = vld [vmem:[#allocation5 + $0x64] sm:$0xf0] }
  0xc5   :  { %v15102_v26 = vld [vmem:[#allocation5 + $0xd44] sm:$0xf]  ;;  %v11197_v33 = vor.u32 %v15038_v24, %v11194_v25  ;;  %3073 = vmatpush.bf16.msrb.mxu1 %v11485_v21  ;;  %3099 = vmatpush.bf16.msrb.mxu3 %v10209_v27  ;;  %v10048_v21 = vld [vmem:[#allocation5 + $0x248] sm:$0xf] }
  0xc6   :  { %v11450_v28 = vld [vmem:[#allocation5 + $0xd60] sm:$0xf0]  ;;  %v14755_v23 = vld [vmem:[#allocation5 + $0x264] sm:$0xf0] }
  0xc7   :  { %v11453_v34 = vor.u32 %v15102_v26, %v11450_v28  ;;  %v15030_v36 = vld [vmem:[#allocation5 + $0xb04] sm:$0xf]  ;;  %3061 = vmatpush.bf16.msrb.mxu0 %v11197_v33  ;;  %3087 = vmatpush.bf16.msrb.mxu2 %v9921_v35  ;;  %v9793_v28 = vor.u32 %v14691_v17, %v9792_v16  ;;  %v10049_v32 = vor.u32 %v14755_v23, %v10048_v21  ;;  %v14683_v33 = vld [vmem:[#allocation5 + $0x24] sm:$0xf0] }
  0xc8   :  { %v11162_v38 = vld [vmem:[#allocation5 + $0xb20] sm:$0xf0]  ;;  %v14747_v35 = vld [vmem:[#allocation5 + $0x224] sm:$0xf0]  ;;  %v9761_v47 = vor.u32 %v14683_v33, %v9760_v31 }
  0xc9   :  { %v15094_v39 = vld [vmem:[#allocation5 + $0xd04] sm:$0xf]  ;;  %v11165_v48 = vor.u32 %v15030_v36, %v11162_v38  ;;  %3074 = vmatpush.bf16.msrb.mxu1 %v11453_v34  ;;  %3100 = vmatpush.bf16.msrb.mxu3 %v10177_v42  ;;  %v10016_v34 = vld [vmem:[#allocation5 + $0x208] sm:$0xf] }
  0xca   :  { %v11418_v43 = vld [vmem:[#allocation5 + $0xd20] sm:$0xf0]  ;;  %v10496_v36 = vld [vmem:[#allocation5 + $0x5c8] sm:$0xf] }
  0xcb   :  { %v11421_v49 = vor.u32 %v15094_v39, %v11418_v43  ;;  %v15022_v51 = vld [vmem:[#allocation5 + $0xac4] sm:$0xf]  ;;  %3062 = vmatpush.bf16.msrb.mxu0 %v11165_v48  ;;  %3088 = vmatpush.bf16.msrb.mxu2 %v9889_v50  ;;  %v14867_v38 = vld [vmem:[#allocation5 + $0x5e4] sm:$0xf0]  ;;  %v10017_v50 = vor.u32 %v14747_v35, %v10016_v34 }
  0xcc   :  { %v11130_v52 = vld [vmem:[#allocation5 + $0xae0] sm:$0xf0]  ;;  %v10752_v39 = vld [vmem:[#allocation5 + $0x7c8] sm:$0xf] }
  0xcd   :  { %v15086_v53 = vld [vmem:[#allocation5 + $0xcc4] sm:$0xf]  ;;  %v11133_v60 = vor.u32 %v15022_v51, %v11130_v52  ;;  %3075 = vmatpush.bf16.msrb.mxu1 %v11421_v49  ;;  %3101 = vmatpush.bf16.msrb.mxu3 %v10145_v54  ;;  %v14931_v43 = vld [vmem:[#allocation5 + $0x7e4] sm:$0xf0]  ;;  %v10497_v51 = vor.u32 %v14867_v38, %v10496_v36 }
  0xce   :  { %v11386_v55 = vld [vmem:[#allocation5 + $0xce0] sm:$0xf0]  ;;  %v11264_v48 = vld [vmem:[#allocation5 + $0xbc8] sm:$0xf]  ;;  %v10753_v52 = vor.u32 %v14931_v43, %v10752_v39 }
  0xcf   :  { %v11389_v61 = vor.u32 %v15086_v53, %v11386_v55  ;;  %v15014_v63 = vld [vmem:[#allocation5 + $0xa84] sm:$0xf]  ;;  %3063 = vmatpush.bf16.msrb.mxu0 %v11133_v60  ;;  %3089 = vmatpush.bf16.msrb.mxu2 %v9857_v62  ;;  %v15059_v49 = vld [vmem:[#allocation5 + $0xbe4] sm:$0xf0]  ;;  %v11009_v53 = vor.u32 %v14995_v45, %v11008_v44 }
  0xd0   :  { %v11098_v0 = vld [vmem:[#allocation5 + $0xaa0] sm:$0xf0]  ;;  %v10464_v54 = vld [vmem:[#allocation5 + $0x588] sm:$0xf]  ;;  %v11265_v57 = vor.u32 %v15059_v49, %v11264_v48 }
  0xd1   :  { %v15078_v1 = vld [vmem:[#allocation5 + $0xc84] sm:$0xf]  ;;  %v11101_v8 = vor.u32 %v15014_v63, %v11098_v0  ;;  %3076 = vmatpush.bf16.msrb.mxu1 %v11389_v61  ;;  %3102 = vmatpush.bf16.msrb.mxu3 %v10113_v2  ;;  %v14859_v55 = vld [vmem:[#allocation5 + $0x5a4] sm:$0xf0] }
  0xd2   :  { %v11354_v3 = vld [vmem:[#allocation5 + $0xca0] sm:$0xf0]  ;;  %v10720_v56 = vld [vmem:[#allocation5 + $0x788] sm:$0xf]  ;;  %v10465_v63 = vor.u32 %v14859_v55, %v10464_v54 }
  0xd3   :  { %v11357_v9 = vor.u32 %v15078_v1, %v11354_v3  ;;  %v15006_v11 = vld [vmem:[#allocation5 + $0xa44] sm:$0xf]  ;;  %3064 = vmatpush.bf16.msrb.mxu0 %v11101_v8  ;;  %3090 = vmatpush.bf16.msrb.mxu2 %v9825_v10  ;;  %v14923_v58 = vld [vmem:[#allocation5 + $0x7a4] sm:$0xf0] }
  0xd4   :  { %v11066_v12 = vld [vmem:[#allocation5 + $0xa60] sm:$0xf0]  ;;  %v10976_v59 = vld [vmem:[#allocation5 + $0x988] sm:$0xf]  ;;  %v10721_v0 = vor.u32 %v14923_v58, %v10720_v56 }
  0xd5   :  { %v15070_v13 = vld [vmem:[#allocation5 + $0xc44] sm:$0xf]  ;;  %v11069_v24 = vor.u32 %v15006_v11, %v11066_v12  ;;  %3077 = vmatpush.bf16.msrb.mxu1 %v11357_v9  ;;  %3103 = vmatpush.bf16.msrb.mxu3 %v10081_v14  ;;  %v14987_v60 = vld [vmem:[#allocation5 + $0x9a4] sm:$0xf0] }
  0xd6   :  { %v11322_v15 = vld [vmem:[#allocation5 + $0xc60] sm:$0xf0]  ;;  %v11232_v61 = vld [vmem:[#allocation5 + $0xb88] sm:$0xf]  ;;  %v10977_v1 = vor.u32 %v14987_v60, %v10976_v59 }
  0xd7   :  { %v14998_v25 = vld [vmem:[#allocation5 + $0xa04] sm:$0xf]  ;;  %v11325_v27 = vor.u32 %v15070_v13, %v11322_v15  ;;  %3065 = vmatpush.bf16.msrb.mxu0 %v11069_v24  ;;  %3091 = vmatpush.bf16.msrb.mxu2 %v9793_v28  ;;  %v15051_v62 = vld [vmem:[#allocation5 + $0xba4] sm:$0xf0] }
  0xd8   :  { %v11034_v26 = vld [vmem:[#allocation5 + $0xa20] sm:$0xf0]  ;;  %v10432_v2 = vld [vmem:[#allocation5 + $0x548] sm:$0xf]  ;;  %v11233_v5 = vor.u32 %v15051_v62, %v11232_v61 }
  0xd9   :  { %v15062_v29 = vld [vmem:[#allocation5 + $0xc04] sm:$0xf]  ;;  %v11037_v42 = vor.u32 %v14998_v25, %v11034_v26  ;;  %3078 = vmatpush.bf16.msrb.mxu1 %v11325_v27  ;;  %3104 = vmatpush.bf16.msrb.mxu3 %v10049_v32  ;;  %v14851_v3 = vld [vmem:[#allocation5 + $0x564] sm:$0xf0] }
  0xda   :  { %v11290_v30 = vld [vmem:[#allocation5 + $0xc20] sm:$0xf0]  ;;  %v10688_v4 = vld [vmem:[#allocation5 + $0x748] sm:$0xf]  ;;  %v10433_v11 = vor.u32 %v14851_v3, %v10432_v2 }
  0xdb   :  { %v11293_v46 = vor.u32 %v15062_v29, %v11290_v30  ;;  %3066 = vmatpush.bf16.msrb.mxu0 %v11037_v42  ;;  %3092 = vmatpush.bf16.msrb.mxu2 %v9761_v47  ;;  %v14915_v6 = vld [vmem:[#allocation5 + $0x764] sm:$0xf0] }
  0xdc   :  { %v10944_v7 = vld [vmem:[#allocation5 + $0x948] sm:$0xf]  ;;  %v10689_v12 = vor.u32 %v14915_v6, %v10688_v4 }
  0xdd   :  { %3079 = vmatpush.bf16.msrb.mxu1 %v11293_v46  ;;  %3105 = vmatpush.bf16.msrb.mxu3 %v10017_v50  ;;  %v14979_v8 = vld [vmem:[#allocation5 + $0x964] sm:$0xf0] }
  0xde   :  { %3067 = vmatmul.bf16.vlgmr.msrb.gmra.mxu0 %v16320_v41  ;;  %v11200_v9 = vld [vmem:[#allocation5 + $0xb48] sm:$0xf]  ;;  %3093 = vmatmul.bf16.vlgmr.msrb.gmra.mxu2 %v16300_v19  ;;  %v10945_v13 = vor.u32 %v14979_v8, %v10944_v7 }
  0xdf   :  { %3111 = vmatpush.bf16.msra.mxu0 %v10497_v51  ;;  %3137 = vmatpush.bf16.msra.mxu2 %v11009_v53  ;;  %v15043_v10 = vld [vmem:[#allocation5 + $0xb64] sm:$0xf0] }
  0xe0   :  { %3080 = vmatmul.bf16.vlgmr.msrb.gmra.mxu1 %v16316_v37  ;;  %3106 = vmatmul.bf16.vlgmr.msrb.gmra.mxu3 %v16304_v22  ;;  %v10400_v14 = vld [vmem:[#allocation5 + $0x508] sm:$0xf]  ;;  %v11201_v17 = vor.u32 %v15043_v10, %v11200_v9 }
  0xe1   :  { %3124 = vmatpush.bf16.msra.mxu1 %v10753_v52  ;;  %3150 = vmatpush.bf16.msra.mxu3 %v11265_v57  ;;  %v14843_v15 = vld [vmem:[#allocation5 + $0x524] sm:$0xf0] }
  0xe2   :  { %v10656_v16 = vld [vmem:[#allocation5 + $0x708] sm:$0xf]  ;;  %v10401_v27 = vor.u32 %v14843_v15, %v10400_v14 }
  0xe3   :  { %3112 = vmatpush.bf16.msra.mxu0 %v10465_v63  ;;  %3138 = vmatpush.bf16.msra.mxu2 %v10977_v1  ;;  %v14907_v21 = vld [vmem:[#allocation5 + $0x724] sm:$0xf0] }
  0xe4   :  { %v10912_v23 = vld [vmem:[#allocation5 + $0x908] sm:$0xf]  ;;  %v10657_v28 = vor.u32 %v14907_v21, %v10656_v16  ;;  %v14735_v16 = vld [vmem:[#allocation5 + $0x1cc] sm:$0xf] }
  0xe5   :  { %3125 = vmatpush.bf16.msra.mxu1 %v10721_v0  ;;  %3151 = vmatpush.bf16.msra.mxu3 %v11233_v5  ;;  %v14971_v24 = vld [vmem:[#allocation5 + $0x924] sm:$0xf0]  ;;  %v9986_v21 = vld [vmem:[#allocation5 + $0x1e8] sm:$0xf0] }
  0xe6   :  { %v11168_v25 = vld [vmem:[#allocation5 + $0xb08] sm:$0xf]  ;;  %v10913_v29 = vor.u32 %v14971_v24, %v10912_v23  ;;  %v14799_v23 = vld [vmem:[#allocation5 + $0x3cc] sm:$0xf] }
  0xe7   :  { %v15035_v26 = vld [vmem:[#allocation5 + $0xb24] sm:$0xf0]  ;;  %3113 = vmatpush.bf16.msra.mxu0 %v10433_v11  ;;  %3139 = vmatpush.bf16.msra.mxu2 %v10945_v13  ;;  %v10242_v24 = vld [vmem:[#allocation5 + $0x3e8] sm:$0xf0] }
  0xe8   :  { %v10368_v30 = vld [vmem:[#allocation5 + $0x4c8] sm:$0xf]  ;;  %v11169_v33 = vor.u32 %v15035_v26, %v11168_v25 }
  0xe9   :  { %3126 = vmatpush.bf16.msra.mxu1 %v10689_v12  ;;  %v14835_v31 = vld [vmem:[#allocation5 + $0x4e4] sm:$0xf0]  ;;  %3152 = vmatpush.bf16.msra.mxu3 %v11201_v17 }
  0xea   :  { %v10624_v32 = vld [vmem:[#allocation5 + $0x6c8] sm:$0xf]  ;;  %v10369_v42 = vor.u32 %v14835_v31, %v10368_v30  ;;  %v9989_v31 = vor.u32 %v14735_v16, %v9986_v21  ;;  %v14831_v16 = vld [vmem:[#allocation5 + $0x4cc] sm:$0xf] }
  0xeb   :  { %v14899_v34 = vld [vmem:[#allocation5 + $0x6e4] sm:$0xf0]  ;;  %3114 = vmatpush.bf16.msra.mxu0 %v10401_v27  ;;  %3140 = vmatpush.bf16.msra.mxu2 %v10913_v29  ;;  %v14863_v27 = vld [vmem:[#allocation5 + $0x5cc] sm:$0xf] }
  0xec   :  { %v10880_v35 = vld [vmem:[#allocation5 + $0x8c8] sm:$0xf]  ;;  %v10625_v43 = vor.u32 %v14899_v34, %v10624_v32  ;;  %v10245_v32 = vor.u32 %v14799_v23, %v10242_v24 }
  0xed   :  { %v14963_v36 = vld [vmem:[#allocation5 + $0x8e4] sm:$0xf0]  ;;  %3127 = vmatpush.bf16.msra.mxu1 %v10657_v28  ;;  %3153 = vmatpush.bf16.msra.mxu3 %v11169_v33  ;;  %v10498_v28 = vld [vmem:[#allocation5 + $0x5e8] sm:$0xf0] }
  0xee   :  { %v11136_v38 = vld [vmem:[#allocation5 + $0xac8] sm:$0xf]  ;;  %v10881_v44 = vor.u32 %v14963_v36, %v10880_v35  ;;  %v14727_v35 = vld [vmem:[#allocation5 + $0x18c] sm:$0xf]  ;;  %v10501_v36 = vor.u32 %v14863_v27, %v10498_v28 }
  0xef   :  { %v15027_v39 = vld [vmem:[#allocation5 + $0xae4] sm:$0xf0]  ;;  %3115 = vmatpush.bf16.msra.mxu0 %v10369_v42  ;;  %v10210_v42 = vld [vmem:[#allocation5 + $0x3a8] sm:$0xf0] }
  0xf0   :  { %v10336_v45 = vld [vmem:[#allocation5 + $0x488] sm:$0xf]  ;;  %v11137_v48 = vor.u32 %v15027_v39, %v11136_v38  ;;  %3141 = vmatpush.bf16.msra.mxu2 %v10881_v44  ;;  %v9954_v38 = vld [vmem:[#allocation5 + $0x1a8] sm:$0xf0] }
  0xf1   :  { %v14827_v46 = vld [vmem:[#allocation5 + $0x4a4] sm:$0xf0]  ;;  %3128 = vmatpush.bf16.msra.mxu1 %v10625_v43  ;;  %v14791_v39 = vld [vmem:[#allocation5 + $0x38c] sm:$0xf] }
  0xf2   :  { %v10592_v47 = vld [vmem:[#allocation5 + $0x688] sm:$0xf]  ;;  %v10337_v54 = vor.u32 %v14827_v46, %v10336_v45  ;;  %3154 = vmatpush.bf16.msra.mxu3 %v11137_v48  ;;  %v14855_v43 = vld [vmem:[#allocation5 + $0x58c] sm:$0xf]  ;;  %v9957_v46 = vor.u32 %v14727_v35, %v9954_v38 }
  0xf3   :  { %v14891_v49 = vld [vmem:[#allocation5 + $0x6a4] sm:$0xf0]  ;;  %v10466_v44 = vld [vmem:[#allocation5 + $0x5a8] sm:$0xf0] }
  0xf4   :  { %v10848_v50 = vld [vmem:[#allocation5 + $0x888] sm:$0xf]  ;;  %v10593_v55 = vor.u32 %v14891_v49, %v10592_v47  ;;  %3116 = vmatpush.bf16.msra.mxu0 %v10337_v54  ;;  %v10213_v47 = vor.u32 %v14791_v39, %v10210_v42  ;;  %v10178_v54 = vld [vmem:[#allocation5 + $0x368] sm:$0xf0] }
  0xf5   :  { %v14955_v51 = vld [vmem:[#allocation5 + $0x8a4] sm:$0xf0]  ;;  %v14695_v27 = vld [vmem:[#allocation5 + $0x8c] sm:$0xf] }
  0xf6   :  { %v11104_v52 = vld [vmem:[#allocation5 + $0xa88] sm:$0xf]  ;;  %v10849_v56 = vor.u32 %v14955_v51, %v10848_v50  ;;  %3129 = vmatpush.bf16.msra.mxu1 %v10593_v55  ;;  %v14719_v50 = vld [vmem:[#allocation5 + $0x14c] sm:$0xf]  ;;  %v10469_v51 = vor.u32 %v14855_v43, %v10466_v44 }
  0xf7   :  { %v15019_v53 = vld [vmem:[#allocation5 + $0xaa4] sm:$0xf0]  ;;  %v14847_v55 = vld [vmem:[#allocation5 + $0x54c] sm:$0xf] }
  0xf8   :  { %v10304_v57 = vld [vmem:[#allocation5 + $0x448] sm:$0xf]  ;;  %v11105_v60 = vor.u32 %v15019_v53, %v11104_v52  ;;  %3142 = vmatpush.bf16.msra.mxu2 %v10849_v56  ;;  %v9922_v52 = vld [vmem:[#allocation5 + $0x168] sm:$0xf0] }
  0xf9   :  { %v14819_v58 = vld [vmem:[#allocation5 + $0x464] sm:$0xf0]  ;;  %v14783_v53 = vld [vmem:[#allocation5 + $0x34c] sm:$0xf] }
  0xfa   :  { %v10560_v59 = vld [vmem:[#allocation5 + $0x648] sm:$0xf]  ;;  %v10305_v2 = vor.u32 %v14819_v58, %v10304_v57  ;;  %3155 = vmatpush.bf16.msra.mxu3 %v11105_v60  ;;  %v10434_v56 = vld [vmem:[#allocation5 + $0x568] sm:$0xf0]  ;;  %v9925_v58 = vor.u32 %v14719_v50, %v9922_v52 }
  0xfb   :  { %v14883_v61 = vld [vmem:[#allocation5 + $0x664] sm:$0xf0]  ;;  %v14687_v44 = vld [vmem:[#allocation5 + $0x4c] sm:$0xf] }
  0xfc   :  { %v10816_v62 = vld [vmem:[#allocation5 + $0x848] sm:$0xf]  ;;  %v10561_v5 = vor.u32 %v14883_v61, %v10560_v59  ;;  %3117 = vmatpush.bf16.msra.mxu0 %v10305_v2  ;;  %v10181_v59 = vor.u32 %v14783_v53, %v10178_v54  ;;  %v10146_v2 = vld [vmem:[#allocation5 + $0x328] sm:$0xf0] }
  0xfd   :  { %v14947_v63 = vld [vmem:[#allocation5 + $0x864] sm:$0xf0]  ;;  %v10050_v50 = vld [vmem:[#allocation5 + $0x268] sm:$0xf0] }
  0xfe   :  { %v11072_v0 = vld [vmem:[#allocation5 + $0xa48] sm:$0xf]  ;;  %v10817_v6 = vor.u32 %v14947_v63, %v10816_v62  ;;  %3130 = vmatpush.bf16.msra.mxu1 %v10561_v5  ;;  %v14711_v62 = vld [vmem:[#allocation5 + $0x10c] sm:$0xf]  ;;  %v10437_v63 = vor.u32 %v14847_v55, %v10434_v56 }
  0xff   :  { %v15011_v1 = vld [vmem:[#allocation5 + $0xa64] sm:$0xf0]  ;;  %v10306_v52 = vld [vmem:[#allocation5 + $0x468] sm:$0xf0] }
 0x100   :  { %v10272_v3 = vld [vmem:[#allocation5 + $0x408] sm:$0xf]  ;;  %v11073_v10 = vor.u32 %v15011_v1, %v11072_v0  ;;  %3143 = vmatpush.bf16.msra.mxu2 %v10817_v6  ;;  %v9890_v0 = vld [vmem:[#allocation5 + $0x128] sm:$0xf0] }
 0x101   :  { %v14811_v4 = vld [vmem:[#allocation5 + $0x424] sm:$0xf0]  ;;  %v14775_v1 = vld [vmem:[#allocation5 + $0x30c] sm:$0xf] }
 0x102   :  { %v10528_v7 = vld [vmem:[#allocation5 + $0x608] sm:$0xf]  ;;  %v10273_v17 = vor.u32 %v14811_v4, %v10272_v3  ;;  %3156 = vmatpush.bf16.msra.mxu3 %v11073_v10  ;;  %v14839_v3 = vld [vmem:[#allocation5 + $0x50c] sm:$0xf] }
 0x103   :  { %v14875_v8 = vld [vmem:[#allocation5 + $0x624] sm:$0xf0]  ;;  %v10402_v4 = vld [vmem:[#allocation5 + $0x528] sm:$0xf0] }
 0x104   :  { %v10784_v9 = vld [vmem:[#allocation5 + $0x808] sm:$0xf]  ;;  %v10529_v25 = vor.u32 %v14875_v8, %v10528_v7  ;;  %3118 = vmatpush.bf16.msra.mxu0 %v10273_v17  ;;  %v9893_v7 = vor.u32 %v14711_v62, %v9890_v0  ;;  %v10149_v8 = vor.u32 %v14775_v1, %v10146_v2  ;;  %v14703_v10 = vld [vmem:[#allocation5 + $0xcc] sm:$0xf]  ;;  %v2938_v62 = vpop.f32.mrf.mxu2 }
 0x105   :  { %v14939_v11 = vld [vmem:[#allocation5 + $0x824] sm:$0xf0]  ;;  %v10370_v17 = vld [vmem:[#allocation5 + $0x4e8] sm:$0xf0] }
 0x106   :  { %v11040_v12 = vld [vmem:[#allocation5 + $0xa08] sm:$0xf]  ;;  %v10785_v26 = vor.u32 %v14939_v11, %v10784_v9  ;;  %3131 = vmatpush.bf16.msra.mxu1 %v10529_v25  ;;  %v9858_v11 = vld [vmem:[#allocation5 + $0xe8] sm:$0xf0] }
 0x107   :  { %v15003_v13 = vld [vmem:[#allocation5 + $0xa24] sm:$0xf0]  ;;  %3119 = vmatmul.bf16.vlgmr.msra.gmra.mxu0 %v16298_v18  ;;  %v9861_v24 = vor.u32 %v14703_v10, %v9858_v11  ;;  %v10018_v0 = vld [vmem:[#allocation5 + $0x228] sm:$0xf0] }
 0x108   :  { %v11520_v14 = vld [vmem:[#allocation5 + $0xdc8] sm:$0xf]  ;;  %v11041_v29 = vor.u32 %v15003_v13, %v11040_v12  ;;  %3144 = vmatpush.bf16.msra.mxu2 %v10785_v26  ;;  %v10405_v12 = vor.u32 %v14839_v3, %v10402_v4  ;;  %v14767_v13 = vld [vmem:[#allocation5 + $0x2cc] sm:$0xf]  ;;  %v2951_v4 = vpop.f32.mrf.mxu3 }
 0x109   :  { %v15123_v15 = vld [vmem:[#allocation5 + $0xde4] sm:$0xf0]  ;;  %3132 = vmatmul.bf16.vlgmr.msra.gmra.mxu1 %v16302_v20  ;;  %v14807_v1 = vld [vmem:[#allocation5 + $0x40c] sm:$0xf] }
 0x10a   :  { %v11521_v30 = vor.u32 %v15123_v15, %v11520_v14  ;;  %v11488_v33 = vld [vmem:[#allocation5 + $0xd88] sm:$0xf]  ;;  %3157 = vmatpush.bf16.msra.mxu3 %v11041_v29  ;;  %3176 = vmatpush.bf16.msrb.mxu1 %v9989_v31  ;;  %v10114_v14 = vld [vmem:[#allocation5 + $0x2e8] sm:$0xf0]  ;;  %v16338_v15 = vld [vmem:[#allocation7] sm:$0xff]  ;;  %v10373_v29 = vor.u32 %v14831_v16, %v10370_v17 }
 0x10b   :  { %v15115_v34 = vld [vmem:[#allocation5 + $0xda4] sm:$0xf0]  ;;  %3145 = vmatmul.bf16.vlgmr.msra.gmra.mxu2 %v16318_v40  ;;  %v10117_v25 = vor.u32 %v14767_v13, %v10114_v14  ;;  %v622_v28 = vperm.slane %v16338_v15, 0  ;;  %v14759_v31 = vld [vmem:[#allocation5 + $0x28c] sm:$0xf] }
 0x10c   :  { %3163 = vmatpush.bf16.msrb.mxu0 %v11521_v30  ;;  %v11489_v45 = vor.u32 %v15115_v34, %v11488_v33  ;;  %3189 = vmatpush.bf16.msrb.mxu2 %v10245_v32  ;;  %v11456_v48 = vld [vmem:[#allocation5 + $0xd48] sm:$0xf]  ;;  %v9826_v30 = vld [vmem:[#allocation5 + $0xa8] sm:$0xf0] }
 0x10d   :  { %v15107_v49 = vld [vmem:[#allocation5 + $0xd64] sm:$0xf0]  ;;  %3158 = vmatmul.bf16.vlgmr.msra.gmra.mxu3 %v16320_v41  ;;  %v10082_v32 = vld [vmem:[#allocation5 + $0x2a8] sm:$0xf0]  ;;  %v9829_v38 = vor.u32 %v14695_v27, %v9826_v30 }
 0x10e   :  { %3202 = vmatpush.bf16.msrb.mxu3 %v10501_v36  ;;  %v11457_v57 = vor.u32 %v15107_v49, %v11456_v48  ;;  %3177 = vmatpush.bf16.msrb.mxu1 %v9957_v46  ;;  %v11424_v60 = vld [vmem:[#allocation5 + $0xd08] sm:$0xf]  ;;  %v14823_v33 = vld [vmem:[#allocation5 + $0x48c] sm:$0xf]  ;;  %v2912_v36 = vpop.f32.mrf.mxu0  ;;  %v10085_v39 = vor.u32 %v14759_v31, %v10082_v32  ;;  %v2925_v46 = vpop.f32.mrf.mxu1 }
 0x10f   :  { %v15099_v61 = vld [vmem:[#allocation5 + $0xd24] sm:$0xf0]  ;;  %v10338_v34 = vld [vmem:[#allocation5 + $0x4a8] sm:$0xf0] }
 0x110   :  { %3164 = vmatpush.bf16.msrb.mxu0 %v11489_v45  ;;  %3190 = vmatpush.bf16.msrb.mxu2 %v10213_v47  ;;  %v11425_v5 = vor.u32 %v15099_v61, %v11424_v60  ;;  %v11392_v6 = vld [vmem:[#allocation5 + $0xcc8] sm:$0xf]  ;;  %v2913_v45 = vadd.f32 %v2912_v36, %v622_v28  ;;  %v10341_v47 = vor.u32 %v14823_v33, %v10338_v34  ;;  %v9794_v48 = vld [vmem:[#allocation5 + $0x68] sm:$0xf0] }
 0x111   :  { %v15091_v9 = vld [vmem:[#allocation5 + $0xce4] sm:$0xf0]  ;;  %v14751_v49 = vld [vmem:[#allocation5 + $0x24c] sm:$0xf] }
 0x112   :  { %3203 = vmatpush.bf16.msrb.mxu3 %v10469_v51  ;;  %3178 = vmatpush.bf16.msrb.mxu1 %v9925_v58  ;;  %v11393_v21 = vor.u32 %v15091_v9, %v11392_v6  ;;  %v11360_v23 = vld [vmem:[#allocation5 + $0xc88] sm:$0xf]  ;;  %v14815_v51 = vld [vmem:[#allocation5 + $0x44c] sm:$0xf]  ;;  %v2926_v53 = vadd.f32 %v2925_v46, %v2913_v45  ;;  %v10053_v58 = vor.u32 %v14751_v49, %v10050_v50 }
 0x113   :  { %v15083_v26 = vld [vmem:[#allocation5 + $0xca4] sm:$0xf0]  ;;  %v9762_v60 = vld [vmem:[#allocation5 + $0x28] sm:$0xf0] }
 0x114   :  { %3165 = vmatpush.bf16.msrb.mxu0 %v11457_v57  ;;  %3191 = vmatpush.bf16.msrb.mxu2 %v10181_v59  ;;  %v11361_v35 = vor.u32 %v15083_v26, %v11360_v23  ;;  %v11328_v42 = vld [vmem:[#allocation5 + $0xc48] sm:$0xf]  ;;  %v9797_v57 = vor.u32 %v14687_v44, %v9794_v48  ;;  %v14679_v59 = vld [vmem:[#allocation5 + $0xc] sm:$0xf]  ;;  %v2939_v3 = vadd.f32 %v2938_v62, %v2926_v53 }
 0x115   :  { %v15075_v43 = vld [vmem:[#allocation5 + $0xc64] sm:$0xf0]  ;;  %v14743_v61 = vld [vmem:[#allocation5 + $0x20c] sm:$0xf]  ;;  %v9765_v14 = vor.u32 %v14679_v59, %v9762_v60 }
 0x116   :  { %3204 = vmatpush.bf16.msrb.mxu3 %v10437_v63  ;;  %3179 = vmatpush.bf16.msrb.mxu1 %v9893_v7  ;;  %v11329_v54 = vor.u32 %v15075_v43, %v11328_v42  ;;  %v11296_v55 = vld [vmem:[#allocation5 + $0xc08] sm:$0xf]  ;;  %v10309_v63 = vor.u32 %v14815_v51, %v10306_v52  ;;  %v10274_v2 = vld [vmem:[#allocation5 + $0x428] sm:$0xf0]  ;;  %v2914_v13 = vpop.f32.mrf.mxu0  ;;  %v10021_v16 = vor.u32 %v14743_v61, %v10018_v0  ;;  %v2927_v23 = vpop.f32.mrf.mxu1 }
 0x117   :  { %v15067_v56 = vld [vmem:[#allocation5 + $0xc24] sm:$0xf0]  ;;  %v10754_v6 = vld [vmem:[#allocation5 + $0x7e8] sm:$0xf0]  ;;  %v2953_v42 = vpop.f32.mrf.mxu3 }
 0x118   :  { %3166 = vmatpush.bf16.msrb.mxu0 %v11425_v5  ;;  %3192 = vmatpush.bf16.msrb.mxu2 %v10149_v8  ;;  %v14927_v5 = vld [vmem:[#allocation5 + $0x7cc] sm:$0xf]  ;;  %v11297_v8 = vor.u32 %v15067_v56, %v11296_v55 }
 0x119   :  { %v14991_v7 = vld [vmem:[#allocation5 + $0x9cc] sm:$0xf] }
 0x11a   :  { %3205 = vmatpush.bf16.msrb.mxu3 %v10405_v12  ;;  %3180 = vmatpush.bf16.msrb.mxu1 %v9861_v24  ;;  %v11010_v9 = vld [vmem:[#allocation5 + $0x9e8] sm:$0xf0]  ;;  %v16341_v12 = vadd.f32 %v2951_v4, %v2939_v3  ;;  %v10277_v24 = vor.u32 %v14807_v1, %v10274_v2 }
 0x11b   :  { %v15055_v10 = vld [vmem:[#allocation5 + $0xbcc] sm:$0xf]  ;;  %v11013_v26 = vor.u32 %v14991_v7, %v11010_v9 }
 0x11c   :  { %3167 = vmatpush.bf16.msrb.mxu0 %v11393_v21  ;;  %3193 = vmatpush.bf16.msrb.mxu2 %v10117_v25  ;;  %v11266_v11 = vld [vmem:[#allocation5 + $0xbe8] sm:$0xf0]  ;;  %v10757_v25 = vor.u32 %v14927_v5, %v10754_v6 }
 0x11d   :  { %v15119_v17 = vld [vmem:[#allocation5 + $0xdcc] sm:$0xf]  ;;  %v11269_v27 = vor.u32 %v15055_v10, %v11266_v11 }
 0x11e   :  { %3206 = vmatpush.bf16.msrb.mxu3 %v10373_v29  ;;  %3181 = vmatpush.bf16.msrb.mxu1 %v9829_v38  ;;  %v11522_v21 = vld [vmem:[#allocation5 + $0xde8] sm:$0xf0]  ;;  %v2940_v38 = vpop.f32.mrf.mxu2  ;;  %v2964_v3 = vpop.f32.mrf.mxu0 }
 0x11f   :  { %v14919_v28 = vld [vmem:[#allocation5 + $0x78c] sm:$0xf]  ;;  %v11525_v31 = vor.u32 %v15119_v17, %v11522_v21  ;;  %v2977_v4 = vpop.f32.mrf.mxu1  ;;  %v2965_v10 = vadd.f32 %v2964_v3, %v16341_v12  ;;  %v16350_v38 = vpop.f32.mrf.mxu3 }
 0x120   :  { %3168 = vmatpush.bf16.msrb.mxu0 %v11361_v35  ;;  %3194 = vmatpush.bf16.msrb.mxu2 %v10085_v39  ;;  %v10722_v29 = vld [vmem:[#allocation5 + $0x7a8] sm:$0xf0] }
 0x121   :  { %v14983_v30 = vld [vmem:[#allocation5 + $0x98c] sm:$0xf]  ;;  %v10725_v39 = vor.u32 %v14919_v28, %v10722_v29  ;;  %v2978_v23 = vadd.f32 %v2977_v4, %v2965_v10  ;;  %v9992_v4 = vld [vmem:[#allocation5 + $0x1d0] sm:$0xf] }
 0x122   :  { %3207 = vmatpush.bf16.msrb.mxu3 %v10341_v47  ;;  %3182 = vmatpush.bf16.msrb.mxu1 %v9797_v57  ;;  %v10978_v32 = vld [vmem:[#allocation5 + $0x9a8] sm:$0xf0]  ;;  %v10504_v10 = vld [vmem:[#allocation5 + $0x5d0] sm:$0xf] }
 0x123   :  { %v15047_v33 = vld [vmem:[#allocation5 + $0xb8c] sm:$0xf]  ;;  %v10981_v43 = vor.u32 %v14983_v30, %v10978_v32 }
 0x124   :  { %3169 = vmatpush.bf16.msrb.mxu0 %v11329_v54  ;;  %3195 = vmatpush.bf16.msrb.mxu2 %v10053_v58  ;;  %v11234_v34 = vld [vmem:[#allocation5 + $0xba8] sm:$0xf0] }
 0x125   :  { %v15111_v35 = vld [vmem:[#allocation5 + $0xd8c] sm:$0xf]  ;;  %v11237_v44 = vor.u32 %v15047_v33, %v11234_v34 }
 0x126   :  { %3208 = vmatpush.bf16.msrb.mxu3 %v10309_v63  ;;  %3183 = vmatpush.bf16.msrb.mxu1 %v9765_v14  ;;  %v11490_v36 = vld [vmem:[#allocation5 + $0xda8] sm:$0xf0]  ;;  %v2990_v30 = vpop.f32.mrf.mxu2  ;;  %v2966_v42 = vpop.f32.mrf.mxu0 }
 0x127   :  { %v14911_v45 = vld [vmem:[#allocation5 + $0x74c] sm:$0xf]  ;;  %v11493_v48 = vor.u32 %v15111_v35, %v11490_v36  ;;  %v16348_v34 = vadd.f32 %v2990_v30, %v2978_v23  ;;  %v14796_v30 = vld [vmem:[#allocation5 + $0x3ac] sm:$0xf0] }
 0x128   :  { %3170 = vmatpush.bf16.msrb.mxu0 %v11297_v8  ;;  %3196 = vmatpush.bf16.msrb.mxu2 %v10021_v16  ;;  %v10690_v46 = vld [vmem:[#allocation5 + $0x768] sm:$0xf0] }
 0x129   :  { %v14975_v47 = vld [vmem:[#allocation5 + $0x94c] sm:$0xf]  ;;  %v10693_v54 = vor.u32 %v14911_v45, %v10690_v46  ;;  %3184 = vmatmul.bf16.vlgmr.msrb.gmra.mxu1 %v16300_v19 }
 0x12a   :  { %3209 = vmatpush.bf16.msrb.mxu3 %v10277_v24  ;;  %3228 = vmatpush.bf16.msra.mxu1 %v11013_v26  ;;  %v10946_v49 = vld [vmem:[#allocation5 + $0x968] sm:$0xf0] }
 0x12b   :  { %3171 = vmatmul.bf16.vlgmr.msrb.gmra.mxu0 %v16316_v37  ;;  %v15039_v50 = vld [vmem:[#allocation5 + $0xb4c] sm:$0xf]  ;;  %3197 = vmatmul.bf16.vlgmr.msrb.gmra.mxu2 %v16304_v22  ;;  %v10949_v55 = vor.u32 %v14975_v47, %v10946_v49 }
 0x12c   :  { %3215 = vmatpush.bf16.msra.mxu0 %v10757_v25  ;;  %3241 = vmatpush.bf16.msra.mxu2 %v11269_v27  ;;  %v11202_v51 = vld [vmem:[#allocation5 + $0xb68] sm:$0xf0] }
 0x12d   :  { %v15103_v52 = vld [vmem:[#allocation5 + $0xd4c] sm:$0xf]  ;;  %3210 = vmatmul.bf16.vlgmr.msrb.gmra.mxu3 %v16298_v18  ;;  %v11205_v56 = vor.u32 %v15039_v50, %v11202_v51 }
 0x12e   :  { %3254 = vmatpush.bf16.msra.mxu3 %v11525_v31  ;;  %v11458_v53 = vld [vmem:[#allocation5 + $0xd68] sm:$0xf0]  ;;  %3229 = vmatpush.bf16.msra.mxu1 %v10981_v43  ;;  %v2979_v43 = vpop.f32.mrf.mxu1 }
 0x12f   :  { %v14903_v57 = vld [vmem:[#allocation5 + $0x70c] sm:$0xf]  ;;  %v11461_v60 = vor.u32 %v15103_v52, %v11458_v53  ;;  %v14724_v43 = vld [vmem:[#allocation5 + $0x16c] sm:$0xf0] }
 0x130   :  { %3216 = vmatpush.bf16.msra.mxu0 %v10725_v39  ;;  %3242 = vmatpush.bf16.msra.mxu2 %v11237_v44  ;;  %v10658_v58 = vld [vmem:[#allocation5 + $0x728] sm:$0xf0] }
 0x131   :  { %v14967_v59 = vld [vmem:[#allocation5 + $0x90c] sm:$0xf]  ;;  %v10661_v2 = vor.u32 %v14903_v57, %v10658_v58 }
 0x132   :  { %3255 = vmatpush.bf16.msra.mxu3 %v11493_v48  ;;  %v10914_v61 = vld [vmem:[#allocation5 + $0x928] sm:$0xf0]  ;;  %3230 = vmatpush.bf16.msra.mxu1 %v10949_v55 }
 0x133   :  { %v15031_v62 = vld [vmem:[#allocation5 + $0xb0c] sm:$0xf]  ;;  %v10917_v5 = vor.u32 %v14967_v59, %v10914_v61 }
 0x134   :  { %v11170_v63 = vld [vmem:[#allocation5 + $0xb28] sm:$0xf0]  ;;  %3217 = vmatpush.bf16.msra.mxu0 %v10693_v54  ;;  %3243 = vmatpush.bf16.msra.mxu2 %v11205_v56 }
 0x135   :  { %v15095_v0 = vld [vmem:[#allocation5 + $0xd0c] sm:$0xf]  ;;  %v11173_v6 = vor.u32 %v15031_v62, %v11170_v63  ;;  %v2992_v63 = vpop.f32.mrf.mxu2 }
 0x136   :  { %v11426_v1 = vld [vmem:[#allocation5 + $0xd28] sm:$0xf0]  ;;  %3256 = vmatpush.bf16.msra.mxu3 %v11461_v60  ;;  %3231 = vmatpush.bf16.msra.mxu1 %v10917_v5  ;;  %v14740_v5 = vld [vmem:[#allocation5 + $0x1ec] sm:$0xf0] }
 0x137   :  { %v14895_v7 = vld [vmem:[#allocation5 + $0x6cc] sm:$0xf]  ;;  %v11429_v11 = vor.u32 %v15095_v0, %v11426_v1  ;;  %v9993_v23 = vor.u32 %v14740_v5, %v9992_v4  ;;  %v10664_v63 = vld [vmem:[#allocation5 + $0x710] sm:$0xf] }
 0x138   :  { %v10626_v8 = vld [vmem:[#allocation5 + $0x6e8] sm:$0xf0]  ;;  %3218 = vmatpush.bf16.msra.mxu0 %v10661_v2  ;;  %3244 = vmatpush.bf16.msra.mxu2 %v11173_v6  ;;  %v10248_v6 = vld [vmem:[#allocation5 + $0x3d0] sm:$0xf] }
 0x139   :  { %v14959_v9 = vld [vmem:[#allocation5 + $0x8cc] sm:$0xf]  ;;  %v10629_v24 = vor.u32 %v14895_v7, %v10626_v8  ;;  %v3005_v7 = vpop.f32.mrf.mxu3  ;;  %v9864_v5 = vld [vmem:[#allocation5 + $0xd0] sm:$0xf] }
 0x13a   :  { %v10882_v13 = vld [vmem:[#allocation5 + $0x8e8] sm:$0xf0]  ;;  %3257 = vmatpush.bf16.msra.mxu3 %v11429_v11  ;;  %v14868_v11 = vld [vmem:[#allocation5 + $0x5ec] sm:$0xf0] }
 0x13b   :  { %v15023_v14 = vld [vmem:[#allocation5 + $0xacc] sm:$0xf]  ;;  %v10885_v25 = vor.u32 %v14959_v9, %v10882_v13  ;;  %v14804_v9 = vld [vmem:[#allocation5 + $0x3ec] sm:$0xf0] }
 0x13c   :  { %v11138_v16 = vld [vmem:[#allocation5 + $0xae8] sm:$0xf0]  ;;  %3219 = vmatpush.bf16.msra.mxu0 %v10629_v24  ;;  %v10249_v24 = vor.u32 %v14804_v9, %v10248_v6  ;;  %v14708_v6 = vld [vmem:[#allocation5 + $0xec] sm:$0xf0] }
 0x13d   :  { %v15087_v17 = vld [vmem:[#allocation5 + $0xccc] sm:$0xf]  ;;  %v11141_v26 = vor.u32 %v15023_v14, %v11138_v16  ;;  %3232 = vmatpush.bf16.msra.mxu1 %v10885_v25  ;;  %v10760_v16 = vld [vmem:[#allocation5 + $0x7d0] sm:$0xf]  ;;  %v10505_v25 = vor.u32 %v14868_v11, %v10504_v10 }
 0x13e   :  { %v11394_v21 = vld [vmem:[#allocation5 + $0xce8] sm:$0xf0]  ;;  %v14772_v10 = vld [vmem:[#allocation5 + $0x2ec] sm:$0xf0] }
 0x13f   :  { %v14887_v27 = vld [vmem:[#allocation5 + $0x68c] sm:$0xf]  ;;  %v11397_v12 = vor.u32 %v15087_v17, %v11394_v21  ;;  %3245 = vmatpush.bf16.msra.mxu2 %v11141_v26  ;;  %v14932_v17 = vld [vmem:[#allocation5 + $0x7ec] sm:$0xf0] }
 0x140   :  { %v10594_v28 = vld [vmem:[#allocation5 + $0x6a8] sm:$0xf0]  ;;  %v9960_v26 = vld [vmem:[#allocation5 + $0x190] sm:$0xf] }
 0x141   :  { %v14951_v29 = vld [vmem:[#allocation5 + $0x88c] sm:$0xf]  ;;  %v10597_v39 = vor.u32 %v14887_v27, %v10594_v28  ;;  %3258 = vmatpush.bf16.msra.mxu3 %v11397_v12  ;;  %v14732_v27 = vld [vmem:[#allocation5 + $0x1ac] sm:$0xf0] }
 0x142   :  { %v10850_v31 = vld [vmem:[#allocation5 + $0x8a8] sm:$0xf0]  ;;  %v10216_v28 = vld [vmem:[#allocation5 + $0x390] sm:$0xf] }
 0x143   :  { %v15015_v32 = vld [vmem:[#allocation5 + $0xa8c] sm:$0xf]  ;;  %v10853_v44 = vor.u32 %v14951_v29, %v10850_v31  ;;  %3220 = vmatpush.bf16.msra.mxu0 %v10597_v39  ;;  %v10761_v29 = vor.u32 %v14932_v17, %v10760_v16  ;;  %v10472_v12 = vld [vmem:[#allocation5 + $0x590] sm:$0xf]  ;;  %v10217_v39 = vor.u32 %v14796_v30, %v10216_v28  ;;  %v3042_v28 = vpop.f32.mrf.mxu2 }
 0x144   :  { %v11106_v33 = vld [vmem:[#allocation5 + $0xaa8] sm:$0xf0]  ;;  %v14860_v31 = vld [vmem:[#allocation5 + $0x5ac] sm:$0xf0] }
 0x145   :  { %v15079_v35 = vld [vmem:[#allocation5 + $0xc8c] sm:$0xf]  ;;  %v11109_v45 = vor.u32 %v15015_v32, %v11106_v33  ;;  %3233 = vmatpush.bf16.msra.mxu1 %v10853_v44  ;;  %v10728_v32 = vld [vmem:[#allocation5 + $0x790] sm:$0xf]  ;;  %v10473_v42 = vor.u32 %v14860_v31, %v10472_v12 }
 0x146   :  { %v11362_v36 = vld [vmem:[#allocation5 + $0xca8] sm:$0xf0]  ;;  %v14924_v33 = vld [vmem:[#allocation5 + $0x7ac] sm:$0xf0] }
 0x147   :  { %v14879_v46 = vld [vmem:[#allocation5 + $0x64c] sm:$0xf]  ;;  %v11365_v49 = vor.u32 %v15079_v35, %v11362_v36  ;;  %3246 = vmatpush.bf16.msra.mxu2 %v11109_v45  ;;  %v9961_v35 = vor.u32 %v14732_v27, %v9960_v26  ;;  %v9928_v36 = vld [vmem:[#allocation5 + $0x150] sm:$0xf]  ;;  %v623_v45 = vperm.slane %v16338_v15, 1 }
 0x148   :  { %v10562_v47 = vld [vmem:[#allocation5 + $0x668] sm:$0xf0]  ;;  %v10184_v44 = vld [vmem:[#allocation5 + $0x350] sm:$0xf] }
 0x149   :  { %v14943_v48 = vld [vmem:[#allocation5 + $0x84c] sm:$0xf]  ;;  %v10565_v55 = vor.u32 %v14879_v46, %v10562_v47  ;;  %3259 = vmatpush.bf16.msra.mxu3 %v11365_v49  ;;  %v10729_v46 = vor.u32 %v14924_v33, %v10728_v32  ;;  %v14788_v47 = vld [vmem:[#allocation5 + $0x36c] sm:$0xf0]  ;;  %v3055_v33 = vpop.f32.mrf.mxu3 }
 0x14a   :  { %v10818_v50 = vld [vmem:[#allocation5 + $0x868] sm:$0xf0]  ;;  %v14852_v49 = vld [vmem:[#allocation5 + $0x56c] sm:$0xf0] }
 0x14b   :  { %v15007_v51 = vld [vmem:[#allocation5 + $0xa4c] sm:$0xf]  ;;  %v10821_v58 = vor.u32 %v14943_v48, %v10818_v50  ;;  %3221 = vmatpush.bf16.msra.mxu0 %v10565_v55  ;;  %v10440_v48 = vld [vmem:[#allocation5 + $0x550] sm:$0xf]  ;;  %v3004_v55 = vadd.f32 %v16350_v38, %v623_v45 }
 0x14c   :  { %v11074_v52 = vld [vmem:[#allocation5 + $0xa68] sm:$0xf0]  ;;  %v10696_v50 = vld [vmem:[#allocation5 + $0x750] sm:$0xf] }
 0x14d   :  { %v15071_v53 = vld [vmem:[#allocation5 + $0xc4c] sm:$0xf]  ;;  %v11077_v59 = vor.u32 %v15007_v51, %v11074_v52  ;;  %3234 = vmatpush.bf16.msra.mxu1 %v10821_v58  ;;  %v14916_v51 = vld [vmem:[#allocation5 + $0x76c] sm:$0xf0]  ;;  %v9929_v52 = vor.u32 %v14724_v43, %v9928_v36 }
 0x14e   :  { %v11330_v54 = vld [vmem:[#allocation5 + $0xc68] sm:$0xf0]  ;;  %v10152_v58 = vld [vmem:[#allocation5 + $0x310] sm:$0xf] }
 0x14f   :  { %v14871_v56 = vld [vmem:[#allocation5 + $0x60c] sm:$0xf]  ;;  %v11333_v0 = vor.u32 %v15071_v53, %v11330_v54  ;;  %3247 = vmatpush.bf16.msra.mxu2 %v11077_v59  ;;  %v10185_v53 = vor.u32 %v14788_v47, %v10184_v44  ;;  %v10441_v54 = vor.u32 %v14852_v49, %v10440_v48  ;;  %v10697_v59 = vor.u32 %v14916_v51, %v10696_v50  ;;  %v10120_v38 = vld [vmem:[#allocation5 + $0x2d0] sm:$0xf] }
 0x150   :  { %v10530_v57 = vld [vmem:[#allocation5 + $0x628] sm:$0xf0]  ;;  %v10376_v11 = vld [vmem:[#allocation5 + $0x4d0] sm:$0xf] }
 0x151   :  { %v14935_v60 = vld [vmem:[#allocation5 + $0x80c] sm:$0xf]  ;;  %v10533_v8 = vor.u32 %v14871_v56, %v10530_v57  ;;  %3260 = vmatpush.bf16.msra.mxu3 %v11333_v0  ;;  %v9896_v56 = vld [vmem:[#allocation5 + $0x110] sm:$0xf] }
 0x152   :  { %v10786_v61 = vld [vmem:[#allocation5 + $0x828] sm:$0xf0]  ;;  %v14716_v57 = vld [vmem:[#allocation5 + $0x12c] sm:$0xf0] }
 0x153   :  { %v14999_v62 = vld [vmem:[#allocation5 + $0xa0c] sm:$0xf]  ;;  %v10789_v13 = vor.u32 %v14935_v60, %v10786_v61  ;;  %3222 = vmatpush.bf16.msra.mxu0 %v10533_v8  ;;  %v14780_v60 = vld [vmem:[#allocation5 + $0x32c] sm:$0xf0]  ;;  %v3029_v8 = vpop.f32.mrf.mxu1 }
 0x154   :  { %v11042_v1 = vld [vmem:[#allocation5 + $0xa28] sm:$0xf0]  ;;  %v10408_v61 = vld [vmem:[#allocation5 + $0x510] sm:$0xf] }
 0x155   :  { %v15063_v2 = vld [vmem:[#allocation5 + $0xc0c] sm:$0xf]  ;;  %v11045_v14 = vor.u32 %v14999_v62, %v11042_v1  ;;  %3235 = vmatpush.bf16.msra.mxu1 %v10789_v13  ;;  %v14844_v62 = vld [vmem:[#allocation5 + $0x52c] sm:$0xf0]  ;;  %v9897_v1 = vor.u32 %v14716_v57, %v9896_v56 }
 0x156   :  { %v11298_v3 = vld [vmem:[#allocation5 + $0xc28] sm:$0xf0]  ;;  %3223 = vmatmul.bf16.vlgmr.msra.gmra.mxu0 %v16302_v20  ;;  %v14908_v0 = vld [vmem:[#allocation5 + $0x72c] sm:$0xf0]  ;;  %v10409_v4 = vor.u32 %v14844_v62, %v10408_v61 }
 0x157   :  { %v11301_v21 = vor.u32 %v15063_v2, %v11298_v3  ;;  %3248 = vmatpush.bf16.msra.mxu2 %v11045_v14  ;;  %3267 = vmatpush.bf16.msrb.mxu0 %v9993_v23  ;;  %v3016_v2 = vpop.f32.mrf.mxu0  ;;  %v10153_v3 = vor.u32 %v14780_v60, %v10152_v58  ;;  %v10665_v9 = vor.u32 %v14908_v0, %v10664_v63  ;;  %v14836_v13 = vld [vmem:[#allocation5 + $0x4ec] sm:$0xf0]  ;;  %v3044_v0 = vpop.f32.mrf.mxu2 }
 0x158   :  { %3236 = vmatmul.bf16.vlgmr.msra.gmra.mxu1 %v16318_v40  ;;  %v3017_v7 = vadd.f32 %v3016_v2, %v3004_v55  ;;  %v10632_v14 = vld [vmem:[#allocation5 + $0x6d0] sm:$0xf]  ;;  %v10121_v23 = vor.u32 %v14772_v10, %v10120_v38  ;;  %v9898_v0 = vld [vmem:[#allocation5 + $0x130] sm:$0xf0] }
 0x159   :  { %3261 = vmatpush.bf16.msra.mxu3 %v11301_v21  ;;  %3280 = vmatpush.bf16.msrb.mxu1 %v10249_v24  ;;  %v14900_v16 = vld [vmem:[#allocation5 + $0x6ec] sm:$0xf0]  ;;  %v9865_v21 = vor.u32 %v14708_v6, %v9864_v5  ;;  %v10377_v24 = vor.u32 %v14836_v13, %v10376_v11  ;;  %v3057_v5 = vpop.f32.mrf.mxu3 }
 0x15a   :  { %3249 = vmatmul.bf16.vlgmr.msra.gmra.mxu2 %v16320_v41  ;;  %v3030_v17 = vadd.f32 %v3029_v8, %v3017_v7  ;;  %v14700_v26 = vld [vmem:[#allocation5 + $0xac] sm:$0xf0] }
 0x15b   :  { %3293 = vmatpush.bf16.msrb.mxu2 %v10505_v25  ;;  %3268 = vmatpush.bf16.msrb.mxu0 %v9961_v35  ;;  %v9832_v25 = vld [vmem:[#allocation5 + $0x90] sm:$0xf]  ;;  %v3031_v49 = vpop.f32.mrf.mxu1 }
 0x15c   :  { %3262 = vmatmul.bf16.vlgmr.msra.gmra.mxu3 %v16316_v37  ;;  %v10088_v27 = vld [vmem:[#allocation5 + $0x290] sm:$0xf]  ;;  %v3043_v32 = vadd.f32 %v3042_v28, %v3030_v17  ;;  %v9994_v17 = vld [vmem:[#allocation5 + $0x1f0] sm:$0xf0] }
 0x15d   :  { %3306 = vmatpush.bf16.msrb.mxu3 %v10761_v29  ;;  %3281 = vmatpush.bf16.msrb.mxu1 %v10217_v39  ;;  %v10633_v29 = vor.u32 %v14900_v16, %v10632_v14  ;;  %v14764_v30 = vld [vmem:[#allocation5 + $0x2ac] sm:$0xf0]  ;;  %v9833_v39 = vor.u32 %v14700_v26, %v9832_v25  ;;  %v14736_v16 = vld [vmem:[#allocation5 + $0x1d4] sm:$0xf] }
 0x15e   :  { %v10344_v12 = vld [vmem:[#allocation5 + $0x490] sm:$0xf]  ;;  %v10089_v44 = vor.u32 %v14764_v30, %v10088_v27 }
 0x15f   :  { %3294 = vmatpush.bf16.msrb.mxu2 %v10473_v42  ;;  %3269 = vmatpush.bf16.msrb.mxu0 %v9929_v52  ;;  %v14828_v31 = vld [vmem:[#allocation5 + $0x4ac] sm:$0xf0]  ;;  %v16358_v42 = vadd.f32 %v3055_v33, %v3043_v32  ;;  %v3018_v43 = vpop.f32.mrf.mxu0  ;;  %v14728_v32 = vld [vmem:[#allocation5 + $0x194] sm:$0xf] }
 0x160   :  { %v10600_v35 = vld [vmem:[#allocation5 + $0x690] sm:$0xf]  ;;  %v10345_v45 = vor.u32 %v14828_v31, %v10344_v12  ;;  %v9962_v33 = vld [vmem:[#allocation5 + $0x1b0] sm:$0xf0] }
 0x161   :  { %3307 = vmatpush.bf16.msrb.mxu3 %v10729_v46  ;;  %3282 = vmatpush.bf16.msrb.mxu1 %v10185_v53  ;;  %v14892_v36 = vld [vmem:[#allocation5 + $0x6ac] sm:$0xf0] }
 0x162   :  { %v9800_v46 = vld [vmem:[#allocation5 + $0x50] sm:$0xf]  ;;  %v10601_v50 = vor.u32 %v14892_v36, %v10600_v35 }
 0x163   :  { %3295 = vmatpush.bf16.msrb.mxu2 %v10441_v54  ;;  %3270 = vmatpush.bf16.msrb.mxu0 %v9897_v1  ;;  %v14692_v47 = vld [vmem:[#allocation5 + $0x6c] sm:$0xf0] }
 0x164   :  { %v10056_v48 = vld [vmem:[#allocation5 + $0x250] sm:$0xf]  ;;  %v9801_v56 = vor.u32 %v14692_v47, %v9800_v46  ;;  %v9965_v46 = vor.u32 %v14728_v32, %v9962_v33  ;;  %v9834_v32 = vld [vmem:[#allocation5 + $0xb0] sm:$0xf0] }
 0x165   :  { %3308 = vmatpush.bf16.msrb.mxu3 %v10697_v59  ;;  %3283 = vmatpush.bf16.msrb.mxu1 %v10153_v3  ;;  %v14756_v51 = vld [vmem:[#allocation5 + $0x26c] sm:$0xf0] }
 0x166   :  { %v10312_v52 = vld [vmem:[#allocation5 + $0x450] sm:$0xf]  ;;  %v10057_v59 = vor.u32 %v14756_v51, %v10056_v48  ;;  %v9930_v51 = vld [vmem:[#allocation5 + $0x170] sm:$0xf0] }
 0x167   :  { %3296 = vmatpush.bf16.msrb.mxu2 %v10409_v4  ;;  %3271 = vmatpush.bf16.msrb.mxu0 %v9865_v21  ;;  %v14820_v53 = vld [vmem:[#allocation5 + $0x46c] sm:$0xf0] }
 0x168   :  { %v10568_v54 = vld [vmem:[#allocation5 + $0x650] sm:$0xf]  ;;  %v10313_v60 = vor.u32 %v14820_v53, %v10312_v52 }
 0x169   :  { %3309 = vmatpush.bf16.msrb.mxu3 %v10665_v9  ;;  %3284 = vmatpush.bf16.msrb.mxu1 %v10121_v23  ;;  %v14884_v55 = vld [vmem:[#allocation5 + $0x66c] sm:$0xf0] }
 0x16a   :  { %v9768_v57 = vld [vmem:[#allocation5 + $0x10] sm:$0xf]  ;;  %v10569_v1 = vor.u32 %v14884_v55, %v10568_v54 }
 0x16b   :  { %3297 = vmatpush.bf16.msrb.mxu2 %v10377_v24  ;;  %3272 = vmatpush.bf16.msrb.mxu0 %v9833_v39  ;;  %v14684_v58 = vld [vmem:[#allocation5 + $0x2c] sm:$0xf0] }
 0x16c   :  { %v10024_v61 = vld [vmem:[#allocation5 + $0x210] sm:$0xf]  ;;  %v9769_v8 = vor.u32 %v14684_v58, %v9768_v57 }
 0x16d   :  { %3310 = vmatpush.bf16.msrb.mxu3 %v10633_v29  ;;  %3285 = vmatpush.bf16.msrb.mxu1 %v10089_v44  ;;  %v14748_v62 = vld [vmem:[#allocation5 + $0x22c] sm:$0xf0]  ;;  %v9997_v29 = vor.u32 %v14736_v16, %v9994_v17  ;;  %v9866_v16 = vld [vmem:[#allocation5 + $0xf0] sm:$0xf0] }
 0x16e   :  { %v10280_v63 = vld [vmem:[#allocation5 + $0x410] sm:$0xf]  ;;  %v10025_v13 = vor.u32 %v14748_v62, %v10024_v61  ;;  %v3068_v62 = vpop.f32.mrf.mxu0 }
 0x16f   :  { %3298 = vmatpush.bf16.msrb.mxu2 %v10345_v45  ;;  %v14812_v2 = vld [vmem:[#allocation5 + $0x42c] sm:$0xf0]  ;;  %3273 = vmatpush.bf16.msrb.mxu0 %v9801_v56 }
 0x170   :  { %v10536_v3 = vld [vmem:[#allocation5 + $0x610] sm:$0xf]  ;;  %v10281_v14 = vor.u32 %v14812_v2, %v10280_v63  ;;  %v14712_v63 = vld [vmem:[#allocation5 + $0x114] sm:$0xf] }
 0x171   :  { %3311 = vmatpush.bf16.msrb.mxu3 %v10601_v50  ;;  %v14876_v4 = vld [vmem:[#allocation5 + $0x62c] sm:$0xf0]  ;;  %3286 = vmatpush.bf16.msrb.mxu1 %v10057_v59  ;;  %v14720_v50 = vld [vmem:[#allocation5 + $0x154] sm:$0xf] }
 0x172   :  { %v11016_v6 = vld [vmem:[#allocation5 + $0x9d0] sm:$0xf]  ;;  %v10537_v21 = vor.u32 %v14876_v4, %v10536_v3  ;;  %v9933_v58 = vor.u32 %v14720_v50, %v9930_v51  ;;  %v3081_v3 = vpop.f32.mrf.mxu1 }
 0x173   :  { %v14996_v38 = vld [vmem:[#allocation5 + $0x9ec] sm:$0xf0]  ;;  %3299 = vmatpush.bf16.msrb.mxu2 %v10313_v60  ;;  %3274 = vmatpush.bf16.msrb.mxu0 %v9769_v8  ;;  %v9901_v8 = vor.u32 %v14712_v63, %v9898_v0 }
 0x174   :  { %v11272_v7 = vld [vmem:[#allocation5 + $0xbd0] sm:$0xf]  ;;  %v11017_v23 = vor.u32 %v14996_v38, %v11016_v6 }
 0x175   :  { %v15060_v9 = vld [vmem:[#allocation5 + $0xbec] sm:$0xf0]  ;;  %3312 = vmatpush.bf16.msrb.mxu3 %v10569_v1  ;;  %3287 = vmatpush.bf16.msrb.mxu1 %v10025_v13  ;;  %v3069_v1 = vadd.f32 %v3068_v62, %v16358_v42  ;;  %v624_v42 = vperm.slane %v16338_v15, 2 }
 0x176   :  { %v11528_v10 = vld [vmem:[#allocation5 + $0xdd0] sm:$0xf]  ;;  %v11273_v24 = vor.u32 %v15060_v9, %v11272_v7  ;;  %3275 = vmatmul.bf16.vlgmr.msrb.gmra.mxu0 %v16300_v19  ;;  %v3070_v15 = vpop.f32.mrf.mxu0 }
 0x177   :  { %v15124_v11 = vld [vmem:[#allocation5 + $0xdec] sm:$0xf0]  ;;  %3300 = vmatpush.bf16.msrb.mxu2 %v10281_v14  ;;  %3319 = vmatpush.bf16.msra.mxu0 %v11017_v23  ;;  %v16365_v9 = vadd.f32 %v3081_v3, %v3069_v1  ;;  %v14704_v14 = vld [vmem:[#allocation5 + $0xd4] sm:$0xf] }
 0x178   :  { %v11529_v25 = vor.u32 %v15124_v11, %v11528_v10  ;;  %v10984_v26 = vld [vmem:[#allocation5 + $0x990] sm:$0xf]  ;;  %3288 = vmatmul.bf16.vlgmr.msrb.gmra.mxu1 %v16304_v22  ;;  %v14680_v1 = vld [vmem:[#allocation5 + $0x14] sm:$0xf] }
 0x179   :  { %v14988_v27 = vld [vmem:[#allocation5 + $0x9ac] sm:$0xf0]  ;;  %3313 = vmatpush.bf16.msrb.mxu3 %v10537_v21  ;;  %3332 = vmatpush.bf16.msra.mxu1 %v11273_v24 }
 0x17a   :  { %v11240_v28 = vld [vmem:[#allocation5 + $0xb90] sm:$0xf]  ;;  %v10985_v35 = vor.u32 %v14988_v27, %v10984_v26  ;;  %3301 = vmatmul.bf16.vlgmr.msrb.gmra.mxu2 %v16298_v18  ;;  %v9869_v27 = vor.u32 %v14704_v14, %v9866_v16  ;;  %v14992_v16 = vld [vmem:[#allocation5 + $0x9d4] sm:$0xf] }
 0x17b   :  { %v15052_v30 = vld [vmem:[#allocation5 + $0xbac] sm:$0xf0]  ;;  %3345 = vmatpush.bf16.msra.mxu2 %v11529_v25 }
 0x17c   :  { %v11496_v12 = vld [vmem:[#allocation5 + $0xd90] sm:$0xf]  ;;  %v11241_v36 = vor.u32 %v15052_v30, %v11240_v28  ;;  %3314 = vmatmul.bf16.vlgmr.msrb.gmra.mxu3 %v16302_v20  ;;  %3320 = vmatpush.bf16.msra.mxu0 %v10985_v35  ;;  %v3107_v35 = vpop.f32.mrf.mxu3 }
 0x17d   :  { %v15116_v31 = vld [vmem:[#allocation5 + $0xdac] sm:$0xf0]  ;;  %3358 = vmatpush.bf16.msra.mxu3 %v9997_v29 }
 0x17e   :  { %v11497_v39 = vor.u32 %v15116_v31, %v11496_v12  ;;  %v10952_v43 = vld [vmem:[#allocation5 + $0x950] sm:$0xf]  ;;  %3333 = vmatpush.bf16.msra.mxu1 %v11241_v36  ;;  %v3094_v12 = vpop.f32.mrf.mxu2  ;;  %v14696_v31 = vld [vmem:[#allocation5 + $0x94] sm:$0xf] }
 0x17f   :  { %v14980_v44 = vld [vmem:[#allocation5 + $0x96c] sm:$0xf0]  ;;  %v3095_v33 = vadd.f32 %v3094_v12, %v624_v42  ;;  %v11018_v42 = vld [vmem:[#allocation5 + $0x9f0] sm:$0xf0] }
 0x180   :  { %v11208_v45 = vld [vmem:[#allocation5 + $0xb50] sm:$0xf]  ;;  %v10953_v52 = vor.u32 %v14980_v44, %v10952_v43  ;;  %3346 = vmatpush.bf16.msra.mxu2 %v11497_v39  ;;  %v3083_v39 = vpop.f32.mrf.mxu1  ;;  %v10730_v12 = vld [vmem:[#allocation5 + $0x7b0] sm:$0xf0] }
 0x181   :  { %v15044_v47 = vld [vmem:[#allocation5 + $0xb6c] sm:$0xf0]  ;;  %3359 = vmatpush.bf16.msra.mxu3 %v9965_v46  ;;  %v10186_v39 = vld [vmem:[#allocation5 + $0x370] sm:$0xf0] }
 0x182   :  { %v11464_v48 = vld [vmem:[#allocation5 + $0xd50] sm:$0xf]  ;;  %v11209_v53 = vor.u32 %v15044_v47, %v11208_v45  ;;  %3321 = vmatpush.bf16.msra.mxu0 %v10953_v52 }
 0x183   :  { %v15108_v49 = vld [vmem:[#allocation5 + $0xd6c] sm:$0xf0] }
 0x184   :  { %v11465_v54 = vor.u32 %v15108_v49, %v11464_v48  ;;  %v10920_v55 = vld [vmem:[#allocation5 + $0x910] sm:$0xf]  ;;  %3334 = vmatpush.bf16.msra.mxu1 %v11209_v53  ;;  %v16368_v48 = vadd.f32 %v3107_v35, %v3095_v33  ;;  %v9837_v49 = vor.u32 %v14696_v31, %v9834_v32  ;;  %v14688_v53 = vld [vmem:[#allocation5 + $0x54] sm:$0xf] }
 0x185   :  { %v14972_v56 = vld [vmem:[#allocation5 + $0x92c] sm:$0xf0]  ;;  %3360 = vmatpush.bf16.msra.mxu3 %v9933_v58  ;;  %v14984_v31 = vld [vmem:[#allocation5 + $0x994] sm:$0xf] }
 0x186   :  { %v11176_v57 = vld [vmem:[#allocation5 + $0xb10] sm:$0xf]  ;;  %v10921_v2 = vor.u32 %v14972_v56, %v10920_v55  ;;  %3347 = vmatpush.bf16.msra.mxu2 %v11465_v54  ;;  %v9802_v54 = vld [vmem:[#allocation5 + $0x70] sm:$0xf0]  ;;  %v3096_v3 = vpop.f32.mrf.mxu2 }
 0x187   :  { %v15036_v59 = vld [vmem:[#allocation5 + $0xb2c] sm:$0xf0]  ;;  %v9805_v63 = vor.u32 %v14688_v53, %v9802_v54  ;;  %v10986_v32 = vld [vmem:[#allocation5 + $0x9b0] sm:$0xf0] }
 0x188   :  { %v11432_v60 = vld [vmem:[#allocation5 + $0xd10] sm:$0xf]  ;;  %v11177_v4 = vor.u32 %v15036_v59, %v11176_v57  ;;  %3322 = vmatpush.bf16.msra.mxu0 %v10921_v2  ;;  %v9770_v2 = vld [vmem:[#allocation5 + $0x30] sm:$0xf0] }
 0x189   :  { %v15100_v61 = vld [vmem:[#allocation5 + $0xd2c] sm:$0xf0]  ;;  %3361 = vmatpush.bf16.msra.mxu3 %v9901_v8  ;;  %v10506_v8 = vld [vmem:[#allocation5 + $0x5f0] sm:$0xf0] }
 0x18a   :  { %v11433_v5 = vor.u32 %v15100_v61, %v11432_v60  ;;  %v10888_v6 = vld [vmem:[#allocation5 + $0x8d0] sm:$0xf]  ;;  %3335 = vmatpush.bf16.msra.mxu1 %v11177_v4  ;;  %v14800_v4 = vld [vmem:[#allocation5 + $0x3d4] sm:$0xf] }
 0x18b   :  { %v14964_v38 = vld [vmem:[#allocation5 + $0x8ec] sm:$0xf0]  ;;  %v14776_v54 = vld [vmem:[#allocation5 + $0x314] sm:$0xf] }
 0x18c   :  { %v11144_v7 = vld [vmem:[#allocation5 + $0xad0] sm:$0xf]  ;;  %v10889_v17 = vor.u32 %v14964_v38, %v10888_v6  ;;  %3348 = vmatpush.bf16.msra.mxu2 %v11433_v5  ;;  %v10250_v5 = vld [vmem:[#allocation5 + $0x3f0] sm:$0xf0]  ;;  %v3109_v38 = vpop.f32.mrf.mxu3 }
 0x18d   :  { %v15028_v10 = vld [vmem:[#allocation5 + $0xaec] sm:$0xf0]  ;;  %3362 = vmatpush.bf16.msra.mxu3 %v9869_v27  ;;  %v14864_v6 = vld [vmem:[#allocation5 + $0x5d4] sm:$0xf]  ;;  %v3133_v38 = vpop.f32.mrf.mxu1 }
 0x18e   :  { %v11400_v11 = vld [vmem:[#allocation5 + $0xcd0] sm:$0xf]  ;;  %v11145_v21 = vor.u32 %v15028_v10, %v11144_v7  ;;  %3323 = vmatpush.bf16.msra.mxu0 %v10889_v17  ;;  %v14928_v10 = vld [vmem:[#allocation5 + $0x7d4] sm:$0xf]  ;;  %v9773_v17 = vor.u32 %v14680_v1, %v9770_v2 }
 0x18f   :  { %v15092_v13 = vld [vmem:[#allocation5 + $0xcec] sm:$0xf0]  ;;  %v14856_v27 = vld [vmem:[#allocation5 + $0x594] sm:$0xf] }
 0x190   :  { %v11401_v23 = vor.u32 %v15092_v13, %v11400_v11  ;;  %v10856_v24 = vld [vmem:[#allocation5 + $0x890] sm:$0xf]  ;;  %3336 = vmatpush.bf16.msra.mxu1 %v11145_v21  ;;  %v10762_v11 = vld [vmem:[#allocation5 + $0x7f0] sm:$0xf0]  ;;  %v10253_v21 = vor.u32 %v14800_v4, %v10250_v5 }
 0x191   :  { %v14956_v25 = vld [vmem:[#allocation5 + $0x8ac] sm:$0xf0]  ;;  %3363 = vmatpush.bf16.msra.mxu3 %v9837_v49  ;;  %v14976_v49 = vld [vmem:[#allocation5 + $0x954] sm:$0xf] }
 0x192   :  { %v11112_v26 = vld [vmem:[#allocation5 + $0xa90] sm:$0xf]  ;;  %v10857_v36 = vor.u32 %v14956_v25, %v10856_v24  ;;  %3349 = vmatpush.bf16.msra.mxu2 %v11401_v23  ;;  %v10509_v23 = vor.u32 %v14864_v6, %v10506_v8  ;;  %v10765_v24 = vor.u32 %v14928_v10, %v10762_v11  ;;  %v14792_v25 = vld [vmem:[#allocation5 + $0x394] sm:$0xf] }
 0x193   :  { %v15020_v28 = vld [vmem:[#allocation5 + $0xaac] sm:$0xf0]  ;;  %v14768_v3 = vld [vmem:[#allocation5 + $0x2d4] sm:$0xf] }
 0x194   :  { %v11368_v29 = vld [vmem:[#allocation5 + $0xc90] sm:$0xf]  ;;  %v11113_v43 = vor.u32 %v15020_v28, %v11112_v26  ;;  %3324 = vmatpush.bf16.msra.mxu0 %v10857_v36  ;;  %v10218_v26 = vld [vmem:[#allocation5 + $0x3b0] sm:$0xf0]  ;;  %v11021_v28 = vor.u32 %v14992_v16, %v11018_v42 }
 0x195   :  { %v15084_v30 = vld [vmem:[#allocation5 + $0xcac] sm:$0xf0]  ;;  %3364 = vmatpush.bf16.msra.mxu3 %v9805_v63  ;;  %v10221_v33 = vor.u32 %v14792_v25, %v10218_v26  ;;  %v14784_v36 = vld [vmem:[#allocation5 + $0x354] sm:$0xf]  ;;  %v3146_v26 = vpop.f32.mrf.mxu2 }
 0x196   :  { %v11369_v44 = vor.u32 %v15084_v30, %v11368_v29  ;;  %v10824_v45 = vld [vmem:[#allocation5 + $0x850] sm:$0xf]  ;;  %3337 = vmatpush.bf16.msra.mxu1 %v11113_v43  ;;  %v10474_v29 = vld [vmem:[#allocation5 + $0x5b0] sm:$0xf0] }
 0x197   :  { %v14948_v46 = vld [vmem:[#allocation5 + $0x86c] sm:$0xf0]  ;;  %v14920_v30 = vld [vmem:[#allocation5 + $0x794] sm:$0xf]  ;;  %v10477_v35 = vor.u32 %v14856_v27, %v10474_v29 }
 0x198   :  { %v11080_v47 = vld [vmem:[#allocation5 + $0xa50] sm:$0xf]  ;;  %v10825_v55 = vor.u32 %v14948_v46, %v10824_v45  ;;  %3350 = vmatpush.bf16.msra.mxu2 %v11369_v44  ;;  %v10733_v15 = vor.u32 %v14920_v30, %v10730_v12  ;;  %v14848_v43 = vld [vmem:[#allocation5 + $0x554] sm:$0xf]  ;;  %v10989_v44 = vor.u32 %v14984_v31, %v10986_v32  ;;  %v3159_v12 = vpop.f32.mrf.mxu3 }
 0x199   :  { %v15012_v50 = vld [vmem:[#allocation5 + $0xa6c] sm:$0xf0]  ;;  %3365 = vmatpush.bf16.msra.mxu3 %v9773_v17  ;;  %v10442_v45 = vld [vmem:[#allocation5 + $0x570] sm:$0xf0] }
 0x19a   :  { %v11336_v51 = vld [vmem:[#allocation5 + $0xc50] sm:$0xf]  ;;  %v11081_v58 = vor.u32 %v15012_v50, %v11080_v47  ;;  %3325 = vmatpush.bf16.msra.mxu0 %v10825_v55  ;;  %v14912_v46 = vld [vmem:[#allocation5 + $0x754] sm:$0xf] }
 0x19b   :  { %v15076_v52 = vld [vmem:[#allocation5 + $0xc6c] sm:$0xf0]  ;;  %v10698_v47 = vld [vmem:[#allocation5 + $0x770] sm:$0xf0] }
 0x19c   :  { %v10792_v56 = vld [vmem:[#allocation5 + $0x810] sm:$0xf]  ;;  %v11337_v59 = vor.u32 %v15076_v52, %v11336_v51  ;;  %3338 = vmatpush.bf16.msra.mxu1 %v11081_v58  ;;  %v10954_v50 = vld [vmem:[#allocation5 + $0x970] sm:$0xf0]  ;;  %v10189_v51 = vor.u32 %v14784_v36, %v10186_v39  ;;  %3366 = vmatmul.bf16.vlgmr.msra.gmra.mxu3 %v16300_v19  ;;  %v10445_v52 = vor.u32 %v14848_v43, %v10442_v45 }
 0x19d   :  { %v14940_v57 = vld [vmem:[#allocation5 + $0x82c] sm:$0xf0]  ;;  %3410 = vmatpush.bf16.msrb.mxu3 %v11021_v28  ;;  %v10701_v53 = vor.u32 %v14912_v46, %v10698_v47  ;;  %v10154_v55 = vld [vmem:[#allocation5 + $0x330] sm:$0xf0]  ;;  %v3135_v46 = vpop.f32.mrf.mxu1 }
 0x19e   :  { %v11048_v60 = vld [vmem:[#allocation5 + $0xa10] sm:$0xf]  ;;  %v10793_v7 = vor.u32 %v14940_v57, %v10792_v56  ;;  %3351 = vmatpush.bf16.msra.mxu2 %v11337_v59  ;;  %v14840_v56 = vld [vmem:[#allocation5 + $0x514] sm:$0xf]  ;;  %v10957_v57 = vor.u32 %v14976_v49, %v10954_v50  ;;  %v10157_v63 = vor.u32 %v14776_v54, %v10154_v55  ;;  %v14725_v46 = vld [vmem:[#allocation5 + $0x174] sm:$0xf0] }
 0x19f   :  { %v15004_v61 = vld [vmem:[#allocation5 + $0xa2c] sm:$0xf0]  ;;  %v10410_v58 = vld [vmem:[#allocation5 + $0x530] sm:$0xf0] }
 0x1a0   :  { %v11304_v62 = vld [vmem:[#allocation5 + $0xc10] sm:$0xf]  ;;  %v11049_v13 = vor.u32 %v15004_v61, %v11048_v60  ;;  %3326 = vmatpush.bf16.msra.mxu0 %v10793_v7  ;;  %v14904_v59 = vld [vmem:[#allocation5 + $0x714] sm:$0xf]  ;;  %v10413_v1 = vor.u32 %v14840_v56, %v10410_v58 }
 0x1a1   :  { %v15068_v0 = vld [vmem:[#allocation5 + $0xc2c] sm:$0xf0]  ;;  %3411 = vmatpush.bf16.msrb.mxu3 %v10989_v44  ;;  %v10666_v60 = vld [vmem:[#allocation5 + $0x730] sm:$0xf0] }
 0x1a2   :  { %v11305_v14 = vor.u32 %v15068_v0, %v11304_v62  ;;  %3339 = vmatpush.bf16.msra.mxu1 %v11049_v13  ;;  %v14968_v61 = vld [vmem:[#allocation5 + $0x914] sm:$0xf]  ;;  %v3120_v0 = vpop.f32.mrf.mxu0  ;;  %v10669_v2 = vor.u32 %v14904_v59, %v10666_v60 }
 0x1a3   :  { %3327 = vmatmul.bf16.vlgmr.msra.gmra.mxu0 %v16318_v40  ;;  %v10922_v62 = vld [vmem:[#allocation5 + $0x930] sm:$0xf0]  ;;  %v3121_v6 = vadd.f32 %v3120_v0, %v16368_v48 }
 0x1a4   :  { %3352 = vmatpush.bf16.msra.mxu2 %v11305_v14  ;;  %3371 = vmatpush.bf16.msrb.mxu0 %v10253_v21  ;;  %v10122_v4 = vld [vmem:[#allocation5 + $0x2f0] sm:$0xf0]  ;;  %v10925_v7 = vor.u32 %v14968_v61, %v10922_v62  ;;  %v3148_v62 = vpop.f32.mrf.mxu2 }
 0x1a5   :  { %3340 = vmatmul.bf16.vlgmr.msra.gmra.mxu1 %v16320_v41  ;;  %v14832_v5 = vld [vmem:[#allocation5 + $0x4d4] sm:$0xf]  ;;  %3412 = vmatpush.bf16.msrb.mxu3 %v10957_v57  ;;  %v3134_v16 = vadd.f32 %v3133_v38, %v3121_v6  ;;  %v10125_v42 = vor.u32 %v14768_v3, %v10122_v4  ;;  %v3161_v3 = vpop.f32.mrf.mxu3  ;;  %v14781_v62 = vld [vmem:[#allocation5 + $0x334] sm:$0xf0] }
 0x1a6   :  { %3384 = vmatpush.bf16.msrb.mxu1 %v10509_v23  ;;  %v10378_v8 = vld [vmem:[#allocation5 + $0x4f0] sm:$0xf0] }
 0x1a7   :  { %3353 = vmatmul.bf16.vlgmr.msra.gmra.mxu2 %v16316_v37  ;;  %v14896_v10 = vld [vmem:[#allocation5 + $0x6d4] sm:$0xf]  ;;  %v10381_v17 = vor.u32 %v14832_v5, %v10378_v8  ;;  %v3147_v30 = vadd.f32 %v3146_v26, %v3134_v16  ;;  %v10000_v8 = vld [vmem:[#allocation5 + $0x1d8] sm:$0xf] }
 0x1a8   :  { %3397 = vmatpush.bf16.msrb.mxu2 %v10765_v24  ;;  %3372 = vmatpush.bf16.msrb.mxu0 %v10221_v33  ;;  %v10634_v11 = vld [vmem:[#allocation5 + $0x6f0] sm:$0xf0]  ;;  %v14805_v16 = vld [vmem:[#allocation5 + $0x3f4] sm:$0xf0] }
 0x1a9   :  { %v14960_v13 = vld [vmem:[#allocation5 + $0x8d4] sm:$0xf]  ;;  %v10637_v21 = vor.u32 %v14896_v10, %v10634_v11  ;;  %3413 = vmatpush.bf16.msrb.mxu3 %v10925_v7  ;;  %v14741_v10 = vld [vmem:[#allocation5 + $0x1f4] sm:$0xf0] }
 0x1aa   :  { %3385 = vmatpush.bf16.msrb.mxu1 %v10477_v35  ;;  %v10890_v14 = vld [vmem:[#allocation5 + $0x8f0] sm:$0xf0]  ;;  %v16375_v35 = vadd.f32 %v3159_v12, %v3147_v30  ;;  %v10224_v30 = vld [vmem:[#allocation5 + $0x398] sm:$0xf] }
 0x1ab   :  { %v14760_v23 = vld [vmem:[#allocation5 + $0x294] sm:$0xf]  ;;  %v10893_v48 = vor.u32 %v14960_v13, %v10890_v14  ;;  %v10256_v14 = vld [vmem:[#allocation5 + $0x3d8] sm:$0xf] }
 0x1ac   :  { %3398 = vmatpush.bf16.msrb.mxu2 %v10733_v15  ;;  %3373 = vmatpush.bf16.msrb.mxu0 %v10189_v51  ;;  %v10090_v24 = vld [vmem:[#allocation5 + $0x2b0] sm:$0xf0]  ;;  %v3122_v15 = vpop.f32.mrf.mxu0  ;;  %v14797_v12 = vld [vmem:[#allocation5 + $0x3b4] sm:$0xf0] }
 0x1ad   :  { %v14824_v25 = vld [vmem:[#allocation5 + $0x494] sm:$0xf]  ;;  %v10093_v33 = vor.u32 %v14760_v23, %v10090_v24  ;;  %3414 = vmatpush.bf16.msrb.mxu3 %v10893_v48  ;;  %v10001_v23 = vor.u32 %v14741_v10, %v10000_v8  ;;  %v10257_v48 = vor.u32 %v14805_v16, %v10256_v14  ;;  %v10128_v14 = vld [vmem:[#allocation5 + $0x2d8] sm:$0xf] }
 0x1ae   :  { %3386 = vmatpush.bf16.msrb.mxu1 %v10445_v52  ;;  %v10346_v27 = vld [vmem:[#allocation5 + $0x4b0] sm:$0xf0]  ;;  %v14773_v16 = vld [vmem:[#allocation5 + $0x2f4] sm:$0xf0] }
 0x1af   :  { %v14888_v28 = vld [vmem:[#allocation5 + $0x694] sm:$0xf]  ;;  %v10349_v36 = vor.u32 %v14824_v25, %v10346_v27 }
 0x1b0   :  { %3399 = vmatpush.bf16.msrb.mxu2 %v10701_v53  ;;  %3374 = vmatpush.bf16.msrb.mxu0 %v10157_v63  ;;  %v10602_v29 = vld [vmem:[#allocation5 + $0x6b0] sm:$0xf0] }
 0x1b1   :  { %v14952_v31 = vld [vmem:[#allocation5 + $0x894] sm:$0xf]  ;;  %v10605_v39 = vor.u32 %v14888_v28, %v10602_v29  ;;  %v9968_v28 = vld [vmem:[#allocation5 + $0x198] sm:$0xf] }
 0x1b2   :  { %3387 = vmatpush.bf16.msrb.mxu1 %v10413_v1  ;;  %v10858_v32 = vld [vmem:[#allocation5 + $0x8b0] sm:$0xf0]  ;;  %v14733_v29 = vld [vmem:[#allocation5 + $0x1b4] sm:$0xf0] }
 0x1b3   :  { %v14752_v43 = vld [vmem:[#allocation5 + $0x254] sm:$0xf]  ;;  %v10861_v47 = vor.u32 %v14952_v31, %v10858_v32 }
 0x1b4   :  { %3400 = vmatpush.bf16.msrb.mxu2 %v10669_v2  ;;  %3375 = vmatpush.bf16.msrb.mxu0 %v10125_v42  ;;  %v10058_v44 = vld [vmem:[#allocation5 + $0x270] sm:$0xf0] }
 0x1b5   :  { %v14816_v45 = vld [vmem:[#allocation5 + $0x454] sm:$0xf]  ;;  %v10061_v54 = vor.u32 %v14752_v43, %v10058_v44  ;;  %3415 = vmatpush.bf16.msrb.mxu3 %v10861_v47  ;;  %v10225_v43 = vor.u32 %v14797_v12, %v10224_v30  ;;  %v10192_v47 = vld [vmem:[#allocation5 + $0x358] sm:$0xf]  ;;  %v3211_v30 = vpop.f32.mrf.mxu3 }
 0x1b6   :  { %3388 = vmatpush.bf16.msrb.mxu1 %v10381_v17  ;;  %v10314_v49 = vld [vmem:[#allocation5 + $0x470] sm:$0xf0]  ;;  %v10096_v12 = vld [vmem:[#allocation5 + $0x298] sm:$0xf] }
 0x1b7   :  { %v14880_v50 = vld [vmem:[#allocation5 + $0x654] sm:$0xf]  ;;  %v10317_v57 = vor.u32 %v14816_v45, %v10314_v49  ;;  %v9936_v45 = vld [vmem:[#allocation5 + $0x158] sm:$0xf] }
 0x1b8   :  { %3401 = vmatpush.bf16.msrb.mxu2 %v10637_v21  ;;  %v10570_v51 = vld [vmem:[#allocation5 + $0x670] sm:$0xf0]  ;;  %3376 = vmatpush.bf16.msrb.mxu0 %v10093_v33  ;;  %v9969_v33 = vor.u32 %v14733_v29, %v9968_v28  ;;  %v14789_v49 = vld [vmem:[#allocation5 + $0x374] sm:$0xf0]  ;;  %v3198_v29 = vpop.f32.mrf.mxu2 }
 0x1b9   :  { %v14944_v52 = vld [vmem:[#allocation5 + $0x854] sm:$0xf]  ;;  %v10573_v58 = vor.u32 %v14880_v50, %v10570_v51  ;;  %v14701_v28 = vld [vmem:[#allocation5 + $0xb4] sm:$0xf0] }
 0x1ba   :  { %v10826_v53 = vld [vmem:[#allocation5 + $0x870] sm:$0xf0]  ;;  %3389 = vmatpush.bf16.msrb.mxu1 %v10349_v36 }
 0x1bb   :  { %v14744_v55 = vld [vmem:[#allocation5 + $0x214] sm:$0xf]  ;;  %v10829_v63 = vor.u32 %v14944_v52, %v10826_v53  ;;  %v9937_v52 = vor.u32 %v14725_v46, %v9936_v45 }
 0x1bc   :  { %v10026_v56 = vld [vmem:[#allocation5 + $0x230] sm:$0xf0]  ;;  %3402 = vmatpush.bf16.msrb.mxu2 %v10605_v39  ;;  %3377 = vmatpush.bf16.msrb.mxu0 %v10061_v54 }
 0x1bd   :  { %v14808_v59 = vld [vmem:[#allocation5 + $0x414] sm:$0xf]  ;;  %v10029_v38 = vor.u32 %v14744_v55, %v10026_v56  ;;  %3416 = vmatpush.bf16.msrb.mxu3 %v10829_v63  ;;  %v10193_v56 = vor.u32 %v14789_v49, %v10192_v47  ;;  %v16381_v63 = vld [vmem:[#allocation7] sm:$0xff] }
 0x1be   :  { %v10282_v60 = vld [vmem:[#allocation5 + $0x430] sm:$0xf0]  ;;  %3390 = vmatpush.bf16.msrb.mxu1 %v10317_v57 }
 0x1bf   :  { %v14872_v61 = vld [vmem:[#allocation5 + $0x614] sm:$0xf]  ;;  %v10285_v11 = vor.u32 %v14808_v59, %v10282_v60  ;;  %v14717_v59 = vld [vmem:[#allocation5 + $0x134] sm:$0xf0]  ;;  %v3172_v60 = vpop.f32.mrf.mxu0 }
 0x1c0   :  { %v10538_v0 = vld [vmem:[#allocation5 + $0x630] sm:$0xf0]  ;;  %3403 = vmatpush.bf16.msrb.mxu2 %v10573_v58  ;;  %3378 = vmatpush.bf16.msrb.mxu0 %v10029_v38  ;;  %v9904_v58 = vld [vmem:[#allocation5 + $0x118] sm:$0xf] }
 0x1c1   :  { %v14936_v1 = vld [vmem:[#allocation5 + $0x814] sm:$0xf]  ;;  %v10541_v13 = vor.u32 %v14872_v61, %v10538_v0  ;;  %v10160_v61 = vld [vmem:[#allocation5 + $0x318] sm:$0xf]  ;;  %v625_v0 = vperm.slane %v16381_v63, 3 }
 0x1c2   :  { %v10794_v2 = vld [vmem:[#allocation5 + $0x830] sm:$0xf0]  ;;  %3391 = vmatpush.bf16.msrb.mxu1 %v10285_v11  ;;  %v10161_v8 = vor.u32 %v14781_v62, %v10160_v61  ;;  %v9872_v11 = vld [vmem:[#allocation5 + $0xd8] sm:$0xf] }
 0x1c3   :  { %v15056_v4 = vld [vmem:[#allocation5 + $0xbd4] sm:$0xf]  ;;  %v10797_v42 = vor.u32 %v14936_v1, %v10794_v2  ;;  %3379 = vmatmul.bf16.vlgmr.msrb.gmra.mxu0 %v16304_v22  ;;  %v16385_v1 = vadd.f32 %v3172_v60, %v16375_v35  ;;  %v9776_v62 = vld [vmem:[#allocation5 + $0x18] sm:$0xf] }
 0x1c4   :  { %v11274_v5 = vld [vmem:[#allocation5 + $0xbf0] sm:$0xf0]  ;;  %3404 = vmatpush.bf16.msrb.mxu2 %v10541_v13  ;;  %v14709_v13 = vld [vmem:[#allocation5 + $0xf4] sm:$0xf0] }
 0x1c5   :  { %v15120_v6 = vld [vmem:[#allocation5 + $0xdd4] sm:$0xf]  ;;  %v11277_v17 = vor.u32 %v15056_v4, %v11274_v5  ;;  %3417 = vmatpush.bf16.msrb.mxu3 %v10797_v42  ;;  %3392 = vmatmul.bf16.vlgmr.msrb.gmra.mxu1 %v16298_v18  ;;  %v9905_v4 = vor.u32 %v14717_v59, %v9904_v58 }
 0x1c6   :  { %v11530_v7 = vld [vmem:[#allocation5 + $0xdf0] sm:$0xf0] }
 0x1c7   :  { %v11533_v21 = vor.u32 %v15120_v6, %v11530_v7  ;;  %v15048_v24 = vld [vmem:[#allocation5 + $0xb94] sm:$0xf]  ;;  %3423 = vmatpush.bf16.msra.mxu0 %v11277_v17  ;;  %3405 = vmatmul.bf16.vlgmr.msrb.gmra.mxu2 %v16302_v20  ;;  %v3185_v7 = vpop.f32.mrf.mxu1 }
 0x1c8   :  { %v11242_v25 = vld [vmem:[#allocation5 + $0xbb0] sm:$0xf0]  ;;  %3449 = vmatpush.bf16.msra.mxu2 %v10001_v23  ;;  %3418 = vmatmul.bf16.vlgmr.msrb.gmra.mxu3 %v16318_v40  ;;  %v3186_v42 = vadd.f32 %v3185_v7, %v625_v0  ;;  %v14869_v7 = vld [vmem:[#allocation5 + $0x5f4] sm:$0xf0] }
 0x1c9   :  { %v15112_v26 = vld [vmem:[#allocation5 + $0xd94] sm:$0xf]  ;;  %v11245_v31 = vor.u32 %v15048_v24, %v11242_v25  ;;  %3436 = vmatpush.bf16.msra.mxu1 %v11533_v21  ;;  %3462 = vmatpush.bf16.msra.mxu3 %v10257_v48  ;;  %v9873_v21 = vor.u32 %v14709_v13, %v9872_v11  ;;  %v14933_v11 = vld [vmem:[#allocation5 + $0x7f4] sm:$0xf0] }
 0x1ca   :  { %v11498_v27 = vld [vmem:[#allocation5 + $0xdb0] sm:$0xf0]  ;;  %v11024_v13 = vld [vmem:[#allocation5 + $0x9d8] sm:$0xf] }
 0x1cb   :  { %v11501_v32 = vor.u32 %v15112_v26, %v11498_v27  ;;  %v15040_v15 = vld [vmem:[#allocation5 + $0xb54] sm:$0xf]  ;;  %3424 = vmatpush.bf16.msra.mxu0 %v11245_v31  ;;  %v10129_v26 = vor.u32 %v14773_v16, %v10128_v14  ;;  %v9840_v27 = vld [vmem:[#allocation5 + $0x98] sm:$0xf] }
 0x1cc   :  { %v11210_v36 = vld [vmem:[#allocation5 + $0xb70] sm:$0xf0]  ;;  %3450 = vmatpush.bf16.msra.mxu2 %v9969_v33  ;;  %v14765_v31 = vld [vmem:[#allocation5 + $0x2b4] sm:$0xf0]  ;;  %v3174_v33 = vpop.f32.mrf.mxu0 }
 0x1cd   :  { %v15104_v39 = vld [vmem:[#allocation5 + $0xd54] sm:$0xf]  ;;  %v11213_v50 = vor.u32 %v15040_v15, %v11210_v36  ;;  %3437 = vmatpush.bf16.msra.mxu1 %v11501_v32  ;;  %3463 = vmatpush.bf16.msra.mxu3 %v10225_v43  ;;  %v3199_v32 = vadd.f32 %v3198_v29, %v3186_v42  ;;  %v10097_v49 = vor.u32 %v14765_v31, %v10096_v12  ;;  %v14997_v14 = vld [vmem:[#allocation5 + $0x9f4] sm:$0xf0] }
 0x1ce   :  { %v11466_v44 = vld [vmem:[#allocation5 + $0xd70] sm:$0xf0]  ;;  %v14925_v29 = vld [vmem:[#allocation5 + $0x7b4] sm:$0xf0] }
 0x1cf   :  { %v11469_v51 = vor.u32 %v15104_v39, %v11466_v44  ;;  %v15032_v53 = vld [vmem:[#allocation5 + $0xb14] sm:$0xf]  ;;  %3425 = vmatpush.bf16.msra.mxu0 %v11213_v50  ;;  %v9841_v39 = vor.u32 %v14701_v28, %v9840_v27  ;;  %v16387_v46 = vadd.f32 %v3211_v30, %v3199_v32  ;;  %v3187_v47 = vpop.f32.mrf.mxu1  ;;  %v10736_v27 = vld [vmem:[#allocation5 + $0x798] sm:$0xf] }
 0x1d0   :  { %v11178_v54 = vld [vmem:[#allocation5 + $0xb30] sm:$0xf0]  ;;  %3451 = vmatpush.bf16.msra.mxu2 %v9937_v52  ;;  %v14693_v52 = vld [vmem:[#allocation5 + $0x74] sm:$0xf0] }
 0x1d1   :  { %v15096_v55 = vld [vmem:[#allocation5 + $0xd14] sm:$0xf]  ;;  %v11181_v2 = vor.u32 %v15032_v53, %v11178_v54  ;;  %3438 = vmatpush.bf16.msra.mxu1 %v11469_v51  ;;  %3464 = vmatpush.bf16.msra.mxu3 %v10193_v56  ;;  %v9808_v51 = vld [vmem:[#allocation5 + $0x58] sm:$0xf] }
 0x1d2   :  { %v11434_v57 = vld [vmem:[#allocation5 + $0xd30] sm:$0xf0]  ;;  %v10064_v53 = vld [vmem:[#allocation5 + $0x258] sm:$0xf]  ;;  %v9809_v59 = vor.u32 %v14693_v52, %v9808_v51 }
 0x1d3   :  { %v11437_v3 = vor.u32 %v15096_v55, %v11434_v57  ;;  %v15024_v5 = vld [vmem:[#allocation5 + $0xad4] sm:$0xf]  ;;  %3426 = vmatpush.bf16.msra.mxu0 %v11181_v2  ;;  %v14757_v54 = vld [vmem:[#allocation5 + $0x274] sm:$0xf0] }
 0x1d4   :  { %v11146_v6 = vld [vmem:[#allocation5 + $0xaf0] sm:$0xf0]  ;;  %3452 = vmatpush.bf16.msra.mxu2 %v9905_v4  ;;  %v10065_v0 = vor.u32 %v14757_v54, %v10064_v53  ;;  %v14685_v2 = vld [vmem:[#allocation5 + $0x34] sm:$0xf0] }
 0x1d5   :  { %v15088_v38 = vld [vmem:[#allocation5 + $0xcd4] sm:$0xf]  ;;  %v11149_v35 = vor.u32 %v15024_v5, %v11146_v6  ;;  %3439 = vmatpush.bf16.msra.mxu1 %v11437_v3  ;;  %3465 = vmatpush.bf16.msra.mxu3 %v10161_v8  ;;  %v10032_v3 = vld [vmem:[#allocation5 + $0x218] sm:$0xf]  ;;  %v3200_v5 = vpop.f32.mrf.mxu2  ;;  %v3213_v6 = vpop.f32.mrf.mxu3  ;;  %v9777_v42 = vor.u32 %v14685_v2, %v9776_v62 }
 0x1d6   :  { %v11402_v10 = vld [vmem:[#allocation5 + $0xcf0] sm:$0xf0]  ;;  %v14749_v4 = vld [vmem:[#allocation5 + $0x234] sm:$0xf0] }
 0x1d7   :  { %v11405_v17 = vor.u32 %v15088_v38, %v11402_v10  ;;  %v15016_v23 = vld [vmem:[#allocation5 + $0xa94] sm:$0xf]  ;;  %3427 = vmatpush.bf16.msra.mxu0 %v11149_v35  ;;  %v10512_v38 = vld [vmem:[#allocation5 + $0x5d8] sm:$0xf] }
 0x1d8   :  { %v11114_v24 = vld [vmem:[#allocation5 + $0xab0] sm:$0xf0]  ;;  %3453 = vmatpush.bf16.msra.mxu2 %v9873_v21  ;;  %v10768_v8 = vld [vmem:[#allocation5 + $0x7d8] sm:$0xf]  ;;  %v10033_v21 = vor.u32 %v14749_v4, %v10032_v3  ;;  %v3224_v4 = vpop.f32.mrf.mxu0 }
 0x1d9   :  { %v15080_v25 = vld [vmem:[#allocation5 + $0xc94] sm:$0xf]  ;;  %v11117_v15 = vor.u32 %v15016_v23, %v11114_v24  ;;  %3440 = vmatpush.bf16.msra.mxu1 %v11405_v17  ;;  %3466 = vmatpush.bf16.msra.mxu3 %v10129_v26  ;;  %v11280_v35 = vld [vmem:[#allocation5 + $0xbd8] sm:$0xf]  ;;  %v10513_v23 = vor.u32 %v14869_v7, %v10512_v38  ;;  %v10769_v24 = vor.u32 %v14933_v11, %v10768_v8  ;;  %v3237_v11 = vpop.f32.mrf.mxu1 }
 0x1da   :  { %v11370_v48 = vld [vmem:[#allocation5 + $0xcb0] sm:$0xf0]  ;;  %v15061_v17 = vld [vmem:[#allocation5 + $0xbf4] sm:$0xf0] }
 0x1db   :  { %v11373_v36 = vor.u32 %v15080_v25, %v11370_v48  ;;  %v15008_v43 = vld [vmem:[#allocation5 + $0xa54] sm:$0xf]  ;;  %3428 = vmatpush.bf16.msra.mxu0 %v11117_v15  ;;  %v11025_v25 = vor.u32 %v14997_v14, %v11024_v13  ;;  %v10480_v26 = vld [vmem:[#allocation5 + $0x598] sm:$0xf]  ;;  %v11281_v28 = vor.u32 %v15061_v17, %v11280_v35  ;;  %v10737_v15 = vor.u32 %v14925_v29, %v10736_v27 }
 0x1dc   :  { %v11082_v44 = vld [vmem:[#allocation5 + $0xa70] sm:$0xf0]  ;;  %3454 = vmatpush.bf16.msra.mxu2 %v9841_v39  ;;  %v14861_v48 = vld [vmem:[#allocation5 + $0x5b4] sm:$0xf0] }
 0x1dd   :  { %v15072_v45 = vld [vmem:[#allocation5 + $0xc54] sm:$0xf]  ;;  %v11085_v55 = vor.u32 %v15008_v43, %v11082_v44  ;;  %3441 = vmatpush.bf16.msra.mxu1 %v11373_v36  ;;  %3467 = vmatpush.bf16.msra.mxu3 %v10097_v49  ;;  %v10992_v30 = vld [vmem:[#allocation5 + $0x998] sm:$0xf]  ;;  %v10481_v33 = vor.u32 %v14861_v48, %v10480_v26 }
 0x1de   :  { %v11338_v50 = vld [vmem:[#allocation5 + $0xc70] sm:$0xf0]  ;;  %v14989_v12 = vld [vmem:[#allocation5 + $0x9b4] sm:$0xf0] }
 0x1df   :  { %v15000_v56 = vld [vmem:[#allocation5 + $0xa14] sm:$0xf]  ;;  %v11341_v58 = vor.u32 %v15072_v45, %v11338_v50  ;;  %3429 = vmatpush.bf16.msra.mxu0 %v11085_v55  ;;  %v11248_v31 = vld [vmem:[#allocation5 + $0xb98] sm:$0xf]  ;;  %v10993_v36 = vor.u32 %v14989_v12, %v10992_v30 }
 0x1e0   :  { %v11050_v57 = vld [vmem:[#allocation5 + $0xa30] sm:$0xf0]  ;;  %3455 = vmatpush.bf16.msra.mxu2 %v9809_v59  ;;  %v15053_v32 = vld [vmem:[#allocation5 + $0xbb4] sm:$0xf0] }
 0x1e1   :  { %v15064_v60 = vld [vmem:[#allocation5 + $0xc14] sm:$0xf]  ;;  %v11053_v10 = vor.u32 %v15000_v56, %v11050_v57  ;;  %3442 = vmatpush.bf16.msra.mxu1 %v11341_v58  ;;  %3468 = vmatpush.bf16.msra.mxu3 %v10065_v0  ;;  %v10448_v39 = vld [vmem:[#allocation5 + $0x558] sm:$0xf]  ;;  %v11249_v45 = vor.u32 %v15053_v32, %v11248_v31  ;;  %v3263_v32 = vpop.f32.mrf.mxu3 }
 0x1e2   :  { %v11306_v61 = vld [vmem:[#allocation5 + $0xc30] sm:$0xf0]  ;;  %v14853_v43 = vld [vmem:[#allocation5 + $0x574] sm:$0xf0] }
 0x1e3   :  { %v11309_v16 = vor.u32 %v15064_v60, %v11306_v61  ;;  %3430 = vmatpush.bf16.msra.mxu0 %v11053_v10  ;;  %v10704_v44 = vld [vmem:[#allocation5 + $0x758] sm:$0xf]  ;;  %v10449_v53 = vor.u32 %v14853_v43, %v10448_v39  ;;  %v3225_v10 = vadd.f32 %v3224_v4, %v16387_v46  ;;  %v3226_v43 = vpop.f32.mrf.mxu0 }
 0x1e4   :  { %3456 = vmatpush.bf16.msra.mxu2 %v9777_v42  ;;  %v14917_v47 = vld [vmem:[#allocation5 + $0x774] sm:$0xf0] }
 0x1e5   :  { %3443 = vmatpush.bf16.msra.mxu1 %v11309_v16  ;;  %3469 = vmatpush.bf16.msra.mxu3 %v10033_v21  ;;  %v10960_v49 = vld [vmem:[#allocation5 + $0x958] sm:$0xf]  ;;  %v10705_v54 = vor.u32 %v14917_v47, %v10704_v44  ;;  %v3238_v21 = vadd.f32 %v3237_v11, %v3225_v10 }
 0x1e6   :  { %3431 = vmatmul.bf16.vlgmr.msra.gmra.mxu0 %v16320_v41  ;;  %v14981_v50 = vld [vmem:[#allocation5 + $0x974] sm:$0xf0] }
 0x1e7   :  { %3475 = vmatpush.bf16.msrb.mxu0 %v10513_v23  ;;  %v11216_v51 = vld [vmem:[#allocation5 + $0xb58] sm:$0xf]  ;;  %3457 = vmatmul.bf16.vlgmr.msra.gmra.mxu2 %v16300_v19  ;;  %v10961_v55 = vor.u32 %v14981_v50, %v10960_v49 }
 0x1e8   :  { %3501 = vmatpush.bf16.msrb.mxu2 %v11025_v25  ;;  %3444 = vmatmul.bf16.vlgmr.msra.gmra.mxu1 %v16316_v37  ;;  %v15045_v52 = vld [vmem:[#allocation5 + $0xb74] sm:$0xf0] }
 0x1e9   :  { %3488 = vmatpush.bf16.msrb.mxu1 %v10769_v24  ;;  %3514 = vmatpush.bf16.msrb.mxu3 %v11281_v28  ;;  %v10416_v56 = vld [vmem:[#allocation5 + $0x518] sm:$0xf]  ;;  %v11217_v59 = vor.u32 %v15045_v52, %v11216_v51  ;;  %v3250_v28 = vpop.f32.mrf.mxu2  ;;  %v3239_v51 = vpop.f32.mrf.mxu1 }
 0x1ea   :  { %3470 = vmatmul.bf16.vlgmr.msra.gmra.mxu3 %v16304_v22  ;;  %v14845_v57 = vld [vmem:[#allocation5 + $0x534] sm:$0xf0]  ;;  %v3251_v31 = vadd.f32 %v3250_v28, %v3238_v21  ;;  %v9938_v51 = vld [vmem:[#allocation5 + $0x178] sm:$0xf0] }
 0x1eb   :  { %3476 = vmatpush.bf16.msrb.mxu0 %v10481_v33  ;;  %v10672_v58 = vld [vmem:[#allocation5 + $0x718] sm:$0xf]  ;;  %v10417_v3 = vor.u32 %v14845_v57, %v10416_v56 }
 0x1ec   :  { %3502 = vmatpush.bf16.msrb.mxu2 %v10993_v36  ;;  %v14909_v60 = vld [vmem:[#allocation5 + $0x734] sm:$0xf0]  ;;  %v16394_v39 = vadd.f32 %v3263_v32, %v3251_v31  ;;  %v14793_v31 = vld [vmem:[#allocation5 + $0x39c] sm:$0xf] }
 0x1ed   :  { %3489 = vmatpush.bf16.msrb.mxu1 %v10737_v15  ;;  %3515 = vmatpush.bf16.msrb.mxu3 %v11249_v45  ;;  %v10928_v61 = vld [vmem:[#allocation5 + $0x918] sm:$0xf]  ;;  %v10673_v5 = vor.u32 %v14909_v60, %v10672_v58  ;;  %v10226_v32 = vld [vmem:[#allocation5 + $0x3b8] sm:$0xf0] }
 0x1ee   :  { %v14973_v62 = vld [vmem:[#allocation5 + $0x934] sm:$0xf0] }
 0x1ef   :  { %v11184_v0 = vld [vmem:[#allocation5 + $0xb18] sm:$0xf]  ;;  %3477 = vmatpush.bf16.msrb.mxu0 %v10449_v53  ;;  %v10929_v6 = vor.u32 %v14973_v62, %v10928_v61 }
 0x1f0   :  { %v15037_v2 = vld [vmem:[#allocation5 + $0xb34] sm:$0xf0]  ;;  %3503 = vmatpush.bf16.msrb.mxu2 %v10961_v55 }
 0x1f1   :  { %3490 = vmatpush.bf16.msrb.mxu1 %v10705_v54  ;;  %v10384_v38 = vld [vmem:[#allocation5 + $0x4d8] sm:$0xf]  ;;  %3516 = vmatpush.bf16.msrb.mxu3 %v11217_v59  ;;  %v11185_v13 = vor.u32 %v15037_v2, %v11184_v0  ;;  %v3252_v4 = vpop.f32.mrf.mxu2 }
 0x1f2   :  { %v14837_v7 = vld [vmem:[#allocation5 + $0x4f4] sm:$0xf0]  ;;  %v10162_v4 = vld [vmem:[#allocation5 + $0x338] sm:$0xf0] }
 0x1f3   :  { %v10640_v8 = vld [vmem:[#allocation5 + $0x6d8] sm:$0xf]  ;;  %3478 = vmatpush.bf16.msrb.mxu0 %v10417_v3  ;;  %v10385_v23 = vor.u32 %v14837_v7, %v10384_v38 }
 0x1f4   :  { %v14901_v14 = vld [vmem:[#allocation5 + $0x6f4] sm:$0xf0]  ;;  %3504 = vmatpush.bf16.msrb.mxu2 %v10929_v6 }
 0x1f5   :  { %v10896_v16 = vld [vmem:[#allocation5 + $0x8d8] sm:$0xf]  ;;  %3491 = vmatpush.bf16.msrb.mxu1 %v10673_v5  ;;  %v10641_v24 = vor.u32 %v14901_v14, %v10640_v8  ;;  %3517 = vmatpush.bf16.msrb.mxu3 %v11185_v13  ;;  %v3265_v8 = vpop.f32.mrf.mxu3  ;;  %v14737_v13 = vld [vmem:[#allocation5 + $0x1dc] sm:$0xf] }
 0x1f6   :  { %v14965_v42 = vld [vmem:[#allocation5 + $0x8f4] sm:$0xf0] }
 0x1f7   :  { %v11152_v35 = vld [vmem:[#allocation5 + $0xad8] sm:$0xf]  ;;  %v10897_v25 = vor.u32 %v14965_v42, %v10896_v16  ;;  %3479 = vmatpush.bf16.msrb.mxu0 %v10385_v23  ;;  %v10002_v16 = vld [vmem:[#allocation5 + $0x1f8] sm:$0xf0] }
 0x1f8   :  { %v15029_v17 = vld [vmem:[#allocation5 + $0xaf4] sm:$0xf0]  ;;  %v14801_v42 = vld [vmem:[#allocation5 + $0x3dc] sm:$0xf] }
 0x1f9   :  { %v10352_v26 = vld [vmem:[#allocation5 + $0x498] sm:$0xf]  ;;  %v11153_v46 = vor.u32 %v15029_v17, %v11152_v35  ;;  %3492 = vmatpush.bf16.msrb.mxu1 %v10641_v24  ;;  %3505 = vmatpush.bf16.msrb.mxu2 %v10897_v25  ;;  %v10258_v35 = vld [vmem:[#allocation5 + $0x3f8] sm:$0xf0] }
 0x1fa   :  { %v14829_v48 = vld [vmem:[#allocation5 + $0x4b4] sm:$0xf0]  ;;  %v14865_v23 = vld [vmem:[#allocation5 + $0x5dc] sm:$0xf] }
 0x1fb   :  { %v10608_v27 = vld [vmem:[#allocation5 + $0x698] sm:$0xf]  ;;  %v10353_v36 = vor.u32 %v14829_v48, %v10352_v26  ;;  %3518 = vmatpush.bf16.msrb.mxu3 %v11153_v46  ;;  %v10514_v24 = vld [vmem:[#allocation5 + $0x5f8] sm:$0xf0]  ;;  %v10005_v48 = vor.u32 %v14737_v13, %v10002_v16 }
 0x1fc   :  { %v14893_v29 = vld [vmem:[#allocation5 + $0x6b4] sm:$0xf0] }
 0x1fd   :  { %v10864_v30 = vld [vmem:[#allocation5 + $0x898] sm:$0xf]  ;;  %v10609_v44 = vor.u32 %v14893_v29, %v10608_v27  ;;  %3480 = vmatpush.bf16.msrb.mxu0 %v10353_v36  ;;  %v10261_v27 = vor.u32 %v14801_v42, %v10258_v35  ;;  %v14729_v29 = vld [vmem:[#allocation5 + $0x19c] sm:$0xf]  ;;  %v3289_v42 = vpop.f32.mrf.mxu1 }
 0x1fe   :  { %v14957_v12 = vld [vmem:[#allocation5 + $0x8b4] sm:$0xf0]  ;;  %v9874_v35 = vld [vmem:[#allocation5 + $0xf8] sm:$0xf0] }
 0x1ff   :  { %v11120_v33 = vld [vmem:[#allocation5 + $0xa98] sm:$0xf]  ;;  %v10865_v45 = vor.u32 %v14957_v12, %v10864_v30  ;;  %3493 = vmatpush.bf16.msrb.mxu1 %v10609_v44  ;;  %v10517_v30 = vor.u32 %v14865_v23, %v10514_v24  ;;  %v9970_v12 = vld [vmem:[#allocation5 + $0x1b8] sm:$0xf0]  ;;  %v10229_v44 = vor.u32 %v14793_v31, %v10226_v32 }
 0x200   :  { %v15021_v15 = vld [vmem:[#allocation5 + $0xab4] sm:$0xf0]  ;;  %v9973_v43 = vor.u32 %v14729_v29, %v9970_v12  ;;  %v14833_v23 = vld [vmem:[#allocation5 + $0x4dc] sm:$0xf] }
 0x201   :  { %v10320_v47 = vld [vmem:[#allocation5 + $0x458] sm:$0xf]  ;;  %v11121_v52 = vor.u32 %v15021_v15, %v11120_v33  ;;  %3506 = vmatpush.bf16.msrb.mxu2 %v10865_v45  ;;  %v14857_v33 = vld [vmem:[#allocation5 + $0x59c] sm:$0xf] }
 0x202   :  { %v14821_v49 = vld [vmem:[#allocation5 + $0x474] sm:$0xf0]  ;;  %v10482_v15 = vld [vmem:[#allocation5 + $0x5b8] sm:$0xf0] }
 0x203   :  { %v10576_v50 = vld [vmem:[#allocation5 + $0x658] sm:$0xf]  ;;  %v10321_v58 = vor.u32 %v14821_v49, %v10320_v47  ;;  %3519 = vmatpush.bf16.msrb.mxu3 %v11121_v52  ;;  %v14721_v49 = vld [vmem:[#allocation5 + $0x15c] sm:$0xf] }
 0x204   :  { %v14885_v53 = vld [vmem:[#allocation5 + $0x674] sm:$0xf0]  ;;  %v14785_v52 = vld [vmem:[#allocation5 + $0x35c] sm:$0xf] }
 0x205   :  { %v10832_v54 = vld [vmem:[#allocation5 + $0x858] sm:$0xf]  ;;  %v10577_v61 = vor.u32 %v14885_v53, %v10576_v50  ;;  %3481 = vmatpush.bf16.msrb.mxu0 %v10321_v58  ;;  %v10485_v50 = vor.u32 %v14857_v33, %v10482_v15  ;;  %v10194_v53 = vld [vmem:[#allocation5 + $0x378] sm:$0xf0]  ;;  %v9941_v58 = vor.u32 %v14721_v49, %v9938_v51 }
 0x206   :  { %v14949_v55 = vld [vmem:[#allocation5 + $0x874] sm:$0xf0]  ;;  %v10386_v24 = vld [vmem:[#allocation5 + $0x4f8] sm:$0xf0] }
 0x207   :  { %v11088_v56 = vld [vmem:[#allocation5 + $0xa58] sm:$0xf]  ;;  %v10833_v62 = vor.u32 %v14949_v55, %v10832_v54  ;;  %3494 = vmatpush.bf16.msrb.mxu1 %v10577_v61  ;;  %v14849_v54 = vld [vmem:[#allocation5 + $0x55c] sm:$0xf]  ;;  %v10389_v12 = vor.u32 %v14833_v23, %v10386_v24 }
 0x208   :  { %v15013_v57 = vld [vmem:[#allocation5 + $0xa74] sm:$0xf0]  ;;  %v10450_v55 = vld [vmem:[#allocation5 + $0x578] sm:$0xf0] }
 0x209   :  { %v10288_v59 = vld [vmem:[#allocation5 + $0x418] sm:$0xf]  ;;  %v11089_v5 = vor.u32 %v15013_v57, %v11088_v56  ;;  %3507 = vmatpush.bf16.msrb.mxu2 %v10833_v62  ;;  %v14713_v61 = vld [vmem:[#allocation5 + $0x11c] sm:$0xf]  ;;  %v626_v62 = vperm.slane %v16381_v63, 4 }
 0x20a   :  { %v14813_v60 = vld [vmem:[#allocation5 + $0x434] sm:$0xf0]  ;;  %v14697_v29 = vld [vmem:[#allocation5 + $0x9c] sm:$0xf] }
 0x20b   :  { %v10544_v0 = vld [vmem:[#allocation5 + $0x618] sm:$0xf]  ;;  %v10289_v14 = vor.u32 %v14813_v60, %v10288_v59  ;;  %3520 = vmatpush.bf16.msrb.mxu3 %v11089_v5  ;;  %v10197_v59 = vor.u32 %v14785_v52, %v10194_v53  ;;  %v14841_v5 = vld [vmem:[#allocation5 + $0x51c] sm:$0xf] }
 0x20c   :  { %v14877_v2 = vld [vmem:[#allocation5 + $0x634] sm:$0xf0]  ;;  %v9842_v31 = vld [vmem:[#allocation5 + $0xb8] sm:$0xf0] }
 0x20d   :  { %v10800_v3 = vld [vmem:[#allocation5 + $0x818] sm:$0xf]  ;;  %v10545_v17 = vor.u32 %v14877_v2, %v10544_v0  ;;  %3482 = vmatpush.bf16.msrb.mxu0 %v10289_v14  ;;  %v10453_v0 = vor.u32 %v14849_v54, %v10450_v55  ;;  %v9906_v2 = vld [vmem:[#allocation5 + $0x138] sm:$0xf0]  ;;  %v3291_v55 = vpop.f32.mrf.mxu1 }
 0x20e   :  { %v14941_v6 = vld [vmem:[#allocation5 + $0x834] sm:$0xf0]  ;;  %v9909_v8 = vor.u32 %v14713_v61, %v9906_v2  ;;  %v14705_v14 = vld [vmem:[#allocation5 + $0xdc] sm:$0xf] }
 0x20f   :  { %v11056_v38 = vld [vmem:[#allocation5 + $0xa18] sm:$0xf]  ;;  %v10801_v21 = vor.u32 %v14941_v6, %v10800_v3  ;;  %3495 = vmatpush.bf16.msrb.mxu1 %v10545_v17  ;;  %v14777_v3 = vld [vmem:[#allocation5 + $0x31c] sm:$0xf] }
 0x210   :  { %v15005_v7 = vld [vmem:[#allocation5 + $0xa34] sm:$0xf0]  ;;  %3483 = vmatmul.bf16.vlgmr.msrb.gmra.mxu0 %v16298_v18  ;;  %v10418_v6 = vld [vmem:[#allocation5 + $0x538] sm:$0xf0] }
 0x211   :  { %v11536_v10 = vld [vmem:[#allocation5 + $0xdd8] sm:$0xf]  ;;  %v11057_v25 = vor.u32 %v15005_v7, %v11056_v38  ;;  %3508 = vmatpush.bf16.msrb.mxu2 %v10801_v21  ;;  %v3276_v7 = vpop.f32.mrf.mxu0  ;;  %v10421_v63 = vor.u32 %v14841_v5, %v10418_v6  ;;  %v14769_v17 = vld [vmem:[#allocation5 + $0x2dc] sm:$0xf] }
 0x212   :  { %v15125_v11 = vld [vmem:[#allocation5 + $0xdf4] sm:$0xf0]  ;;  %3496 = vmatmul.bf16.vlgmr.msrb.gmra.mxu1 %v16302_v20  ;;  %v3277_v16 = vadd.f32 %v3276_v7, %v626_v62  ;;  %v10130_v21 = vld [vmem:[#allocation5 + $0x2f8] sm:$0xf0] }
 0x213   :  { %v11537_v26 = vor.u32 %v15125_v11, %v11536_v10  ;;  %v11504_v28 = vld [vmem:[#allocation5 + $0xd98] sm:$0xf]  ;;  %3521 = vmatpush.bf16.msrb.mxu3 %v11057_v25  ;;  %3540 = vmatpush.bf16.msra.mxu1 %v10005_v48  ;;  %v10165_v10 = vor.u32 %v14777_v3, %v10162_v4  ;;  %v9877_v48 = vor.u32 %v14705_v14, %v9874_v35  ;;  %v14761_v32 = vld [vmem:[#allocation5 + $0x29c] sm:$0xf] }
 0x214   :  { %v15117_v46 = vld [vmem:[#allocation5 + $0xdb4] sm:$0xf0]  ;;  %3509 = vmatmul.bf16.vlgmr.msrb.gmra.mxu2 %v16318_v40  ;;  %v3290_v25 = vadd.f32 %v3289_v42, %v3277_v16  ;;  %v10098_v33 = vld [vmem:[#allocation5 + $0x2b8] sm:$0xf0] }
 0x215   :  { %3527 = vmatpush.bf16.msra.mxu0 %v11537_v26  ;;  %v11505_v36 = vor.u32 %v15117_v46, %v11504_v28  ;;  %3553 = vmatpush.bf16.msra.mxu2 %v10261_v27  ;;  %v11472_v45 = vld [vmem:[#allocation5 + $0xd58] sm:$0xf]  ;;  %v10133_v27 = vor.u32 %v14769_v17, %v10130_v21  ;;  %v10101_v51 = vor.u32 %v14761_v32, %v10098_v33  ;;  %v14689_v54 = vld [vmem:[#allocation5 + $0x5c] sm:$0xf] }
 0x216   :  { %v15109_v47 = vld [vmem:[#allocation5 + $0xd74] sm:$0xf0]  ;;  %3522 = vmatmul.bf16.vlgmr.msrb.gmra.mxu3 %v16320_v41  ;;  %v10322_v61 = vld [vmem:[#allocation5 + $0x478] sm:$0xf0] }
 0x217   :  { %3566 = vmatpush.bf16.msra.mxu3 %v10517_v30  ;;  %v11473_v56 = vor.u32 %v15109_v47, %v11472_v45  ;;  %v11440_v57 = vld [vmem:[#allocation5 + $0xd18] sm:$0xf]  ;;  %3541 = vmatpush.bf16.msra.mxu1 %v9973_v43  ;;  %v3302_v30 = vpop.f32.mrf.mxu2  ;;  %v14825_v43 = vld [vmem:[#allocation5 + $0x49c] sm:$0xf] }
 0x218   :  { %v15101_v60 = vld [vmem:[#allocation5 + $0xd34] sm:$0xf0]  ;;  %v3303_v15 = vadd.f32 %v3302_v30, %v3290_v25  ;;  %v14681_v5 = vld [vmem:[#allocation5 + $0x1c] sm:$0xf] }
 0x219   :  { %3528 = vmatpush.bf16.msra.mxu0 %v11505_v36  ;;  %3554 = vmatpush.bf16.msra.mxu2 %v10229_v44  ;;  %v11441_v38 = vor.u32 %v15101_v60, %v11440_v57  ;;  %v11408_v11 = vld [vmem:[#allocation5 + $0xcd8] sm:$0xf]  ;;  %v3315_v36 = vpop.f32.mrf.mxu3  ;;  %v10354_v44 = vld [vmem:[#allocation5 + $0x4b8] sm:$0xf0]  ;;  %v3278_v49 = vpop.f32.mrf.mxu0 }
 0x21a   :  { %v15093_v13 = vld [vmem:[#allocation5 + $0xcf4] sm:$0xf0]  ;;  %v16401_v47 = vadd.f32 %v3315_v36, %v3303_v15  ;;  %v9810_v57 = vld [vmem:[#allocation5 + $0x78] sm:$0xf0] }
 0x21b   :  { %3567 = vmatpush.bf16.msra.mxu3 %v10485_v50  ;;  %3542 = vmatpush.bf16.msra.mxu1 %v9941_v58  ;;  %v11409_v26 = vor.u32 %v15093_v13, %v11408_v11  ;;  %v11376_v28 = vld [vmem:[#allocation5 + $0xc98] sm:$0xf]  ;;  %v9845_v50 = vor.u32 %v14697_v29, %v9842_v31  ;;  %v14753_v58 = vld [vmem:[#allocation5 + $0x25c] sm:$0xf]  ;;  %v9813_v3 = vor.u32 %v14689_v54, %v9810_v57 }
 0x21c   :  { %v15085_v46 = vld [vmem:[#allocation5 + $0xcb4] sm:$0xf0]  ;;  %v14817_v60 = vld [vmem:[#allocation5 + $0x45c] sm:$0xf] }
 0x21d   :  { %3529 = vmatpush.bf16.msra.mxu0 %v11473_v56  ;;  %3555 = vmatpush.bf16.msra.mxu2 %v10197_v59  ;;  %v11377_v45 = vor.u32 %v15085_v46, %v11376_v28  ;;  %v11344_v52 = vld [vmem:[#allocation5 + $0xc58] sm:$0xf]  ;;  %v10357_v56 = vor.u32 %v14825_v43, %v10354_v44  ;;  %v10066_v59 = vld [vmem:[#allocation5 + $0x278] sm:$0xf0] }
 0x21e   :  { %v15077_v53 = vld [vmem:[#allocation5 + $0xc74] sm:$0xf0]  ;;  %v10069_v4 = vor.u32 %v14753_v58, %v10066_v59  ;;  %v9778_v6 = vld [vmem:[#allocation5 + $0x38] sm:$0xf0] }
 0x21f   :  { %3568 = vmatpush.bf16.msra.mxu3 %v10453_v0  ;;  %3543 = vmatpush.bf16.msra.mxu1 %v9909_v8  ;;  %v11345_v62 = vor.u32 %v15077_v53, %v11344_v52  ;;  %v11312_v0 = vld [vmem:[#allocation5 + $0xc18] sm:$0xf]  ;;  %v3304_v7 = vpop.f32.mrf.mxu2  ;;  %v10325_v8 = vor.u32 %v14817_v60, %v10322_v61  ;;  %v14809_v11 = vld [vmem:[#allocation5 + $0x41c] sm:$0xf]  ;;  %v9781_v24 = vor.u32 %v14681_v5, %v9778_v6 }
 0x220   :  { %v15069_v2 = vld [vmem:[#allocation5 + $0xc34] sm:$0xf0]  ;;  %v10290_v13 = vld [vmem:[#allocation5 + $0x438] sm:$0xf0] }
 0x221   :  { %3530 = vmatpush.bf16.msra.mxu0 %v11441_v38  ;;  %3556 = vmatpush.bf16.msra.mxu2 %v10165_v10  ;;  %v14745_v38 = vld [vmem:[#allocation5 + $0x21c] sm:$0xf]  ;;  %v3317_v14 = vpop.f32.mrf.mxu3  ;;  %v11313_v35 = vor.u32 %v15069_v2, %v11312_v0 }
 0x222   :  { %v10034_v10 = vld [vmem:[#allocation5 + $0x238] sm:$0xf0] }
 0x223   :  { %3569 = vmatpush.bf16.msra.mxu3 %v10421_v63  ;;  %3544 = vmatpush.bf16.msra.mxu1 %v9877_v48  ;;  %v14929_v16 = vld [vmem:[#allocation5 + $0x7dc] sm:$0xf]  ;;  %v10037_v25 = vor.u32 %v14745_v38, %v10034_v10  ;;  %v3341_v10 = vpop.f32.mrf.mxu1 }
 0x224   :  { %v10770_v42 = vld [vmem:[#allocation5 + $0x7f8] sm:$0xf0] }
 0x225   :  { %3531 = vmatpush.bf16.msra.mxu0 %v11409_v26  ;;  %3557 = vmatpush.bf16.msra.mxu2 %v10133_v27  ;;  %v14993_v63 = vld [vmem:[#allocation5 + $0x9dc] sm:$0xf]  ;;  %v10293_v27 = vor.u32 %v14809_v11, %v10290_v13  ;;  %v10773_v28 = vor.u32 %v14929_v16, %v10770_v42 }
 0x226   :  { %v11026_v17 = vld [vmem:[#allocation5 + $0x9f8] sm:$0xf0] }
 0x227   :  { %3570 = vmatpush.bf16.msra.mxu3 %v10389_v12  ;;  %3545 = vmatpush.bf16.msra.mxu1 %v9845_v50  ;;  %v15057_v21 = vld [vmem:[#allocation5 + $0xbdc] sm:$0xf]  ;;  %v11029_v46 = vor.u32 %v14993_v63, %v11026_v17 }
 0x228   :  { %v11282_v23 = vld [vmem:[#allocation5 + $0xbf8] sm:$0xf0] }
 0x229   :  { %3532 = vmatpush.bf16.msra.mxu0 %v11377_v45  ;;  %3558 = vmatpush.bf16.msra.mxu2 %v10101_v51  ;;  %v15121_v26 = vld [vmem:[#allocation5 + $0xddc] sm:$0xf]  ;;  %v11285_v29 = vor.u32 %v15057_v21, %v11282_v23 }
 0x22a   :  { %v11538_v48 = vld [vmem:[#allocation5 + $0xdf8] sm:$0xf0] }
 0x22b   :  { %3571 = vmatpush.bf16.msra.mxu3 %v10357_v56  ;;  %3546 = vmatpush.bf16.msra.mxu1 %v9813_v3  ;;  %v14921_v30 = vld [vmem:[#allocation5 + $0x79c] sm:$0xf]  ;;  %v11541_v32 = vor.u32 %v15121_v26, %v11538_v48 }
 0x22c   :  { %v10738_v12 = vld [vmem:[#allocation5 + $0x7b8] sm:$0xf0] }
 0x22d   :  { %3533 = vmatpush.bf16.msra.mxu0 %v11345_v62  ;;  %3559 = vmatpush.bf16.msra.mxu2 %v10069_v4  ;;  %v14985_v31 = vld [vmem:[#allocation5 + $0x99c] sm:$0xf]  ;;  %v10741_v45 = vor.u32 %v14921_v30, %v10738_v12  ;;  %v3354_v30 = vpop.f32.mrf.mxu2 }
 0x22e   :  { %v10994_v33 = vld [vmem:[#allocation5 + $0x9b8] sm:$0xf0] }
 0x22f   :  { %3572 = vmatpush.bf16.msra.mxu3 %v10325_v8  ;;  %v15049_v15 = vld [vmem:[#allocation5 + $0xb9c] sm:$0xf]  ;;  %3547 = vmatpush.bf16.msra.mxu1 %v9781_v24  ;;  %v10997_v49 = vor.u32 %v14985_v31, %v10994_v33  ;;  %v3328_v8 = vpop.f32.mrf.mxu0 }
 0x230   :  { %v11250_v36 = vld [vmem:[#allocation5 + $0xbb8] sm:$0xf0]  ;;  %v3329_v42 = vadd.f32 %v3328_v8, %v16401_v47 }
 0x231   :  { %3534 = vmatpush.bf16.msra.mxu0 %v11313_v35  ;;  %3560 = vmatpush.bf16.msra.mxu2 %v10037_v25  ;;  %v15113_v43 = vld [vmem:[#allocation5 + $0xd9c] sm:$0xf]  ;;  %v11253_v50 = vor.u32 %v15049_v15, %v11250_v36 }
 0x232   :  { %v11506_v44 = vld [vmem:[#allocation5 + $0xdb8] sm:$0xf0]  ;;  %3548 = vmatmul.bf16.vlgmr.msra.gmra.mxu1 %v16300_v19  ;;  %v3342_v25 = vadd.f32 %v3341_v10, %v3329_v42  ;;  %v11768_v10 = vld [vmem:[#allocation8 + $0x1c0] sm:$0xf] }
 0x233   :  { %3573 = vmatpush.bf16.msra.mxu3 %v10293_v27  ;;  %3592 = vmatpush.bf16.msrb.mxu1 %v11029_v46  ;;  %v14913_v51 = vld [vmem:[#allocation5 + $0x75c] sm:$0xf]  ;;  %v11509_v54 = vor.u32 %v15113_v43, %v11506_v44  ;;  %v16410_v43 = vpop.f32.mrf.mxu3  ;;  %v12280_v42 = vld [vmem:[#allocation8 + $0x5c0] sm:$0xf] }
 0x234   :  { %v10706_v52 = vld [vmem:[#allocation5 + $0x778] sm:$0xf0]  ;;  %3535 = vmatmul.bf16.vlgmr.msra.gmra.mxu0 %v16316_v37  ;;  %3561 = vmatmul.bf16.vlgmr.msra.gmra.mxu2 %v16304_v22  ;;  %v16408_v33 = vadd.f32 %v3354_v30, %v3342_v25  ;;  %v15242_v30 = vld [vmem:[#allocation8 + $0x39c] sm:$0xf0] }
 0x235   :  { %3579 = vmatpush.bf16.msrb.mxu0 %v10773_v28  ;;  %3605 = vmatpush.bf16.msrb.mxu2 %v11285_v29  ;;  %v14977_v53 = vld [vmem:[#allocation5 + $0x95c] sm:$0xf]  ;;  %v10709_v60 = vor.u32 %v14913_v51, %v10706_v52 }
 0x236   :  { %v10962_v55 = vld [vmem:[#allocation5 + $0x978] sm:$0xf0]  ;;  %3574 = vmatmul.bf16.vlgmr.msra.gmra.mxu3 %v16298_v18 }
 0x237   :  { %3618 = vmatpush.bf16.msrb.mxu3 %v11541_v32  ;;  %v15041_v56 = vld [vmem:[#allocation5 + $0xb5c] sm:$0xf]  ;;  %3593 = vmatpush.bf16.msrb.mxu1 %v10997_v49  ;;  %v10965_v61 = vor.u32 %v14977_v53, %v10962_v55  ;;  %v3343_v49 = vpop.f32.mrf.mxu1 }
 0x238   :  { %v11218_v57 = vld [vmem:[#allocation5 + $0xb78] sm:$0xf0]  ;;  %v15170_v49 = vld [vmem:[#allocation8 + $0x15c] sm:$0xf0] }
 0x239   :  { %v15105_v58 = vld [vmem:[#allocation5 + $0xd5c] sm:$0xf]  ;;  %3580 = vmatpush.bf16.msrb.mxu0 %v10741_v45  ;;  %3606 = vmatpush.bf16.msrb.mxu2 %v11253_v50  ;;  %v11221_v62 = vor.u32 %v15041_v56, %v11218_v57  ;;  %v3330_v45 = vpop.f32.mrf.mxu0 }
 0x23a   :  { %v11474_v59 = vld [vmem:[#allocation5 + $0xd78] sm:$0xf0]  ;;  %v11704_v45 = vld [vmem:[#allocation8 + $0x140] sm:$0xf] }
 0x23b   :  { %v14905_v0 = vld [vmem:[#allocation5 + $0x71c] sm:$0xf]  ;;  %3619 = vmatpush.bf16.msrb.mxu3 %v11509_v54  ;;  %v11477_v4 = vor.u32 %v15105_v58, %v11474_v59  ;;  %3594 = vmatpush.bf16.msrb.mxu1 %v10965_v61 }
 0x23c   :  { %v10674_v2 = vld [vmem:[#allocation5 + $0x738] sm:$0xf0] }
 0x23d   :  { %v14969_v3 = vld [vmem:[#allocation5 + $0x91c] sm:$0xf]  ;;  %3581 = vmatpush.bf16.msrb.mxu0 %v10709_v60  ;;  %v10677_v18 = vor.u32 %v14905_v0, %v10674_v2  ;;  %3607 = vmatpush.bf16.msrb.mxu2 %v11221_v62 }
 0x23e   :  { %v10930_v5 = vld [vmem:[#allocation5 + $0x938] sm:$0xf0] }
 0x23f   :  { %v15033_v6 = vld [vmem:[#allocation5 + $0xb1c] sm:$0xf]  ;;  %v10933_v19 = vor.u32 %v14969_v3, %v10930_v5  ;;  %3620 = vmatpush.bf16.msrb.mxu3 %v11477_v4 }
 0x240   :  { %v11186_v22 = vld [vmem:[#allocation5 + $0xb38] sm:$0xf0] }
 0x241   :  { %v15097_v38 = vld [vmem:[#allocation5 + $0xd1c] sm:$0xf]  ;;  %v11189_v11 = vor.u32 %v15033_v6, %v11186_v22  ;;  %3582 = vmatpush.bf16.msrb.mxu0 %v10677_v18  ;;  %3595 = vmatpush.bf16.msrb.mxu1 %v10933_v19  ;;  %v3356_v22 = vpop.f32.mrf.mxu2  ;;  %v15186_v19 = vld [vmem:[#allocation8 + $0x1dc] sm:$0xf0] }
 0x242   :  { %v11442_v7 = vld [vmem:[#allocation5 + $0xd38] sm:$0xf0]  ;;  %v11769_v25 = vor.u32 %v15186_v19, %v11768_v10  ;;  %v11640_v22 = vld [vmem:[#allocation8 + $0xc0] sm:$0xf] }
 0x243   :  { %v14897_v13 = vld [vmem:[#allocation5 + $0x6dc] sm:$0xf]  ;;  %v11445_v63 = vor.u32 %v15097_v38, %v11442_v7  ;;  %3608 = vmatpush.bf16.msrb.mxu2 %v11189_v11  ;;  %v12024_v11 = vld [vmem:[#allocation8 + $0x3c0] sm:$0xf] }
 0x244   :  { %v10642_v14 = vld [vmem:[#allocation5 + $0x6f8] sm:$0xf0]  ;;  %v15218_v10 = vld [vmem:[#allocation8 + $0x2dc] sm:$0xf0] }
 0x245   :  { %v14961_v16 = vld [vmem:[#allocation5 + $0x8dc] sm:$0xf]  ;;  %v10645_v26 = vor.u32 %v14897_v13, %v10642_v14  ;;  %3621 = vmatpush.bf16.msrb.mxu3 %v11445_v63  ;;  %v3369_v13 = vpop.f32.mrf.mxu3  ;;  %v15314_v63 = vld [vmem:[#allocation8 + $0x5dc] sm:$0xf0] }
 0x246   :  { %v10898_v35 = vld [vmem:[#allocation5 + $0x8f8] sm:$0xf0]  ;;  %v12152_v19 = vld [vmem:[#allocation8 + $0x4c0] sm:$0xf] }
 0x247   :  { %v15025_v17 = vld [vmem:[#allocation5 + $0xadc] sm:$0xf]  ;;  %v10901_v48 = vor.u32 %v14961_v16, %v10898_v35  ;;  %3583 = vmatpush.bf16.msrb.mxu0 %v10645_v26  ;;  %v15250_v16 = vld [vmem:[#allocation8 + $0x3dc] sm:$0xf0] }
 0x248   :  { %v11154_v21 = vld [vmem:[#allocation5 + $0xaf8] sm:$0xf0]  ;;  %v12025_v26 = vor.u32 %v15250_v16, %v12024_v11  ;;  %v15282_v11 = vld [vmem:[#allocation8 + $0x4dc] sm:$0xf0] }
 0x249   :  { %v15089_v23 = vld [vmem:[#allocation5 + $0xcdc] sm:$0xf]  ;;  %v11157_v27 = vor.u32 %v15025_v17, %v11154_v21  ;;  %3596 = vmatpush.bf16.msrb.mxu1 %v10901_v48  ;;  %v12536_v21 = vld [vmem:[#allocation8 + $0x7c0] sm:$0xf]  ;;  %v12281_v48 = vor.u32 %v15314_v63, %v12280_v42  ;;  %v12153_v63 = vor.u32 %v15282_v11, %v12152_v19  ;;  %v16427_v19 = vld [vmem:[#allocation7] sm:$0xff] }
 0x24a   :  { %v11410_v24 = vld [vmem:[#allocation5 + $0xcf8] sm:$0xf0]  ;;  %v12408_v13 = vld [vmem:[#allocation8 + $0x6c0] sm:$0xf]  ;;  %v627_v11 = vperm.slane %v16427_v19, 5 }
 0x24b   :  { %v14889_v28 = vld [vmem:[#allocation5 + $0x69c] sm:$0xf]  ;;  %v11413_v47 = vor.u32 %v15089_v23, %v11410_v24  ;;  %3609 = vmatpush.bf16.msrb.mxu2 %v11157_v27  ;;  %v15378_v23 = vld [vmem:[#allocation8 + $0x7dc] sm:$0xf0] }
 0x24c   :  { %v10610_v46 = vld [vmem:[#allocation5 + $0x6b8] sm:$0xf0]  ;;  %v11736_v27 = vld [vmem:[#allocation8 + $0x180] sm:$0xf] }
 0x24d   :  { %v14953_v29 = vld [vmem:[#allocation5 + $0x89c] sm:$0xf]  ;;  %v10613_v44 = vor.u32 %v14889_v28, %v10610_v46  ;;  %3622 = vmatpush.bf16.msrb.mxu3 %v11413_v47  ;;  %v15178_v28 = vld [vmem:[#allocation8 + $0x19c] sm:$0xf0] }
 0x24e   :  { %v10866_v12 = vld [vmem:[#allocation5 + $0x8b8] sm:$0xf0]  ;;  %v11992_v46 = vld [vmem:[#allocation8 + $0x380] sm:$0xf] }
 0x24f   :  { %v15017_v31 = vld [vmem:[#allocation5 + $0xa9c] sm:$0xf]  ;;  %v10869_v50 = vor.u32 %v14953_v29, %v10866_v12  ;;  %3584 = vmatpush.bf16.msrb.mxu0 %v10613_v44  ;;  %v12537_v29 = vor.u32 %v15378_v23, %v12536_v21  ;;  %v12248_v47 = vld [vmem:[#allocation8 + $0x580] sm:$0xf]  ;;  %v16420_v23 = vpop.f32.mrf.mxu2 }
 0x250   :  { %v11122_v32 = vld [vmem:[#allocation5 + $0xab8] sm:$0xf0]  ;;  %v15306_v12 = vld [vmem:[#allocation8 + $0x59c] sm:$0xf0] }
 0x251   :  { %v15081_v15 = vld [vmem:[#allocation5 + $0xc9c] sm:$0xf]  ;;  %v11125_v51 = vor.u32 %v15017_v31, %v11122_v32  ;;  %3597 = vmatpush.bf16.msrb.mxu1 %v10869_v50  ;;  %v12504_v31 = vld [vmem:[#allocation8 + $0x780] sm:$0xf]  ;;  %v12249_v44 = vor.u32 %v15306_v12, %v12248_v47 }
 0x252   :  { %v11378_v36 = vld [vmem:[#allocation5 + $0xcb8] sm:$0xf0]  ;;  %v15370_v32 = vld [vmem:[#allocation8 + $0x79c] sm:$0xf0] }
 0x253   :  { %v14881_v52 = vld [vmem:[#allocation5 + $0x65c] sm:$0xf]  ;;  %v11381_v55 = vor.u32 %v15081_v15, %v11378_v36  ;;  %3610 = vmatpush.bf16.msrb.mxu2 %v11125_v51  ;;  %v11737_v15 = vor.u32 %v15178_v28, %v11736_v27  ;;  %v11993_v36 = vor.u32 %v15242_v30, %v11992_v46  ;;  %v11960_v50 = vld [vmem:[#allocation8 + $0x340] sm:$0xf]  ;;  %v12505_v51 = vor.u32 %v15370_v32, %v12504_v31  ;;  %v16422_v27 = vpop.f32.mrf.mxu3 }
 0x254   :  { %v10578_v53 = vld [vmem:[#allocation5 + $0x678] sm:$0xf0]  ;;  %v11864_v21 = vld [vmem:[#allocation8 + $0x280] sm:$0xf] }
 0x255   :  { %v14945_v54 = vld [vmem:[#allocation5 + $0x85c] sm:$0xf]  ;;  %v10581_v61 = vor.u32 %v14881_v52, %v10578_v53  ;;  %3623 = vmatpush.bf16.msrb.mxu3 %v11381_v55  ;;  %v15234_v52 = vld [vmem:[#allocation8 + $0x35c] sm:$0xf0] }
 0x256   :  { %v10834_v56 = vld [vmem:[#allocation5 + $0x878] sm:$0xf0]  ;;  %v12216_v53 = vld [vmem:[#allocation8 + $0x540] sm:$0xf] }
 0x257   :  { %v15009_v57 = vld [vmem:[#allocation5 + $0xa5c] sm:$0xf]  ;;  %v10837_v2 = vor.u32 %v14945_v54, %v10834_v56  ;;  %3585 = vmatpush.bf16.msrb.mxu0 %v10581_v61  ;;  %v15298_v54 = vld [vmem:[#allocation8 + $0x55c] sm:$0xf0] }
 0x258   :  { %v11090_v58 = vld [vmem:[#allocation5 + $0xa78] sm:$0xf0]  ;;  %v12472_v55 = vld [vmem:[#allocation8 + $0x740] sm:$0xf] }
 0x259   :  { %v15073_v59 = vld [vmem:[#allocation5 + $0xc5c] sm:$0xf]  ;;  %v11093_v3 = vor.u32 %v15009_v57, %v11090_v58  ;;  %3598 = vmatpush.bf16.msrb.mxu1 %v10837_v2  ;;  %v15362_v56 = vld [vmem:[#allocation8 + $0x75c] sm:$0xf0]  ;;  %v11705_v57 = vor.u32 %v15170_v49, %v11704_v45  ;;  %v11961_v58 = vor.u32 %v15234_v52, %v11960_v50 }
 0x25a   :  { %v11346_v60 = vld [vmem:[#allocation5 + $0xc78] sm:$0xf0]  ;;  %v11928_v61 = vld [vmem:[#allocation8 + $0x300] sm:$0xf] }
 0x25b   :  { %v14873_v62 = vld [vmem:[#allocation5 + $0x61c] sm:$0xf]  ;;  %v11349_v38 = vor.u32 %v15073_v59, %v11346_v60  ;;  %3611 = vmatpush.bf16.msrb.mxu2 %v11093_v3  ;;  %v12217_v59 = vor.u32 %v15298_v54, %v12216_v53  ;;  %v11672_v60 = vld [vmem:[#allocation8 + $0x100] sm:$0xf] }
 0x25c   :  { %v10546_v0 = vld [vmem:[#allocation5 + $0x638] sm:$0xf0]  ;;  %v12184_v2 = vld [vmem:[#allocation8 + $0x500] sm:$0xf] }
 0x25d   :  { %v14937_v4 = vld [vmem:[#allocation5 + $0x81c] sm:$0xf]  ;;  %v10549_v14 = vor.u32 %v14873_v62, %v10546_v0  ;;  %3624 = vmatpush.bf16.msrb.mxu3 %v11349_v38  ;;  %v12473_v62 = vor.u32 %v15362_v56, %v12472_v55  ;;  %v15226_v0 = vld [vmem:[#allocation8 + $0x31c] sm:$0xf0] }
 0x25e   :  { %v10802_v5 = vld [vmem:[#allocation5 + $0x838] sm:$0xf0]  ;;  %v12440_v3 = vld [vmem:[#allocation8 + $0x700] sm:$0xf] }
 0x25f   :  { %v15001_v6 = vld [vmem:[#allocation5 + $0xa1c] sm:$0xf]  ;;  %v10805_v35 = vor.u32 %v14937_v4, %v10802_v5  ;;  %3586 = vmatpush.bf16.msrb.mxu0 %v10549_v14  ;;  %v16416_v5 = vpop.f32.mrf.mxu0  ;;  %v15154_v38 = vld [vmem:[#allocation8 + $0xdc] sm:$0xf0] }
 0x260   :  { %v11058_v7 = vld [vmem:[#allocation5 + $0xa38] sm:$0xf0]  ;;  %v15346_v14 = vld [vmem:[#allocation8 + $0x6dc] sm:$0xf0]  ;;  %v11641_v16 = vor.u32 %v15154_v38, %v11640_v22  ;;  %v3631_v22 = vmax.f32 %v16348_v34, 0.0  ;;  %v3632_v38 = vmax.f32 %v16365_v9, 0.0 }
 0x261   :  { %v15065_v18 = vld [vmem:[#allocation5 + $0xc1c] sm:$0xf]  ;;  %v11061_v17 = vor.u32 %v15001_v6, %v11058_v7  ;;  %3599 = vmatpush.bf16.msrb.mxu1 %v10805_v35  ;;  %v11896_v7 = vld [vmem:[#allocation8 + $0x2c0] sm:$0xf] }
 0x262   :  { %v11314_v8 = vld [vmem:[#allocation5 + $0xc38] sm:$0xf0]  ;;  %3587 = vmatmul.bf16.vlgmr.msrb.gmra.mxu0 %v16302_v20  ;;  %v15162_v20 = vld [vmem:[#allocation8 + $0x11c] sm:$0xf0]  ;;  %v11897_v42 = vor.u32 %v15218_v10, %v11896_v7  ;;  %v3633_v10 = vmax.f32 %v16385_v1, 0.0  ;;  %v16433_v1 = vpack.c.bf16 %v3632_v38, %v3632_v38 }
 0x263   :  { %v11317_v24 = vor.u32 %v15065_v18, %v11314_v8  ;;  %3612 = vmatpush.bf16.msrb.mxu2 %v11061_v17  ;;  %6737 = vmatpush.bf16.msra.mxu0 %v11769_v25  ;;  %v11673_v4 = vor.u32 %v15162_v20, %v11672_v60  ;;  %v16418_v18 = vpop.f32.mrf.mxu1  ;;  %v11608_v35 = vld [vmem:[#allocation8 + $0x80] sm:$0xf]  ;;  %v3408_v60 = vpop.f32.mrf.mxu2 }
 0x264   :  { %3600 = vmatmul.bf16.vlgmr.msrb.gmra.mxu1 %v16318_v40  ;;  %v15290_v40 = vld [vmem:[#allocation8 + $0x51c] sm:$0xf0] }
 0x265   :  { %3625 = vmatpush.bf16.msrb.mxu3 %v11317_v24  ;;  %6750 = vmatpush.bf16.msra.mxu1 %v12025_v26  ;;  %v12185_v6 = vor.u32 %v15290_v40, %v12184_v2  ;;  %v15146_v17 = vld [vmem:[#allocation8 + $0x9c] sm:$0xf0]  ;;  %v12409_v24 = vor.u32 %v15346_v14, %v12408_v13  ;;  %v3421_v2 = vpop.f32.mrf.mxu3 }
 0x266   :  { %3613 = vmatmul.bf16.vlgmr.msrb.gmra.mxu2 %v16320_v41  ;;  %v15354_v41 = vld [vmem:[#allocation8 + $0x71c] sm:$0xf0] }
 0x267   :  { %6763 = vmatpush.bf16.msra.mxu2 %v12281_v48  ;;  %6738 = vmatpush.bf16.msra.mxu0 %v11737_v15  ;;  %v12441_v8 = vor.u32 %v15354_v41, %v12440_v3  ;;  %v15210_v25 = vld [vmem:[#allocation8 + $0x29c] sm:$0xf0]  ;;  %v3382_v30 = vpop.f32.mrf.mxu0 }
 0x268   :  { %3626 = vmatmul.bf16.vlgmr.msrb.gmra.mxu3 %v16316_v37  ;;  %v11929_v37 = vor.u32 %v15226_v0, %v11928_v61  ;;  %v12120_v26 = vld [vmem:[#allocation8 + $0x480] sm:$0xf]  ;;  %v11865_v47 = vor.u32 %v15210_v25, %v11864_v21 }
 0x269   :  { %6776 = vmatpush.bf16.msra.mxu3 %v12537_v29  ;;  %6751 = vmatpush.bf16.msra.mxu1 %v11993_v36  ;;  %v15274_v48 = vld [vmem:[#allocation8 + $0x49c] sm:$0xf0]  ;;  %v11609_v29 = vor.u32 %v15146_v17, %v11608_v35 }
 0x26a   :  { %v12376_v28 = vld [vmem:[#allocation8 + $0x680] sm:$0xf]  ;;  %v12121_v12 = vor.u32 %v15274_v48, %v12120_v26  ;;  %v16435_v26 = vpack.c.bf16 %v3633_v10, %v3633_v10  ;;  %v3368_v48 = vadd.f32 %v16410_v43, %v627_v11 }
 0x26b   :  { %6764 = vmatpush.bf16.msra.mxu2 %v12249_v44  ;;  %6739 = vmatpush.bf16.msra.mxu0 %v11705_v57  ;;  %v15338_v46 = vld [vmem:[#allocation8 + $0x69c] sm:$0xf0]  ;;  %v3395_v36 = vpop.f32.mrf.mxu1 }
 0x26c   :  { %v11576_v31 = vld [vmem:[#allocation8 + $0x40] sm:$0xf]  ;;  %v12377_v44 = vor.u32 %v15338_v46, %v12376_v28 }
 0x26d   :  { %6777 = vmatpush.bf16.msra.mxu3 %v12505_v51  ;;  %6752 = vmatpush.bf16.msra.mxu1 %v11961_v58  ;;  %v15138_v32 = vld [vmem:[#allocation8 + $0x5c] sm:$0xf0]  ;;  %v16449_v10 = vpop.f32.mrf.mxu3 }
 0x26e   :  { %v11832_v15 = vld [vmem:[#allocation8 + $0x240] sm:$0xf]  ;;  %v11577_v53 = vor.u32 %v15138_v32, %v11576_v31 }
 0x26f   :  { %6765 = vmatpush.bf16.msra.mxu2 %v12217_v59  ;;  %6740 = vmatpush.bf16.msra.mxu0 %v11673_v4  ;;  %v15202_v45 = vld [vmem:[#allocation8 + $0x25c] sm:$0xf0] }
 0x270   :  { %v12088_v49 = vld [vmem:[#allocation8 + $0x440] sm:$0xf]  ;;  %v11833_v55 = vor.u32 %v15202_v45, %v11832_v15  ;;  %v3381_v15 = vadd.f32 %v16416_v5, %v3368_v48 }
 0x271   :  { %6778 = vmatpush.bf16.msra.mxu3 %v12473_v62  ;;  %6753 = vmatpush.bf16.msra.mxu1 %v11929_v37  ;;  %v15266_v50 = vld [vmem:[#allocation8 + $0x45c] sm:$0xf0] }
 0x272   :  { %v12344_v51 = vld [vmem:[#allocation8 + $0x640] sm:$0xf]  ;;  %v12089_v56 = vor.u32 %v15266_v50, %v12088_v49 }
 0x273   :  { %6766 = vmatpush.bf16.msra.mxu2 %v12185_v6  ;;  %6741 = vmatpush.bf16.msra.mxu0 %v11641_v16  ;;  %v15330_v52 = vld [vmem:[#allocation8 + $0x65c] sm:$0xf0] }
 0x274   :  { %v11544_v54 = vld [vmem:[#allocation8] sm:$0xf]  ;;  %v12345_v20 = vor.u32 %v15330_v52, %v12344_v51 }
 0x275   :  { %6779 = vmatpush.bf16.msra.mxu3 %v12441_v8  ;;  %6754 = vmatpush.bf16.msra.mxu1 %v11897_v42  ;;  %v15130_v57 = vld [vmem:[#allocation8 + $0x1c] sm:$0xf0] }
 0x276   :  { %v11800_v58 = vld [vmem:[#allocation8 + $0x200] sm:$0xf]  ;;  %v11545_v4 = vor.u32 %v15130_v57, %v11544_v54  ;;  %v3432_v54 = vpop.f32.mrf.mxu0 }
 0x277   :  { %6767 = vmatpush.bf16.msra.mxu2 %v12153_v63  ;;  %6742 = vmatpush.bf16.msra.mxu0 %v11609_v29  ;;  %v15194_v59 = vld [vmem:[#allocation8 + $0x21c] sm:$0xf0]  ;;  %v3634_v63 = vmax.f32 %v16394_v39, 0.0 }
 0x278   :  { %v12056_v61 = vld [vmem:[#allocation8 + $0x400] sm:$0xf]  ;;  %v11801_v7 = vor.u32 %v15194_v59, %v11800_v58  ;;  %v3445_v58 = vpop.f32.mrf.mxu1 }
 0x279   :  { %6780 = vmatpush.bf16.msra.mxu3 %v12409_v24  ;;  %6755 = vmatpush.bf16.msra.mxu1 %v11865_v47  ;;  %v15258_v62 = vld [vmem:[#allocation8 + $0x41c] sm:$0xf0]  ;;  %v16431_v24 = vpack.c.bf16 %v3631_v22, %v3631_v22  ;;  %v16438_v29 = vpack.c.bf16 %v3634_v63, %v3634_v63 }
 0x27a   :  { %v12312_v0 = vld [vmem:[#allocation8 + $0x600] sm:$0xf]  ;;  %v12057_v8 = vor.u32 %v15258_v62, %v12056_v61 }
 0x27b   :  { %6768 = vmatpush.bf16.msra.mxu2 %v12121_v12  ;;  %v15322_v40 = vld [vmem:[#allocation8 + $0x61c] sm:$0xf0]  ;;  %6743 = vmatpush.bf16.msra.mxu0 %v11577_v53 }
 0x27c   :  { %v12792_v3 = vld [vmem:[#allocation8 + $0x9c0] sm:$0xf]  ;;  %v12313_v13 = vor.u32 %v15322_v40, %v12312_v0 }
 0x27d   :  { %6781 = vmatpush.bf16.msra.mxu3 %v12377_v44  ;;  %v15442_v41 = vld [vmem:[#allocation8 + $0x9dc] sm:$0xf0]  ;;  %6756 = vmatpush.bf16.msra.mxu1 %v11833_v55 }
 0x27e   :  { %v13048_v37 = vld [vmem:[#allocation8 + $0xbc0] sm:$0xf]  ;;  %v12793_v14 = vor.u32 %v15442_v41, %v12792_v3  ;;  %v3434_v11 = vpop.f32.mrf.mxu0 }
 0x27f   :  { %v15506_v6 = vld [vmem:[#allocation8 + $0xbdc] sm:$0xf0]  ;;  %6769 = vmatpush.bf16.msra.mxu2 %v12089_v56  ;;  %6744 = vmatpush.bf16.msra.mxu0 %v11545_v4  ;;  %v3394_v56 = vadd.f32 %v16418_v18, %v3381_v15  ;;  %v15182_v15 = vld [vmem:[#allocation8 + $0x1c4] sm:$0xf] }
 0x280   :  { %v13304_v16 = vld [vmem:[#allocation8 + $0xdc0] sm:$0xf]  ;;  %v13049_v34 = vor.u32 %v15506_v6, %v13048_v37 }
 0x281   :  { %6782 = vmatpush.bf16.msra.mxu3 %v12345_v20  ;;  %v15570_v42 = vld [vmem:[#allocation8 + $0xddc] sm:$0xf0]  ;;  %6757 = vmatpush.bf16.msra.mxu1 %v11801_v7  ;;  %v3407_v40 = vadd.f32 %v16420_v23, %v3394_v56  ;;  %v16447_v7 = vpop.f32.mrf.mxu2 }
 0x282   :  { %v12760_v35 = vld [vmem:[#allocation8 + $0x980] sm:$0xf]  ;;  %v13305_v25 = vor.u32 %v15570_v42, %v13304_v16  ;;  %6745 = vmatmul.bf16.vlgmr.msra.gmra.mxu0 %v16431_v24  ;;  %v3447_v42 = vpop.f32.mrf.mxu1 }
 0x283   :  { %v15434_v9 = vld [vmem:[#allocation8 + $0x99c] sm:$0xf0]  ;;  %6770 = vmatpush.bf16.msra.mxu2 %v12057_v8  ;;  %6789 = vmatpush.bf16.msrb.mxu0 %v12793_v14  ;;  %v15230_v42 = vld [vmem:[#allocation8 + $0x344] sm:$0xf] }
 0x284   :  { %v13016_v17 = vld [vmem:[#allocation8 + $0xb80] sm:$0xf]  ;;  %v12761_v39 = vor.u32 %v15434_v9, %v12760_v35  ;;  %6758 = vmatmul.bf16.vlgmr.msra.gmra.mxu1 %v16433_v1 }
 0x285   :  { %v15498_v21 = vld [vmem:[#allocation8 + $0xb9c] sm:$0xf0]  ;;  %6783 = vmatpush.bf16.msra.mxu3 %v12313_v13  ;;  %6802 = vmatpush.bf16.msrb.mxu1 %v13049_v34  ;;  %v3420_v13 = vadd.f32 %v16422_v27, %v3407_v40  ;;  %v15238_v40 = vld [vmem:[#allocation8 + $0x384] sm:$0xf] }
 0x286   :  { %v13272_v28 = vld [vmem:[#allocation8 + $0xd80] sm:$0xf]  ;;  %v13017_v30 = vor.u32 %v15498_v21, %v13016_v17  ;;  %6771 = vmatmul.bf16.vlgmr.msra.gmra.mxu2 %v16435_v26 }
 0x287   :  { %v15562_v46 = vld [vmem:[#allocation8 + $0xd9c] sm:$0xf0]  ;;  %6815 = vmatpush.bf16.msrb.mxu2 %v13305_v25  ;;  %6790 = vmatpush.bf16.msrb.mxu0 %v12761_v39  ;;  %v3433_v9 = vadd.f32 %v3432_v54, %v3420_v13 }
 0x288   :  { %v12728_v47 = vld [vmem:[#allocation8 + $0x940] sm:$0xf]  ;;  %6784 = vmatmul.bf16.vlgmr.msra.gmra.mxu3 %v16438_v29  ;;  %v13273_v43 = vor.u32 %v15562_v46, %v13272_v28 }
 0x289   :  { %v15426_v12 = vld [vmem:[#allocation8 + $0x95c] sm:$0xf0]  ;;  %6803 = vmatpush.bf16.msrb.mxu1 %v13017_v30 }
 0x28a   :  { %v12984_v31 = vld [vmem:[#allocation8 + $0xb40] sm:$0xf]  ;;  %v12729_v36 = vor.u32 %v15426_v12, %v12728_v47 }
 0x28b   :  { %v15490_v32 = vld [vmem:[#allocation8 + $0xb5c] sm:$0xf0]  ;;  %6816 = vmatpush.bf16.msrb.mxu2 %v13273_v43 }
 0x28c   :  { %v13240_v44 = vld [vmem:[#allocation8 + $0xd40] sm:$0xf]  ;;  %v12985_v49 = vor.u32 %v15490_v32, %v12984_v31  ;;  %6791 = vmatpush.bf16.msrb.mxu0 %v12729_v36  ;;  %v3446_v32 = vadd.f32 %v3445_v58, %v3433_v9  ;;  %v11770_v36 = vld [vmem:[#allocation8 + $0x1e0] sm:$0xf0] }
 0x28d   :  { %v15554_v45 = vld [vmem:[#allocation8 + $0xd5c] sm:$0xf0] }
 0x28e   :  { %v12696_v50 = vld [vmem:[#allocation8 + $0x900] sm:$0xf]  ;;  %v13241_v55 = vor.u32 %v15554_v45, %v13240_v44  ;;  %6804 = vmatpush.bf16.msrb.mxu1 %v12985_v49  ;;  %v3460_v44 = vpop.f32.mrf.mxu2  ;;  %v3635_v49 = vmax.f32 %v16408_v33, 0.0  ;;  %v15174_v33 = vld [vmem:[#allocation8 + $0x184] sm:$0xf] }
 0x28f   :  { %v15418_v51 = vld [vmem:[#allocation8 + $0x91c] sm:$0xf0]  ;;  %v15150_v44 = vld [vmem:[#allocation8 + $0xc4] sm:$0xf] }
 0x290   :  { %v12952_v52 = vld [vmem:[#allocation8 + $0xb00] sm:$0xf]  ;;  %v12697_v57 = vor.u32 %v15418_v51, %v12696_v50  ;;  %6817 = vmatpush.bf16.msrb.mxu2 %v13241_v55  ;;  %v15246_v50 = vld [vmem:[#allocation8 + $0x3c4] sm:$0xf] }
 0x291   :  { %v15482_v53 = vld [vmem:[#allocation8 + $0xb1c] sm:$0xf0]  ;;  %v12026_v51 = vld [vmem:[#allocation8 + $0x3e0] sm:$0xf0] }
 0x292   :  { %v13208_v59 = vld [vmem:[#allocation8 + $0xd00] sm:$0xf]  ;;  %v12953_v60 = vor.u32 %v15482_v53, %v12952_v52  ;;  %6792 = vmatpush.bf16.msrb.mxu0 %v12697_v57  ;;  %v3473_v53 = vpop.f32.mrf.mxu3  ;;  %v15310_v57 = vld [vmem:[#allocation8 + $0x5c4] sm:$0xf] }
 0x293   :  { %v15546_v5 = vld [vmem:[#allocation8 + $0xd1c] sm:$0xf0]  ;;  %v16461_v53 = vpop.f32.mrf.mxu1 }
 0x294   :  { %v12664_v20 = vld [vmem:[#allocation8 + $0x8c0] sm:$0xf]  ;;  %v13209_v2 = vor.u32 %v15546_v5, %v13208_v59  ;;  %6805 = vmatpush.bf16.msrb.mxu1 %v12953_v60  ;;  %v11773_v59 = vor.u32 %v15182_v15, %v11770_v36  ;;  %v12282_v5 = vld [vmem:[#allocation8 + $0x5e0] sm:$0xf0] }
 0x295   :  { %v15410_v61 = vld [vmem:[#allocation8 + $0x8dc] sm:$0xf0] }
 0x296   :  { %v12920_v62 = vld [vmem:[#allocation8 + $0xac0] sm:$0xf]  ;;  %v12665_v3 = vor.u32 %v15410_v61, %v12664_v20  ;;  %6818 = vmatpush.bf16.msrb.mxu2 %v13209_v2  ;;  %v3636_v61 = vmax.f32 %v3446_v32, 0.0  ;;  %v12186_v32 = vld [vmem:[#allocation8 + $0x520] sm:$0xf0] }
 0x297   :  { %v15474_v0 = vld [vmem:[#allocation8 + $0xadc] sm:$0xf0] }
 0x298   :  { %v13176_v41 = vld [vmem:[#allocation8 + $0xcc0] sm:$0xf]  ;;  %v12921_v18 = vor.u32 %v15474_v0, %v12920_v62  ;;  %6793 = vmatpush.bf16.msrb.mxu0 %v12665_v3  ;;  %v12029_v62 = vor.u32 %v15246_v50, %v12026_v51  ;;  %v11738_v0 = vld [vmem:[#allocation8 + $0x1a0] sm:$0xf0]  ;;  %v16455_v11 = vpack.c.bf16 %v3636_v61, %v3636_v61 }
 0x299   :  { %v15538_v4 = vld [vmem:[#allocation8 + $0xcdc] sm:$0xf0]  ;;  %v11994_v3 = vld [vmem:[#allocation8 + $0x3a0] sm:$0xf0] }
 0x29a   :  { %v12632_v37 = vld [vmem:[#allocation8 + $0x880] sm:$0xf]  ;;  %v13177_v8 = vor.u32 %v15538_v4, %v13176_v41  ;;  %6806 = vmatpush.bf16.msrb.mxu1 %v12921_v18  ;;  %v12285_v4 = vor.u32 %v15310_v57, %v12282_v5  ;;  %v15302_v18 = vld [vmem:[#allocation8 + $0x584] sm:$0xf]  ;;  %v11997_v13 = vor.u32 %v15238_v40, %v11994_v3  ;;  %v628_v5 = vperm.slane %v16427_v19, 6  ;;  %v16466_v40 = vpop.f32.mrf.mxu3 }
 0x29b   :  { %v15402_v6 = vld [vmem:[#allocation8 + $0x89c] sm:$0xf0]  ;;  %v15214_v51 = vld [vmem:[#allocation8 + $0x2c4] sm:$0xf] }
 0x29c   :  { %v12888_v22 = vld [vmem:[#allocation8 + $0xa80] sm:$0xf]  ;;  %v12633_v23 = vor.u32 %v15402_v6, %v12632_v37  ;;  %6819 = vmatpush.bf16.msrb.mxu2 %v13177_v8  ;;  %v16453_v37 = vpack.c.bf16 %v3635_v49, %v3635_v49  ;;  %v11741_v6 = vor.u32 %v15174_v33, %v11738_v0  ;;  %v16459_v49 = vpop.f32.mrf.mxu0  ;;  %v12154_v57 = vld [vmem:[#allocation8 + $0x4e0] sm:$0xf0] }
 0x29d   :  { %v15466_v38 = vld [vmem:[#allocation8 + $0xa9c] sm:$0xf0]  ;;  %v11610_v61 = vld [vmem:[#allocation8 + $0xa0] sm:$0xf0] }
 0x29e   :  { %v13144_v14 = vld [vmem:[#allocation8 + $0xc80] sm:$0xf]  ;;  %v12889_v63 = vor.u32 %v15466_v38, %v12888_v22  ;;  %6794 = vmatpush.bf16.msrb.mxu0 %v12633_v23  ;;  %v12250_v22 = vld [vmem:[#allocation8 + $0x5a0] sm:$0xf0] }
 0x29f   :  { %v15530_v16 = vld [vmem:[#allocation8 + $0xc9c] sm:$0xf0]  ;;  %v15166_v23 = vld [vmem:[#allocation8 + $0x144] sm:$0xf] }
 0x2a0   :  { %v12600_v34 = vld [vmem:[#allocation8 + $0x840] sm:$0xf]  ;;  %v13145_v48 = vor.u32 %v15530_v16, %v13144_v14  ;;  %6807 = vmatpush.bf16.msrb.mxu1 %v12889_v63  ;;  %v11706_v14 = vld [vmem:[#allocation8 + $0x160] sm:$0xf0] }
 0x2a1   :  { %v15394_v35 = vld [vmem:[#allocation8 + $0x85c] sm:$0xf0]  ;;  %v11962_v63 = vld [vmem:[#allocation8 + $0x360] sm:$0xf0]  ;;  %v11709_v9 = vor.u32 %v15166_v23, %v11706_v14 }
 0x2a2   :  { %v12856_v17 = vld [vmem:[#allocation8 + $0xa40] sm:$0xf]  ;;  %v12601_v39 = vor.u32 %v15394_v35, %v12600_v34  ;;  %6820 = vmatpush.bf16.msrb.mxu2 %v13145_v48  ;;  %v12253_v34 = vor.u32 %v15302_v18, %v12250_v22  ;;  %v15294_v35 = vld [vmem:[#allocation8 + $0x544] sm:$0xf]  ;;  %v11965_v48 = vor.u32 %v15230_v42, %v11962_v63 }
 0x2a3   :  { %v15458_v21 = vld [vmem:[#allocation8 + $0xa5c] sm:$0xf0]  ;;  %v15206_v33 = vld [vmem:[#allocation8 + $0x284] sm:$0xf] }
 0x2a4   :  { %v12568_v25 = vld [vmem:[#allocation8 + $0x800] sm:$0xf]  ;;  %v12857_v30 = vor.u32 %v15458_v21, %v12856_v17  ;;  %6795 = vmatpush.bf16.msrb.mxu0 %v12601_v39  ;;  %v12218_v17 = vld [vmem:[#allocation8 + $0x560] sm:$0xf0]  ;;  %v3486_v14 = vpop.f32.mrf.mxu0 }
 0x2a5   :  { %v15386_v28 = vld [vmem:[#allocation8 + $0x81c] sm:$0xf0]  ;;  %v15158_v39 = vld [vmem:[#allocation8 + $0x104] sm:$0xf] }
 0x2a6   :  { %v13112_v46 = vld [vmem:[#allocation8 + $0xc40] sm:$0xf]  ;;  %v12569_v54 = vor.u32 %v15386_v28, %v12568_v25  ;;  %6808 = vmatpush.bf16.msrb.mxu1 %v12857_v30  ;;  %v11674_v28 = vld [vmem:[#allocation8 + $0x120] sm:$0xf0] }
 0x2a7   :  { %v15522_v27 = vld [vmem:[#allocation8 + $0xc5c] sm:$0xf0]  ;;  %v11930_v30 = vld [vmem:[#allocation8 + $0x320] sm:$0xf0] }
 0x2a8   :  { %v12824_v47 = vld [vmem:[#allocation8 + $0xa00] sm:$0xf]  ;;  %v13113_v52 = vor.u32 %v15522_v27, %v13112_v46  ;;  %6796 = vmatpush.bf16.msrb.mxu0 %v12569_v54  ;;  %v15222_v27 = vld [vmem:[#allocation8 + $0x304] sm:$0xf] }
 0x2a9   :  { %v13560_v12 = vld [vmem:[#allocation8 + $0xfc0] sm:$0xf]  ;;  %v11933_v36 = vor.u32 %v15222_v27, %v11930_v30  ;;  %v11866_v0 = vld [vmem:[#allocation8 + $0x2a0] sm:$0xf0] }
 0x2aa   :  { %v15634_v31 = vld [vmem:[#allocation8 + $0xfdc] sm:$0xf0]  ;;  %6821 = vmatpush.bf16.msrb.mxu2 %v13113_v52  ;;  %v11898_v52 = vld [vmem:[#allocation8 + $0x2e0] sm:$0xf0] }
 0x2ab   :  { %v15450_v43 = vld [vmem:[#allocation8 + $0xa1c] sm:$0xf0]  ;;  %v13561_v45 = vor.u32 %v15634_v31, %v13560_v12  ;;  %6797 = vmatmul.bf16.vlgmr.msrb.gmra.mxu0 %v16453_v37  ;;  %v15286_v12 = vld [vmem:[#allocation8 + $0x504] sm:$0xf]  ;;  %v11677_v31 = vor.u32 %v15158_v39, %v11674_v28 }
 0x2ac   :  { %v13080_v55 = vld [vmem:[#allocation8 + $0xc00] sm:$0xf]  ;;  %v12825_v58 = vor.u32 %v15450_v43, %v12824_v47  ;;  %6841 = vmatpush.bf16.msra.mxu0 %v11773_v59  ;;  %v12221_v47 = vor.u32 %v15294_v35, %v12218_v17  ;;  %v12189_v54 = vor.u32 %v15286_v12, %v12186_v32  ;;  %v12122_v18 = vld [vmem:[#allocation8 + $0x4a0] sm:$0xf0] }
 0x2ad   :  { %v15514_v56 = vld [vmem:[#allocation8 + $0xc1c] sm:$0xf0]  ;;  %6828 = vmatpush.bf16.msrb.mxu3 %v13561_v45  ;;  %v11642_v45 = vld [vmem:[#allocation8 + $0xe0] sm:$0xf0] }
 0x2ae   :  { %v13528_v60 = vld [vmem:[#allocation8 + $0xf80] sm:$0xf]  ;;  %v13081_v41 = vor.u32 %v15514_v56, %v13080_v55  ;;  %6809 = vmatpush.bf16.msrb.mxu1 %v12825_v58  ;;  %v15278_v55 = vld [vmem:[#allocation8 + $0x4c4] sm:$0xf]  ;;  %v11645_v56 = vor.u32 %v15150_v44, %v11642_v45 }
 0x2af   :  { %v15626_v20 = vld [vmem:[#allocation8 + $0xf9c] sm:$0xf0]  ;;  %v12157_v3 = vor.u32 %v15278_v55, %v12154_v57  ;;  %v11578_v23 = vld [vmem:[#allocation8 + $0x60] sm:$0xf0] }
 0x2b0   :  { %v13529_v2 = vor.u32 %v15626_v20, %v13528_v60  ;;  %v13496_v38 = vld [vmem:[#allocation8 + $0xf40] sm:$0xf]  ;;  %6822 = vmatpush.bf16.msrb.mxu2 %v13081_v41  ;;  %6842 = vmatpush.bf16.msra.mxu0 %v11741_v6  ;;  %v11901_v60 = vor.u32 %v15214_v51, %v11898_v52  ;;  %v15142_v20 = vld [vmem:[#allocation8 + $0x84] sm:$0xf]  ;;  %v3525_v51 = vpop.f32.mrf.mxu3 }
 0x2b1   :  { %v15618_v8 = vld [vmem:[#allocation8 + $0xf5c] sm:$0xf0]  ;;  %6810 = vmatmul.bf16.vlgmr.msrb.gmra.mxu1 %v16455_v11  ;;  %v15270_v41 = vld [vmem:[#allocation8 + $0x484] sm:$0xf] }
 0x2b2   :  { %6829 = vmatpush.bf16.msrb.mxu3 %v13529_v2  ;;  %6854 = vmatpush.bf16.msra.mxu1 %v12029_v62  ;;  %v13497_v16 = vor.u32 %v15618_v8, %v13496_v38  ;;  %v13464_v21 = vld [vmem:[#allocation8 + $0xf00] sm:$0xf]  ;;  %v16464_v2 = vpop.f32.mrf.mxu2  ;;  %v3459_v38 = vadd.f32 %v16447_v7, %v628_v5  ;;  %v11869_v8 = vor.u32 %v15206_v33, %v11866_v0  ;;  %v15198_v42 = vld [vmem:[#allocation8 + $0x244] sm:$0xf] }
 0x2b3   :  { %v15610_v25 = vld [vmem:[#allocation8 + $0xf1c] sm:$0xf0]  ;;  %v11834_v63 = vld [vmem:[#allocation8 + $0x260] sm:$0xf0]  ;;  %v12125_v17 = vor.u32 %v15270_v41, %v12122_v18 }
 0x2b4   :  { %6867 = vmatpush.bf16.msra.mxu2 %v12285_v4  ;;  %v13465_v46 = vor.u32 %v15610_v25, %v13464_v21  ;;  %6843 = vmatpush.bf16.msra.mxu0 %v11709_v9  ;;  %v13432_v43 = vld [vmem:[#allocation8 + $0xec0] sm:$0xf]  ;;  %v11613_v4 = vor.u32 %v15142_v20, %v11610_v61  ;;  %v15126_v35 = vld [vmem:[#allocation8 + $0x4] sm:$0xf]  ;;  %v3472_v28 = vadd.f32 %v16449_v10, %v3459_v38 }
 0x2b5   :  { %v15602_v15 = vld [vmem:[#allocation8 + $0xedc] sm:$0xf0]  ;;  %v11546_v9 = vld [vmem:[#allocation8 + $0x20] sm:$0xf0] }
 0x2b6   :  { %6830 = vmatpush.bf16.msrb.mxu3 %v13497_v16  ;;  %6855 = vmatpush.bf16.msra.mxu1 %v11997_v13  ;;  %v13433_v50 = vor.u32 %v15602_v15, %v13432_v43  ;;  %v13400_v58 = vld [vmem:[#allocation8 + $0xe80] sm:$0xf]  ;;  %v15134_v13 = vld [vmem:[#allocation8 + $0x44] sm:$0xf]  ;;  %v11549_v52 = vor.u32 %v15126_v35, %v11546_v9  ;;  %v3485_v55 = vadd.f32 %v16459_v49, %v3472_v28 }
 0x2b7   :  { %v15594_v59 = vld [vmem:[#allocation8 + $0xe9c] sm:$0xf0]  ;;  %v15262_v21 = vld [vmem:[#allocation8 + $0x444] sm:$0xf]  ;;  %v11581_v25 = vor.u32 %v15134_v13, %v11578_v23 }
 0x2b8   :  { %6868 = vmatpush.bf16.msra.mxu2 %v12253_v34  ;;  %6844 = vmatpush.bf16.msra.mxu0 %v11677_v31  ;;  %v13401_v62 = vor.u32 %v15594_v59, %v13400_v58  ;;  %v13368_v6 = vld [vmem:[#allocation8 + $0xe40] sm:$0xf]  ;;  %v3499_v34 = vpop.f32.mrf.mxu1  ;;  %v15190_v27 = vld [vmem:[#allocation8 + $0x204] sm:$0xf] }
 0x2b9   :  { %v15586_v22 = vld [vmem:[#allocation8 + $0xe5c] sm:$0xf0]  ;;  %v12538_v12 = vld [vmem:[#allocation8 + $0x7e0] sm:$0xf0] }
 0x2ba   :  { %6831 = vmatpush.bf16.msrb.mxu3 %v13465_v46  ;;  %6856 = vmatpush.bf16.msra.mxu1 %v11965_v48  ;;  %v13369_v16 = vor.u32 %v15586_v22, %v13368_v6  ;;  %v12090_v48 = vld [vmem:[#allocation8 + $0x460] sm:$0xf0]  ;;  %v13336_v39 = vld [vmem:[#allocation8 + $0xe00] sm:$0xf]  ;;  %v11837_v46 = vor.u32 %v15198_v42, %v11834_v63  ;;  %v3512_v15 = vpop.f32.mrf.mxu2 }
 0x2bb   :  { %v15578_v7 = vld [vmem:[#allocation8 + $0xe1c] sm:$0xf0]  ;;  %v11802_v31 = vld [vmem:[#allocation8 + $0x220] sm:$0xf0] }
 0x2bc   :  { %6869 = vmatpush.bf16.msra.mxu2 %v12221_v47  ;;  %6845 = vmatpush.bf16.msra.mxu0 %v11645_v56  ;;  %v13337_v30 = vor.u32 %v15578_v7, %v13336_v39  ;;  %v15374_v47 = vld [vmem:[#allocation8 + $0x7c4] sm:$0xf]  ;;  %v11805_v56 = vor.u32 %v15190_v27, %v11802_v31 }
 0x2bd   :  { %v15438_v32 = vld [vmem:[#allocation8 + $0x9c4] sm:$0xf] }
 0x2be   :  { %6832 = vmatpush.bf16.msrb.mxu3 %v13433_v50  ;;  %6857 = vmatpush.bf16.msra.mxu1 %v11933_v36  ;;  %v12794_v43 = vld [vmem:[#allocation8 + $0x9e0] sm:$0xf0]  ;;  %v12541_v36 = vor.u32 %v15374_v47, %v12538_v12  ;;  %v12093_v50 = vor.u32 %v15262_v21, %v12090_v48 }
 0x2bf   :  { %v15502_v44 = vld [vmem:[#allocation8 + $0xbc4] sm:$0xf]  ;;  %v12797_v57 = vor.u32 %v15438_v32, %v12794_v43 }
 0x2c0   :  { %6870 = vmatpush.bf16.msra.mxu2 %v12189_v54  ;;  %6846 = vmatpush.bf16.msra.mxu0 %v11613_v4  ;;  %v13050_v45 = vld [vmem:[#allocation8 + $0xbe0] sm:$0xf0]  ;;  %v16476_v43 = vpop.f32.mrf.mxu1 }
 0x2c1   :  { %v15254_v54 = vld [vmem:[#allocation8 + $0x404] sm:$0xf]  ;;  %v13053_v5 = vor.u32 %v15502_v44, %v13050_v45 }
 0x2c2   :  { %6833 = vmatpush.bf16.msrb.mxu3 %v13401_v62  ;;  %6858 = vmatpush.bf16.msra.mxu1 %v11901_v60  ;;  %v12058_v10 = vld [vmem:[#allocation8 + $0x420] sm:$0xf0] }
 0x2c3   :  { %v15366_v58 = vld [vmem:[#allocation8 + $0x784] sm:$0xf]  ;;  %v12061_v0 = vor.u32 %v15254_v54, %v12058_v10 }
 0x2c4   :  { %6871 = vmatpush.bf16.msra.mxu2 %v12157_v3  ;;  %6847 = vmatpush.bf16.msra.mxu0 %v11581_v25  ;;  %v12506_v59 = vld [vmem:[#allocation8 + $0x7a0] sm:$0xf0]  ;;  %v3498_v3 = vadd.f32 %v16461_v53, %v3485_v55 }
 0x2c5   :  { %v15430_v60 = vld [vmem:[#allocation8 + $0x984] sm:$0xf]  ;;  %v12509_v61 = vor.u32 %v15366_v58, %v12506_v59 }
 0x2c6   :  { %6834 = vmatpush.bf16.msrb.mxu3 %v13369_v16  ;;  %6859 = vmatpush.bf16.msra.mxu1 %v11869_v8  ;;  %v12762_v20 = vld [vmem:[#allocation8 + $0x9a0] sm:$0xf0]  ;;  %v3511_v53 = vadd.f32 %v16464_v2, %v3498_v3  ;;  %v3536_v2 = vpop.f32.mrf.mxu0 }
 0x2c7   :  { %v15494_v62 = vld [vmem:[#allocation8 + $0xb84] sm:$0xf]  ;;  %v12765_v49 = vor.u32 %v15430_v60, %v12762_v20  ;;  %v16483_v60 = vpop.f32.mrf.mxu3 }
 0x2c8   :  { %6872 = vmatpush.bf16.msra.mxu2 %v12125_v17  ;;  %v13018_v33 = vld [vmem:[#allocation8 + $0xba0] sm:$0xf0]  ;;  %6848 = vmatpush.bf16.msra.mxu0 %v11549_v52  ;;  %v3524_v21 = vadd.f32 %v16466_v40, %v3511_v53 }
 0x2c9   :  { %v15358_v41 = vld [vmem:[#allocation8 + $0x744] sm:$0xf]  ;;  %v13021_v18 = vor.u32 %v15494_v62, %v13018_v33 }
 0x2ca   :  { %6835 = vmatpush.bf16.msrb.mxu3 %v13337_v30  ;;  %6860 = vmatpush.bf16.msra.mxu1 %v11837_v46  ;;  %v12474_v4 = vld [vmem:[#allocation8 + $0x760] sm:$0xf0]  ;;  %v3537_v47 = vadd.f32 %v3536_v2, %v3524_v21 }
 0x2cb   :  { %v15422_v6 = vld [vmem:[#allocation8 + $0x944] sm:$0xf]  ;;  %v12477_v38 = vor.u32 %v15358_v41, %v12474_v4  ;;  %6849 = vmatmul.bf16.vlgmr.msra.gmra.mxu0 %v16431_v24 }
 0x2cc   :  { %6873 = vmatpush.bf16.msra.mxu2 %v12093_v50  ;;  %6893 = vmatpush.bf16.msrb.mxu0 %v12797_v57  ;;  %v12730_v22 = vld [vmem:[#allocation8 + $0x960] sm:$0xf0]  ;;  %v3637_v15 = vmax.f32 %v3537_v47, 0.0 }
 0x2cd   :  { %v15486_v8 = vld [vmem:[#allocation8 + $0xb44] sm:$0xf]  ;;  %v12733_v23 = vor.u32 %v15422_v6, %v12730_v22 }
 0x2ce   :  { %6880 = vmatpush.bf16.msra.mxu3 %v12541_v36  ;;  %6861 = vmatpush.bf16.msra.mxu1 %v11805_v56  ;;  %v12986_v13 = vld [vmem:[#allocation8 + $0xb60] sm:$0xf0]  ;;  %v16478_v10 = vpack.c.bf16 %v3637_v15, %v3637_v15  ;;  %v3538_v41 = vpop.f32.mrf.mxu0  ;;  %v12000_v15 = vld [vmem:[#allocation8 + $0x388] sm:$0xf] }
 0x2cf   :  { %v15350_v14 = vld [vmem:[#allocation8 + $0x704] sm:$0xf]  ;;  %v12989_v42 = vor.u32 %v15486_v8, %v12986_v13 }
 0x2d0   :  { %6874 = vmatpush.bf16.msra.mxu2 %v12061_v0  ;;  %6894 = vmatpush.bf16.msrb.mxu0 %v12765_v49  ;;  %v12442_v16 = vld [vmem:[#allocation8 + $0x720] sm:$0xf0] }
 0x2d1   :  { %6862 = vmatmul.bf16.vlgmr.msra.gmra.mxu1 %v16433_v1  ;;  %v15414_v63 = vld [vmem:[#allocation8 + $0x904] sm:$0xf]  ;;  %v12445_v35 = vor.u32 %v15350_v14, %v12442_v16  ;;  %6823 = vmatmul.bf16.vlgmr.msrb.gmra.mxu2 %v16478_v10 }
 0x2d2   :  { %6906 = vmatpush.bf16.msrb.mxu1 %v13053_v5  ;;  %6881 = vmatpush.bf16.msra.mxu3 %v12509_v61  ;;  %v12698_v34 = vld [vmem:[#allocation8 + $0x920] sm:$0xf0]  ;;  %v16481_v5 = vpop.f32.mrf.mxu2 }
 0x2d3   :  { %v15478_v9 = vld [vmem:[#allocation8 + $0xb04] sm:$0xf]  ;;  %v12701_v25 = vor.u32 %v15414_v63, %v12698_v34 }
 0x2d4   :  { %v12954_v17 = vld [vmem:[#allocation8 + $0xb20] sm:$0xf0]  ;;  %6895 = vmatpush.bf16.msrb.mxu0 %v12733_v23 }
 0x2d5   :  { %v15342_v48 = vld [vmem:[#allocation8 + $0x6c4] sm:$0xf]  ;;  %v12957_v7 = vor.u32 %v15478_v9, %v12954_v17  ;;  %v15187_v9 = vld [vmem:[#allocation8 + $0x1e4] sm:$0xf0] }
 0x2d6   :  { %6907 = vmatpush.bf16.msrb.mxu1 %v13021_v18  ;;  %6882 = vmatpush.bf16.msra.mxu3 %v12477_v38  ;;  %v12410_v39 = vld [vmem:[#allocation8 + $0x6e0] sm:$0xf0]  ;;  %v3551_v38 = vpop.f32.mrf.mxu1  ;;  %v12032_v17 = vld [vmem:[#allocation8 + $0x3c8] sm:$0xf] }
 0x2d7   :  { %v15406_v28 = vld [vmem:[#allocation8 + $0x8c4] sm:$0xf]  ;;  %v12413_v30 = vor.u32 %v15342_v48, %v12410_v39  ;;  %v15155_v38 = vld [vmem:[#allocation8 + $0xe4] sm:$0xf0] }
 0x2d8   :  { %v12666_v46 = vld [vmem:[#allocation8 + $0x8e0] sm:$0xf0]  ;;  %6896 = vmatpush.bf16.msrb.mxu0 %v12701_v25  ;;  %v15251_v25 = vld [vmem:[#allocation8 + $0x3e4] sm:$0xf0] }
 0x2d9   :  { %v15470_v27 = vld [vmem:[#allocation8 + $0xac4] sm:$0xf]  ;;  %v12669_v40 = vor.u32 %v15406_v28, %v12666_v46  ;;  %v3577_v28 = vpop.f32.mrf.mxu3  ;;  %v629_v46 = vperm.slane %v16427_v19, 7  ;;  %v12033_v47 = vor.u32 %v15251_v25, %v12032_v17  ;;  %v15147_v25 = vld [vmem:[#allocation8 + $0xa4] sm:$0xf0] }
 0x2da   :  { %6908 = vmatpush.bf16.msrb.mxu1 %v12989_v42  ;;  %6883 = vmatpush.bf16.msra.mxu3 %v12445_v35  ;;  %v12922_v12 = vld [vmem:[#allocation8 + $0xae0] sm:$0xf0]  ;;  %v11776_v35 = vld [vmem:[#allocation8 + $0x1c8] sm:$0xf] }
 0x2db   :  { %v15566_v31 = vld [vmem:[#allocation8 + $0xdc4] sm:$0xf]  ;;  %v12925_v45 = vor.u32 %v15470_v27, %v12922_v12 }
 0x2dc   :  { %v13306_v32 = vld [vmem:[#allocation8 + $0xde0] sm:$0xf0]  ;;  %6897 = vmatpush.bf16.msrb.mxu0 %v12669_v40  ;;  %v15243_v40 = vld [vmem:[#allocation8 + $0x3a4] sm:$0xf0] }
 0x2dd   :  { %v15334_v36 = vld [vmem:[#allocation8 + $0x684] sm:$0xf]  ;;  %v13309_v50 = vor.u32 %v15566_v31, %v13306_v32  ;;  %v11744_v31 = vld [vmem:[#allocation8 + $0x188] sm:$0xf]  ;;  %v12001_v19 = vor.u32 %v15243_v40, %v12000_v15 }
 0x2de   :  { %v12378_v44 = vld [vmem:[#allocation8 + $0x6a0] sm:$0xf0]  ;;  %6909 = vmatpush.bf16.msrb.mxu1 %v12957_v7  ;;  %6884 = vmatpush.bf16.msra.mxu3 %v12413_v30  ;;  %v3564_v7 = vpop.f32.mrf.mxu2  ;;  %v11777_v30 = vor.u32 %v15187_v9, %v11776_v35  ;;  %v15179_v32 = vld [vmem:[#allocation8 + $0x1a4] sm:$0xf0] }
 0x2df   :  { %v15398_v51 = vld [vmem:[#allocation8 + $0x884] sm:$0xf]  ;;  %v12381_v58 = vor.u32 %v15334_v36, %v12378_v44  ;;  %6919 = vmatpush.bf16.msrb.mxu2 %v13309_v50  ;;  %v15307_v7 = vld [vmem:[#allocation8 + $0x5a4] sm:$0xf0] }
 0x2e0   :  { %v12634_v52 = vld [vmem:[#allocation8 + $0x8a0] sm:$0xf0] }
 0x2e1   :  { %v15462_v54 = vld [vmem:[#allocation8 + $0xa84] sm:$0xf]  ;;  %v12637_v59 = vor.u32 %v15398_v51, %v12634_v52  ;;  %v11712_v51 = vld [vmem:[#allocation8 + $0x148] sm:$0xf]  ;;  %6875 = vmatmul.bf16.vlgmr.msra.gmra.mxu2 %v16435_v26 }
 0x2e2   :  { %v12890_v55 = vld [vmem:[#allocation8 + $0xaa0] sm:$0xf0]  ;;  %6910 = vmatpush.bf16.msrb.mxu1 %v12925_v45  ;;  %6885 = vmatpush.bf16.msra.mxu3 %v12381_v58  ;;  %v11745_v45 = vor.u32 %v15179_v32, %v11744_v31  ;;  %v15171_v52 = vld [vmem:[#allocation8 + $0x164] sm:$0xf0] }
 0x2e3   :  { %v15558_v56 = vld [vmem:[#allocation8 + $0xd84] sm:$0xf]  ;;  %v12893_v62 = vor.u32 %v15462_v54, %v12890_v55  ;;  %6898 = vmatpush.bf16.msrb.mxu0 %v12637_v59  ;;  %v11968_v54 = vld [vmem:[#allocation8 + $0x348] sm:$0xf]  ;;  %v3550_v55 = vadd.f32 %v16476_v43, %v629_v46  ;;  %v11713_v59 = vor.u32 %v15171_v52, %v11712_v51 }
 0x2e4   :  { %v13274_v57 = vld [vmem:[#allocation8 + $0xda0] sm:$0xf0]  ;;  %v15299_v51 = vld [vmem:[#allocation8 + $0x564] sm:$0xf0] }
 0x2e5   :  { %v15326_v20 = vld [vmem:[#allocation8 + $0x644] sm:$0xf]  ;;  %v13277_v33 = vor.u32 %v15558_v56, %v13274_v57  ;;  %v15235_v56 = vld [vmem:[#allocation8 + $0x364] sm:$0xf0]  ;;  %v3563_v43 = vadd.f32 %v16481_v5, %v3550_v55 }
 0x2e6   :  { %v12346_v61 = vld [vmem:[#allocation8 + $0x660] sm:$0xf0]  ;;  %6911 = vmatpush.bf16.msrb.mxu1 %v12893_v62  ;;  %v11680_v62 = vld [vmem:[#allocation8 + $0x108] sm:$0xf] }
 0x2e7   :  { %v15390_v0 = vld [vmem:[#allocation8 + $0x844] sm:$0xf]  ;;  %v12349_v22 = vor.u32 %v15326_v20, %v12346_v61  ;;  %6920 = vmatpush.bf16.msrb.mxu2 %v13277_v33  ;;  %v11969_v20 = vor.u32 %v15235_v56, %v11968_v54  ;;  %v15163_v33 = vld [vmem:[#allocation8 + $0x124] sm:$0xf0] }
 0x2e8   :  { %v12602_v3 = vld [vmem:[#allocation8 + $0x860] sm:$0xf0]  ;;  %v12288_v5 = vld [vmem:[#allocation8 + $0x5c8] sm:$0xf] }
 0x2e9   :  { %v15454_v49 = vld [vmem:[#allocation8 + $0xa44] sm:$0xf]  ;;  %v12605_v8 = vor.u32 %v15390_v0, %v12602_v3  ;;  %6886 = vmatpush.bf16.msra.mxu3 %v12349_v22  ;;  %v11936_v0 = vld [vmem:[#allocation8 + $0x308] sm:$0xf] }
 0x2ea   :  { %v12858_v4 = vld [vmem:[#allocation8 + $0xa60] sm:$0xf0]  ;;  %v15227_v3 = vld [vmem:[#allocation8 + $0x324] sm:$0xf0] }
 0x2eb   :  { %v15550_v18 = vld [vmem:[#allocation8 + $0xd44] sm:$0xf]  ;;  %v12861_v14 = vor.u32 %v15454_v49, %v12858_v4  ;;  %6899 = vmatpush.bf16.msrb.mxu0 %v12605_v8  ;;  %v11681_v4 = vor.u32 %v15163_v33, %v11680_v62  ;;  %v11648_v22 = vld [vmem:[#allocation8 + $0xc8] sm:$0xf]  ;;  %v3627_v32 = vpop.f32.mrf.mxu3 }
 0x2ec   :  { %v13242_v6 = vld [vmem:[#allocation8 + $0xd60] sm:$0xf0]  ;;  %v11904_v8 = vld [vmem:[#allocation8 + $0x2c8] sm:$0xf]  ;;  %v11649_v35 = vor.u32 %v15155_v38, %v11648_v22 }
 0x2ed   :  { %v15382_v13 = vld [vmem:[#allocation8 + $0x804] sm:$0xf]  ;;  %v13245_v16 = vor.u32 %v15550_v18, %v13242_v6  ;;  %6912 = vmatpush.bf16.msrb.mxu1 %v12861_v14  ;;  %v11937_v18 = vor.u32 %v15227_v3, %v11936_v0  ;;  %v11552_v56 = vld [vmem:[#allocation8 + $0x8] sm:$0xf] }
 0x2ee   :  { %v15318_v53 = vld [vmem:[#allocation8 + $0x604] sm:$0xf]  ;;  %v15443_v0 = vld [vmem:[#allocation8 + $0x9e4] sm:$0xf0] }
 0x2ef   :  { %v12314_v23 = vld [vmem:[#allocation8 + $0x620] sm:$0xf0]  ;;  %6921 = vmatpush.bf16.msrb.mxu2 %v13245_v16 }
 0x2f0   :  { %v12570_v42 = vld [vmem:[#allocation8 + $0x820] sm:$0xf0]  ;;  %v12317_v21 = vor.u32 %v15318_v53, %v12314_v23  ;;  %v3588_v53 = vpop.f32.mrf.mxu0  ;;  %v15219_v23 = vld [vmem:[#allocation8 + $0x2e4] sm:$0xf0] }
 0x2f1   :  { %v15446_v63 = vld [vmem:[#allocation8 + $0xa04] sm:$0xf]  ;;  %v12573_v2 = vor.u32 %v15382_v13, %v12570_v42  ;;  %v3576_v13 = vadd.f32 %v16483_v60, %v3563_v43  ;;  %v3601_v42 = vpop.f32.mrf.mxu1  ;;  %v11905_v9 = vor.u32 %v15219_v23, %v11904_v8  ;;  %v12256_v60 = vld [vmem:[#allocation8 + $0x588] sm:$0xf] }
 0x2f2   :  { %v12826_v34 = vld [vmem:[#allocation8 + $0xa20] sm:$0xf0]  ;;  %6887 = vmatpush.bf16.msra.mxu3 %v12317_v21  ;;  %v11616_v21 = vld [vmem:[#allocation8 + $0x88] sm:$0xf]  ;;  %v12257_v40 = vor.u32 %v15307_v7, %v12256_v60 }
 0x2f3   :  { %v15542_v48 = vld [vmem:[#allocation8 + $0xd04] sm:$0xf]  ;;  %v12829_v27 = vor.u32 %v15446_v63, %v12826_v34  ;;  %6900 = vmatpush.bf16.msrb.mxu0 %v12573_v2  ;;  %v15315_v63 = vld [vmem:[#allocation8 + $0x5e4] sm:$0xf0]  ;;  %v3589_v34 = vadd.f32 %v3588_v53, %v3576_v13  ;;  %v11617_v46 = vor.u32 %v15147_v25, %v11616_v21  ;;  %v3629_v23 = vpop.f32.mrf.mxu3 }
 0x2f4   :  { %v13210_v39 = vld [vmem:[#allocation8 + $0xd20] sm:$0xf0]  ;;  %v15211_v2 = vld [vmem:[#allocation8 + $0x2a4] sm:$0xf0] }
 0x2f5   :  { %v13213_v12 = vor.u32 %v15542_v48, %v13210_v39  ;;  %v15534_v36 = vld [vmem:[#allocation8 + $0xcc4] sm:$0xf]  ;;  %6913 = vmatpush.bf16.msrb.mxu1 %v12829_v27  ;;  %v12289_v48 = vor.u32 %v15315_v63, %v12288_v5  ;;  %v11872_v39 = vld [vmem:[#allocation8 + $0x288] sm:$0xf]  ;;  %v3602_v28 = vadd.f32 %v3601_v42, %v3589_v34  ;;  %v3614_v27 = vpop.f32.mrf.mxu2 }
 0x2f6   :  { %v13178_v44 = vld [vmem:[#allocation8 + $0xce0] sm:$0xf0]  ;;  %6901 = vmatmul.bf16.vlgmr.msrb.gmra.mxu0 %v16453_v37  ;;  %v13056_v43 = vld [vmem:[#allocation8 + $0xbc8] sm:$0xf] }
 0x2f7   :  { %6945 = vmatpush.bf16.msra.mxu0 %v11777_v30  ;;  %6922 = vmatpush.bf16.msrb.mxu2 %v13213_v12  ;;  %v13181_v50 = vor.u32 %v15534_v36, %v13178_v44  ;;  %v15526_v57 = vld [vmem:[#allocation8 + $0xc84] sm:$0xf]  ;;  %v11873_v30 = vor.u32 %v15211_v2, %v11872_v39  ;;  %v15139_v12 = vld [vmem:[#allocation8 + $0x64] sm:$0xf0]  ;;  %v3615_v31 = vadd.f32 %v3614_v27, %v3602_v28 }
 0x2f8   :  { %v13146_v58 = vld [vmem:[#allocation8 + $0xca0] sm:$0xf0]  ;;  %6914 = vmatmul.bf16.vlgmr.msrb.gmra.mxu1 %v16455_v11  ;;  %v3590_v15 = vpop.f32.mrf.mxu0  ;;  %v11840_v36 = vld [vmem:[#allocation8 + $0x248] sm:$0xf] }
 0x2f9   :  { %6958 = vmatpush.bf16.msra.mxu1 %v12033_v47  ;;  %v13149_v61 = vor.u32 %v15526_v57, %v13146_v58  ;;  %v15518_v49 = vld [vmem:[#allocation8 + $0xc44] sm:$0xf]  ;;  %v11584_v47 = vld [vmem:[#allocation8 + $0x48] sm:$0xf]  ;;  %v3628_v52 = vadd.f32 %v3627_v32, %v3615_v31 }
 0x2fa   :  { %v13114_v41 = vld [vmem:[#allocation8 + $0xc60] sm:$0xf0]  ;;  %v15203_v44 = vld [vmem:[#allocation8 + $0x264] sm:$0xf0]  ;;  %v11585_v54 = vor.u32 %v15139_v12, %v11584_v47 }
 0x2fb   :  { %6946 = vmatpush.bf16.msra.mxu0 %v11745_v45  ;;  %6923 = vmatpush.bf16.msrb.mxu2 %v13181_v50  ;;  %v13117_v6 = vor.u32 %v15518_v49, %v13114_v41  ;;  %v15510_v14 = vld [vmem:[#allocation8 + $0xc04] sm:$0xf]  ;;  %v3603_v45 = vpop.f32.mrf.mxu1  ;;  %v12224_v50 = vld [vmem:[#allocation8 + $0x548] sm:$0xf]  ;;  %v11841_v58 = vor.u32 %v15203_v44, %v11840_v36  ;;  %v3638_v62 = vmax.f32 %v3628_v52, 0.0 }
 0x2fc   :  { %v13082_v16 = vld [vmem:[#allocation8 + $0xc20] sm:$0xf0]  ;;  %v15131_v57 = vld [vmem:[#allocation8 + $0x24] sm:$0xf0]  ;;  %v12225_v33 = vor.u32 %v15299_v51, %v12224_v50 }
 0x2fd   :  { %6959 = vmatpush.bf16.msra.mxu1 %v12001_v19  ;;  %v13085_v17 = vor.u32 %v15510_v14, %v13082_v16  ;;  %v15630_v19 = vld [vmem:[#allocation8 + $0xfc4] sm:$0xf]  ;;  %v15507_v49 = vld [vmem:[#allocation8 + $0xbe4] sm:$0xf0]  ;;  %v3616_v8 = vpop.f32.mrf.mxu2 }
 0x2fe   :  { %v13562_v55 = vld [vmem:[#allocation8 + $0xfe0] sm:$0xf0]  ;;  %v12192_v41 = vld [vmem:[#allocation8 + $0x508] sm:$0xf]  ;;  %v13057_v14 = vor.u32 %v15507_v49, %v13056_v43 }
 0x2ff   :  { %6947 = vmatpush.bf16.msra.mxu0 %v11713_v59  ;;  %6924 = vmatpush.bf16.msrb.mxu2 %v13149_v61  ;;  %v11808_v59 = vld [vmem:[#allocation8 + $0x208] sm:$0xf]  ;;  %v13565_v3 = vor.u32 %v15630_v19, %v13562_v55  ;;  %v15622_v22 = vld [vmem:[#allocation8 + $0xf84] sm:$0xf] }
 0x300   :  { %v12800_v61 = vld [vmem:[#allocation8 + $0x9c8] sm:$0xf]  ;;  %v13530_v38 = vld [vmem:[#allocation8 + $0xfa0] sm:$0xf0] }
 0x301   :  { %6960 = vmatpush.bf16.msra.mxu1 %v11969_v20  ;;  %v15195_v20 = vld [vmem:[#allocation8 + $0x224] sm:$0xf0]  ;;  %v12801_v53 = vor.u32 %v15443_v0, %v12800_v61  ;;  %v13533_v34 = vor.u32 %v15622_v22, %v13530_v38  ;;  %v15614_v21 = vld [vmem:[#allocation8 + $0xf44] sm:$0xf] }
 0x302   :  { %v11809_v13 = vor.u32 %v15195_v20, %v11808_v59  ;;  %v12768_v42 = vld [vmem:[#allocation8 + $0x988] sm:$0xf]  ;;  %v13498_v25 = vld [vmem:[#allocation8 + $0xf60] sm:$0xf0] }
 0x303   :  { %6948 = vmatpush.bf16.msra.mxu0 %v11681_v4  ;;  %6925 = vmatpush.bf16.msrb.mxu2 %v13117_v6  ;;  %v15291_v4 = vld [vmem:[#allocation8 + $0x524] sm:$0xf0]  ;;  %v11553_v6 = vor.u32 %v15131_v57, %v11552_v56  ;;  %v13501_v27 = vor.u32 %v15614_v21, %v13498_v25  ;;  %v16497_v12 = vld [vmem:[#allocation10] sm:$0xff] }
 0x304   :  { %v12193_v16 = vor.u32 %v15291_v4, %v12192_v41  ;;  %v15435_v5 = vld [vmem:[#allocation8 + $0x9a4] sm:$0xf0]  ;;  %v15606_v31 = vld [vmem:[#allocation8 + $0xf04] sm:$0xf]  ;;  %v4161_v44 = vperm.slane %v16497_v12, 0  ;;  %v6759_v4 = vpop.f32.mrf.mxu1 }
 0x305   :  { %6961 = vmatpush.bf16.msra.mxu1 %v11937_v18  ;;  %v16493_v18 = vpack.c.bf16 %v3638_v62, %v3638_v62  ;;  %v13024_v63 = vld [vmem:[#allocation8 + $0xb88] sm:$0xf]  ;;  %v13466_v32 = vld [vmem:[#allocation8 + $0xf20] sm:$0xf0]  ;;  %v6746_v62 = vpop.f32.mrf.mxu0 }
 0x306   :  { %v12736_v39 = vld [vmem:[#allocation8 + $0x948] sm:$0xf]  ;;  %v13469_v50 = vor.u32 %v15606_v31, %v13466_v32  ;;  %v13434_v55 = vld [vmem:[#allocation8 + $0xee0] sm:$0xf0]  ;;  %v6747_v41 = vadd.f32 %v6746_v62, %v4161_v44  ;;  %v11778_v62 = vld [vmem:[#allocation8 + $0x1e8] sm:$0xf0] }
 0x307   :  { %6949 = vmatpush.bf16.msra.mxu0 %v11649_v35  ;;  %6926 = vmatpush.bf16.msrb.mxu2 %v13085_v17  ;;  %v15499_v35 = vld [vmem:[#allocation8 + $0xba4] sm:$0xf0]  ;;  %v15590_v49 = vld [vmem:[#allocation8 + $0xe84] sm:$0xf] }
 0x308   :  { %6836 = vmatmul.bf16.vlgmr.msrb.gmra.mxu3 %v16493_v18  ;;  %v15283_v17 = vld [vmem:[#allocation8 + $0x4e4] sm:$0xf0]  ;;  %v13025_v2 = vor.u32 %v15499_v35, %v13024_v63  ;;  %v6760_v23 = vadd.f32 %v6759_v4, %v6747_v41  ;;  %v13370_v21 = vld [vmem:[#allocation8 + $0xe60] sm:$0xf0] }
 0x309   :  { %6962 = vmatpush.bf16.msra.mxu1 %v11905_v9  ;;  %6932 = vmatpush.bf16.msrb.mxu3 %v13565_v3  ;;  %v12160_v9 = vld [vmem:[#allocation8 + $0x4c8] sm:$0xf]  ;;  %v13338_v44 = vld [vmem:[#allocation8 + $0xe20] sm:$0xf0] }
 0x30a   :  { %6927 = vmatmul.bf16.vlgmr.msrb.gmra.mxu2 %v16478_v10  ;;  %v12161_v60 = vor.u32 %v15283_v17, %v12160_v9  ;;  %v15427_v7 = vld [vmem:[#allocation8 + $0x964] sm:$0xf0]  ;;  %v15582_v17 = vld [vmem:[#allocation8 + $0xe44] sm:$0xf] }
 0x30b   :  { %6971 = vmatpush.bf16.msra.mxu2 %v12289_v48  ;;  %6950 = vmatpush.bf16.msra.mxu0 %v11617_v46  ;;  %v12769_v48 = vor.u32 %v15435_v5, %v12768_v42  ;;  %v12992_v28 = vld [vmem:[#allocation8 + $0xb48] sm:$0xf]  ;;  %v12737_v15 = vor.u32 %v15427_v7, %v12736_v39 }
 0x30c   :  { %v15491_v46 = vld [vmem:[#allocation8 + $0xb64] sm:$0xf0] }
 0x30d   :  { %6963 = vmatpush.bf16.msra.mxu1 %v11873_v30  ;;  %6933 = vmatpush.bf16.msrb.mxu3 %v13533_v34  ;;  %v12128_v30 = vld [vmem:[#allocation8 + $0x488] sm:$0xf] }
 0x30e   :  { %v15275_v47 = vld [vmem:[#allocation8 + $0x4a4] sm:$0xf0] }
 0x30f   :  { %6972 = vmatpush.bf16.msra.mxu2 %v12257_v40  ;;  %6951 = vmatpush.bf16.msra.mxu0 %v11585_v54  ;;  %v12993_v40 = vor.u32 %v15491_v46, %v12992_v28  ;;  %v12129_v36 = vor.u32 %v15275_v47, %v12128_v30  ;;  %v12704_v45 = vld [vmem:[#allocation8 + $0x908] sm:$0xf]  ;;  %v15598_v54 = vld [vmem:[#allocation8 + $0xec4] sm:$0xf]  ;;  %v6748_v30 = vpop.f32.mrf.mxu0  ;;  %v13373_v47 = vor.u32 %v15582_v17, %v13370_v21 }
 0x310   :  { %v15419_v19 = vld [vmem:[#allocation8 + $0x924] sm:$0xf0] }
 0x311   :  { %6964 = vmatpush.bf16.msra.mxu1 %v11841_v58  ;;  %6934 = vmatpush.bf16.msrb.mxu3 %v13501_v27  ;;  %v12960_v51 = vld [vmem:[#allocation8 + $0xb08] sm:$0xf]  ;;  %v12705_v58 = vor.u32 %v15419_v19, %v12704_v45  ;;  %v6785_v27 = vpop.f32.mrf.mxu3 }
 0x312   :  { %v15483_v52 = vld [vmem:[#allocation8 + $0xb24] sm:$0xf0] }
 0x313   :  { %6973 = vmatpush.bf16.msra.mxu2 %v12225_v33  ;;  %6952 = vmatpush.bf16.msra.mxu0 %v11553_v6  ;;  %v12096_v56 = vld [vmem:[#allocation8 + $0x448] sm:$0xf]  ;;  %v12961_v59 = vor.u32 %v15483_v52, %v12960_v51  ;;  %v13437_v33 = vor.u32 %v15598_v54, %v13434_v55  ;;  %v13402_v6 = vld [vmem:[#allocation8 + $0xea0] sm:$0xf0] }
 0x314   :  { %v15267_v57 = vld [vmem:[#allocation8 + $0x464] sm:$0xf0]  ;;  %v13405_v5 = vor.u32 %v15590_v49, %v13402_v6 }
 0x315   :  { %6965 = vmatpush.bf16.msra.mxu1 %v11809_v13  ;;  %v12672_v20 = vld [vmem:[#allocation8 + $0x8c8] sm:$0xf]  ;;  %6935 = vmatpush.bf16.msrb.mxu3 %v13469_v50  ;;  %v12097_v0 = vor.u32 %v15267_v57, %v12096_v56 }
 0x316   :  { %6953 = vmatmul.bf16.vlgmr.msra.gmra.mxu0 %v16431_v24  ;;  %v15411_v61 = vld [vmem:[#allocation8 + $0x8e4] sm:$0xf0] }
 0x317   :  { %6997 = vmatpush.bf16.msrb.mxu0 %v12801_v53  ;;  %6974 = vmatpush.bf16.msra.mxu2 %v12193_v16  ;;  %v12928_v43 = vld [vmem:[#allocation8 + $0xac8] sm:$0xf]  ;;  %v12673_v8 = vor.u32 %v15411_v61, %v12672_v20  ;;  %v15183_v61 = vld [vmem:[#allocation8 + $0x1cc] sm:$0xf] }
 0x318   :  { %6966 = vmatmul.bf16.vlgmr.msra.gmra.mxu1 %v16433_v1  ;;  %v15475_v3 = vld [vmem:[#allocation8 + $0xae4] sm:$0xf0]  ;;  %6888 = vmatmul.bf16.vlgmr.msra.gmra.mxu3 %v16438_v29 }
 0x319   :  { %7010 = vmatpush.bf16.msrb.mxu1 %v13057_v14  ;;  %v12064_v22 = vld [vmem:[#allocation8 + $0x408] sm:$0xf]  ;;  %v12929_v14 = vor.u32 %v15475_v3, %v12928_v43  ;;  %6936 = vmatpush.bf16.msrb.mxu3 %v13437_v33  ;;  %v15247_v43 = vld [vmem:[#allocation8 + $0x3cc] sm:$0xf] }
 0x31a   :  { %v15259_v38 = vld [vmem:[#allocation8 + $0x424] sm:$0xf0]  ;;  %v12034_v3 = vld [vmem:[#allocation8 + $0x3e8] sm:$0xf0] }
 0x31b   :  { %6998 = vmatpush.bf16.msrb.mxu0 %v12769_v48  ;;  %6975 = vmatpush.bf16.msra.mxu2 %v12161_v60  ;;  %v13312_v13 = vld [vmem:[#allocation8 + $0xdc8] sm:$0xf]  ;;  %v12065_v63 = vor.u32 %v15259_v38, %v12064_v22 }
 0x31c   :  { %v15571_v53 = vld [vmem:[#allocation8 + $0xde4] sm:$0xf0] }
 0x31d   :  { %7011 = vmatpush.bf16.msrb.mxu1 %v13025_v2  ;;  %v12640_v16 = vld [vmem:[#allocation8 + $0x888] sm:$0xf]  ;;  %v13313_v9 = vor.u32 %v15571_v53, %v13312_v13  ;;  %v6772_v2 = vpop.f32.mrf.mxu2  ;;  %6937 = vmatpush.bf16.msrb.mxu3 %v13405_v5  ;;  %v6787_v13 = vpop.f32.mrf.mxu3  ;;  %v11781_v53 = vor.u32 %v15183_v61, %v11778_v62 }
 0x31e   :  { %v15403_v42 = vld [vmem:[#allocation8 + $0x8a4] sm:$0xf0]  ;;  %v6773_v46 = vadd.f32 %v6772_v2, %v6760_v23  ;;  %v12037_v23 = vor.u32 %v15247_v43, %v12034_v3  ;;  %v11714_v2 = vld [vmem:[#allocation8 + $0x168] sm:$0xf0] }
 0x31f   :  { %6999 = vmatpush.bf16.msrb.mxu0 %v12737_v15  ;;  %6976 = vmatpush.bf16.msra.mxu2 %v12129_v36  ;;  %v12896_v34 = vld [vmem:[#allocation8 + $0xa88] sm:$0xf]  ;;  %v12641_v25 = vor.u32 %v15403_v42, %v12640_v16  ;;  %v6761_v15 = vpop.f32.mrf.mxu1  ;;  %v15574_v36 = vld [vmem:[#allocation8 + $0xe04] sm:$0xf]  ;;  %v11746_v16 = vld [vmem:[#allocation8 + $0x1a8] sm:$0xf0] }
 0x320   :  { %v15467_v35 = vld [vmem:[#allocation8 + $0xaa4] sm:$0xf0]  ;;  %v16502_v19 = vadd.f32 %v6785_v27, %v6773_v46  ;;  %v11970_v46 = vld [vmem:[#allocation8 + $0x368] sm:$0xf0] }
 0x321   :  { %7012 = vmatpush.bf16.msrb.mxu1 %v12993_v40  ;;  %v13280_v48 = vld [vmem:[#allocation8 + $0xd88] sm:$0xf]  ;;  %v12897_v60 = vor.u32 %v15467_v35, %v12896_v34  ;;  %6938 = vmatpush.bf16.msrb.mxu3 %v13373_v47  ;;  %v12002_v34 = vld [vmem:[#allocation8 + $0x3a8] sm:$0xf0] }
 0x322   :  { %v15563_v39 = vld [vmem:[#allocation8 + $0xda4] sm:$0xf0] }
 0x323   :  { %7000 = vmatpush.bf16.msrb.mxu0 %v12705_v58  ;;  %6977 = vmatpush.bf16.msra.mxu2 %v12097_v0  ;;  %v12608_v7 = vld [vmem:[#allocation8 + $0x848] sm:$0xf]  ;;  %v13281_v40 = vor.u32 %v15563_v39, %v13280_v48  ;;  %v15167_v39 = vld [vmem:[#allocation8 + $0x14c] sm:$0xf] }
 0x324   :  { %v15395_v28 = vld [vmem:[#allocation8 + $0x864] sm:$0xf0] }
 0x325   :  { %7013 = vmatpush.bf16.msrb.mxu1 %v12961_v59  ;;  %v12864_v31 = vld [vmem:[#allocation8 + $0xa48] sm:$0xf]  ;;  %v12609_v50 = vor.u32 %v15395_v28, %v12608_v7  ;;  %v13341_v59 = vor.u32 %v15574_v36, %v13338_v44  ;;  %v6774_v38 = vpop.f32.mrf.mxu2  ;;  %v15231_v28 = vld [vmem:[#allocation8 + $0x34c] sm:$0xf] }
 0x326   :  { %v15459_v32 = vld [vmem:[#allocation8 + $0xa64] sm:$0xf0]  ;;  %v11973_v15 = vor.u32 %v15231_v28, %v11970_v46  ;;  %v11682_v36 = vld [vmem:[#allocation8 + $0x128] sm:$0xf0] }
 0x327   :  { %7001 = vmatpush.bf16.msrb.mxu0 %v12673_v8  ;;  %6978 = vmatpush.bf16.msra.mxu2 %v12065_v63  ;;  %v12544_v45 = vld [vmem:[#allocation8 + $0x7c8] sm:$0xf]  ;;  %v12865_v55 = vor.u32 %v15459_v32, %v12864_v31  ;;  %v15239_v63 = vld [vmem:[#allocation8 + $0x38c] sm:$0xf]  ;;  %v11717_v32 = vor.u32 %v15167_v39, %v11714_v2 }
 0x328   :  { %v15379_v51 = vld [vmem:[#allocation8 + $0x7e4] sm:$0xf0]  ;;  %6939 = vmatpush.bf16.msrb.mxu3 %v13341_v59  ;;  %v12005_v48 = vor.u32 %v15239_v63, %v12002_v34  ;;  %v15151_v59 = vld [vmem:[#allocation8 + $0xcc] sm:$0xf]  ;;  %v6798_v3 = vpop.f32.mrf.mxu0 }
 0x329   :  { %7014 = vmatpush.bf16.msrb.mxu1 %v12929_v14  ;;  %v13248_v52 = vld [vmem:[#allocation8 + $0xd48] sm:$0xf]  ;;  %v12545_v33 = vor.u32 %v15379_v51, %v12544_v45  ;;  %v15175_v14 = vld [vmem:[#allocation8 + $0x18c] sm:$0xf] }
 0x32a   :  { %v15555_v54 = vld [vmem:[#allocation8 + $0xd64] sm:$0xf0]  ;;  %6979 = vmatmul.bf16.vlgmr.msra.gmra.mxu2 %v16435_v26  ;;  %v11938_v51 = vld [vmem:[#allocation8 + $0x328] sm:$0xf0] }
 0x32b   :  { %7023 = vmatpush.bf16.msrb.mxu2 %v13313_v9  ;;  %7002 = vmatpush.bf16.msrb.mxu0 %v12641_v25  ;;  %v12576_v56 = vld [vmem:[#allocation8 + $0x808] sm:$0xf]  ;;  %v13249_v0 = vor.u32 %v15555_v54, %v13248_v52  ;;  %v11749_v25 = vor.u32 %v15175_v14, %v11746_v16  ;;  %v15311_v38 = vld [vmem:[#allocation8 + $0x5cc] sm:$0xf] }
 0x32c   :  { %v15387_v57 = vld [vmem:[#allocation8 + $0x824] sm:$0xf0]  ;;  %6984 = vmatpush.bf16.msra.mxu3 %v12545_v33  ;;  %v15215_v33 = vld [vmem:[#allocation8 + $0x2cc] sm:$0xf] }
 0x32d   :  { %7015 = vmatpush.bf16.msrb.mxu1 %v12897_v60  ;;  %v12832_v58 = vld [vmem:[#allocation8 + $0xa08] sm:$0xf]  ;;  %v12577_v41 = vor.u32 %v15387_v57, %v12576_v56  ;;  %6940 = vmatmul.bf16.vlgmr.msrb.gmra.mxu3 %v16493_v18  ;;  %v15207_v63 = vld [vmem:[#allocation8 + $0x28c] sm:$0xf] }
 0x32e   :  { %v15451_v20 = vld [vmem:[#allocation8 + $0xa24] sm:$0xf0]  ;;  %v11842_v28 = vld [vmem:[#allocation8 + $0x268] sm:$0xf0] }
 0x32f   :  { %7024 = vmatpush.bf16.msrb.mxu2 %v13281_v40  ;;  %v12512_v49 = vld [vmem:[#allocation8 + $0x788] sm:$0xf]  ;;  %7003 = vmatpush.bf16.msrb.mxu0 %v12609_v50  ;;  %v12833_v8 = vor.u32 %v15451_v20, %v12832_v58  ;;  %v15159_v40 = vld [vmem:[#allocation8 + $0x10c] sm:$0xf] }
 0x330   :  { %v15371_v4 = vld [vmem:[#allocation8 + $0x7a4] sm:$0xf0]  ;;  %v15223_v50 = vld [vmem:[#allocation8 + $0x30c] sm:$0xf]  ;;  %v11685_v57 = vor.u32 %v15159_v40, %v11682_v36  ;;  %v6800_v46 = vpop.f32.mrf.mxu0 }
 0x331   :  { %v13216_v6 = vld [vmem:[#allocation8 + $0xd08] sm:$0xf]  ;;  %7016 = vmatpush.bf16.msrb.mxu1 %v12865_v55  ;;  %v12513_v42 = vor.u32 %v15371_v4, %v12512_v49  ;;  %v11941_v58 = vor.u32 %v15223_v50, %v11938_v51  ;;  %v11650_v20 = vld [vmem:[#allocation8 + $0xe8] sm:$0xf0] }
 0x332   :  { %v15547_v22 = vld [vmem:[#allocation8 + $0xd24] sm:$0xf0]  ;;  %v11653_v13 = vor.u32 %v15151_v59, %v11650_v20  ;;  %v15295_v40 = vld [vmem:[#allocation8 + $0x54c] sm:$0xf] }
 0x333   :  { %7025 = vmatpush.bf16.msrb.mxu2 %v13249_v0  ;;  %v13217_v5 = vor.u32 %v15547_v22, %v13216_v6  ;;  %v12480_v35 = vld [vmem:[#allocation8 + $0x748] sm:$0xf]  ;;  %7004 = vmatpush.bf16.msrb.mxu0 %v12577_v41  ;;  %v11906_v0 = vld [vmem:[#allocation8 + $0x2e8] sm:$0xf0]  ;;  %v6799_v6 = vadd.f32 %v6798_v3, %v16502_v19  ;;  %v6811_v22 = vpop.f32.mrf.mxu1 }
 0x334   :  { %v15363_v9 = vld [vmem:[#allocation8 + $0x764] sm:$0xf0]  ;;  %6985 = vmatpush.bf16.msra.mxu3 %v12513_v42  ;;  %v15143_v42 = vld [vmem:[#allocation8 + $0x8c] sm:$0xf] }
 0x335   :  { %v13184_v17 = vld [vmem:[#allocation8 + $0xcc8] sm:$0xf]  ;;  %7017 = vmatpush.bf16.msrb.mxu1 %v12833_v8  ;;  %v12481_v60 = vor.u32 %v15363_v9, %v12480_v35  ;;  %v12290_v8 = vld [vmem:[#allocation8 + $0x5e8] sm:$0xf0] }
 0x336   :  { %v15539_v21 = vld [vmem:[#allocation8 + $0xce4] sm:$0xf0]  ;;  %7005 = vmatmul.bf16.vlgmr.msrb.gmra.mxu0 %v16453_v37  ;;  %v12293_v34 = vor.u32 %v15311_v38, %v12290_v8  ;;  %v11874_v35 = vld [vmem:[#allocation8 + $0x2a8] sm:$0xf0] }
 0x337   :  { %7049 = vmatpush.bf16.msra.mxu0 %v11781_v53  ;;  %7026 = vmatpush.bf16.msrb.mxu2 %v13217_v5  ;;  %v13185_v7 = vor.u32 %v15539_v21, %v13184_v17  ;;  %v12448_v27 = vld [vmem:[#allocation8 + $0x708] sm:$0xf]  ;;  %v11909_v53 = vor.u32 %v15215_v33, %v11906_v0  ;;  %v11618_v5 = vld [vmem:[#allocation8 + $0xa8] sm:$0xf0]  ;;  %v11877_v39 = vor.u32 %v15207_v63, %v11874_v35 }
 0x338   :  { %7018 = vmatmul.bf16.vlgmr.msrb.gmra.mxu1 %v16455_v11  ;;  %v15355_v30 = vld [vmem:[#allocation8 + $0x724] sm:$0xf0]  ;;  %6986 = vmatpush.bf16.msra.mxu3 %v12481_v60  ;;  %v15303_v17 = vld [vmem:[#allocation8 + $0x58c] sm:$0xf] }
 0x339   :  { %7062 = vmatpush.bf16.msra.mxu1 %v12037_v23  ;;  %v13152_v47 = vld [vmem:[#allocation8 + $0xc88] sm:$0xf]  ;;  %v12449_v44 = vor.u32 %v15355_v30, %v12448_v27  ;;  %v16509_v23 = vadd.f32 %v6811_v22, %v6799_v6  ;;  %v12258_v21 = vld [vmem:[#allocation8 + $0x5a8] sm:$0xf0] }
 0x33a   :  { %v15531_v31 = vld [vmem:[#allocation8 + $0xca4] sm:$0xf0]  ;;  %v11586_v60 = vld [vmem:[#allocation8 + $0x68] sm:$0xf0]  ;;  %v12261_v27 = vor.u32 %v15303_v17, %v12258_v21 }
 0x33b   :  { %7050 = vmatpush.bf16.msra.mxu0 %v11749_v25  ;;  %7027 = vmatpush.bf16.msrb.mxu2 %v13185_v7  ;;  %v13153_v45 = vor.u32 %v15531_v31, %v13152_v47  ;;  %v12416_v52 = vld [vmem:[#allocation8 + $0x6c8] sm:$0xf]  ;;  %v11621_v25 = vor.u32 %v15143_v42, %v11618_v5  ;;  %v15199_v7 = vld [vmem:[#allocation8 + $0x24c] sm:$0xf] }
 0x33c   :  { %v15347_v54 = vld [vmem:[#allocation8 + $0x6e4] sm:$0xf0]  ;;  %6987 = vmatpush.bf16.msra.mxu3 %v12449_v44  ;;  %v12226_v36 = vld [vmem:[#allocation8 + $0x568] sm:$0xf0]  ;;  %v11845_v50 = vor.u32 %v15199_v7, %v11842_v28 }
 0x33d   :  { %7063 = vmatpush.bf16.msra.mxu1 %v12005_v48  ;;  %v13120_v55 = vld [vmem:[#allocation8 + $0xc48] sm:$0xf]  ;;  %v12417_v61 = vor.u32 %v15347_v54, %v12416_v52  ;;  %v15135_v48 = vld [vmem:[#allocation8 + $0x4c] sm:$0xf] }
 0x33e   :  { %v15523_v56 = vld [vmem:[#allocation8 + $0xc64] sm:$0xf0]  ;;  %v11589_v44 = vor.u32 %v15135_v48, %v11586_v60  ;;  %v11554_v52 = vld [vmem:[#allocation8 + $0x28] sm:$0xf0] }
 0x33f   :  { %7051 = vmatpush.bf16.msra.mxu0 %v11717_v32  ;;  %7028 = vmatpush.bf16.msrb.mxu2 %v13153_v45  ;;  %v13121_v62 = vor.u32 %v15523_v56, %v13120_v55  ;;  %v12384_v43 = vld [vmem:[#allocation8 + $0x688] sm:$0xf]  ;;  %v6813_v32 = vpop.f32.mrf.mxu1  ;;  %v15127_v45 = vld [vmem:[#allocation8 + $0xc] sm:$0xf] }
 0x340   :  { %v15339_v49 = vld [vmem:[#allocation8 + $0x6a4] sm:$0xf0]  ;;  %6988 = vmatpush.bf16.msra.mxu3 %v12417_v61  ;;  %v15191_v54 = vld [vmem:[#allocation8 + $0x20c] sm:$0xf]  ;;  %v11557_v0 = vor.u32 %v15127_v45, %v11554_v52 }
 0x341   :  { %7064 = vmatpush.bf16.msra.mxu1 %v11973_v15  ;;  %v13088_v41 = vld [vmem:[#allocation8 + $0xc08] sm:$0xf]  ;;  %v12385_v14 = vor.u32 %v15339_v49, %v12384_v43  ;;  %v11810_v55 = vld [vmem:[#allocation8 + $0x228] sm:$0xf0] }
 0x342   :  { %v15515_v4 = vld [vmem:[#allocation8 + $0xc24] sm:$0xf0]  ;;  %v12802_v59 = vld [vmem:[#allocation8 + $0x9e8] sm:$0xf0]  ;;  %v11813_v49 = vor.u32 %v15191_v54, %v11810_v55 }
 0x343   :  { %7052 = vmatpush.bf16.msra.mxu0 %v11685_v57  ;;  %7029 = vmatpush.bf16.msrb.mxu2 %v13121_v62  ;;  %v13089_v16 = vor.u32 %v15515_v4, %v13088_v41  ;;  %v12352_v9 = vld [vmem:[#allocation8 + $0x648] sm:$0xf]  ;;  %v12229_v57 = vor.u32 %v15295_v40, %v12226_v36  ;;  %v15503_v20 = vld [vmem:[#allocation8 + $0xbcc] sm:$0xf]  ;;  %v4162_v36 = vperm.slane %v16497_v12, 1 }
 0x344   :  { %v15331_v19 = vld [vmem:[#allocation8 + $0x664] sm:$0xf0]  ;;  %6989 = vmatpush.bf16.msra.mxu3 %v12385_v14  ;;  %v13058_v61 = vld [vmem:[#allocation8 + $0xbe8] sm:$0xf0] }
 0x345   :  { %7065 = vmatpush.bf16.msra.mxu1 %v11941_v58  ;;  %v12353_v2 = vor.u32 %v15331_v19, %v12352_v9  ;;  %v12320_v30 = vld [vmem:[#allocation8 + $0x608] sm:$0xf]  ;;  %v15439_v58 = vld [vmem:[#allocation8 + $0x9cc] sm:$0xf]  ;;  %v13061_v4 = vor.u32 %v15503_v20, %v13058_v61 }
 0x346   :  { %v15323_v47 = vld [vmem:[#allocation8 + $0x624] sm:$0xf0]  ;;  %v15287_v43 = vld [vmem:[#allocation8 + $0x50c] sm:$0xf]  ;;  %v12805_v41 = vor.u32 %v15439_v58, %v12802_v59 }
 0x347   :  { %7053 = vmatpush.bf16.msra.mxu0 %v11653_v13  ;;  %7030 = vmatpush.bf16.msrb.mxu2 %v13089_v16  ;;  %v13568_v31 = vld [vmem:[#allocation8 + $0xfc8] sm:$0xf]  ;;  %v12321_v51 = vor.u32 %v15323_v47, %v12320_v30  ;;  %v12194_v3 = vld [vmem:[#allocation8 + $0x528] sm:$0xf0] }
 0x348   :  { %v15635_v15 = vld [vmem:[#allocation8 + $0xfe4] sm:$0xf0]  ;;  %6990 = vmatpush.bf16.msra.mxu3 %v12353_v2  ;;  %v15431_v22 = vld [vmem:[#allocation8 + $0x98c] sm:$0xf]  ;;  %v12197_v13 = vor.u32 %v15287_v43, %v12194_v3 }
 0x349   :  { %7066 = vmatpush.bf16.msra.mxu1 %v11909_v53  ;;  %v13569_v56 = vor.u32 %v15635_v15, %v13568_v31  ;;  %v13536_v62 = vld [vmem:[#allocation8 + $0xf88] sm:$0xf]  ;;  %v12770_v38 = vld [vmem:[#allocation8 + $0x9a8] sm:$0xf0] }
 0x34a   :  { %7031 = vmatmul.bf16.vlgmr.msrb.gmra.mxu2 %v16478_v10  ;;  %v15627_v33 = vld [vmem:[#allocation8 + $0xfa4] sm:$0xf0]  ;;  %v15495_v8 = vld [vmem:[#allocation8 + $0xb8c] sm:$0xf]  ;;  %v12773_v63 = vor.u32 %v15431_v22, %v12770_v38 }
 0x34b   :  { %7075 = vmatpush.bf16.msra.mxu2 %v12293_v34  ;;  %7054 = vmatpush.bf16.msra.mxu0 %v11621_v25  ;;  %v13537_v6 = vor.u32 %v15627_v33, %v13536_v62  ;;  %v13026_v53 = vld [vmem:[#allocation8 + $0xba8] sm:$0xf0]  ;;  %v13504_v14 = vld [vmem:[#allocation8 + $0xf48] sm:$0xf] }
 0x34c   :  { %6991 = vmatpush.bf16.msra.mxu3 %v12321_v51  ;;  %v15619_v16 = vld [vmem:[#allocation8 + $0xf64] sm:$0xf0]  ;;  %v15279_v42 = vld [vmem:[#allocation8 + $0x4cc] sm:$0xf]  ;;  %v13029_v34 = vor.u32 %v15495_v8, %v13026_v53 }
 0x34d   :  { %7067 = vmatpush.bf16.msra.mxu1 %v11877_v39  ;;  %v12162_v5 = vld [vmem:[#allocation8 + $0x4e8] sm:$0xf0]  ;;  %v13505_v35 = vor.u32 %v15619_v16, %v13504_v14  ;;  %v13472_v48 = vld [vmem:[#allocation8 + $0xf08] sm:$0xf] }
 0x34e   :  { %v15423_v9 = vld [vmem:[#allocation8 + $0x94c] sm:$0xf]  ;;  %v12165_v21 = vor.u32 %v15279_v42, %v12162_v5  ;;  %v15611_v39 = vld [vmem:[#allocation8 + $0xf24] sm:$0xf0]  ;;  %v6863_v33 = vpop.f32.mrf.mxu1 }
 0x34f   :  { %7076 = vmatpush.bf16.msra.mxu2 %v12261_v27  ;;  %7055 = vmatpush.bf16.msra.mxu0 %v11589_v44  ;;  %v12738_v19 = vld [vmem:[#allocation8 + $0x968] sm:$0xf0]  ;;  %v13473_v46 = vor.u32 %v15611_v39, %v13472_v48  ;;  %v13440_v15 = vld [vmem:[#allocation8 + $0xec8] sm:$0xf] }
 0x350   :  { %7036 = vmatpush.bf16.msrb.mxu3 %v13569_v56  ;;  %v15487_v17 = vld [vmem:[#allocation8 + $0xb4c] sm:$0xf]  ;;  %v12741_v7 = vor.u32 %v15423_v9, %v12738_v19  ;;  %v15603_v40 = vld [vmem:[#allocation8 + $0xee4] sm:$0xf0] }
 0x351   :  { %7068 = vmatpush.bf16.msra.mxu1 %v11845_v50  ;;  %6992 = vmatmul.bf16.vlgmr.msra.gmra.mxu3 %v16438_v29  ;;  %v12994_v25 = vld [vmem:[#allocation8 + $0xb68] sm:$0xf0]  ;;  %v13441_v52 = vor.u32 %v15603_v40, %v13440_v15  ;;  %v13408_v20 = vld [vmem:[#allocation8 + $0xe88] sm:$0xf] }
 0x352   :  { %v15271_v2 = vld [vmem:[#allocation8 + $0x48c] sm:$0xf]  ;;  %v12997_v28 = vor.u32 %v15487_v17, %v12994_v25  ;;  %v15595_v61 = vld [vmem:[#allocation8 + $0xea4] sm:$0xf0] }
 0x353   :  { %7077 = vmatpush.bf16.msra.mxu2 %v12229_v57  ;;  %7056 = vmatpush.bf16.msra.mxu0 %v11557_v0  ;;  %v12130_v60 = vld [vmem:[#allocation8 + $0x4a8] sm:$0xf0]  ;;  %v6850_v57 = vpop.f32.mrf.mxu0  ;;  %v13376_v16 = vld [vmem:[#allocation8 + $0xe48] sm:$0xf] }
 0x354   :  { %7037 = vmatpush.bf16.msrb.mxu3 %v13537_v6  ;;  %v15415_v27 = vld [vmem:[#allocation8 + $0x90c] sm:$0xf]  ;;  %v12133_v31 = vor.u32 %v15271_v2, %v12130_v60  ;;  %v6851_v62 = vadd.f32 %v6850_v57, %v4162_v36  ;;  %v13409_v6 = vor.u32 %v15595_v61, %v13408_v20  ;;  %v15587_v42 = vld [vmem:[#allocation8 + $0xe64] sm:$0xf0] }
 0x355   :  { %7069 = vmatpush.bf16.msra.mxu1 %v11813_v49  ;;  %v12706_v30 = vld [vmem:[#allocation8 + $0x928] sm:$0xf0]  ;;  %v13344_v60 = vld [vmem:[#allocation8 + $0xe08] sm:$0xf] }
 0x356   :  { %7057 = vmatmul.bf16.vlgmr.msra.gmra.mxu0 %v16431_v24  ;;  %v15479_v47 = vld [vmem:[#allocation8 + $0xb0c] sm:$0xf]  ;;  %v12709_v50 = vor.u32 %v15415_v27, %v12706_v30  ;;  %v6865_v39 = vpop.f32.mrf.mxu1 }
 0x357   :  { %7101 = vmatpush.bf16.msrb.mxu0 %v12805_v41  ;;  %7078 = vmatpush.bf16.msra.mxu2 %v12197_v13  ;;  %v12962_v32 = vld [vmem:[#allocation8 + $0xb28] sm:$0xf0]  ;;  %v16516_v41 = vadd.f32 %v6863_v33, %v6851_v62 }
 0x358   :  { %7070 = vmatmul.bf16.vlgmr.msra.gmra.mxu1 %v16433_v1  ;;  %7038 = vmatpush.bf16.msrb.mxu3 %v13505_v35  ;;  %v15263_v44 = vld [vmem:[#allocation8 + $0x44c] sm:$0xf]  ;;  %v12965_v51 = vor.u32 %v15479_v47, %v12962_v32 }
 0x359   :  { %7114 = vmatpush.bf16.msrb.mxu1 %v13061_v4  ;;  %v12098_v45 = vld [vmem:[#allocation8 + $0x468] sm:$0xf0] }
 0x35a   :  { %v15407_v54 = vld [vmem:[#allocation8 + $0x8cc] sm:$0xf]  ;;  %v12101_v58 = vor.u32 %v15263_v44, %v12098_v45  ;;  %v11784_v45 = vld [vmem:[#allocation8 + $0x1d0] sm:$0xf] }
 0x35b   :  { %7102 = vmatpush.bf16.msrb.mxu0 %v12773_v63  ;;  %7079 = vmatpush.bf16.msra.mxu2 %v12165_v21  ;;  %v12674_v55 = vld [vmem:[#allocation8 + $0x8e8] sm:$0xf0]  ;;  %v6852_v17 = vpop.f32.mrf.mxu0  ;;  %v13377_v21 = vor.u32 %v15587_v42, %v13376_v16  ;;  %v11720_v16 = vld [vmem:[#allocation8 + $0x150] sm:$0xf] }
 0x35c   :  { %7039 = vmatpush.bf16.msrb.mxu3 %v13473_v46  ;;  %v15471_v56 = vld [vmem:[#allocation8 + $0xacc] sm:$0xf]  ;;  %v12677_v43 = vor.u32 %v15407_v54, %v12674_v55  ;;  %v12040_v54 = vld [vmem:[#allocation8 + $0x3d0] sm:$0xf] }
 0x35d   :  { %7115 = vmatpush.bf16.msrb.mxu1 %v13029_v34  ;;  %v12930_v59 = vld [vmem:[#allocation8 + $0xae8] sm:$0xf0]  ;;  %v15252_v55 = vld [vmem:[#allocation8 + $0x3ec] sm:$0xf0] }
 0x35e   :  { %v15255_v12 = vld [vmem:[#allocation8 + $0x40c] sm:$0xf]  ;;  %v12933_v4 = vor.u32 %v15471_v56, %v12930_v59  ;;  %v12041_v33 = vor.u32 %v15252_v55, %v12040_v54  ;;  %v15172_v42 = vld [vmem:[#allocation8 + $0x16c] sm:$0xf0] }
 0x35f   :  { %7103 = vmatpush.bf16.msrb.mxu0 %v12741_v7  ;;  %7080 = vmatpush.bf16.msra.mxu2 %v12133_v31  ;;  %v12066_v0 = vld [vmem:[#allocation8 + $0x428] sm:$0xf0]  ;;  %v15579_v7 = vld [vmem:[#allocation8 + $0xe24] sm:$0xf0]  ;;  %v15220_v54 = vld [vmem:[#allocation8 + $0x2ec] sm:$0xf0] }
 0x360   :  { %v15567_v3 = vld [vmem:[#allocation8 + $0xdcc] sm:$0xf]  ;;  %7040 = vmatpush.bf16.msrb.mxu3 %v13441_v52  ;;  %v12069_v8 = vor.u32 %v15255_v12, %v12066_v0  ;;  %v13345_v36 = vor.u32 %v15579_v7, %v13344_v60  ;;  %v11752_v12 = vld [vmem:[#allocation8 + $0x190] sm:$0xf] }
 0x361   :  { %7116 = vmatpush.bf16.msrb.mxu1 %v12997_v28  ;;  %v13314_v49 = vld [vmem:[#allocation8 + $0xde8] sm:$0xf0]  ;;  %v15180_v0 = vld [vmem:[#allocation8 + $0x1ac] sm:$0xf0] }
 0x362   :  { %v15399_v22 = vld [vmem:[#allocation8 + $0x88c] sm:$0xf]  ;;  %v13317_v14 = vor.u32 %v15567_v3, %v13314_v49  ;;  %v12008_v49 = vld [vmem:[#allocation8 + $0x390] sm:$0xf] }
 0x363   :  { %7104 = vmatpush.bf16.msrb.mxu0 %v12709_v50  ;;  %v12642_v38 = vld [vmem:[#allocation8 + $0x8a8] sm:$0xf0]  ;;  %7081 = vmatpush.bf16.msra.mxu2 %v12101_v58  ;;  %v15188_v50 = vld [vmem:[#allocation8 + $0x1ec] sm:$0xf0] }
 0x364   :  { %v15463_v13 = vld [vmem:[#allocation8 + $0xa8c] sm:$0xf]  ;;  %v12645_v5 = vor.u32 %v15399_v22, %v12642_v38  ;;  %7041 = vmatpush.bf16.msrb.mxu3 %v13409_v6  ;;  %v11785_v62 = vor.u32 %v15188_v50, %v11784_v45  ;;  %v15164_v60 = vld [vmem:[#allocation8 + $0x12c] sm:$0xf0] }
 0x365   :  { %7117 = vmatpush.bf16.msrb.mxu1 %v12965_v51  ;;  %v12898_v53 = vld [vmem:[#allocation8 + $0xaa8] sm:$0xf0] }
 0x366   :  { %v15559_v63 = vld [vmem:[#allocation8 + $0xd8c] sm:$0xf]  ;;  %v12901_v35 = vor.u32 %v15463_v13, %v12898_v53  ;;  %v6824_v13 = vpop.f32.mrf.mxu2  ;;  %v11753_v53 = vor.u32 %v15180_v0, %v11752_v12 }
 0x367   :  { %7105 = vmatpush.bf16.msrb.mxu0 %v12677_v43  ;;  %v13282_v34 = vld [vmem:[#allocation8 + $0xda8] sm:$0xf0]  ;;  %7082 = vmatpush.bf16.msra.mxu2 %v12069_v8 }
 0x368   :  { %v15391_v9 = vld [vmem:[#allocation8 + $0x84c] sm:$0xf]  ;;  %v13285_v2 = vor.u32 %v15559_v63, %v13282_v34  ;;  %7042 = vmatpush.bf16.msrb.mxu3 %v13377_v21 }
 0x369   :  { %7118 = vmatpush.bf16.msrb.mxu1 %v12933_v4  ;;  %v12610_v19 = vld [vmem:[#allocation8 + $0x868] sm:$0xf0]  ;;  %v15244_v4 = vld [vmem:[#allocation8 + $0x3ac] sm:$0xf0] }
 0x36a   :  { %v15455_v25 = vld [vmem:[#allocation8 + $0xa4c] sm:$0xf]  ;;  %v12613_v46 = vor.u32 %v15391_v9, %v12610_v19  ;;  %7083 = vmatmul.bf16.vlgmr.msra.gmra.mxu2 %v16435_v26  ;;  %v15236_v9 = vld [vmem:[#allocation8 + $0x36c] sm:$0xf0] }
 0x36b   :  { %v12866_v48 = vld [vmem:[#allocation8 + $0xa68] sm:$0xf0]  ;;  %7127 = vmatpush.bf16.msrb.mxu2 %v13317_v14  ;;  %7106 = vmatpush.bf16.msrb.mxu0 %v12645_v5  ;;  %v12009_v14 = vor.u32 %v15244_v4, %v12008_v49  ;;  %v16521_v5 = vadd.f32 %v6824_v13, %v16509_v23  ;;  %v11880_v49 = vld [vmem:[#allocation8 + $0x290] sm:$0xf] }
 0x36c   :  { %v15375_v28 = vld [vmem:[#allocation8 + $0x7cc] sm:$0xf]  ;;  %v12869_v31 = vor.u32 %v15455_v25, %v12866_v48  ;;  %7043 = vmatpush.bf16.msrb.mxu3 %v13345_v36  ;;  %v11721_v48 = vor.u32 %v15172_v42, %v11720_v16  ;;  %v11656_v36 = vld [vmem:[#allocation8 + $0xd0] sm:$0xf] }
 0x36d   :  { %v12546_v27 = vld [vmem:[#allocation8 + $0x7e8] sm:$0xf0]  ;;  %7119 = vmatpush.bf16.msrb.mxu1 %v12901_v35  ;;  %v11976_v35 = vld [vmem:[#allocation8 + $0x350] sm:$0xf] }
 0x36e   :  { %v15551_v30 = vld [vmem:[#allocation8 + $0xd4c] sm:$0xf]  ;;  %v12549_v51 = vor.u32 %v15375_v28, %v12546_v27  ;;  %v11977_v39 = vor.u32 %v15236_v9, %v11976_v35  ;;  %v11944_v28 = vld [vmem:[#allocation8 + $0x310] sm:$0xf] }
 0x36f   :  { %v13250_v47 = vld [vmem:[#allocation8 + $0xd68] sm:$0xf0]  ;;  %7128 = vmatpush.bf16.msrb.mxu2 %v13285_v2  ;;  %7107 = vmatpush.bf16.msrb.mxu0 %v12613_v46  ;;  %v11688_v2 = vld [vmem:[#allocation8 + $0x110] sm:$0xf] }
 0x370   :  { %v15383_v32 = vld [vmem:[#allocation8 + $0x80c] sm:$0xf]  ;;  %v13253_v52 = vor.u32 %v15551_v30, %v13250_v47  ;;  %7088 = vmatpush.bf16.msra.mxu3 %v12549_v51  ;;  %v15228_v46 = vld [vmem:[#allocation8 + $0x32c] sm:$0xf0] }
 0x371   :  { %v12578_v15 = vld [vmem:[#allocation8 + $0x828] sm:$0xf0]  ;;  %7120 = vmatpush.bf16.msrb.mxu1 %v12869_v31  ;;  %7044 = vmatmul.bf16.vlgmr.msrb.gmra.mxu3 %v16493_v18  ;;  %v15308_v13 = vld [vmem:[#allocation8 + $0x5ac] sm:$0xf0] }
 0x372   :  { %v15447_v40 = vld [vmem:[#allocation8 + $0xa0c] sm:$0xf]  ;;  %v12581_v57 = vor.u32 %v15383_v32, %v12578_v15  ;;  %v6826_v32 = vpop.f32.mrf.mxu2  ;;  %v11689_v15 = vor.u32 %v15164_v60, %v11688_v2  ;;  %v11592_v16 = vld [vmem:[#allocation8 + $0x50] sm:$0xf] }
 0x373   :  { %v12834_v44 = vld [vmem:[#allocation8 + $0xa28] sm:$0xf0]  ;;  %7129 = vmatpush.bf16.msrb.mxu2 %v13253_v52  ;;  %v16525_v45 = vpop.f32.mrf.mxu0  ;;  %v11912_v52 = vld [vmem:[#allocation8 + $0x2d0] sm:$0xf] }
 0x374   :  { %v15367_v56 = vld [vmem:[#allocation8 + $0x78c] sm:$0xf]  ;;  %v12837_v61 = vor.u32 %v15447_v40, %v12834_v44  ;;  %7108 = vmatpush.bf16.msrb.mxu0 %v12581_v57  ;;  %v11945_v40 = vor.u32 %v15228_v46, %v11944_v28  ;;  %v15156_v44 = vld [vmem:[#allocation8 + $0xec] sm:$0xf0] }
 0x375   :  { %v12514_v58 = vld [vmem:[#allocation8 + $0x7a8] sm:$0xf0]  ;;  %v15140_v9 = vld [vmem:[#allocation8 + $0x6c] sm:$0xf0] }
 0x376   :  { %v15543_v59 = vld [vmem:[#allocation8 + $0xd0c] sm:$0xf]  ;;  %v12517_v43 = vor.u32 %v15367_v56, %v12514_v58  ;;  %7121 = vmatpush.bf16.msrb.mxu1 %v12837_v61  ;;  %v16527_v56 = vpop.f32.mrf.mxu1  ;;  %v15316_v61 = vld [vmem:[#allocation8 + $0x5ec] sm:$0xf0]  ;;  %v11593_v28 = vor.u32 %v15140_v9, %v11592_v16 }
 0x377   :  { %v13218_v20 = vld [vmem:[#allocation8 + $0xd28] sm:$0xf0]  ;;  %7109 = vmatmul.bf16.vlgmr.msrb.gmra.mxu0 %v16453_v37  ;;  %v13000_v16 = vld [vmem:[#allocation8 + $0xb50] sm:$0xf] }
 0x378   :  { %v13221_v3 = vor.u32 %v15543_v59, %v13218_v20  ;;  %v15359_v6 = vld [vmem:[#allocation8 + $0x74c] sm:$0xf]  ;;  %7153 = vmatpush.bf16.msra.mxu0 %v11785_v62  ;;  %7089 = vmatpush.bf16.msra.mxu3 %v12517_v43  ;;  %v12296_v20 = vld [vmem:[#allocation8 + $0x5d0] sm:$0xf]  ;;  %v11657_v62 = vor.u32 %v15156_v44, %v11656_v36 }
 0x379   :  { %v12482_v22 = vld [vmem:[#allocation8 + $0x768] sm:$0xf0]  ;;  %7122 = vmatmul.bf16.vlgmr.msrb.gmra.mxu1 %v16455_v11  ;;  %v11624_v43 = vld [vmem:[#allocation8 + $0x90] sm:$0xf]  ;;  %v12297_v4 = vor.u32 %v15316_v61, %v12296_v20 }
 0x37a   :  { %v15535_v38 = vld [vmem:[#allocation8 + $0xccc] sm:$0xf]  ;;  %7166 = vmatpush.bf16.msra.mxu1 %v12041_v33  ;;  %7130 = vmatpush.bf16.msrb.mxu2 %v13221_v3  ;;  %v12485_v63 = vor.u32 %v15359_v6, %v12482_v22  ;;  %v11913_v33 = vor.u32 %v15220_v54, %v11912_v52  ;;  %v15148_v3 = vld [vmem:[#allocation8 + $0xac] sm:$0xf0] }
 0x37b   :  { %v13186_v8 = vld [vmem:[#allocation8 + $0xce8] sm:$0xf0]  ;;  %v15212_v6 = vld [vmem:[#allocation8 + $0x2ac] sm:$0xf0]  ;;  %v6904_v42 = vpop.f32.mrf.mxu0 }
 0x37c   :  { %v13189_v34 = vor.u32 %v15535_v38, %v13186_v8  ;;  %v15351_v19 = vld [vmem:[#allocation8 + $0x70c] sm:$0xf]  ;;  %7154 = vmatpush.bf16.msra.mxu0 %v11753_v53  ;;  %7090 = vmatpush.bf16.msra.mxu3 %v12485_v63  ;;  %v12264_v8 = vld [vmem:[#allocation8 + $0x590] sm:$0xf]  ;;  %v6876_v53 = vpop.f32.mrf.mxu2 }
 0x37d   :  { %v12450_v17 = vld [vmem:[#allocation8 + $0x728] sm:$0xf0]  ;;  %v16530_v63 = vadd.f32 %v6876_v53, %v16516_v41  ;;  %v11560_v41 = vld [vmem:[#allocation8 + $0x10] sm:$0xf] }
 0x37e   :  { %v15527_v21 = vld [vmem:[#allocation8 + $0xc8c] sm:$0xf]  ;;  %7167 = vmatpush.bf16.msra.mxu1 %v12009_v14  ;;  %7131 = vmatpush.bf16.msrb.mxu2 %v13189_v34  ;;  %v12453_v23 = vor.u32 %v15351_v19, %v12450_v17  ;;  %v11625_v14 = vor.u32 %v15148_v3, %v11624_v43  ;;  %v11881_v34 = vor.u32 %v15212_v6, %v11880_v49  ;;  %v11848_v19 = vld [vmem:[#allocation8 + $0x250] sm:$0xf] }
 0x37f   :  { %v13154_v25 = vld [vmem:[#allocation8 + $0xca8] sm:$0xf0]  ;;  %v15204_v17 = vld [vmem:[#allocation8 + $0x26c] sm:$0xf0] }
 0x380   :  { %v13157_v7 = vor.u32 %v15527_v21, %v13154_v25  ;;  %v15343_v27 = vld [vmem:[#allocation8 + $0x6cc] sm:$0xf]  ;;  %7155 = vmatpush.bf16.msra.mxu0 %v11721_v48  ;;  %7091 = vmatpush.bf16.msra.mxu3 %v12453_v23  ;;  %v6917_v21 = vpop.f32.mrf.mxu1  ;;  %v12265_v25 = vor.u32 %v15308_v13, %v12264_v8  ;;  %v12232_v23 = vld [vmem:[#allocation8 + $0x550] sm:$0xf]  ;;  %v11849_v46 = vor.u32 %v15204_v17, %v11848_v19 }
 0x381   :  { %v12418_v30 = vld [vmem:[#allocation8 + $0x6e8] sm:$0xf0]  ;;  %v15444_v36 = vld [vmem:[#allocation8 + $0x9ec] sm:$0xf0] }
 0x382   :  { %v15519_v47 = vld [vmem:[#allocation8 + $0xc4c] sm:$0xf]  ;;  %7168 = vmatpush.bf16.msra.mxu1 %v11977_v39  ;;  %7132 = vmatpush.bf16.msrb.mxu2 %v13157_v7  ;;  %v12421_v50 = vor.u32 %v15343_v27, %v12418_v30  ;;  %v15300_v7 = vld [vmem:[#allocation8 + $0x56c] sm:$0xf0] }
 0x383   :  { %v13122_v31 = vld [vmem:[#allocation8 + $0xc68] sm:$0xf0]  ;;  %v15132_v30 = vld [vmem:[#allocation8 + $0x2c] sm:$0xf0] }
 0x384   :  { %v13125_v51 = vor.u32 %v15519_v47, %v13122_v31  ;;  %v15335_v55 = vld [vmem:[#allocation8 + $0x68c] sm:$0xf]  ;;  %7156 = vmatpush.bf16.msra.mxu0 %v11689_v15  ;;  %7092 = vmatpush.bf16.msra.mxu3 %v12421_v50  ;;  %v11816_v47 = vld [vmem:[#allocation8 + $0x210] sm:$0xf]  ;;  %v12233_v15 = vor.u32 %v15300_v7, %v12232_v23  ;;  %v6878_v54 = vpop.f32.mrf.mxu2 }
 0x385   :  { %v12386_v57 = vld [vmem:[#allocation8 + $0x6a8] sm:$0xf0]  ;;  %v15196_v31 = vld [vmem:[#allocation8 + $0x22c] sm:$0xf0] }
 0x386   :  { %v15511_v58 = vld [vmem:[#allocation8 + $0xc0c] sm:$0xf]  ;;  %7169 = vmatpush.bf16.msra.mxu1 %v11945_v40  ;;  %7133 = vmatpush.bf16.msrb.mxu2 %v13125_v51  ;;  %v12389_v12 = vor.u32 %v15335_v55, %v12386_v57  ;;  %v12808_v40 = vld [vmem:[#allocation8 + $0x9d0] sm:$0xf]  ;;  %v11561_v55 = vor.u32 %v15132_v30, %v11560_v41 }
 0x387   :  { %v13090_v59 = vld [vmem:[#allocation8 + $0xc28] sm:$0xf0]  ;;  %v13064_v44 = vld [vmem:[#allocation8 + $0xbd0] sm:$0xf]  ;;  %v12809_v20 = vor.u32 %v15444_v36, %v12808_v40 }
 0x388   :  { %v13093_v0 = vor.u32 %v15511_v58, %v13090_v59  ;;  %v15327_v22 = vld [vmem:[#allocation8 + $0x64c] sm:$0xf]  ;;  %7157 = vmatpush.bf16.msra.mxu0 %v11657_v62  ;;  %7093 = vmatpush.bf16.msra.mxu3 %v12389_v12  ;;  %v15508_v50 = vld [vmem:[#allocation8 + $0xbec] sm:$0xf0]  ;;  %v11817_v59 = vor.u32 %v15196_v31, %v11816_v47 }
 0x389   :  { %v12354_v38 = vld [vmem:[#allocation8 + $0x668] sm:$0xf0]  ;;  %v12200_v57 = vld [vmem:[#allocation8 + $0x510] sm:$0xf]  ;;  %v13065_v61 = vor.u32 %v15508_v50, %v13064_v44 }
 0x38a   :  { %7170 = vmatpush.bf16.msra.mxu1 %v11913_v33  ;;  %7134 = vmatpush.bf16.msrb.mxu2 %v13093_v0  ;;  %v12357_v35 = vor.u32 %v15327_v22, %v12354_v38  ;;  %v15319_v48 = vld [vmem:[#allocation8 + $0x60c] sm:$0xf]  ;;  %v15292_v58 = vld [vmem:[#allocation8 + $0x52c] sm:$0xf0] }
 0x38b   :  { %v12322_v39 = vld [vmem:[#allocation8 + $0x628] sm:$0xf0]  ;;  %v12776_v33 = vld [vmem:[#allocation8 + $0x990] sm:$0xf]  ;;  %v12201_v43 = vor.u32 %v15292_v58, %v12200_v57 }
 0x38c   :  { %v15631_v2 = vld [vmem:[#allocation8 + $0xfcc] sm:$0xf]  ;;  %7158 = vmatpush.bf16.msra.mxu0 %v11625_v14  ;;  %7094 = vmatpush.bf16.msra.mxu3 %v12357_v35  ;;  %v12325_v27 = vor.u32 %v15319_v48, %v12322_v39  ;;  %v15436_v12 = vld [vmem:[#allocation8 + $0x9ac] sm:$0xf0]  ;;  %v16538_v48 = vld [vmem:[#allocation10] sm:$0xff] }
 0x38d   :  { %v13570_v60 = vld [vmem:[#allocation8 + $0xfe8] sm:$0xf0]  ;;  %7135 = vmatmul.bf16.vlgmr.msrb.gmra.mxu2 %v16478_v10  ;;  %v13032_v0 = vld [vmem:[#allocation8 + $0xb90] sm:$0xf]  ;;  %v12777_v38 = vor.u32 %v15436_v12, %v12776_v33  ;;  %v16536_v21 = vpop.f32.mrf.mxu2  ;;  %v4163_v39 = vperm.slane %v16538_v48, 2 }
 0x38e   :  { %7179 = vmatpush.bf16.msra.mxu2 %v12297_v4  ;;  %7171 = vmatpush.bf16.msra.mxu1 %v11881_v34  ;;  %v13573_v32 = vor.u32 %v15631_v2, %v13570_v60  ;;  %v15623_v51 = vld [vmem:[#allocation8 + $0xf8c] sm:$0xf]  ;;  %v15500_v3 = vld [vmem:[#allocation8 + $0xbac] sm:$0xf0] }
 0x38f   :  { %v13538_v52 = vld [vmem:[#allocation8 + $0xfa8] sm:$0xf0]  ;;  %v12168_v6 = vld [vmem:[#allocation8 + $0x4d0] sm:$0xf]  ;;  %v13033_v8 = vor.u32 %v15500_v3, %v13032_v0 }
 0x390   :  { %7159 = vmatpush.bf16.msra.mxu0 %v11593_v28  ;;  %7095 = vmatpush.bf16.msra.mxu3 %v12325_v27  ;;  %v13541_v62 = vor.u32 %v15623_v51, %v13538_v52  ;;  %v15615_v49 = vld [vmem:[#allocation8 + $0xf4c] sm:$0xf]  ;;  %v15284_v22 = vld [vmem:[#allocation8 + $0x4ec] sm:$0xf0] }
 0x391   :  { %v13506_v4 = vld [vmem:[#allocation8 + $0xf68] sm:$0xf0]  ;;  %v12744_v53 = vld [vmem:[#allocation8 + $0x950] sm:$0xf]  ;;  %v12169_v42 = vor.u32 %v15284_v22, %v12168_v6 }
 0x392   :  { %7180 = vmatpush.bf16.msra.mxu2 %v12265_v25  ;;  %7172 = vmatpush.bf16.msra.mxu1 %v11849_v46  ;;  %v13509_v13 = vor.u32 %v15615_v49, %v13506_v4  ;;  %v15428_v14 = vld [vmem:[#allocation8 + $0x96c] sm:$0xf0]  ;;  %v15607_v35 = vld [vmem:[#allocation8 + $0xf0c] sm:$0xf] }
 0x393   :  { %7096 = vmatmul.bf16.vlgmr.msra.gmra.mxu3 %v16438_v29  ;;  %v15492_v34 = vld [vmem:[#allocation8 + $0xb6c] sm:$0xf0]  ;;  %v13474_v9 = vld [vmem:[#allocation8 + $0xf28] sm:$0xf0]  ;;  %v12745_v25 = vor.u32 %v15428_v14, %v12744_v53 }
 0x394   :  { %7140 = vmatpush.bf16.msrb.mxu3 %v13573_v32  ;;  %7160 = vmatpush.bf16.msra.mxu0 %v11561_v55  ;;  %v12136_v19 = vld [vmem:[#allocation8 + $0x490] sm:$0xf]  ;;  %v13001_v2 = vor.u32 %v15492_v34, %v13000_v16  ;;  %v13477_v60 = vor.u32 %v15607_v35, %v13474_v9  ;;  %v15599_v27 = vld [vmem:[#allocation8 + $0xecc] sm:$0xf]  ;;  %v6837_v55 = vpop.f32.mrf.mxu3 }
 0x395   :  { %v15276_v17 = vld [vmem:[#allocation8 + $0x4ac] sm:$0xf0]  ;;  %v13442_v30 = vld [vmem:[#allocation8 + $0xee8] sm:$0xf0]  ;;  %v6967_v54 = vpop.f32.mrf.mxu1  ;;  %v6930_v0 = vpop.f32.mrf.mxu2 }
 0x396   :  { %7181 = vmatpush.bf16.msra.mxu2 %v12233_v15  ;;  %7173 = vmatpush.bf16.msra.mxu1 %v11817_v59  ;;  %v12712_v23 = vld [vmem:[#allocation8 + $0x910] sm:$0xf]  ;;  %v12137_v41 = vor.u32 %v15276_v17, %v12136_v19  ;;  %v6954_v15 = vpop.f32.mrf.mxu0  ;;  %v13445_v36 = vor.u32 %v15599_v27, %v13442_v30  ;;  %v15591_v59 = vld [vmem:[#allocation8 + $0xe8c] sm:$0xf] }
 0x397   :  { %7161 = vmatmul.bf16.vlgmr.msra.gmra.mxu0 %v16431_v24  ;;  %v15420_v7 = vld [vmem:[#allocation8 + $0x92c] sm:$0xf0]  ;;  %v6955_v52 = vadd.f32 %v6954_v15, %v4163_v39  ;;  %v15583_v14 = vld [vmem:[#allocation8 + $0xe4c] sm:$0xf] }
 0x398   :  { %7205 = vmatpush.bf16.msrb.mxu0 %v12809_v20  ;;  %7141 = vmatpush.bf16.msrb.mxu3 %v13541_v62  ;;  %v12968_v28 = vld [vmem:[#allocation8 + $0xb10] sm:$0xf]  ;;  %v12713_v32 = vor.u32 %v15420_v7, %v12712_v23  ;;  %v13410_v20 = vld [vmem:[#allocation8 + $0xea8] sm:$0xf0] }
 0x399   :  { %7174 = vmatmul.bf16.vlgmr.msra.gmra.mxu1 %v16433_v1  ;;  %v15484_v46 = vld [vmem:[#allocation8 + $0xb2c] sm:$0xf0]  ;;  %v16544_v12 = vadd.f32 %v6967_v54, %v6955_v52  ;;  %v13413_v6 = vor.u32 %v15591_v59, %v13410_v20  ;;  %v13378_v16 = vld [vmem:[#allocation8 + $0xe68] sm:$0xf0]  ;;  %v15184_v52 = vld [vmem:[#allocation8 + $0x1d4] sm:$0xf] }
 0x39a   :  { %7218 = vmatpush.bf16.msrb.mxu1 %v13065_v61  ;;  %7182 = vmatpush.bf16.msra.mxu2 %v12201_v43  ;;  %v12104_v47 = vld [vmem:[#allocation8 + $0x450] sm:$0xf]  ;;  %v12969_v40 = vor.u32 %v15484_v46, %v12968_v28  ;;  %v16542_v61 = vadd.f32 %v6837_v55, %v16521_v5  ;;  %v13346_v46 = vld [vmem:[#allocation8 + $0xe28] sm:$0xf0]  ;;  %v11786_v54 = vld [vmem:[#allocation8 + $0x1f0] sm:$0xf0] }
 0x39b   :  { %v15268_v31 = vld [vmem:[#allocation8 + $0x46c] sm:$0xf0]  ;;  %v12042_v59 = vld [vmem:[#allocation8 + $0x3f0] sm:$0xf0] }
 0x39c   :  { %7206 = vmatpush.bf16.msrb.mxu0 %v12777_v38  ;;  %7142 = vmatpush.bf16.msrb.mxu3 %v13509_v13  ;;  %v12680_v44 = vld [vmem:[#allocation8 + $0x8d0] sm:$0xf]  ;;  %v12105_v57 = vor.u32 %v15268_v31, %v12104_v47 }
 0x39d   :  { %v15412_v50 = vld [vmem:[#allocation8 + $0x8ec] sm:$0xf0]  ;;  %v6969_v39 = vpop.f32.mrf.mxu1 }
 0x39e   :  { %7219 = vmatpush.bf16.msrb.mxu1 %v13033_v8  ;;  %7183 = vmatpush.bf16.msra.mxu2 %v12169_v42  ;;  %v12936_v51 = vld [vmem:[#allocation8 + $0xad0] sm:$0xf]  ;;  %v12681_v43 = vor.u32 %v15412_v50, %v12680_v44  ;;  %v6956_v9 = vpop.f32.mrf.mxu0 }
 0x39f   :  { %v15476_v58 = vld [vmem:[#allocation8 + $0xaec] sm:$0xf0] }
 0x3a0   :  { %7207 = vmatpush.bf16.msrb.mxu0 %v12745_v25  ;;  %7143 = vmatpush.bf16.msrb.mxu3 %v13477_v60  ;;  %v12072_v62 = vld [vmem:[#allocation8 + $0x410] sm:$0xf]  ;;  %v12937_v4 = vor.u32 %v15476_v58, %v12936_v51  ;;  %v13381_v60 = vor.u32 %v15583_v14, %v13378_v16  ;;  %v15248_v58 = vld [vmem:[#allocation8 + $0x3d4] sm:$0xf] }
 0x3a1   :  { %v15260_v33 = vld [vmem:[#allocation8 + $0x42c] sm:$0xf0]  ;;  %v12010_v14 = vld [vmem:[#allocation8 + $0x3b0] sm:$0xf0] }
 0x3a2   :  { %7220 = vmatpush.bf16.msrb.mxu1 %v13001_v2  ;;  %7184 = vmatpush.bf16.msra.mxu2 %v12137_v41  ;;  %v13320_v3 = vld [vmem:[#allocation8 + $0xdd0] sm:$0xf]  ;;  %v12073_v8 = vor.u32 %v15260_v33, %v12072_v62  ;;  %v6839_v2 = vpop.f32.mrf.mxu3  ;;  %v15575_v41 = vld [vmem:[#allocation8 + $0xe0c] sm:$0xf] }
 0x3a3   :  { %v15572_v49 = vld [vmem:[#allocation8 + $0xdec] sm:$0xf0]  ;;  %v13349_v50 = vor.u32 %v15575_v41, %v13346_v46 }
 0x3a4   :  { %7208 = vmatpush.bf16.msrb.mxu0 %v12713_v32  ;;  %7144 = vmatpush.bf16.msrb.mxu3 %v13445_v36  ;;  %v12648_v22 = vld [vmem:[#allocation8 + $0x890] sm:$0xf]  ;;  %v13321_v53 = vor.u32 %v15572_v49, %v13320_v3 }
 0x3a5   :  { %v15404_v38 = vld [vmem:[#allocation8 + $0x8ac] sm:$0xf0] }
 0x3a6   :  { %7221 = vmatpush.bf16.msrb.mxu1 %v12969_v40  ;;  %7185 = vmatpush.bf16.msra.mxu2 %v12105_v57  ;;  %v12904_v13 = vld [vmem:[#allocation8 + $0xa90] sm:$0xf]  ;;  %v12649_v42 = vor.u32 %v15404_v38, %v12648_v22  ;;  %v15176_v22 = vld [vmem:[#allocation8 + $0x194] sm:$0xf] }
 0x3a7   :  { %v15468_v5 = vld [vmem:[#allocation8 + $0xaac] sm:$0xf0]  ;;  %v11754_v38 = vld [vmem:[#allocation8 + $0x1b0] sm:$0xf0] }
 0x3a8   :  { %7209 = vmatpush.bf16.msrb.mxu0 %v12681_v43  ;;  %v13288_v34 = vld [vmem:[#allocation8 + $0xd90] sm:$0xf]  ;;  %7145 = vmatpush.bf16.msrb.mxu3 %v13413_v6  ;;  %v12905_v19 = vor.u32 %v15468_v5, %v12904_v13  ;;  %v12045_v6 = vor.u32 %v15248_v58, %v12042_v59  ;;  %v15152_v59 = vld [vmem:[#allocation8 + $0xd4] sm:$0xf] }
 0x3a9   :  { %v15564_v35 = vld [vmem:[#allocation8 + $0xdac] sm:$0xf0] }
 0x3aa   :  { %7222 = vmatpush.bf16.msrb.mxu1 %v12937_v4  ;;  %v12616_v17 = vld [vmem:[#allocation8 + $0x850] sm:$0xf]  ;;  %7186 = vmatpush.bf16.msra.mxu2 %v12073_v8  ;;  %v13289_v28 = vor.u32 %v15564_v35, %v13288_v34  ;;  %v6889_v49 = vpop.f32.mrf.mxu3  ;;  %v11789_v4 = vor.u32 %v15184_v52, %v11786_v54 }
 0x3ab   :  { %v15396_v25 = vld [vmem:[#allocation8 + $0x86c] sm:$0xf0]  ;;  %v6890_v8 = vadd.f32 %v6889_v49, %v16530_v63  ;;  %v11722_v63 = vld [vmem:[#allocation8 + $0x170] sm:$0xf0] }
 0x3ac   :  { %v12872_v23 = vld [vmem:[#allocation8 + $0xa50] sm:$0xf]  ;;  %7210 = vmatpush.bf16.msrb.mxu0 %v12649_v42  ;;  %v12617_v30 = vor.u32 %v15396_v25, %v12616_v17  ;;  %7146 = vmatpush.bf16.msrb.mxu3 %v13381_v60  ;;  %v15168_v25 = vld [vmem:[#allocation8 + $0x154] sm:$0xf] }
 0x3ad   :  { %v15460_v7 = vld [vmem:[#allocation8 + $0xa6c] sm:$0xf0]  ;;  %7187 = vmatmul.bf16.vlgmr.msra.gmra.mxu2 %v16435_v26  ;;  %v6903_v9 = vadd.f32 %v16525_v45, %v6890_v8  ;;  %v15232_v60 = vld [vmem:[#allocation8 + $0x354] sm:$0xf] }
 0x3ae   :  { %7231 = vmatpush.bf16.msrb.mxu2 %v13321_v53  ;;  %v12552_v27 = vld [vmem:[#allocation8 + $0x7d0] sm:$0xf]  ;;  %7223 = vmatpush.bf16.msrb.mxu1 %v12905_v19  ;;  %v12873_v15 = vor.u32 %v15460_v7, %v12872_v23  ;;  %v15240_v53 = vld [vmem:[#allocation8 + $0x394] sm:$0xf]  ;;  %v11757_v19 = vor.u32 %v15176_v22, %v11754_v38 }
 0x3af   :  { %v15380_v47 = vld [vmem:[#allocation8 + $0x7ec] sm:$0xf0]  ;;  %v12013_v17 = vor.u32 %v15240_v53, %v12010_v14  ;;  %v11978_v23 = vld [vmem:[#allocation8 + $0x370] sm:$0xf0] }
 0x3b0   :  { %v13256_v31 = vld [vmem:[#allocation8 + $0xd50] sm:$0xf]  ;;  %v12553_v55 = vor.u32 %v15380_v47, %v12552_v27  ;;  %7211 = vmatpush.bf16.msrb.mxu0 %v12617_v30  ;;  %7147 = vmatpush.bf16.msrb.mxu3 %v13349_v50  ;;  %v6980_v30 = vpop.f32.mrf.mxu2  ;;  %v15224_v50 = vld [vmem:[#allocation8 + $0x314] sm:$0xf] }
 0x3b1   :  { %v15556_v32 = vld [vmem:[#allocation8 + $0xd6c] sm:$0xf0]  ;;  %v15312_v38 = vld [vmem:[#allocation8 + $0x5d4] sm:$0xf] }
 0x3b2   :  { %v12584_v40 = vld [vmem:[#allocation8 + $0x810] sm:$0xf]  ;;  %7232 = vmatpush.bf16.msrb.mxu2 %v13289_v28  ;;  %v13257_v57 = vor.u32 %v15556_v32, %v13256_v31  ;;  %7224 = vmatpush.bf16.msrb.mxu1 %v12873_v15  ;;  %v6916_v28 = vadd.f32 %v16527_v56, %v6903_v9  ;;  %v6891_v47 = vpop.f32.mrf.mxu3  ;;  %v11725_v31 = vor.u32 %v15168_v25, %v11722_v63  ;;  %v15160_v15 = vld [vmem:[#allocation8 + $0x114] sm:$0xf] }
 0x3b3   :  { %v15388_v36 = vld [vmem:[#allocation8 + $0x82c] sm:$0xf0]  ;;  %7148 = vmatmul.bf16.vlgmr.msrb.gmra.mxu3 %v16493_v18  ;;  %v11981_v32 = vor.u32 %v15232_v60, %v11978_v23  ;;  %v16555_v56 = vadd.f32 %v6980_v30, %v16544_v12  ;;  %v12298_v8 = vld [vmem:[#allocation8 + $0x5f0] sm:$0xf0] }
 0x3b4   :  { %v12840_v44 = vld [vmem:[#allocation8 + $0xa10] sm:$0xf]  ;;  %v12585_v62 = vor.u32 %v15388_v36, %v12584_v40  ;;  %7192 = vmatpush.bf16.msra.mxu3 %v12553_v55  ;;  %v6929_v27 = vadd.f32 %v16536_v21, %v6916_v28  ;;  %v11690_v40 = vld [vmem:[#allocation8 + $0x130] sm:$0xf0] }
 0x3b5   :  { %v15452_v51 = vld [vmem:[#allocation8 + $0xa2c] sm:$0xf0]  ;;  %v16559_v12 = vpop.f32.mrf.mxu1  ;;  %v11626_v9 = vld [vmem:[#allocation8 + $0xb0] sm:$0xf0] }
 0x3b6   :  { %v12520_v20 = vld [vmem:[#allocation8 + $0x790] sm:$0xf]  ;;  %v12841_v3 = vor.u32 %v15452_v51, %v12840_v44  ;;  %7233 = vmatpush.bf16.msrb.mxu2 %v13257_v57  ;;  %7212 = vmatpush.bf16.msrb.mxu0 %v12585_v62  ;;  %v11946_v51 = vld [vmem:[#allocation8 + $0x330] sm:$0xf0]  ;;  %v11693_v57 = vor.u32 %v15160_v15, %v11690_v40  ;;  %v16557_v62 = vpop.f32.mrf.mxu0 }
 0x3b7   :  { %v15372_v33 = vld [vmem:[#allocation8 + $0x7ac] sm:$0xf0]  ;;  %v11949_v58 = vor.u32 %v15224_v50, %v11946_v51  ;;  %v11882_v25 = vld [vmem:[#allocation8 + $0x2b0] sm:$0xf0] }
 0x3b8   :  { %v13224_v0 = vld [vmem:[#allocation8 + $0xd10] sm:$0xf]  ;;  %v12521_v13 = vor.u32 %v15372_v33, %v12520_v20  ;;  %7225 = vmatpush.bf16.msrb.mxu1 %v12841_v3  ;;  %v11658_v20 = vld [vmem:[#allocation8 + $0xf0] sm:$0xf0] }
 0x3b9   :  { %v15548_v43 = vld [vmem:[#allocation8 + $0xd2c] sm:$0xf0]  ;;  %7213 = vmatmul.bf16.vlgmr.msrb.gmra.mxu0 %v16453_v37  ;;  %v11914_v3 = vld [vmem:[#allocation8 + $0x2f0] sm:$0xf0]  ;;  %v11661_v53 = vor.u32 %v15152_v59, %v11658_v20 }
 0x3ba   :  { %v13225_v5 = vor.u32 %v15548_v43, %v13224_v0  ;;  %v12488_v16 = vld [vmem:[#allocation8 + $0x750] sm:$0xf]  ;;  %7257 = vmatpush.bf16.msra.mxu0 %v11789_v4  ;;  %7193 = vmatpush.bf16.msra.mxu3 %v12521_v13  ;;  %v15216_v43 = vld [vmem:[#allocation8 + $0x2d4] sm:$0xf]  ;;  %v6982_v13 = vpop.f32.mrf.mxu2 }
 0x3bb   :  { %v15364_v42 = vld [vmem:[#allocation8 + $0x76c] sm:$0xf0]  ;;  %7226 = vmatmul.bf16.vlgmr.msrb.gmra.mxu1 %v16455_v11  ;;  %v11917_v14 = vor.u32 %v15216_v43, %v11914_v3  ;;  %v12266_v60 = vld [vmem:[#allocation8 + $0x5b0] sm:$0xf0] }
 0x3bc   :  { %v13192_v34 = vld [vmem:[#allocation8 + $0xcd0] sm:$0xf]  ;;  %7270 = vmatpush.bf16.msra.mxu1 %v12045_v6  ;;  %7234 = vmatpush.bf16.msrb.mxu2 %v13225_v5  ;;  %v12489_v39 = vor.u32 %v15364_v42, %v12488_v16  ;;  %v6941_v5 = vpop.f32.mrf.mxu3  ;;  %v15200_v30 = vld [vmem:[#allocation8 + $0x254] sm:$0xf] }
 0x3bd   :  { %v15540_v35 = vld [vmem:[#allocation8 + $0xcec] sm:$0xf0]  ;;  %v16561_v16 = vadd.f32 %v6941_v5, %v6929_v27  ;;  %v11594_v27 = vld [vmem:[#allocation8 + $0x70] sm:$0xf0] }
 0x3be   :  { %v13193_v2 = vor.u32 %v15540_v35, %v13192_v34  ;;  %v12456_v7 = vld [vmem:[#allocation8 + $0x710] sm:$0xf]  ;;  %7258 = vmatpush.bf16.msra.mxu0 %v11757_v19  ;;  %7194 = vmatpush.bf16.msra.mxu3 %v12489_v39  ;;  %v15144_v35 = vld [vmem:[#allocation8 + $0x94] sm:$0xf]  ;;  %v7008_v28 = vpop.f32.mrf.mxu0 }
 0x3bf   :  { %v15356_v45 = vld [vmem:[#allocation8 + $0x72c] sm:$0xf0]  ;;  %v15208_v19 = vld [vmem:[#allocation8 + $0x294] sm:$0xf]  ;;  %v11629_v23 = vor.u32 %v15144_v35, %v11626_v9 }
 0x3c0   :  { %v13160_v41 = vld [vmem:[#allocation8 + $0xc90] sm:$0xf]  ;;  %7271 = vmatpush.bf16.msra.mxu1 %v12013_v17  ;;  %7235 = vmatpush.bf16.msrb.mxu2 %v13193_v2  ;;  %v12457_v36 = vor.u32 %v15356_v45, %v12456_v7  ;;  %v12301_v17 = vor.u32 %v15312_v38, %v12298_v8  ;;  %v15304_v2 = vld [vmem:[#allocation8 + $0x594] sm:$0xf]  ;;  %v7021_v45 = vpop.f32.mrf.mxu1 }
 0x3c1   :  { %v15532_v46 = vld [vmem:[#allocation8 + $0xcac] sm:$0xf0]  ;;  %v15136_v7 = vld [vmem:[#allocation8 + $0x54] sm:$0xf] }
 0x3c2   :  { %v13161_v44 = vor.u32 %v15532_v46, %v13160_v41  ;;  %v12424_v52 = vld [vmem:[#allocation8 + $0x6d0] sm:$0xf]  ;;  %7259 = vmatpush.bf16.msra.mxu0 %v11725_v31  ;;  %7195 = vmatpush.bf16.msra.mxu3 %v12457_v36  ;;  %v11885_v41 = vor.u32 %v15208_v19, %v11882_v25  ;;  %v11850_v47 = vld [vmem:[#allocation8 + $0x270] sm:$0xf0]  ;;  %v12269_v31 = vor.u32 %v15304_v2, %v12266_v60 }
 0x3c3   :  { %v15348_v54 = vld [vmem:[#allocation8 + $0x6ec] sm:$0xf0]  ;;  %v12234_v50 = vld [vmem:[#allocation8 + $0x570] sm:$0xf0] }
 0x3c4   :  { %v13128_v21 = vld [vmem:[#allocation8 + $0xc50] sm:$0xf]  ;;  %7272 = vmatpush.bf16.msra.mxu1 %v11981_v32  ;;  %7236 = vmatpush.bf16.msrb.mxu2 %v13161_v44  ;;  %v12425_v33 = vor.u32 %v15348_v54, %v12424_v52  ;;  %v15296_v44 = vld [vmem:[#allocation8 + $0x554] sm:$0xf]  ;;  %v6943_v51 = vpop.f32.mrf.mxu3  ;;  %v11597_v52 = vor.u32 %v15136_v7, %v11594_v27 }
 0x3c5   :  { %v15524_v55 = vld [vmem:[#allocation8 + $0xc6c] sm:$0xf0]  ;;  %v15128_v54 = vld [vmem:[#allocation8 + $0x14] sm:$0xf] }
 0x3c6   :  { %v13129_v0 = vor.u32 %v15524_v55, %v13128_v21  ;;  %v12392_v49 = vld [vmem:[#allocation8 + $0x690] sm:$0xf]  ;;  %7260 = vmatpush.bf16.msra.mxu0 %v11693_v57  ;;  %7196 = vmatpush.bf16.msra.mxu3 %v12425_v33  ;;  %v11853_v21 = vor.u32 %v15200_v30, %v11850_v47  ;;  %v11562_v57 = vld [vmem:[#allocation8 + $0x30] sm:$0xf0]  ;;  %v12237_v33 = vor.u32 %v15296_v44, %v12234_v50 }
 0x3c7   :  { %v15340_v4 = vld [vmem:[#allocation8 + $0x6ac] sm:$0xf0]  ;;  %v11818_v59 = vld [vmem:[#allocation8 + $0x230] sm:$0xf0] }
 0x3c8   :  { %v13096_v6 = vld [vmem:[#allocation8 + $0xc10] sm:$0xf]  ;;  %7273 = vmatpush.bf16.msra.mxu1 %v11949_v58  ;;  %7237 = vmatpush.bf16.msrb.mxu2 %v13129_v0  ;;  %v12393_v42 = vor.u32 %v15340_v4, %v12392_v49  ;;  %v15192_v58 = vld [vmem:[#allocation8 + $0x214] sm:$0xf] }
 0x3c9   :  { %v15516_v22 = vld [vmem:[#allocation8 + $0xc2c] sm:$0xf0]  ;;  %v15440_v0 = vld [vmem:[#allocation8 + $0x9d4] sm:$0xf]  ;;  %v11821_v13 = vor.u32 %v15192_v58, %v11818_v59 }
 0x3ca   :  { %v13097_v34 = vor.u32 %v15516_v22, %v13096_v6  ;;  %v12360_v63 = vld [vmem:[#allocation8 + $0x650] sm:$0xf]  ;;  %7261 = vmatpush.bf16.msra.mxu0 %v11661_v53  ;;  %7197 = vmatpush.bf16.msra.mxu3 %v12393_v42  ;;  %v12810_v43 = vld [vmem:[#allocation8 + $0x9f0] sm:$0xf0]  ;;  %v11565_v22 = vor.u32 %v15128_v54, %v11562_v57 }
 0x3cb   :  { %v15332_v39 = vld [vmem:[#allocation8 + $0x66c] sm:$0xf0]  ;;  %v15504_v3 = vld [vmem:[#allocation8 + $0xbd4] sm:$0xf]  ;;  %v12813_v5 = vor.u32 %v15440_v0, %v12810_v43 }
 0x3cc   :  { %7274 = vmatpush.bf16.msra.mxu1 %v11917_v14  ;;  %7238 = vmatpush.bf16.msrb.mxu2 %v13097_v34  ;;  %v12361_v46 = vor.u32 %v15332_v39, %v12360_v63  ;;  %v12328_v32 = vld [vmem:[#allocation8 + $0x610] sm:$0xf]  ;;  %v13066_v49 = vld [vmem:[#allocation8 + $0xbf0] sm:$0xf0] }
 0x3cd   :  { %v15324_v15 = vld [vmem:[#allocation8 + $0x62c] sm:$0xf0]  ;;  %v15288_v38 = vld [vmem:[#allocation8 + $0x514] sm:$0xf]  ;;  %v13069_v53 = vor.u32 %v15504_v3, %v13066_v49 }
 0x3ce   :  { %v13576_v40 = vld [vmem:[#allocation8 + $0xfd0] sm:$0xf]  ;;  %7262 = vmatpush.bf16.msra.mxu0 %v11629_v23  ;;  %7198 = vmatpush.bf16.msra.mxu3 %v12361_v46  ;;  %v12329_v55 = vor.u32 %v15324_v15, %v12328_v32  ;;  %v12202_v8 = vld [vmem:[#allocation8 + $0x530] sm:$0xf0]  ;;  %v16567_v32 = vpop.f32.mrf.mxu2 }
 0x3cf   :  { %v15636_v36 = vld [vmem:[#allocation8 + $0xfec] sm:$0xf0]  ;;  %7239 = vmatmul.bf16.vlgmr.msrb.gmra.mxu2 %v16478_v10  ;;  %v15432_v42 = vld [vmem:[#allocation8 + $0x994] sm:$0xf]  ;;  %v12205_v9 = vor.u32 %v15288_v38, %v12202_v8 }
 0x3d0   :  { %7283 = vmatpush.bf16.msra.mxu2 %v12301_v17  ;;  %7275 = vmatpush.bf16.msra.mxu1 %v11885_v41  ;;  %v13577_v20 = vor.u32 %v15636_v36, %v13576_v40  ;;  %v13544_v4 = vld [vmem:[#allocation8 + $0xf90] sm:$0xf]  ;;  %v12778_v34 = vld [vmem:[#allocation8 + $0x9b0] sm:$0xf0]  ;;  %v4164_v40 = vperm.slane %v16538_v48, 3 }
 0x3d1   :  { %v15628_v6 = vld [vmem:[#allocation8 + $0xfac] sm:$0xf0]  ;;  %v15496_v35 = vld [vmem:[#allocation8 + $0xb94] sm:$0xf]  ;;  %v12781_v2 = vor.u32 %v15432_v42, %v12778_v34 }
 0x3d2   :  { %7263 = vmatpush.bf16.msra.mxu0 %v11597_v52  ;;  %7199 = vmatpush.bf16.msra.mxu3 %v12329_v55  ;;  %v13545_v14 = vor.u32 %v15628_v6, %v13544_v4  ;;  %v13034_v19 = vld [vmem:[#allocation8 + $0xbb0] sm:$0xf0]  ;;  %v13512_v17 = vld [vmem:[#allocation8 + $0xf50] sm:$0xf] }
 0x3d3   :  { %v15620_v25 = vld [vmem:[#allocation8 + $0xf6c] sm:$0xf0]  ;;  %v15280_v63 = vld [vmem:[#allocation8 + $0x4d4] sm:$0xf]  ;;  %v13037_v60 = vor.u32 %v15496_v35, %v13034_v19 }
 0x3d4   :  { %7284 = vmatpush.bf16.msra.mxu2 %v12269_v31  ;;  %7276 = vmatpush.bf16.msra.mxu1 %v11853_v21  ;;  %v12170_v39 = vld [vmem:[#allocation8 + $0x4f0] sm:$0xf0]  ;;  %v13513_v23 = vor.u32 %v15620_v25, %v13512_v17  ;;  %v13480_v27 = vld [vmem:[#allocation8 + $0xf10] sm:$0xf]  ;;  %v6993_v42 = vpop.f32.mrf.mxu3 }
 0x3d5   :  { %7200 = vmatmul.bf16.vlgmr.msra.gmra.mxu3 %v16438_v29  ;;  %v15424_v7 = vld [vmem:[#allocation8 + $0x954] sm:$0xf]  ;;  %v12173_v41 = vor.u32 %v15280_v63, %v12170_v39  ;;  %v15612_v30 = vld [vmem:[#allocation8 + $0xf2c] sm:$0xf0]  ;;  %v7071_v6 = vpop.f32.mrf.mxu1  ;;  %v6994_v17 = vadd.f32 %v6993_v42, %v16555_v56 }
 0x3d6   :  { %7244 = vmatpush.bf16.msrb.mxu3 %v13577_v20  ;;  %7264 = vmatpush.bf16.msra.mxu0 %v11565_v22  ;;  %v12746_v28 = vld [vmem:[#allocation8 + $0x970] sm:$0xf0]  ;;  %v13481_v44 = vor.u32 %v15612_v30, %v13480_v27  ;;  %v13448_v55 = vld [vmem:[#allocation8 + $0xed0] sm:$0xf]  ;;  %v7034_v34 = vpop.f32.mrf.mxu2 }
 0x3d7   :  { %v15488_v45 = vld [vmem:[#allocation8 + $0xb54] sm:$0xf]  ;;  %v12749_v15 = vor.u32 %v15424_v7, %v12746_v28  ;;  %v15604_v57 = vld [vmem:[#allocation8 + $0xeec] sm:$0xf0]  ;;  %v7007_v28 = vadd.f32 %v16557_v62, %v6994_v17 }
 0x3d8   :  { %7285 = vmatpush.bf16.msra.mxu2 %v12237_v33  ;;  %7277 = vmatpush.bf16.msra.mxu1 %v11821_v13  ;;  %v13002_v46 = vld [vmem:[#allocation8 + $0xb70] sm:$0xf0]  ;;  %v7058_v33 = vpop.f32.mrf.mxu0  ;;  %v13449_v0 = vor.u32 %v15604_v57, %v13448_v55  ;;  %v13416_v8 = vld [vmem:[#allocation8 + $0xe90] sm:$0xf] }
 0x3d9   :  { %7265 = vmatmul.bf16.vlgmr.msra.gmra.mxu0 %v16431_v24  ;;  %v15272_v47 = vld [vmem:[#allocation8 + $0x494] sm:$0xf]  ;;  %v13005_v36 = vor.u32 %v15488_v45, %v13002_v46  ;;  %v7059_v4 = vadd.f32 %v7058_v33, %v4164_v40  ;;  %v15596_v13 = vld [vmem:[#allocation8 + $0xeac] sm:$0xf0] }
 0x3da   :  { %7309 = vmatpush.bf16.msrb.mxu0 %v12813_v5  ;;  %7245 = vmatpush.bf16.msrb.mxu3 %v13545_v14  ;;  %v12138_v31 = vld [vmem:[#allocation8 + $0x4b0] sm:$0xf0]  ;;  %v13417_v63 = vor.u32 %v15596_v13, %v13416_v8  ;;  %v15588_v46 = vld [vmem:[#allocation8 + $0xe6c] sm:$0xf0]  ;;  %v12048_v8 = vld [vmem:[#allocation8 + $0x3d8] sm:$0xf] }
 0x3db   :  { %7278 = vmatmul.bf16.vlgmr.msra.gmra.mxu1 %v16433_v1  ;;  %v15416_v50 = vld [vmem:[#allocation8 + $0x914] sm:$0xf]  ;;  %v12141_v54 = vor.u32 %v15272_v47, %v12138_v31  ;;  %v16570_v14 = vadd.f32 %v7071_v6, %v7059_v4  ;;  %v11792_v6 = vld [vmem:[#allocation8 + $0x1d8] sm:$0xf] }
 0x3dc   :  { %7322 = vmatpush.bf16.msrb.mxu1 %v13069_v53  ;;  %7286 = vmatpush.bf16.msra.mxu2 %v12205_v9  ;;  %v12714_v51 = vld [vmem:[#allocation8 + $0x930] sm:$0xf0]  ;;  %v15253_v13 = vld [vmem:[#allocation8 + $0x3f4] sm:$0xf0] }
 0x3dd   :  { %v15480_v52 = vld [vmem:[#allocation8 + $0xb14] sm:$0xf]  ;;  %v12717_v20 = vor.u32 %v15416_v50, %v12714_v51  ;;  %v12049_v17 = vor.u32 %v15253_v13, %v12048_v8  ;;  %v11920_v13 = vld [vmem:[#allocation8 + $0x2d8] sm:$0xf] }
 0x3de   :  { %7310 = vmatpush.bf16.msrb.mxu0 %v12781_v2  ;;  %7246 = vmatpush.bf16.msrb.mxu3 %v13513_v23  ;;  %v12970_v21 = vld [vmem:[#allocation8 + $0xb30] sm:$0xf0] }
 0x3df   :  { %v15264_v58 = vld [vmem:[#allocation8 + $0x454] sm:$0xf]  ;;  %v12973_v48 = vor.u32 %v15480_v52, %v12970_v21  ;;  %v15580_v21 = vld [vmem:[#allocation8 + $0xe2c] sm:$0xf0] }
 0x3e0   :  { %7323 = vmatpush.bf16.msrb.mxu1 %v13037_v60  ;;  %7287 = vmatpush.bf16.msra.mxu2 %v12173_v41  ;;  %v12106_v59 = vld [vmem:[#allocation8 + $0x470] sm:$0xf0]  ;;  %v13384_v41 = vld [vmem:[#allocation8 + $0xe50] sm:$0xf]  ;;  %v7060_v56 = vpop.f32.mrf.mxu0 }
 0x3e1   :  { %v15408_v43 = vld [vmem:[#allocation8 + $0x8d4] sm:$0xf]  ;;  %v12109_v22 = vor.u32 %v15264_v58, %v12106_v59  ;;  %v13385_v50 = vor.u32 %v15588_v46, %v13384_v41  ;;  %v6995_v58 = vpop.f32.mrf.mxu3 }
 0x3e2   :  { %7311 = vmatpush.bf16.msrb.mxu0 %v12749_v15  ;;  %7247 = vmatpush.bf16.msrb.mxu3 %v13481_v44  ;;  %v12682_v3 = vld [vmem:[#allocation8 + $0x8f0] sm:$0xf0]  ;;  %v7073_v44 = vpop.f32.mrf.mxu1 }
 0x3e3   :  { %v15472_v49 = vld [vmem:[#allocation8 + $0xad4] sm:$0xf]  ;;  %v12685_v35 = vor.u32 %v15408_v43, %v12682_v3 }
 0x3e4   :  { %7324 = vmatpush.bf16.msrb.mxu1 %v13005_v36  ;;  %7288 = vmatpush.bf16.msra.mxu2 %v12141_v54  ;;  %v12938_v38 = vld [vmem:[#allocation8 + $0xaf0] sm:$0xf0]  ;;  %v7020_v36 = vadd.f32 %v16559_v12, %v7007_v28  ;;  %v13352_v54 = vld [vmem:[#allocation8 + $0xe10] sm:$0xf] }
 0x3e5   :  { %v15256_v5 = vld [vmem:[#allocation8 + $0x414] sm:$0xf]  ;;  %v12941_v25 = vor.u32 %v15472_v49, %v12938_v38  ;;  %v13353_v49 = vor.u32 %v15580_v21, %v13352_v54  ;;  %v11696_v21 = vld [vmem:[#allocation8 + $0x118] sm:$0xf] }
 0x3e6   :  { %v12074_v53 = vld [vmem:[#allocation8 + $0x430] sm:$0xf0]  ;;  %7312 = vmatpush.bf16.msrb.mxu0 %v12717_v20  ;;  %7248 = vmatpush.bf16.msrb.mxu3 %v13449_v0  ;;  %v16576_v57 = vadd.f32 %v16567_v32, %v7020_v36 }
 0x3e7   :  { %v15568_v9 = vld [vmem:[#allocation8 + $0xdd4] sm:$0xf]  ;;  %v12077_v60 = vor.u32 %v15256_v5, %v12074_v53 }
 0x3e8   :  { %v13322_v19 = vld [vmem:[#allocation8 + $0xdf0] sm:$0xf0]  ;;  %7325 = vmatpush.bf16.msrb.mxu1 %v12973_v48  ;;  %7289 = vmatpush.bf16.msra.mxu2 %v12109_v22  ;;  %v15189_v22 = vld [vmem:[#allocation8 + $0x1f4] sm:$0xf0] }
 0x3e9   :  { %v15400_v39 = vld [vmem:[#allocation8 + $0x894] sm:$0xf]  ;;  %v13325_v45 = vor.u32 %v15568_v9, %v13322_v19  ;;  %v11793_v19 = vor.u32 %v15189_v22, %v11792_v6  ;;  %v11664_v6 = vld [vmem:[#allocation8 + $0xd8] sm:$0xf] }
 0x3ea   :  { %v12650_v2 = vld [vmem:[#allocation8 + $0x8b0] sm:$0xf0]  ;;  %7313 = vmatpush.bf16.msrb.mxu0 %v12685_v35  ;;  %7249 = vmatpush.bf16.msrb.mxu3 %v13417_v63  ;;  %v15181_v63 = vld [vmem:[#allocation8 + $0x1b4] sm:$0xf0] }
 0x3eb   :  { %v15464_v23 = vld [vmem:[#allocation8 + $0xa94] sm:$0xf]  ;;  %v12653_v27 = vor.u32 %v15400_v39, %v12650_v2  ;;  %v15157_v22 = vld [vmem:[#allocation8 + $0xf4] sm:$0xf0] }
 0x3ec   :  { %v12906_v7 = vld [vmem:[#allocation8 + $0xab0] sm:$0xf0]  ;;  %7326 = vmatpush.bf16.msrb.mxu1 %v12941_v25  ;;  %7290 = vmatpush.bf16.msra.mxu2 %v12077_v60  ;;  %v11760_v25 = vld [vmem:[#allocation8 + $0x198] sm:$0xf] }
 0x3ed   :  { %v15560_v30 = vld [vmem:[#allocation8 + $0xd94] sm:$0xf]  ;;  %v12909_v31 = vor.u32 %v15464_v23, %v12906_v7  ;;  %v12016_v60 = vld [vmem:[#allocation8 + $0x398] sm:$0xf]  ;;  %v11761_v46 = vor.u32 %v15181_v63, %v11760_v25  ;;  %v11665_v63 = vor.u32 %v15157_v22, %v11664_v6 }
 0x3ee   :  { %v13290_v47 = vld [vmem:[#allocation8 + $0xdb0] sm:$0xf0]  ;;  %7314 = vmatpush.bf16.msrb.mxu0 %v12653_v27  ;;  %7250 = vmatpush.bf16.msrb.mxu3 %v13385_v50  ;;  %v15245_v23 = vld [vmem:[#allocation8 + $0x3b4] sm:$0xf0] }
 0x3ef   :  { %v15392_v15 = vld [vmem:[#allocation8 + $0x854] sm:$0xf]  ;;  %v13293_v52 = vor.u32 %v15560_v30, %v13290_v47  ;;  %7291 = vmatmul.bf16.vlgmr.msra.gmra.mxu2 %v16435_v26  ;;  %v12017_v27 = vor.u32 %v15245_v23, %v12016_v60  ;;  %v11728_v30 = vld [vmem:[#allocation8 + $0x158] sm:$0xf] }
 0x3f0   :  { %v12618_v40 = vld [vmem:[#allocation8 + $0x870] sm:$0xf0]  ;;  %7335 = vmatpush.bf16.msrb.mxu2 %v13325_v45  ;;  %7327 = vmatpush.bf16.msrb.mxu1 %v12909_v31  ;;  %v15173_v47 = vld [vmem:[#allocation8 + $0x174] sm:$0xf0] }
 0x3f1   :  { %v15456_v51 = vld [vmem:[#allocation8 + $0xa54] sm:$0xf]  ;;  %v12621_v59 = vor.u32 %v15392_v15, %v12618_v40  ;;  %v11984_v15 = vld [vmem:[#allocation8 + $0x358] sm:$0xf] }
 0x3f2   :  { %v12874_v62 = vld [vmem:[#allocation8 + $0xa70] sm:$0xf0]  ;;  %7251 = vmatpush.bf16.msrb.mxu3 %v13353_v49  ;;  %v15237_v40 = vld [vmem:[#allocation8 + $0x374] sm:$0xf0] }
 0x3f3   :  { %v15376_v55 = vld [vmem:[#allocation8 + $0x7d4] sm:$0xf]  ;;  %v12877_v12 = vor.u32 %v15456_v51, %v12874_v62  ;;  %7315 = vmatpush.bf16.msrb.mxu0 %v12621_v59  ;;  %v7084_v62 = vpop.f32.mrf.mxu2  ;;  %v11985_v54 = vor.u32 %v15237_v40, %v11984_v15  ;;  %v11600_v15 = vld [vmem:[#allocation8 + $0x58] sm:$0xf] }
 0x3f4   :  { %v12554_v20 = vld [vmem:[#allocation8 + $0x7f0] sm:$0xf0]  ;;  %7336 = vmatpush.bf16.msrb.mxu2 %v13293_v52  ;;  %v11729_v52 = vor.u32 %v15173_v47, %v11728_v30  ;;  %v16583_v58 = vadd.f32 %v7084_v62, %v16570_v14  ;;  %v12272_v47 = vld [vmem:[#allocation8 + $0x598] sm:$0xf] }
 0x3f5   :  { %v15552_v33 = vld [vmem:[#allocation8 + $0xd54] sm:$0xf]  ;;  %v12557_v32 = vor.u32 %v15376_v55, %v12554_v20  ;;  %7328 = vmatpush.bf16.msrb.mxu1 %v12877_v12  ;;  %7252 = vmatmul.bf16.vlgmr.msrb.gmra.mxu3 %v16493_v18  ;;  %v15165_v55 = vld [vmem:[#allocation8 + $0x134] sm:$0xf0] }
 0x3f6   :  { %v13258_v48 = vld [vmem:[#allocation8 + $0xd70] sm:$0xf0]  ;;  %v11697_v49 = vor.u32 %v15165_v55, %v11696_v21  ;;  %v16587_v14 = vpop.f32.mrf.mxu1  ;;  %v15205_v62 = vld [vmem:[#allocation8 + $0x274] sm:$0xf0] }
 0x3f7   :  { %v15384_v0 = vld [vmem:[#allocation8 + $0x814] sm:$0xf]  ;;  %v13261_v38 = vor.u32 %v15552_v33, %v13258_v48  ;;  %7296 = vmatpush.bf16.msra.mxu3 %v12557_v32  ;;  %v11952_v33 = vld [vmem:[#allocation8 + $0x318] sm:$0xf]  ;;  %v16585_v32 = vpop.f32.mrf.mxu0 }
 0x3f8   :  { %v12586_v43 = vld [vmem:[#allocation8 + $0x830] sm:$0xf0]  ;;  %v15229_v48 = vld [vmem:[#allocation8 + $0x334] sm:$0xf0] }
 0x3f9   :  { %v15448_v3 = vld [vmem:[#allocation8 + $0xa14] sm:$0xf]  ;;  %v12589_v53 = vor.u32 %v15384_v0, %v12586_v43  ;;  %7337 = vmatpush.bf16.msrb.mxu2 %v13261_v38  ;;  %v15197_v6 = vld [vmem:[#allocation8 + $0x234] sm:$0xf0] }
 0x3fa   :  { %v12842_v4 = vld [vmem:[#allocation8 + $0xa30] sm:$0xf0] }
 0x3fb   :  { %v15368_v5 = vld [vmem:[#allocation8 + $0x794] sm:$0xf]  ;;  %v12845_v9 = vor.u32 %v15448_v3, %v12842_v4  ;;  %7316 = vmatpush.bf16.msrb.mxu0 %v12589_v53  ;;  %v11953_v4 = vor.u32 %v15229_v48, %v11952_v33  ;;  %v7086_v25 = vpop.f32.mrf.mxu2  ;;  %v15301_v33 = vld [vmem:[#allocation8 + $0x574] sm:$0xf0] }
 0x3fc   :  { %v12522_v42 = vld [vmem:[#allocation8 + $0x7b0] sm:$0xf0] }
 0x3fd   :  { %v15544_v34 = vld [vmem:[#allocation8 + $0xd14] sm:$0xf]  ;;  %v12525_v39 = vor.u32 %v15368_v5, %v12522_v42  ;;  %7329 = vmatpush.bf16.msrb.mxu1 %v12845_v9  ;;  %v15221_v5 = vld [vmem:[#allocation8 + $0x2f4] sm:$0xf0] }
 0x3fe   :  { %v13226_v35 = vld [vmem:[#allocation8 + $0xd30] sm:$0xf0]  ;;  %7317 = vmatmul.bf16.vlgmr.msrb.gmra.mxu0 %v16453_v37  ;;  %v12304_v9 = vld [vmem:[#allocation8 + $0x5d8] sm:$0xf] }
 0x3ff   :  { %v13229_v2 = vor.u32 %v15544_v34, %v13226_v35  ;;  %v15360_v7 = vld [vmem:[#allocation8 + $0x754] sm:$0xf]  ;;  %7361 = vmatpush.bf16.msra.mxu0 %v11793_v19  ;;  %7297 = vmatpush.bf16.msra.mxu3 %v12525_v39  ;;  %v15317_v19 = vld [vmem:[#allocation8 + $0x5f4] sm:$0xf0]  ;;  %v11921_v39 = vor.u32 %v15221_v5, %v11920_v13  ;;  %v7112_v40 = vpop.f32.mrf.mxu0 }
 0x400   :  { %v12490_v28 = vld [vmem:[#allocation8 + $0x770] sm:$0xf0]  ;;  %7330 = vmatmul.bf16.vlgmr.msrb.gmra.mxu1 %v16455_v11  ;;  %v15445_v13 = vld [vmem:[#allocation8 + $0x9f4] sm:$0xf0] }
 0x401   :  { %v15536_v45 = vld [vmem:[#allocation8 + $0xcd4] sm:$0xf]  ;;  %7374 = vmatpush.bf16.msra.mxu1 %v12049_v17  ;;  %7338 = vmatpush.bf16.msrb.mxu2 %v13229_v2  ;;  %v12493_v56 = vor.u32 %v15360_v7, %v12490_v28  ;;  %v7045_v17 = vpop.f32.mrf.mxu3  ;;  %v11632_v7 = vld [vmem:[#allocation8 + $0x98] sm:$0xf] }
 0x402   :  { %v13194_v41 = vld [vmem:[#allocation8 + $0xcf0] sm:$0xf0]  ;;  %v16590_v2 = vadd.f32 %v7045_v17, %v16576_v57  ;;  %v15149_v28 = vld [vmem:[#allocation8 + $0xb4] sm:$0xf0]  ;;  %v7125_v57 = vpop.f32.mrf.mxu1 }
 0x403   :  { %v13197_v31 = vor.u32 %v15536_v45, %v13194_v41  ;;  %v15352_v36 = vld [vmem:[#allocation8 + $0x714] sm:$0xf]  ;;  %7362 = vmatpush.bf16.msra.mxu0 %v11761_v46  ;;  %7298 = vmatpush.bf16.msra.mxu3 %v12493_v56  ;;  %v11888_v45 = vld [vmem:[#allocation8 + $0x298] sm:$0xf]  ;;  %v12305_v41 = vor.u32 %v15317_v19, %v12304_v9 }
 0x404   :  { %v12458_v44 = vld [vmem:[#allocation8 + $0x730] sm:$0xf0]  ;;  %v15213_v46 = vld [vmem:[#allocation8 + $0x2b4] sm:$0xf0] }
 0x405   :  { %v15528_v50 = vld [vmem:[#allocation8 + $0xc94] sm:$0xf]  ;;  %7375 = vmatpush.bf16.msra.mxu1 %v12017_v27  ;;  %7339 = vmatpush.bf16.msrb.mxu2 %v13197_v31  ;;  %v12461_v59 = vor.u32 %v15352_v36, %v12458_v44  ;;  %v15309_v56 = vld [vmem:[#allocation8 + $0x5b4] sm:$0xf0]  ;;  %v11633_v31 = vor.u32 %v15149_v28, %v11632_v7  ;;  %v11889_v36 = vor.u32 %v15213_v46, %v11888_v45 }
 0x406   :  { %v13162_v51 = vld [vmem:[#allocation8 + $0xcb0] sm:$0xf0]  ;;  %v13072_v5 = vld [vmem:[#allocation8 + $0xbd8] sm:$0xf] }
 0x407   :  { %v13165_v20 = vor.u32 %v15528_v50, %v13162_v51  ;;  %v15344_v12 = vld [vmem:[#allocation8 + $0x6d4] sm:$0xf]  ;;  %7363 = vmatpush.bf16.msra.mxu0 %v11729_v52  ;;  %7299 = vmatpush.bf16.msra.mxu3 %v12461_v59  ;;  %v15141_v50 = vld [vmem:[#allocation8 + $0x74] sm:$0xf0]  ;;  %v12273_v52 = vor.u32 %v15309_v56, %v12272_v47 }
 0x408   :  { %v12426_v0 = vld [vmem:[#allocation8 + $0x6f0] sm:$0xf0]  ;;  %v11856_v51 = vld [vmem:[#allocation8 + $0x258] sm:$0xf] }
 0x409   :  { %v15520_v43 = vld [vmem:[#allocation8 + $0xc54] sm:$0xf]  ;;  %7376 = vmatpush.bf16.msra.mxu1 %v11985_v54  ;;  %7340 = vmatpush.bf16.msrb.mxu2 %v13165_v20  ;;  %v12429_v38 = vor.u32 %v15344_v12, %v12426_v0  ;;  %v12240_v20 = vld [vmem:[#allocation8 + $0x558] sm:$0xf]  ;;  %v7047_v48 = vpop.f32.mrf.mxu3  ;;  %v11601_v12 = vor.u32 %v15141_v50, %v11600_v15 }
 0x40a   :  { %v13130_v3 = vld [vmem:[#allocation8 + $0xc70] sm:$0xf0]  ;;  %v11568_v0 = vld [vmem:[#allocation8 + $0x18] sm:$0xf] }
 0x40b   :  { %v13133_v8 = vor.u32 %v15520_v43, %v13130_v3  ;;  %v15336_v53 = vld [vmem:[#allocation8 + $0x694] sm:$0xf]  ;;  %7364 = vmatpush.bf16.msra.mxu0 %v11697_v49  ;;  %7300 = vmatpush.bf16.msra.mxu3 %v12429_v38  ;;  %v11857_v43 = vor.u32 %v15205_v62, %v11856_v51  ;;  %v15133_v49 = vld [vmem:[#allocation8 + $0x34] sm:$0xf0]  ;;  %v12241_v38 = vor.u32 %v15301_v33, %v12240_v20 }
 0x40c   :  { %v12394_v42 = vld [vmem:[#allocation8 + $0x6b0] sm:$0xf0]  ;;  %v12208_v9 = vld [vmem:[#allocation8 + $0x518] sm:$0xf] }
 0x40d   :  { %v15512_v34 = vld [vmem:[#allocation8 + $0xc14] sm:$0xf]  ;;  %7377 = vmatpush.bf16.msra.mxu1 %v11953_v4  ;;  %7341 = vmatpush.bf16.msrb.mxu2 %v13133_v8  ;;  %v12397_v60 = vor.u32 %v15336_v53, %v12394_v42  ;;  %v11824_v4 = vld [vmem:[#allocation8 + $0x218] sm:$0xf] }
 0x40e   :  { %v13098_v35 = vld [vmem:[#allocation8 + $0xc30] sm:$0xf0]  ;;  %v12816_v8 = vld [vmem:[#allocation8 + $0x9d8] sm:$0xf]  ;;  %v11825_v17 = vor.u32 %v15197_v6, %v11824_v4 }
 0x40f   :  { %v13101_v23 = vor.u32 %v15512_v34, %v13098_v35  ;;  %v15328_v27 = vld [vmem:[#allocation8 + $0x654] sm:$0xf]  ;;  %7365 = vmatpush.bf16.msra.mxu0 %v11665_v63  ;;  %7301 = vmatpush.bf16.msra.mxu3 %v12397_v60  ;;  %v15509_v53 = vld [vmem:[#allocation8 + $0xbf4] sm:$0xf0]  ;;  %v11569_v35 = vor.u32 %v15133_v49, %v11568_v0  ;;  %v12817_v25 = vor.u32 %v15445_v13, %v12816_v8 }
 0x410   :  { %v12362_v30 = vld [vmem:[#allocation8 + $0x670] sm:$0xf0]  ;;  %v15293_v19 = vld [vmem:[#allocation8 + $0x534] sm:$0xf0]  ;;  %v13073_v63 = vor.u32 %v15509_v53, %v13072_v5 }
 0x411   :  { %7378 = vmatpush.bf16.msra.mxu1 %v11921_v39  ;;  %7342 = vmatpush.bf16.msrb.mxu2 %v13101_v23  ;;  %v12365_v44 = vor.u32 %v15328_v27, %v12362_v30  ;;  %v15320_v54 = vld [vmem:[#allocation8 + $0x614] sm:$0xf]  ;;  %v12784_v60 = vld [vmem:[#allocation8 + $0x998] sm:$0xf]  ;;  %v12209_v28 = vor.u32 %v15293_v19, %v12208_v9 }
 0x412   :  { %v12330_v21 = vld [vmem:[#allocation8 + $0x630] sm:$0xf0]  ;;  %v15437_v23 = vld [vmem:[#allocation8 + $0x9b4] sm:$0xf0] }
 0x413   :  { %v15632_v55 = vld [vmem:[#allocation8 + $0xfd4] sm:$0xf]  ;;  %7366 = vmatpush.bf16.msra.mxu0 %v11633_v31  ;;  %7302 = vmatpush.bf16.msra.mxu3 %v12365_v44  ;;  %v12333_v3 = vor.u32 %v15320_v54, %v12330_v21  ;;  %v13040_v7 = vld [vmem:[#allocation8 + $0xb98] sm:$0xf]  ;;  %v12785_v47 = vor.u32 %v15437_v23, %v12784_v60  ;;  %v16596_v54 = vpop.f32.mrf.mxu2 }
 0x414   :  { %v13578_v59 = vld [vmem:[#allocation8 + $0xff0] sm:$0xf0]  ;;  %7343 = vmatmul.bf16.vlgmr.msrb.gmra.mxu2 %v16478_v10  ;;  %v15501_v45 = vld [vmem:[#allocation8 + $0xbb4] sm:$0xf0]  ;;  %v7162_v8 = vpop.f32.mrf.mxu0 }
 0x415   :  { %7387 = vmatpush.bf16.msra.mxu2 %v12305_v41  ;;  %7379 = vmatpush.bf16.msra.mxu1 %v11889_v36  ;;  %v13581_v22 = vor.u32 %v15632_v55, %v13578_v59  ;;  %v15624_v42 = vld [vmem:[#allocation8 + $0xf94] sm:$0xf]  ;;  %v12176_v27 = vld [vmem:[#allocation8 + $0x4d8] sm:$0xf]  ;;  %v13041_v56 = vor.u32 %v15501_v45, %v13040_v7  ;;  %v16598_v55 = vld [vmem:[#allocation10] sm:$0xff] }
 0x416   :  { %v13546_v34 = vld [vmem:[#allocation8 + $0xfb0] sm:$0xf0]  ;;  %v15285_v30 = vld [vmem:[#allocation8 + $0x4f4] sm:$0xf0]  ;;  %v4165_v59 = vperm.slane %v16598_v55, 4  ;;  %v7175_v9 = vpop.f32.mrf.mxu1  ;;  %v7097_v7 = vpop.f32.mrf.mxu3 }
 0x417   :  { %7367 = vmatpush.bf16.msra.mxu0 %v11601_v12  ;;  %7303 = vmatpush.bf16.msra.mxu3 %v12333_v3  ;;  %v13549_v39 = vor.u32 %v15624_v42, %v13546_v34  ;;  %v15616_v41 = vld [vmem:[#allocation8 + $0xf54] sm:$0xf]  ;;  %v12752_v15 = vld [vmem:[#allocation8 + $0x958] sm:$0xf]  ;;  %v12177_v36 = vor.u32 %v15285_v30, %v12176_v27  ;;  %v7098_v27 = vadd.f32 %v7097_v7, %v16583_v58 }
 0x418   :  { %v13514_v46 = vld [vmem:[#allocation8 + $0xf70] sm:$0xf0]  ;;  %v15429_v40 = vld [vmem:[#allocation8 + $0x974] sm:$0xf0] }
 0x419   :  { %7388 = vmatpush.bf16.msra.mxu2 %v12273_v52  ;;  %7380 = vmatpush.bf16.msra.mxu1 %v11857_v43  ;;  %v13517_v31 = vor.u32 %v15616_v41, %v13514_v46  ;;  %v13008_v57 = vld [vmem:[#allocation8 + $0xb58] sm:$0xf]  ;;  %v15608_v50 = vld [vmem:[#allocation8 + $0xf14] sm:$0xf]  ;;  %v12753_v21 = vor.u32 %v15429_v40, %v12752_v15 }
 0x41a   :  { %7304 = vmatmul.bf16.vlgmr.msra.gmra.mxu3 %v16438_v29  ;;  %v15493_v44 = vld [vmem:[#allocation8 + $0xb74] sm:$0xf0]  ;;  %v13482_v51 = vld [vmem:[#allocation8 + $0xf30] sm:$0xf0] }
 0x41b   :  { %7348 = vmatpush.bf16.msrb.mxu3 %v13581_v22  ;;  %7368 = vmatpush.bf16.msra.mxu0 %v11569_v35  ;;  %v12144_v62 = vld [vmem:[#allocation8 + $0x498] sm:$0xf]  ;;  %v13009_v20 = vor.u32 %v15493_v44, %v13008_v57  ;;  %v13485_v33 = vor.u32 %v15608_v50, %v13482_v51  ;;  %v15600_v49 = vld [vmem:[#allocation8 + $0xed4] sm:$0xf]  ;;  %v7163_v35 = vadd.f32 %v7162_v8, %v4165_v59 }
 0x41c   :  { %v15277_v52 = vld [vmem:[#allocation8 + $0x4b4] sm:$0xf0]  ;;  %v13450_v4 = vld [vmem:[#allocation8 + $0xef0] sm:$0xf0]  ;;  %v7164_v58 = vpop.f32.mrf.mxu0 }
 0x41d   :  { %7389 = vmatpush.bf16.msra.mxu2 %v12241_v38  ;;  %7381 = vmatpush.bf16.msra.mxu1 %v11825_v17  ;;  %v12720_v48 = vld [vmem:[#allocation8 + $0x918] sm:$0xf]  ;;  %v12145_v43 = vor.u32 %v15277_v52, %v12144_v62  ;;  %v13453_v5 = vor.u32 %v15600_v49, %v13450_v4  ;;  %v16601_v23 = vadd.f32 %v7175_v9, %v7163_v35  ;;  %v15584_v50 = vld [vmem:[#allocation8 + $0xe54] sm:$0xf]  ;;  %v15169_v58 = vld [vmem:[#allocation8 + $0x15c] sm:$0xf] }
 0x41e   :  { %7369 = vmatmul.bf16.vlgmr.msra.gmra.mxu0 %v16431_v24  ;;  %v15421_v12 = vld [vmem:[#allocation8 + $0x934] sm:$0xf0]  ;;  %v13386_v51 = vld [vmem:[#allocation8 + $0xe70] sm:$0xf0] }
 0x41f   :  { %7413 = vmatpush.bf16.msrb.mxu0 %v12817_v25  ;;  %7349 = vmatpush.bf16.msrb.mxu3 %v13549_v39  ;;  %v12976_v0 = vld [vmem:[#allocation8 + $0xb18] sm:$0xf]  ;;  %v12721_v38 = vor.u32 %v15421_v12, %v12720_v48  ;;  %v15592_v25 = vld [vmem:[#allocation8 + $0xe94] sm:$0xf]  ;;  %v7177_v12 = vpop.f32.mrf.mxu1 }
 0x420   :  { %7382 = vmatmul.bf16.vlgmr.msra.gmra.mxu1 %v16433_v1  ;;  %v15485_v3 = vld [vmem:[#allocation8 + $0xb34] sm:$0xf0]  ;;  %v15576_v49 = vld [vmem:[#allocation8 + $0xe14] sm:$0xf]  ;;  %v11986_v12 = vld [vmem:[#allocation8 + $0x378] sm:$0xf0] }
 0x421   :  { %7426 = vmatpush.bf16.msrb.mxu1 %v13073_v63  ;;  %7390 = vmatpush.bf16.msra.mxu2 %v12209_v28  ;;  %v12112_v6 = vld [vmem:[#allocation8 + $0x458] sm:$0xf]  ;;  %v12977_v13 = vor.u32 %v15485_v3, %v12976_v0  ;;  %v13418_v63 = vld [vmem:[#allocation8 + $0xeb0] sm:$0xf0]  ;;  %v7138_v28 = vpop.f32.mrf.mxu2  ;;  %v13389_v0 = vor.u32 %v15584_v50, %v13386_v51 }
 0x422   :  { %v15269_v22 = vld [vmem:[#allocation8 + $0x474] sm:$0xf0]  ;;  %v13354_v4 = vld [vmem:[#allocation8 + $0xe30] sm:$0xf0] }
 0x423   :  { %7414 = vmatpush.bf16.msrb.mxu0 %v12785_v47  ;;  %7350 = vmatpush.bf16.msrb.mxu3 %v13517_v31  ;;  %v12688_v53 = vld [vmem:[#allocation8 + $0x8d8] sm:$0xf]  ;;  %v12113_v19 = vor.u32 %v15269_v22, %v12112_v6  ;;  %v13421_v47 = vor.u32 %v15592_v25, %v13418_v63  ;;  %v13357_v9 = vor.u32 %v15576_v49, %v13354_v4  ;;  %v11794_v25 = vld [vmem:[#allocation8 + $0x1f8] sm:$0xf0] }
 0x424   :  { %v15413_v42 = vld [vmem:[#allocation8 + $0x8f4] sm:$0xf0] }
 0x425   :  { %7427 = vmatpush.bf16.msrb.mxu1 %v13041_v56  ;;  %7391 = vmatpush.bf16.msra.mxu2 %v12177_v36  ;;  %v12944_v34 = vld [vmem:[#allocation8 + $0xad8] sm:$0xf]  ;;  %v12689_v45 = vor.u32 %v15413_v42, %v12688_v53  ;;  %v7111_v36 = vadd.f32 %v16585_v32, %v7098_v27 }
 0x426   :  { %v15477_v17 = vld [vmem:[#allocation8 + $0xaf4] sm:$0xf0] }
 0x427   :  { %7415 = vmatpush.bf16.msrb.mxu0 %v12753_v21  ;;  %7351 = vmatpush.bf16.msrb.mxu3 %v13485_v33  ;;  %v12080_v39 = vld [vmem:[#allocation8 + $0x418] sm:$0xf]  ;;  %v12945_v30 = vor.u32 %v15477_v17, %v12944_v34  ;;  %v7124_v48 = vadd.f32 %v16587_v14, %v7111_v36  ;;  %v15185_v17 = vld [vmem:[#allocation8 + $0x1dc] sm:$0xf] }
 0x428   :  { %v15261_v60 = vld [vmem:[#allocation8 + $0x434] sm:$0xf0]  ;;  %v12018_v36 = vld [vmem:[#allocation8 + $0x3b8] sm:$0xf0] }
 0x429   :  { %7428 = vmatpush.bf16.msrb.mxu1 %v13009_v20  ;;  %7392 = vmatpush.bf16.msra.mxu2 %v12145_v43  ;;  %v13328_v41 = vld [vmem:[#allocation8 + $0xdd8] sm:$0xf]  ;;  %v12081_v15 = vor.u32 %v15261_v60, %v12080_v39  ;;  %v16607_v22 = vadd.f32 %v16596_v54, %v7124_v48  ;;  %v15249_v39 = vld [vmem:[#allocation8 + $0x3dc] sm:$0xf] }
 0x42a   :  { %v15573_v46 = vld [vmem:[#allocation8 + $0xdf4] sm:$0xf0]  ;;  %v12050_v60 = vld [vmem:[#allocation8 + $0x3f8] sm:$0xf0] }
 0x42b   :  { %7416 = vmatpush.bf16.msrb.mxu0 %v12721_v38  ;;  %7352 = vmatpush.bf16.msrb.mxu3 %v13453_v5  ;;  %v12656_v56 = vld [vmem:[#allocation8 + $0x898] sm:$0xf]  ;;  %v13329_v44 = vor.u32 %v15573_v46, %v13328_v41  ;;  %v7099_v38 = vpop.f32.mrf.mxu3  ;;  %v15233_v48 = vld [vmem:[#allocation8 + $0x35c] sm:$0xf] }
 0x42c   :  { %v15405_v31 = vld [vmem:[#allocation8 + $0x8b4] sm:$0xf0]  ;;  %v15161_v38 = vld [vmem:[#allocation8 + $0x11c] sm:$0xf] }
 0x42d   :  { %7429 = vmatpush.bf16.msrb.mxu1 %v12977_v13  ;;  %7393 = vmatpush.bf16.msra.mxu2 %v12113_v19  ;;  %v12912_v40 = vld [vmem:[#allocation8 + $0xa98] sm:$0xf]  ;;  %v12657_v62 = vor.u32 %v15405_v31, %v12656_v56  ;;  %v15177_v56 = vld [vmem:[#allocation8 + $0x19c] sm:$0xf] }
 0x42e   :  { %v15469_v57 = vld [vmem:[#allocation8 + $0xab4] sm:$0xf0]  ;;  %v11762_v31 = vld [vmem:[#allocation8 + $0x1b8] sm:$0xf0] }
 0x42f   :  { %7417 = vmatpush.bf16.msrb.mxu0 %v12689_v45  ;;  %v13296_v52 = vld [vmem:[#allocation8 + $0xd98] sm:$0xf]  ;;  %7353 = vmatpush.bf16.msrb.mxu3 %v13421_v47  ;;  %v12913_v59 = vor.u32 %v15469_v57, %v12912_v40  ;;  %v12053_v47 = vor.u32 %v15249_v39, %v12050_v60  ;;  %v15241_v57 = vld [vmem:[#allocation8 + $0x39c] sm:$0xf] }
 0x430   :  { %v15565_v21 = vld [vmem:[#allocation8 + $0xdb4] sm:$0xf0]  ;;  %v7188_v49 = vpop.f32.mrf.mxu2 }
 0x431   :  { %7430 = vmatpush.bf16.msrb.mxu1 %v12945_v30  ;;  %v12624_v20 = vld [vmem:[#allocation8 + $0x858] sm:$0xf]  ;;  %7394 = vmatpush.bf16.msra.mxu2 %v12081_v15  ;;  %v13297_v3 = vor.u32 %v15565_v21, %v13296_v52  ;;  %v11797_v30 = vor.u32 %v15185_v17, %v11794_v25  ;;  %v11765_v52 = vor.u32 %v15177_v56, %v11762_v31  ;;  %v12306_v56 = vld [vmem:[#allocation8 + $0x5f8] sm:$0xf0] }
 0x432   :  { %v15397_v33 = vld [vmem:[#allocation8 + $0x874] sm:$0xf0]  ;;  %v12021_v21 = vor.u32 %v15241_v57, %v12018_v36 }
 0x433   :  { %v12880_v43 = vld [vmem:[#allocation8 + $0xa58] sm:$0xf]  ;;  %7418 = vmatpush.bf16.msrb.mxu0 %v12657_v62  ;;  %v12625_v8 = vor.u32 %v15397_v33, %v12624_v20  ;;  %7354 = vmatpush.bf16.msrb.mxu3 %v13389_v0 }
 0x434   :  { %v15461_v32 = vld [vmem:[#allocation8 + $0xa74] sm:$0xf0]  ;;  %7395 = vmatmul.bf16.vlgmr.msra.gmra.mxu2 %v16435_v26 }
 0x435   :  { %7439 = vmatpush.bf16.msrb.mxu2 %v13329_v44  ;;  %v12560_v6 = vld [vmem:[#allocation8 + $0x7d8] sm:$0xf]  ;;  %7431 = vmatpush.bf16.msrb.mxu1 %v12913_v59  ;;  %v12881_v14 = vor.u32 %v15461_v32, %v12880_v43  ;;  %v11730_v59 = vld [vmem:[#allocation8 + $0x178] sm:$0xf0] }
 0x436   :  { %v15381_v13 = vld [vmem:[#allocation8 + $0x7f4] sm:$0xf0]  ;;  %v11733_v4 = vor.u32 %v15169_v58, %v11730_v59  ;;  %v16616_v39 = vpop.f32.mrf.mxu0  ;;  %v7149_v31 = vpop.f32.mrf.mxu3  ;;  %v11890_v58 = vld [vmem:[#allocation8 + $0x2b8] sm:$0xf0] }
 0x437   :  { %v13264_v5 = vld [vmem:[#allocation8 + $0xd58] sm:$0xf]  ;;  %v12561_v54 = vor.u32 %v15381_v13, %v12560_v6  ;;  %7419 = vmatpush.bf16.msrb.mxu0 %v12625_v8  ;;  %7355 = vmatpush.bf16.msrb.mxu3 %v13357_v9  ;;  %v11989_v6 = vor.u32 %v15233_v48, %v11986_v12  ;;  %v11698_v8 = vld [vmem:[#allocation8 + $0x138] sm:$0xf0]  ;;  %v16614_v13 = vadd.f32 %v7188_v49, %v16601_v23 }
 0x438   :  { %v15557_v53 = vld [vmem:[#allocation8 + $0xd74] sm:$0xf0]  ;;  %v11701_v17 = vor.u32 %v15161_v38, %v11698_v8  ;;  %v16618_v23 = vpop.f32.mrf.mxu1  ;;  %v16621_v36 = vadd.f32 %v7149_v31, %v16607_v22  ;;  %v12274_v48 = vld [vmem:[#allocation8 + $0x5b8] sm:$0xf0] }
 0x439   :  { %v12592_v42 = vld [vmem:[#allocation8 + $0x818] sm:$0xf]  ;;  %7440 = vmatpush.bf16.msrb.mxu2 %v13297_v3  ;;  %v13265_v63 = vor.u32 %v15557_v53, %v13264_v5  ;;  %7432 = vmatpush.bf16.msrb.mxu1 %v12881_v14  ;;  %v15225_v14 = vld [vmem:[#allocation8 + $0x31c] sm:$0xf] }
 0x43a   :  { %v15389_v34 = vld [vmem:[#allocation8 + $0x834] sm:$0xf0]  ;;  %7356 = vmatmul.bf16.vlgmr.msrb.gmra.mxu3 %v16493_v18  ;;  %v11602_v49 = vld [vmem:[#allocation8 + $0x78] sm:$0xf0] }
 0x43b   :  { %v12848_v35 = vld [vmem:[#allocation8 + $0xa18] sm:$0xf]  ;;  %v12593_v28 = vor.u32 %v15389_v34, %v12592_v42  ;;  %7400 = vmatpush.bf16.msra.mxu3 %v12561_v54  ;;  %v11954_v42 = vld [vmem:[#allocation8 + $0x338] sm:$0xf0] }
 0x43c   :  { %v15453_v19 = vld [vmem:[#allocation8 + $0xa34] sm:$0xf0]  ;;  %v11957_v25 = vor.u32 %v15225_v14, %v11954_v42  ;;  %v15153_v54 = vld [vmem:[#allocation8 + $0xdc] sm:$0xf] }
 0x43d   :  { %v12528_v7 = vld [vmem:[#allocation8 + $0x798] sm:$0xf]  ;;  %v12849_v27 = vor.u32 %v15453_v19, %v12848_v35  ;;  %7441 = vmatpush.bf16.msrb.mxu2 %v13265_v63  ;;  %7420 = vmatpush.bf16.msrb.mxu0 %v12593_v28  ;;  %v11666_v63 = vld [vmem:[#allocation8 + $0xf8] sm:$0xf0] }
 0x43e   :  { %v15373_v45 = vld [vmem:[#allocation8 + $0x7b4] sm:$0xf0]  ;;  %v15217_v28 = vld [vmem:[#allocation8 + $0x2dc] sm:$0xf] }
 0x43f   :  { %v13232_v41 = vld [vmem:[#allocation8 + $0xd18] sm:$0xf]  ;;  %v12529_v15 = vor.u32 %v15373_v45, %v12528_v7  ;;  %7433 = vmatpush.bf16.msrb.mxu1 %v12849_v27  ;;  %v11922_v45 = vld [vmem:[#allocation8 + $0x2f8] sm:$0xf0] }
 0x440   :  { %v15549_v46 = vld [vmem:[#allocation8 + $0xd34] sm:$0xf0]  ;;  %7421 = vmatmul.bf16.vlgmr.msrb.gmra.mxu0 %v16453_v37  ;;  %v11925_v57 = vor.u32 %v15217_v28, %v11922_v45  ;;  %v7229_v22 = vpop.f32.mrf.mxu1  ;;  %v15297_v42 = vld [vmem:[#allocation8 + $0x55c] sm:$0xf] }
 0x441   :  { %v13233_v40 = vor.u32 %v15549_v46, %v13232_v41  ;;  %v12496_v44 = vld [vmem:[#allocation8 + $0x758] sm:$0xf]  ;;  %7465 = vmatpush.bf16.msra.mxu0 %v11797_v30  ;;  %7401 = vmatpush.bf16.msra.mxu3 %v12529_v15  ;;  %v7190_v15 = vpop.f32.mrf.mxu2  ;;  %v15441_v45 = vld [vmem:[#allocation8 + $0x9dc] sm:$0xf] }
 0x442   :  { %v15365_v50 = vld [vmem:[#allocation8 + $0x774] sm:$0xf0]  ;;  %7434 = vmatmul.bf16.vlgmr.msrb.gmra.mxu1 %v16455_v11  ;;  %v15289_v31 = vld [vmem:[#allocation8 + $0x51c] sm:$0xf] }
 0x443   :  { %v13200_v51 = vld [vmem:[#allocation8 + $0xcd8] sm:$0xf]  ;;  %7478 = vmatpush.bf16.msra.mxu1 %v12053_v47  ;;  %7442 = vmatpush.bf16.msrb.mxu2 %v13233_v40  ;;  %v12497_v20 = vor.u32 %v15365_v50, %v12496_v44  ;;  %v15313_v47 = vld [vmem:[#allocation8 + $0x5dc] sm:$0xf]  ;;  %v11669_v40 = vor.u32 %v15153_v54, %v11666_v63 }
 0x444   :  { %v15541_v62 = vld [vmem:[#allocation8 + $0xcf4] sm:$0xf0]  ;;  %v11570_v54 = vld [vmem:[#allocation8 + $0x38] sm:$0xf0] }
 0x445   :  { %v13201_v33 = vor.u32 %v15541_v62, %v13200_v51  ;;  %v12464_v0 = vld [vmem:[#allocation8 + $0x718] sm:$0xf]  ;;  %7466 = vmatpush.bf16.msra.mxu0 %v11765_v52  ;;  %7402 = vmatpush.bf16.msra.mxu3 %v12497_v20  ;;  %v15145_v51 = vld [vmem:[#allocation8 + $0x9c] sm:$0xf] }
 0x446   :  { %v15357_v43 = vld [vmem:[#allocation8 + $0x734] sm:$0xf0]  ;;  %v11634_v62 = vld [vmem:[#allocation8 + $0xb8] sm:$0xf0] }
 0x447   :  { %v13168_v32 = vld [vmem:[#allocation8 + $0xc98] sm:$0xf]  ;;  %7479 = vmatpush.bf16.msra.mxu1 %v12021_v21  ;;  %7443 = vmatpush.bf16.msrb.mxu2 %v13201_v33  ;;  %v12465_v5 = vor.u32 %v15357_v43, %v12464_v0  ;;  %v15209_v52 = vld [vmem:[#allocation8 + $0x29c] sm:$0xf]  ;;  %v12309_v21 = vor.u32 %v15313_v47, %v12306_v56  ;;  %v11637_v12 = vor.u32 %v15145_v51, %v11634_v62  ;;  %v7216_v43 = vpop.f32.mrf.mxu0 }
 0x448   :  { %v15533_v3 = vld [vmem:[#allocation8 + $0xcb4] sm:$0xf0]  ;;  %v15305_v33 = vld [vmem:[#allocation8 + $0x59c] sm:$0xf] }
 0x449   :  { %v13169_v53 = vor.u32 %v15533_v3, %v13168_v32  ;;  %v12432_v34 = vld [vmem:[#allocation8 + $0x6d8] sm:$0xf]  ;;  %7467 = vmatpush.bf16.msra.mxu0 %v11733_v4  ;;  %7403 = vmatpush.bf16.msra.mxu3 %v12465_v5  ;;  %v15137_v0 = vld [vmem:[#allocation8 + $0x5c] sm:$0xf]  ;;  %v11893_v32 = vor.u32 %v15209_v52, %v11890_v58  ;;  %v12277_v38 = vor.u32 %v15305_v33, %v12274_v48 }
 0x44a   :  { %v15349_v35 = vld [vmem:[#allocation8 + $0x6f4] sm:$0xf0]  ;;  %v15201_v4 = vld [vmem:[#allocation8 + $0x25c] sm:$0xf] }
 0x44b   :  { %v13136_v9 = vld [vmem:[#allocation8 + $0xc58] sm:$0xf]  ;;  %7480 = vmatpush.bf16.msra.mxu1 %v11989_v6  ;;  %7444 = vmatpush.bf16.msrb.mxu2 %v13169_v53  ;;  %v12433_v60 = vor.u32 %v15349_v35, %v12432_v34  ;;  %v11858_v6 = vld [vmem:[#allocation8 + $0x278] sm:$0xf0]  ;;  %v7151_v35 = vpop.f32.mrf.mxu3 }
 0x44c   :  { %v15525_v19 = vld [vmem:[#allocation8 + $0xc74] sm:$0xf0]  ;;  %v12242_v34 = vld [vmem:[#allocation8 + $0x578] sm:$0xf0] }
 0x44d   :  { %v13137_v7 = vor.u32 %v15525_v19, %v13136_v9  ;;  %v12400_v41 = vld [vmem:[#allocation8 + $0x698] sm:$0xf]  ;;  %7468 = vmatpush.bf16.msra.mxu0 %v11701_v17  ;;  %7404 = vmatpush.bf16.msra.mxu3 %v12433_v60  ;;  %v11605_v9 = vor.u32 %v15137_v0, %v11602_v49  ;;  %v15129_v19 = vld [vmem:[#allocation8 + $0x1c] sm:$0xf]  ;;  %v11861_v17 = vor.u32 %v15201_v4, %v11858_v6 }
 0x44e   :  { %v15341_v46 = vld [vmem:[#allocation8 + $0x6b4] sm:$0xf0]  ;;  %v15193_v63 = vld [vmem:[#allocation8 + $0x21c] sm:$0xf]  ;;  %v12245_v28 = vor.u32 %v15297_v42, %v12242_v34  ;;  %v11573_v56 = vor.u32 %v15129_v19, %v11570_v54  ;;  %v4166_v42 = vperm.slane %v16598_v55, 5 }
 0x44f   :  { %v13104_v27 = vld [vmem:[#allocation8 + $0xc18] sm:$0xf]  ;;  %7481 = vmatpush.bf16.msra.mxu1 %v11957_v25  ;;  %7445 = vmatpush.bf16.msrb.mxu2 %v13137_v7  ;;  %v12401_v44 = vor.u32 %v15341_v46, %v12400_v41  ;;  %v11826_v60 = vld [vmem:[#allocation8 + $0x238] sm:$0xf0] }
 0x450   :  { %v15517_v30 = vld [vmem:[#allocation8 + $0xc34] sm:$0xf0]  ;;  %v12818_v41 = vld [vmem:[#allocation8 + $0x9f8] sm:$0xf0] }
 0x451   :  { %v13105_v50 = vor.u32 %v15517_v30, %v13104_v27  ;;  %v12368_v59 = vld [vmem:[#allocation8 + $0x658] sm:$0xf]  ;;  %7469 = vmatpush.bf16.msra.mxu0 %v11669_v40  ;;  %7405 = vmatpush.bf16.msra.mxu3 %v12401_v44  ;;  %v15505_v46 = vld [vmem:[#allocation8 + $0xbdc] sm:$0xf]  ;;  %v11829_v40 = vor.u32 %v15193_v63, %v11826_v60 }
 0x452   :  { %v15333_v20 = vld [vmem:[#allocation8 + $0x674] sm:$0xf0]  ;;  %v13074_v27 = vld [vmem:[#allocation8 + $0xbf8] sm:$0xf0] }
 0x453   :  { %7482 = vmatpush.bf16.msra.mxu1 %v11925_v57  ;;  %7446 = vmatpush.bf16.msrb.mxu2 %v13105_v50  ;;  %v12369_v3 = vor.u32 %v15333_v20, %v12368_v59  ;;  %v12336_v8 = vld [vmem:[#allocation8 + $0x618] sm:$0xf]  ;;  %v12210_v15 = vld [vmem:[#allocation8 + $0x538] sm:$0xf0]  ;;  %v12821_v57 = vor.u32 %v15441_v45, %v12818_v41  ;;  %v13077_v44 = vor.u32 %v15505_v46, %v13074_v27 }
 0x454   :  { %v15325_v5 = vld [vmem:[#allocation8 + $0x634] sm:$0xf0]  ;;  %v15433_v51 = vld [vmem:[#allocation8 + $0x99c] sm:$0xf] }
 0x455   :  { %v13584_v53 = vld [vmem:[#allocation8 + $0xfd8] sm:$0xf]  ;;  %7470 = vmatpush.bf16.msra.mxu0 %v11637_v12  ;;  %7406 = vmatpush.bf16.msra.mxu3 %v12369_v3  ;;  %v12337_v25 = vor.u32 %v15325_v5, %v12336_v8  ;;  %v12786_v62 = vld [vmem:[#allocation8 + $0x9b8] sm:$0xf0] }
 0x456   :  { %v15637_v14 = vld [vmem:[#allocation8 + $0xff4] sm:$0xf0]  ;;  %7447 = vmatmul.bf16.vlgmr.msrb.gmra.mxu2 %v16478_v10  ;;  %v15497_v52 = vld [vmem:[#allocation8 + $0xb9c] sm:$0xf]  ;;  %v12789_v12 = vor.u32 %v15433_v51, %v12786_v62 }
 0x457   :  { %7491 = vmatpush.bf16.msra.mxu2 %v12309_v21  ;;  %7483 = vmatpush.bf16.msra.mxu1 %v11893_v32  ;;  %v13585_v7 = vor.u32 %v15637_v14, %v13584_v53  ;;  %v13552_v30 = vld [vmem:[#allocation8 + $0xf98] sm:$0xf]  ;;  %v12213_v21 = vor.u32 %v15289_v31, %v12210_v15  ;;  %v13042_v58 = vld [vmem:[#allocation8 + $0xbb8] sm:$0xf0]  ;;  %v16627_v53 = vpop.f32.mrf.mxu2 }
 0x458   :  { %v15629_v47 = vld [vmem:[#allocation8 + $0xfb4] sm:$0xf0]  ;;  %v15281_v33 = vld [vmem:[#allocation8 + $0x4dc] sm:$0xf]  ;;  %v13045_v0 = vor.u32 %v15497_v52, %v13042_v58  ;;  %v7201_v51 = vpop.f32.mrf.mxu3 }
 0x459   :  { %7471 = vmatpush.bf16.msra.mxu0 %v11605_v9  ;;  %7407 = vmatpush.bf16.msra.mxu3 %v12337_v25  ;;  %v13553_v50 = vor.u32 %v15629_v47, %v13552_v30  ;;  %v13520_v59 = vld [vmem:[#allocation8 + $0xf58] sm:$0xf]  ;;  %v12178_v48 = vld [vmem:[#allocation8 + $0x4f8] sm:$0xf0]  ;;  %v7279_v47 = vpop.f32.mrf.mxu1 }
 0x45a   :  { %v15621_v20 = vld [vmem:[#allocation8 + $0xf74] sm:$0xf0]  ;;  %v15425_v22 = vld [vmem:[#allocation8 + $0x95c] sm:$0xf]  ;;  %v12181_v49 = vor.u32 %v15281_v33, %v12178_v48 }
 0x45b   :  { %7492 = vmatpush.bf16.msra.mxu2 %v12277_v38  ;;  %7484 = vmatpush.bf16.msra.mxu1 %v11861_v17  ;;  %v13521_v43 = vor.u32 %v15621_v20, %v13520_v59  ;;  %v12754_v32 = vld [vmem:[#allocation8 + $0x978] sm:$0xf0]  ;;  %v13488_v6 = vld [vmem:[#allocation8 + $0xf18] sm:$0xf]  ;;  %v7202_v59 = vadd.f32 %v7201_v51, %v16614_v13 }
 0x45c   :  { %7408 = vmatmul.bf16.vlgmr.msra.gmra.mxu3 %v16438_v29  ;;  %v15489_v3 = vld [vmem:[#allocation8 + $0xb5c] sm:$0xf]  ;;  %v15613_v38 = vld [vmem:[#allocation8 + $0xf34] sm:$0xf0]  ;;  %v12757_v14 = vor.u32 %v15425_v22, %v12754_v32 }
 0x45d   :  { %7452 = vmatpush.bf16.msrb.mxu3 %v13585_v7  ;;  %7472 = vmatpush.bf16.msra.mxu0 %v11573_v56  ;;  %v13010_v4 = vld [vmem:[#allocation8 + $0xb78] sm:$0xf0]  ;;  %v13489_v35 = vor.u32 %v15613_v38, %v13488_v6  ;;  %v13456_v54 = vld [vmem:[#allocation8 + $0xed8] sm:$0xf]  ;;  %v7215_v32 = vadd.f32 %v16616_v39, %v7202_v59  ;;  %v13688_v59 = vld [vmem:[#allocation11 + $0xc0] sm:$0xf] }
 0x45e   :  { %v15273_v8 = vld [vmem:[#allocation8 + $0x49c] sm:$0xf]  ;;  %v13013_v34 = vor.u32 %v15489_v3, %v13010_v4  ;;  %v13424_v15 = vld [vmem:[#allocation8 + $0xe98] sm:$0xf] }
 0x45f   :  { %7493 = vmatpush.bf16.msra.mxu2 %v12245_v28  ;;  %7485 = vmatpush.bf16.msra.mxu1 %v11829_v40  ;;  %v12146_v5 = vld [vmem:[#allocation8 + $0x4b8] sm:$0xf0]  ;;  %v7266_v28 = vpop.f32.mrf.mxu0  ;;  %v15597_v40 = vld [vmem:[#allocation8 + $0xeb4] sm:$0xf0]  ;;  %v7242_v62 = vpop.f32.mrf.mxu2 }
 0x460   :  { %7473 = vmatmul.bf16.vlgmr.msra.gmra.mxu0 %v16431_v24  ;;  %v15417_v9 = vld [vmem:[#allocation8 + $0x91c] sm:$0xf]  ;;  %v12149_v17 = vor.u32 %v15273_v8, %v12146_v5  ;;  %v7267_v30 = vadd.f32 %v7266_v28, %v4166_v42  ;;  %v13425_v33 = vor.u32 %v15597_v40, %v13424_v15  ;;  %v15589_v4 = vld [vmem:[#allocation8 + $0xe74] sm:$0xf0]  ;;  %v13832_v15 = vld [vmem:[#allocation11 + $0x1e0] sm:$0xf] }
 0x461   :  { %7517 = vmatpush.bf16.msrb.mxu0 %v12821_v57  ;;  %7453 = vmatpush.bf16.msrb.mxu3 %v13553_v50  ;;  %v12722_v24 = vld [vmem:[#allocation8 + $0x938] sm:$0xf0]  ;;  %v15700_v40 = vld [vmem:[#allocation11 + $0x1ec] sm:$0xf0] }
 0x462   :  { %7486 = vmatmul.bf16.vlgmr.msra.gmra.mxu1 %v16433_v1  ;;  %v15481_v19 = vld [vmem:[#allocation8 + $0xb1c] sm:$0xf]  ;;  %v15605_v1 = vld [vmem:[#allocation8 + $0xef4] sm:$0xf0]  ;;  %v12725_v7 = vor.u32 %v15417_v9, %v12722_v24  ;;  %v16630_v50 = vadd.f32 %v7279_v47, %v7267_v30  ;;  %v13704_v47 = vld [vmem:[#allocation11 + $0xe0] sm:$0xf] }
 0x463   :  { %7530 = vmatpush.bf16.msrb.mxu1 %v13077_v44  ;;  %7494 = vmatpush.bf16.msra.mxu2 %v12213_v21  ;;  %v12978_v25 = vld [vmem:[#allocation8 + $0xb38] sm:$0xf0]  ;;  %v13457_v45 = vor.u32 %v15605_v1, %v13456_v54 }
 0x464   :  { %v15265_v63 = vld [vmem:[#allocation8 + $0x45c] sm:$0xf]  ;;  %v12981_v55 = vor.u32 %v15481_v19, %v12978_v25  ;;  %v15581_v25 = vld [vmem:[#allocation8 + $0xe34] sm:$0xf0] }
 0x465   :  { %7518 = vmatpush.bf16.msrb.mxu0 %v12789_v12  ;;  %7454 = vmatpush.bf16.msrb.mxu3 %v13521_v43  ;;  %v12114_v60 = vld [vmem:[#allocation8 + $0x478] sm:$0xf0] }
 0x466   :  { %v15409_v41 = vld [vmem:[#allocation8 + $0x8dc] sm:$0xf]  ;;  %v12117_v56 = vor.u32 %v15265_v63, %v12114_v60  ;;  %v7203_v63 = vpop.f32.mrf.mxu3 }
 0x467   :  { %7531 = vmatpush.bf16.msrb.mxu1 %v13045_v0  ;;  %7495 = vmatpush.bf16.msra.mxu2 %v12181_v49  ;;  %v12690_v46 = vld [vmem:[#allocation8 + $0x8f8] sm:$0xf0]  ;;  %v13392_v49 = vld [vmem:[#allocation8 + $0xe58] sm:$0xf]  ;;  %v7268_v13 = vpop.f32.mrf.mxu0 }
 0x468   :  { %v15473_v27 = vld [vmem:[#allocation8 + $0xadc] sm:$0xf]  ;;  %v12693_v52 = vor.u32 %v15409_v41, %v12690_v46  ;;  %v13393_v9 = vor.u32 %v15589_v4, %v13392_v49 }
 0x469   :  { %7519 = vmatpush.bf16.msrb.mxu0 %v12757_v14  ;;  %7455 = vmatpush.bf16.msrb.mxu3 %v13489_v35  ;;  %v12946_v31 = vld [vmem:[#allocation8 + $0xaf8] sm:$0xf0]  ;;  %v7281_v35 = vpop.f32.mrf.mxu1 }
 0x46a   :  { %v15257_v57 = vld [vmem:[#allocation8 + $0x41c] sm:$0xf]  ;;  %v12949_v20 = vor.u32 %v15473_v27, %v12946_v31 }
 0x46b   :  { %7532 = vmatpush.bf16.msrb.mxu1 %v13013_v34  ;;  %7496 = vmatpush.bf16.msra.mxu2 %v12149_v17  ;;  %v12082_v44 = vld [vmem:[#allocation8 + $0x438] sm:$0xf0]  ;;  %v7228_v34 = vadd.f32 %v16618_v23, %v7215_v32  ;;  %v13360_v17 = vld [vmem:[#allocation8 + $0xe18] sm:$0xf] }
 0x46c   :  { %v15569_v21 = vld [vmem:[#allocation8 + $0xddc] sm:$0xf]  ;;  %v12085_v0 = vor.u32 %v15257_v57, %v12082_v44  ;;  %v13361_v27 = vor.u32 %v15581_v25, %v13360_v17  ;;  %v13656_v17 = vld [vmem:[#allocation11 + $0x80] sm:$0xf]  ;;  %v15656_v25 = vld [vmem:[#allocation11 + $0x8c] sm:$0xf0] }
 0x46d   :  { %7520 = vmatpush.bf16.msrb.mxu0 %v12725_v7  ;;  %v13330_v58 = vld [vmem:[#allocation8 + $0xdf8] sm:$0xf0]  ;;  %7456 = vmatpush.bf16.msrb.mxu3 %v13457_v45  ;;  %v16636_v1 = vadd.f32 %v16627_v53, %v7228_v34 }
 0x46e   :  { %v15401_v48 = vld [vmem:[#allocation8 + $0x89c] sm:$0xf]  ;;  %v13333_v3 = vor.u32 %v15569_v21, %v13330_v58  ;;  %v13833_v58 = vor.u32 %v15700_v40, %v13832_v15 }
 0x46f   :  { %7533 = vmatpush.bf16.msrb.mxu1 %v12981_v55  ;;  %v12658_v12 = vld [vmem:[#allocation8 + $0x8b8] sm:$0xf0]  ;;  %7497 = vmatpush.bf16.msra.mxu2 %v12117_v56  ;;  %v15668_v56 = vld [vmem:[#allocation11 + $0xec] sm:$0xf0] }
 0x470   :  { %v15465_v43 = vld [vmem:[#allocation8 + $0xa9c] sm:$0xf]  ;;  %v12661_v6 = vor.u32 %v15401_v48, %v12658_v12  ;;  %v13705_v21 = vor.u32 %v15668_v56, %v13704_v47  ;;  %v13816_v12 = vld [vmem:[#allocation11 + $0x1c0] sm:$0xf] }
 0x471   :  { %v12914_v22 = vld [vmem:[#allocation8 + $0xab8] sm:$0xf0]  ;;  %7521 = vmatpush.bf16.msrb.mxu0 %v12693_v52  ;;  %7457 = vmatpush.bf16.msrb.mxu3 %v13425_v33 }
 0x472   :  { %v15561_v38 = vld [vmem:[#allocation8 + $0xd9c] sm:$0xf]  ;;  %v12917_v5 = vor.u32 %v15465_v43, %v12914_v22 }
 0x473   :  { %v13298_v8 = vld [vmem:[#allocation8 + $0xdb8] sm:$0xf0]  ;;  %7534 = vmatpush.bf16.msrb.mxu1 %v12949_v20  ;;  %7498 = vmatpush.bf16.msra.mxu2 %v12085_v0  ;;  %v15664_v20 = vld [vmem:[#allocation11 + $0xcc] sm:$0xf0] }
 0x474   :  { %v15393_v14 = vld [vmem:[#allocation8 + $0x85c] sm:$0xf]  ;;  %v13301_v19 = vor.u32 %v15561_v38, %v13298_v8  ;;  %v15696_v0 = vld [vmem:[#allocation11 + $0x1cc] sm:$0xf0]  ;;  %v13689_v49 = vor.u32 %v15664_v20, %v13688_v59 }
 0x475   :  { %v12626_v42 = vld [vmem:[#allocation8 + $0x878] sm:$0xf0]  ;;  %7522 = vmatpush.bf16.msrb.mxu0 %v12661_v6  ;;  %7458 = vmatpush.bf16.msrb.mxu3 %v13393_v9  ;;  %v13817_v4 = vor.u32 %v15696_v0, %v13816_v12  ;;  %v13672_v6 = vld [vmem:[#allocation11 + $0xa0] sm:$0xf]  ;;  %v15660_v38 = vld [vmem:[#allocation11 + $0xac] sm:$0xf0] }
 0x476   :  { %v15457_v24 = vld [vmem:[#allocation8 + $0xa5c] sm:$0xf]  ;;  %v12629_v60 = vor.u32 %v15393_v14, %v12626_v42  ;;  %7499 = vmatmul.bf16.vlgmr.msra.gmra.mxu2 %v16435_v26  ;;  %v15692_v14 = vld [vmem:[#allocation11 + $0x1ac] sm:$0xf0]  ;;  %v13752_v12 = vld [vmem:[#allocation11 + $0x140] sm:$0xf] }
 0x477   :  { %v12882_v39 = vld [vmem:[#allocation8 + $0xa78] sm:$0xf0]  ;;  %7543 = vmatpush.bf16.msrb.mxu2 %v13333_v3  ;;  %7535 = vmatpush.bf16.msrb.mxu1 %v12917_v5  ;;  %v13800_v5 = vld [vmem:[#allocation11 + $0x1a0] sm:$0xf] }
 0x478   :  { %v15377_v54 = vld [vmem:[#allocation8 + $0x7dc] sm:$0xf]  ;;  %v12885_v23 = vor.u32 %v15457_v24, %v12882_v39  ;;  %v16642_v24 = vpop.f32.mrf.mxu2  ;;  %v13673_v39 = vor.u32 %v15660_v38, %v13672_v6  ;;  %v13608_v6 = vld [vmem:[#allocation11 + $0x20] sm:$0xf] }
 0x479   :  { %v12562_v7 = vld [vmem:[#allocation8 + $0x7f8] sm:$0xf0]  ;;  %7523 = vmatpush.bf16.msrb.mxu0 %v12629_v60  ;;  %7459 = vmatpush.bf16.msrb.mxu3 %v13361_v27  ;;  %v13784_v60 = vld [vmem:[#allocation11 + $0x180] sm:$0xf] }
 0x47a   :  { %v15553_v28 = vld [vmem:[#allocation8 + $0xd5c] sm:$0xf]  ;;  %v12565_v53 = vor.u32 %v15377_v54, %v12562_v7  ;;  %v15688_v7 = vld [vmem:[#allocation11 + $0x18c] sm:$0xf0] }
 0x47b   :  { %v13266_v55 = vld [vmem:[#allocation8 + $0xd78] sm:$0xf0]  ;;  %7544 = vmatpush.bf16.msrb.mxu2 %v13301_v19  ;;  %7536 = vmatpush.bf16.msrb.mxu1 %v12885_v23  ;;  %v13801_v19 = vor.u32 %v15692_v14, %v13800_v5  ;;  %v13657_v23 = vor.u32 %v15656_v25, %v13656_v17  ;;  %v16644_v27 = vpop.f32.mrf.mxu0  ;;  %v15644_v14 = vld [vmem:[#allocation11 + $0x2c] sm:$0xf0]  ;;  %v13928_v25 = vld [vmem:[#allocation11 + $0x2a0] sm:$0xf] }
 0x47c   :  { %v15385_v45 = vld [vmem:[#allocation8 + $0x81c] sm:$0xf]  ;;  %v13269_v31 = vor.u32 %v15553_v28, %v13266_v55  ;;  %7460 = vmatmul.bf16.vlgmr.msrb.gmra.mxu3 %v16493_v18 }
 0x47d   :  { %v12594_v41 = vld [vmem:[#allocation8 + $0x838] sm:$0xf0]  ;;  %7504 = vmatpush.bf16.msra.mxu3 %v12565_v53  ;;  %v13768_v53 = vld [vmem:[#allocation11 + $0x160] sm:$0xf] }
 0x47e   :  { %v15449_v46 = vld [vmem:[#allocation8 + $0xa1c] sm:$0xf]  ;;  %v12597_v44 = vor.u32 %v15385_v45, %v12594_v41  ;;  %v13785_v45 = vor.u32 %v15688_v7, %v13784_v60  ;;  %v13640_v41 = vld [vmem:[#allocation11 + $0x60] sm:$0xf]  ;;  %v13609_v60 = vor.u32 %v15644_v14, %v13608_v6 }
 0x47f   :  { %v12850_v30 = vld [vmem:[#allocation8 + $0xa38] sm:$0xf0]  ;;  %7545 = vmatpush.bf16.msrb.mxu2 %v13269_v31  ;;  %v15684_v31 = vld [vmem:[#allocation11 + $0x16c] sm:$0xf0]  ;;  %v13592_v7 = vld [vmem:[#allocation11] sm:$0xf] }
 0x480   :  { %v15369_v57 = vld [vmem:[#allocation8 + $0x79c] sm:$0xf]  ;;  %v12853_v52 = vor.u32 %v15449_v46, %v12850_v30  ;;  %7524 = vmatpush.bf16.msrb.mxu0 %v12597_v44  ;;  %v15652_v46 = vld [vmem:[#allocation11 + $0x6c] sm:$0xf0]  ;;  %v16646_v30 = vpop.f32.mrf.mxu1  ;;  %v14184_v6 = vld [vmem:[#allocation11 + $0x4a0] sm:$0xf] }
 0x481   :  { %v12530_v51 = vld [vmem:[#allocation8 + $0x7b8] sm:$0xf0] }
 0x482   :  { %v15545_v26 = vld [vmem:[#allocation8 + $0xd1c] sm:$0xf]  ;;  %v12533_v33 = vor.u32 %v15369_v57, %v12530_v51  ;;  %7537 = vmatpush.bf16.msrb.mxu1 %v12853_v52  ;;  %v13960_v51 = vld [vmem:[#allocation11 + $0x2e0] sm:$0xf]  ;;  %v7294_v52 = vpop.f32.mrf.mxu2 }
 0x483   :  { %v13234_v62 = vld [vmem:[#allocation8 + $0xd38] sm:$0xf0]  ;;  %7525 = vmatmul.bf16.vlgmr.msrb.gmra.mxu0 %v16453_v37  ;;  %v7320_v38 = vpop.f32.mrf.mxu0 }
 0x484   :  { %v13237_v48 = vor.u32 %v15545_v26, %v13234_v62  ;;  %v15361_v43 = vld [vmem:[#allocation8 + $0x75c] sm:$0xf]  ;;  %9131 = vmatpush.bf16.msra.mxu0 %v13705_v21  ;;  %7505 = vmatpush.bf16.msra.mxu3 %v12533_v33  ;;  %v15732_v26 = vld [vmem:[#allocation11 + $0x2ec] sm:$0xf0]  ;;  %v16648_v62 = vpop.f32.mrf.mxu3  ;;  %v13641_v21 = vor.u32 %v15652_v46, %v13640_v41  ;;  %v13624_v33 = vld [vmem:[#allocation11 + $0x40] sm:$0xf] }
 0x485   :  { %v12498_v22 = vld [vmem:[#allocation8 + $0x778] sm:$0xf0]  ;;  %7538 = vmatmul.bf16.vlgmr.msrb.gmra.mxu1 %v16455_v11  ;;  %v13961_v0 = vor.u32 %v15732_v26, %v13960_v51  ;;  %v14216_v46 = vld [vmem:[#allocation11 + $0x4e0] sm:$0xf]  ;;  %v7570_v51 = vmax.f32 %v16561_v16, 0.0 }
 0x486   :  { %v15537_v32 = vld [vmem:[#allocation8 + $0xcdc] sm:$0xf]  ;;  %9144 = vmatpush.bf16.msra.mxu1 %v13833_v58  ;;  %7546 = vmatpush.bf16.msrb.mxu2 %v13237_v48  ;;  %v12501_v8 = vor.u32 %v15361_v43, %v12498_v22  ;;  %v13769_v58 = vor.u32 %v15684_v31, %v13768_v53  ;;  %v15648_v48 = vld [vmem:[#allocation11 + $0x4c] sm:$0xf0] }
 0x487   :  { %v13202_v3 = vld [vmem:[#allocation8 + $0xcf8] sm:$0xf0]  ;;  %v15680_v43 = vld [vmem:[#allocation11 + $0x14c] sm:$0xf0] }
 0x488   :  { %v13205_v13 = vor.u32 %v15537_v32, %v13202_v3  ;;  %v15353_v42 = vld [vmem:[#allocation8 + $0x71c] sm:$0xf]  ;;  %9132 = vmatpush.bf16.msra.mxu0 %v13689_v49  ;;  %7506 = vmatpush.bf16.msra.mxu3 %v12501_v8  ;;  %v13944_v3 = vld [vmem:[#allocation11 + $0x2c0] sm:$0xf]  ;;  %v15728_v49 = vld [vmem:[#allocation11 + $0x2cc] sm:$0xf0]  ;;  %v7333_v8 = vpop.f32.mrf.mxu1 }
 0x489   :  { %v12466_v34 = vld [vmem:[#allocation8 + $0x738] sm:$0xf0]  ;;  %v15828_v53 = vld [vmem:[#allocation11 + $0x5ec] sm:$0xf0]  ;;  %v14312_v8 = vld [vmem:[#allocation11 + $0x5a0] sm:$0xf] }
 0x48a   :  { %v15529_v35 = vld [vmem:[#allocation8 + $0xc9c] sm:$0xf]  ;;  %9145 = vmatpush.bf16.msra.mxu1 %v13817_v4  ;;  %7547 = vmatpush.bf16.msrb.mxu2 %v13205_v13  ;;  %v12469_v54 = vor.u32 %v15353_v42, %v12466_v34  ;;  %v13625_v4 = vor.u32 %v15648_v48, %v13624_v33  ;;  %v13753_v13 = vor.u32 %v15680_v43, %v13752_v12  ;;  %v13736_v42 = vld [vmem:[#allocation11 + $0x120] sm:$0xf]  ;;  %v15676_v34 = vld [vmem:[#allocation11 + $0x12c] sm:$0xf0] }
 0x48b   :  { %v13170_v9 = vld [vmem:[#allocation8 + $0xcb8] sm:$0xf0]  ;;  %v14328_v33 = vld [vmem:[#allocation11 + $0x5c0] sm:$0xf]  ;;  %v15824_v12 = vld [vmem:[#allocation11 + $0x5cc] sm:$0xf0] }
 0x48c   :  { %v13173_v63 = vor.u32 %v15529_v35, %v13170_v9  ;;  %v15345_v37 = vld [vmem:[#allocation8 + $0x6dc] sm:$0xf]  ;;  %9133 = vmatpush.bf16.msra.mxu0 %v13673_v39  ;;  %7507 = vmatpush.bf16.msra.mxu3 %v12469_v54  ;;  %v13945_v35 = vor.u32 %v15728_v49, %v13944_v3  ;;  %v15724_v54 = vld [vmem:[#allocation11 + $0x2ac] sm:$0xf0]  ;;  %v16656_v3 = vpack.c.bf16 %v7570_v51, %v7570_v51 }
 0x48d   :  { %v12434_v28 = vld [vmem:[#allocation8 + $0x6f8] sm:$0xf0]  ;;  %v13929_v41 = vor.u32 %v15724_v54, %v13928_v25  ;;  %v15716_v16 = vld [vmem:[#allocation11 + $0x26c] sm:$0xf0]  ;;  %v14329_v49 = vor.u32 %v15824_v12, %v14328_v33  ;;  %v14168_v54 = vld [vmem:[#allocation11 + $0x480] sm:$0xf] }
 0x48e   :  { %v15521_v11 = vld [vmem:[#allocation8 + $0xc5c] sm:$0xf]  ;;  %9146 = vmatpush.bf16.msra.mxu1 %v13801_v19  ;;  %7548 = vmatpush.bf16.msrb.mxu2 %v13173_v63  ;;  %v12437_v47 = vor.u32 %v15345_v37, %v12434_v28  ;;  %v7255_v63 = vpop.f32.mrf.mxu3  ;;  %v13737_v37 = vor.u32 %v15676_v34, %v13736_v42  ;;  %v15788_v38 = vld [vmem:[#allocation11 + $0x4ac] sm:$0xf0]  ;;  %v13880_v42 = vld [vmem:[#allocation11 + $0x240] sm:$0xf] }
 0x48f   :  { %v13138_v55 = vld [vmem:[#allocation8 + $0xc78] sm:$0xf0]  ;;  %v15712_v34 = vld [vmem:[#allocation11 + $0x24c] sm:$0xf0]  ;;  %v14136_v12 = vld [vmem:[#allocation11 + $0x440] sm:$0xf] }
 0x490   :  { %v13141_v56 = vor.u32 %v15521_v11, %v13138_v55  ;;  %v15337_v15 = vld [vmem:[#allocation8 + $0x69c] sm:$0xf]  ;;  %9134 = vmatpush.bf16.msra.mxu0 %v13657_v23  ;;  %7508 = vmatpush.bf16.msra.mxu3 %v12437_v47  ;;  %v15640_v11 = vld [vmem:[#allocation11 + $0xc] sm:$0xf0]  ;;  %v13720_v55 = vld [vmem:[#allocation11 + $0x100] sm:$0xf] }
 0x491   :  { %v12402_v40 = vld [vmem:[#allocation8 + $0x6b8] sm:$0xf0]  ;;  %v15672_v23 = vld [vmem:[#allocation11 + $0x10c] sm:$0xf0] }
 0x492   :  { %v15513_v57 = vld [vmem:[#allocation8 + $0xc1c] sm:$0xf]  ;;  %9147 = vmatpush.bf16.msra.mxu1 %v13785_v45  ;;  %7549 = vmatpush.bf16.msrb.mxu2 %v13141_v56  ;;  %v12405_v59 = vor.u32 %v15337_v15, %v12402_v40  ;;  %v15796_v47 = vld [vmem:[#allocation11 + $0x4ec] sm:$0xf0]  ;;  %v14344_v56 = vld [vmem:[#allocation11 + $0x5e0] sm:$0xf]  ;;  %v13593_v15 = vor.u32 %v15640_v11, %v13592_v7  ;;  %v13721_v26 = vor.u32 %v15672_v23, %v13720_v55 }
 0x493   :  { %v13106_v44 = vld [vmem:[#allocation8 + $0xc38] sm:$0xf0]  ;;  %v13912_v40 = vld [vmem:[#allocation11 + $0x280] sm:$0xf]  ;;  %v14217_v52 = vor.u32 %v15796_v47, %v14216_v46  ;;  %v15784_v63 = vld [vmem:[#allocation11 + $0x48c] sm:$0xf0]  ;;  %v13881_v7 = vor.u32 %v15712_v34, %v13880_v42 }
 0x494   :  { %v13109_v20 = vor.u32 %v15513_v57, %v13106_v44  ;;  %v15329_v22 = vld [vmem:[#allocation8 + $0x65c] sm:$0xf]  ;;  %9135 = vmatpush.bf16.msra.mxu0 %v13641_v21  ;;  %7509 = vmatpush.bf16.msra.mxu3 %v12405_v59  ;;  %v15720_v57 = vld [vmem:[#allocation11 + $0x28c] sm:$0xf0]  ;;  %v7569_v44 = vmax.f32 %v16542_v61, 0.0  ;;  %v14345_v21 = vor.u32 %v15828_v53, %v14344_v56 }
 0x495   :  { %v12370_v32 = vld [vmem:[#allocation8 + $0x678] sm:$0xf0]  ;;  %v14200_v59 = vld [vmem:[#allocation11 + $0x4c0] sm:$0xf]  ;;  %v13913_v48 = vor.u32 %v15720_v57, %v13912_v40  ;;  %v15708_v23 = vld [vmem:[#allocation11 + $0x22c] sm:$0xf0] }
 0x496   :  { %9148 = vmatpush.bf16.msra.mxu1 %v13769_v58  ;;  %7550 = vmatpush.bf16.msrb.mxu2 %v13109_v20  ;;  %v12373_v5 = vor.u32 %v15329_v22, %v12370_v32  ;;  %v15321_v9 = vld [vmem:[#allocation8 + $0x61c] sm:$0xf]  ;;  %v15792_v20 = vld [vmem:[#allocation11 + $0x4cc] sm:$0xf0]  ;;  %v13896_v61 = vld [vmem:[#allocation11 + $0x260] sm:$0xf]  ;;  %v16654_v22 = vpack.c.bf16 %v7569_v44, %v7569_v44 }
 0x497   :  { %v12338_v39 = vld [vmem:[#allocation8 + $0x638] sm:$0xf0]  ;;  %v14201_v32 = vor.u32 %v15792_v20, %v14200_v59  ;;  %v13864_v55 = vld [vmem:[#allocation11 + $0x220] sm:$0xf]  ;;  %v15780_v53 = vld [vmem:[#allocation11 + $0x46c] sm:$0xf0] }
 0x498   :  { %v15633_v19 = vld [vmem:[#allocation8 + $0xfdc] sm:$0xf]  ;;  %9136 = vmatpush.bf16.msra.mxu0 %v13625_v4  ;;  %7510 = vmatpush.bf16.msra.mxu3 %v12373_v5  ;;  %v12341_v28 = vor.u32 %v15321_v9, %v12338_v39  ;;  %v14185_v9 = vor.u32 %v15788_v38, %v14184_v6  ;;  %v16662_v39 = vld [vmem:[#allocation10] sm:$0xff]  ;;  %v14152_v56 = vld [vmem:[#allocation11 + $0x460] sm:$0xf]  ;;  %v13865_v40 = vor.u32 %v15708_v23, %v13864_v55 }
 0x499   :  { %v13586_v17 = vld [vmem:[#allocation8 + $0xff8] sm:$0xf0]  ;;  %7551 = vmatmul.bf16.vlgmr.msrb.gmra.mxu2 %v16478_v10  ;;  %v15812_v57 = vld [vmem:[#allocation11 + $0x56c] sm:$0xf0]  ;;  %v14153_v20 = vor.u32 %v15780_v53, %v14152_v56  ;;  %v14120_v38 = vld [vmem:[#allocation11 + $0x420] sm:$0xf] }
 0x49a   :  { %9157 = vmatpush.bf16.msra.mxu2 %v13961_v0  ;;  %9149 = vmatpush.bf16.msra.mxu1 %v13753_v13  ;;  %v13589_v45 = vor.u32 %v15633_v19, %v13586_v17  ;;  %v15625_v31 = vld [vmem:[#allocation8 + $0xf9c] sm:$0xf]  ;;  %v15820_v13 = vld [vmem:[#allocation11 + $0x5ac] sm:$0xf0]  ;;  %v4167_v19 = vperm.slane %v16662_v39, 6 }
 0x49b   :  { %v13554_v10 = vld [vmem:[#allocation8 + $0xfb8] sm:$0xf0]  ;;  %v14313_v17 = vor.u32 %v15820_v13, %v14312_v8  ;;  %v15772_v13 = vld [vmem:[#allocation11 + $0x42c] sm:$0xf0]  ;;  %v15666_v53 = vld [vmem:[#allocation11 + $0xe4] sm:$0xf] }
 0x49c   :  { %9137 = vmatpush.bf16.msra.mxu0 %v13609_v60  ;;  %7511 = vmatpush.bf16.msra.mxu3 %v12341_v28  ;;  %v13557_v58 = vor.u32 %v15625_v31, %v13554_v10  ;;  %v15617_v0 = vld [vmem:[#allocation8 + $0xf5c] sm:$0xf]  ;;  %v14296_v60 = vld [vmem:[#allocation11 + $0x580] sm:$0xf]  ;;  %v15768_v23 = vld [vmem:[#allocation11 + $0x40c] sm:$0xf0] }
 0x49d   :  { %v13522_v43 = vld [vmem:[#allocation8 + $0xf78] sm:$0xf0]  ;;  %v14280_v31 = vld [vmem:[#allocation11 + $0x560] sm:$0xf]  ;;  %v15800_v56 = vld [vmem:[#allocation11 + $0x50c] sm:$0xf0] }
 0x49e   :  { %9158 = vmatpush.bf16.msra.mxu2 %v13945_v35  ;;  %9150 = vmatpush.bf16.msra.mxu1 %v13737_v37  ;;  %v13525_v4 = vor.u32 %v15617_v0, %v13522_v43  ;;  %v15609_v5 = vld [vmem:[#allocation8 + $0xf1c] sm:$0xf]  ;;  %v16660_v35 = vpop.f32.mrf.mxu2  ;;  %v15816_v37 = vld [vmem:[#allocation11 + $0x58c] sm:$0xf0]  ;;  %v14281_v33 = vor.u32 %v15812_v57, %v14280_v31 }
 0x49f   :  { %7512 = vmatmul.bf16.vlgmr.msra.gmra.mxu3 %v16438_v29  ;;  %v13897_v29 = vor.u32 %v15716_v16, %v13896_v61  ;;  %v13490_v14 = vld [vmem:[#allocation8 + $0xf38] sm:$0xf0]  ;;  %v14297_v46 = vor.u32 %v15816_v37, %v14296_v60  ;;  %v15776_v0 = vld [vmem:[#allocation11 + $0x44c] sm:$0xf0]  ;;  %v14264_v61 = vld [vmem:[#allocation11 + $0x540] sm:$0xf]  ;;  %v14121_v60 = vor.u32 %v15772_v13, %v14120_v38 }
 0x4a0   :  { %7556 = vmatpush.bf16.msrb.mxu3 %v13589_v45  ;;  %9138 = vmatpush.bf16.msra.mxu0 %v13593_v15  ;;  %v13493_v25 = vor.u32 %v15609_v5, %v13490_v14  ;;  %v15601_v28 = vld [vmem:[#allocation8 + $0xedc] sm:$0xf]  ;;  %v14169_v45 = vor.u32 %v15784_v63, %v14168_v54  ;;  %v7383_v15 = vpop.f32.mrf.mxu1  ;;  %v15808_v16 = vld [vmem:[#allocation11 + $0x54c] sm:$0xf0]  ;;  %v14137_v6 = vor.u32 %v15776_v0, %v14136_v12  ;;  %v14472_v5 = vld [vmem:[#allocation11 + $0x6e0] sm:$0xf] }
 0x4a1   :  { %v13458_v11 = vld [vmem:[#allocation8 + $0xef8] sm:$0xf0]  ;;  %v15860_v14 = vld [vmem:[#allocation11 + $0x6ec] sm:$0xf0]  ;;  %v7293_v0 = vadd.f32 %v16642_v24, %v16630_v50  ;;  %v15658_v13 = vld [vmem:[#allocation11 + $0xa4] sm:$0xf] }
 0x4a2   :  { %9159 = vmatpush.bf16.msra.mxu2 %v13929_v41  ;;  %9151 = vmatpush.bf16.msra.mxu1 %v13721_v26  ;;  %v7370_v41 = vpop.f32.mrf.mxu0  ;;  %v13461_v47 = vor.u32 %v15601_v28, %v13458_v11  ;;  %v15593_v44 = vld [vmem:[#allocation8 + $0xe9c] sm:$0xf]  ;;  %v13848_v26 = vld [vmem:[#allocation11 + $0x200] sm:$0xf]  ;;  %v15764_v37 = vld [vmem:[#allocation11 + $0x3ec] sm:$0xf0]  ;;  %v7254_v11 = vadd.f32 %v16648_v62, %v16636_v1 }
 0x4a3   :  { %9139 = vmatmul.bf16.vlgmr.msra.gmra.mxu0 %v16654_v22  ;;  %v7371_v10 = vadd.f32 %v7370_v41, %v4167_v19  ;;  %v13426_v51 = vld [vmem:[#allocation8 + $0xeb8] sm:$0xf0]  ;;  %v15804_v19 = vld [vmem:[#allocation11 + $0x52c] sm:$0xf0]  ;;  %v14104_v28 = vld [vmem:[#allocation11 + $0x400] sm:$0xf] }
 0x4a4   :  { %9183 = vmatpush.bf16.msrb.mxu0 %v14217_v52  ;;  %7557 = vmatpush.bf16.msrb.mxu3 %v13557_v58  ;;  %v15704_v52 = vld [vmem:[#allocation11 + $0x20c] sm:$0xf0]  ;;  %v16667_v58 = vpop.f32.mrf.mxu3  ;;  %v13362_v54 = vld [vmem:[#allocation8 + $0xe38] sm:$0xf0]  ;;  %v14072_v1 = vld [vmem:[#allocation11 + $0x3c0] sm:$0xf] }
 0x4a5   :  { %9152 = vmatmul.bf16.vlgmr.msra.gmra.mxu1 %v16656_v3  ;;  %v13849_v43 = vor.u32 %v15704_v52, %v13848_v26  ;;  %v15856_v41 = vld [vmem:[#allocation11 + $0x6cc] sm:$0xf0]  ;;  %v13834_v57 = vld [vmem:[#allocation11 + $0x1f0] sm:$0xf0]  ;;  %v14440_v52 = vld [vmem:[#allocation11 + $0x6a0] sm:$0xf]  ;;  %v7306_v38 = vadd.f32 %v16667_v58, %v7293_v0 }
 0x4a6   :  { %9196 = vmatpush.bf16.msrb.mxu1 %v14345_v21  ;;  %9160 = vmatpush.bf16.msra.mxu2 %v13913_v48  ;;  %v16665_v21 = vadd.f32 %v7383_v15, %v7371_v10  ;;  %v7346_v59 = vpop.f32.mrf.mxu2  ;;  %v13429_v48 = vor.u32 %v15593_v44, %v13426_v51  ;;  %v13706_v15 = vld [vmem:[#allocation11 + $0xf0] sm:$0xf0]  ;;  %v14105_v44 = vor.u32 %v15768_v23, %v14104_v28  ;;  %v15760_v62 = vld [vmem:[#allocation11 + $0x3cc] sm:$0xf0]  ;;  %v7573_v51 = vmax.f32 %v7254_v11, 0.0 }
 0x4a7   :  { %v15852_v59 = vld [vmem:[#allocation11 + $0x6ac] sm:$0xf0]  ;;  %v13658_v11 = vld [vmem:[#allocation11 + $0x90] sm:$0xf0]  ;;  %v15646_v0 = vld [vmem:[#allocation11 + $0x44] sm:$0xf] }
 0x4a8   :  { %9184 = vmatpush.bf16.msrb.mxu0 %v14201_v32  ;;  %7558 = vmatpush.bf16.msrb.mxu3 %v13525_v4  ;;  %v7571_v32 = vmax.f32 %v16590_v2, 0.0  ;;  %v13394_v4 = vld [vmem:[#allocation8 + $0xe78] sm:$0xf0]  ;;  %v7385_v42 = vpop.f32.mrf.mxu1  ;;  %v14441_v12 = vor.u32 %v15852_v59, %v14440_v52  ;;  %v15752_v58 = vld [vmem:[#allocation11 + $0x38c] sm:$0xf0] }
 0x4a9   :  { %v15577_v2 = vld [vmem:[#allocation8 + $0xe1c] sm:$0xf]  ;;  %v14376_v52 = vld [vmem:[#allocation11 + $0x620] sm:$0xf]  ;;  %v15836_v59 = vld [vmem:[#allocation11 + $0x62c] sm:$0xf0] }
 0x4aa   :  { %9197 = vmatpush.bf16.msrb.mxu1 %v14329_v49  ;;  %9161 = vmatpush.bf16.msra.mxu2 %v13897_v29  ;;  %v15585_v49 = vld [vmem:[#allocation8 + $0xe5c] sm:$0xf]  ;;  %v7372_v8 = vpop.f32.mrf.mxu0  ;;  %v14265_v29 = vor.u32 %v15808_v16, %v14264_v61  ;;  %v15694_v16 = vld [vmem:[#allocation11 + $0x1c4] sm:$0xf] }
 0x4ab   :  { %v13397_v34 = vor.u32 %v15585_v49, %v13394_v4  ;;  %v13690_v61 = vld [vmem:[#allocation11 + $0xd0] sm:$0xf0]  ;;  %v14056_v49 = vld [vmem:[#allocation11 + $0x3a0] sm:$0xf]  ;;  %v15756_v4 = vld [vmem:[#allocation11 + $0x3ac] sm:$0xf0] }
 0x4ac   :  { %9185 = vmatpush.bf16.msrb.mxu0 %v14185_v9  ;;  %7559 = vmatpush.bf16.msrb.mxu3 %v13493_v25  ;;  %v14248_v9 = vld [vmem:[#allocation11 + $0x520] sm:$0xf]  ;;  %v16670_v25 = vpack.c.bf16 %v7571_v32, %v7571_v32  ;;  %v7307_v63 = vpop.f32.mrf.mxu3  ;;  %v13818_v32 = vld [vmem:[#allocation11 + $0x1d0] sm:$0xf0]  ;;  %v14057_v42 = vor.u32 %v15756_v4, %v14056_v49  ;;  %v15678_v49 = vld [vmem:[#allocation11 + $0x144] sm:$0xf] }
 0x4ad   :  { %v14249_v55 = vor.u32 %v15804_v19, %v14248_v9  ;;  %v14424_v8 = vld [vmem:[#allocation11 + $0x680] sm:$0xf]  ;;  %v13821_v24 = vor.u32 %v15694_v16, %v13818_v32  ;;  %v13802_v9 = vld [vmem:[#allocation11 + $0x1b0] sm:$0xf0] }
 0x4ae   :  { %9198 = vmatpush.bf16.msrb.mxu1 %v14313_v17  ;;  %9162 = vmatpush.bf16.msra.mxu2 %v13881_v7  ;;  %v14473_v17 = vor.u32 %v15860_v14, %v14472_v5  ;;  %v14088_v7 = vld [vmem:[#allocation11 + $0x3e0] sm:$0xf]  ;;  %v13674_v5 = vld [vmem:[#allocation11 + $0xb0] sm:$0xf0] }
 0x4af   :  { %v14089_v10 = vor.u32 %v15764_v37, %v14088_v7  ;;  %v14040_v19 = vld [vmem:[#allocation11 + $0x380] sm:$0xf]  ;;  %v15654_v37 = vld [vmem:[#allocation11 + $0x84] sm:$0xf]  ;;  %v13786_v23 = vld [vmem:[#allocation11 + $0x190] sm:$0xf0] }
 0x4b0   :  { %9186 = vmatpush.bf16.msrb.mxu0 %v14169_v45  ;;  %7560 = vmatpush.bf16.msrb.mxu3 %v13461_v47  ;;  %v14456_v45 = vld [vmem:[#allocation11 + $0x6c0] sm:$0xf]  ;;  %v14041_v28 = vor.u32 %v15752_v58, %v14040_v19  ;;  %v13626_v32 = vld [vmem:[#allocation11 + $0x50] sm:$0xf0] }
 0x4b1   :  { %v14232_v47 = vld [vmem:[#allocation11 + $0x500] sm:$0xf]  ;;  %v14457_v31 = vor.u32 %v15856_v41, %v14456_v45  ;;  %v15748_v41 = vld [vmem:[#allocation11 + $0x36c] sm:$0xf0]  ;;  %v13754_v4 = vld [vmem:[#allocation11 + $0x150] sm:$0xf0] }
 0x4b2   :  { %9199 = vmatpush.bf16.msrb.mxu1 %v14297_v46  ;;  %9163 = vmatpush.bf16.msra.mxu2 %v13865_v40  ;;  %v13365_v46 = vor.u32 %v15577_v2, %v13362_v54  ;;  %v15698_v40 = vld [vmem:[#allocation11 + $0x1e4] sm:$0xf]  ;;  %v14233_v26 = vor.u32 %v15800_v56, %v14232_v47  ;;  %v7319_v2 = vadd.f32 %v16644_v27, %v7306_v38  ;;  %v14024_v45 = vld [vmem:[#allocation11 + $0x360] sm:$0xf]  ;;  %v15840_v27 = vld [vmem:[#allocation11 + $0x64c] sm:$0xf0] }
 0x4b3   :  { %v14392_v47 = vld [vmem:[#allocation11 + $0x640] sm:$0xf]  ;;  %v13661_v56 = vor.u32 %v15654_v37, %v13658_v11 }
 0x4b4   :  { %9187 = vmatpush.bf16.msrb.mxu0 %v14153_v20  ;;  %7561 = vmatpush.bf16.msrb.mxu3 %v13429_v48  ;;  %v13709_v20 = vor.u32 %v15666_v53, %v13706_v15  ;;  %v15662_v48 = vld [vmem:[#allocation11 + $0xc4] sm:$0xf]  ;;  %v13992_v38 = vld [vmem:[#allocation11 + $0x320] sm:$0xf] }
 0x4b5   :  { %v13693_v50 = vor.u32 %v15662_v48, %v13690_v61 }
 0x4b6   :  { %9200 = vmatpush.bf16.msrb.mxu1 %v14281_v33  ;;  %9164 = vmatpush.bf16.msra.mxu2 %v13849_v43  ;;  %v13837_v33 = vor.u32 %v15698_v40, %v13834_v57  ;;  %v14073_v43 = vor.u32 %v15760_v62, %v14072_v1  ;;  %v14025_v57 = vor.u32 %v15748_v41, %v14024_v45  ;;  %v15682_v1 = vld [vmem:[#allocation11 + $0x164] sm:$0xf]  ;;  %v13770_v62 = vld [vmem:[#allocation11 + $0x170] sm:$0xf0] }
 0x4b7   :  { %v16683_v63 = vpop.f32.mrf.mxu2  ;;  %v15726_v45 = vld [vmem:[#allocation11 + $0x2c4] sm:$0xf]  ;;  %v13946_v41 = vld [vmem:[#allocation11 + $0x2d0] sm:$0xf0] }
 0x4b8   :  { %9188 = vmatpush.bf16.msrb.mxu0 %v14137_v6  ;;  %7562 = vmatpush.bf16.msrb.mxu3 %v13397_v34  ;;  %v16677_v6 = vpack.c.bf16 %v7573_v51, %v7573_v51  ;;  %v15690_v34 = vld [vmem:[#allocation11 + $0x1a4] sm:$0xf]  ;;  %v14008_v51 = vld [vmem:[#allocation11 + $0x340] sm:$0xf] }
 0x4b9   :  { %9165 = vmatmul.bf16.vlgmr.msra.gmra.mxu2 %v16670_v25  ;;  %v13805_v7 = vor.u32 %v15690_v34, %v13802_v9 }
 0x4ba   :  { %9209 = vmatpush.bf16.msrb.mxu2 %v14473_v17  ;;  %9201 = vmatpush.bf16.msrb.mxu1 %v14265_v29  ;;  %v15848_v29 = vld [vmem:[#allocation11 + $0x68c] sm:$0xf0] }
 0x4bb   :  { %v14425_v14 = vor.u32 %v15848_v29, %v14424_v8  ;;  %v15844_v17 = vld [vmem:[#allocation11 + $0x66c] sm:$0xf0]  ;;  %v14360_v29 = vld [vmem:[#allocation11 + $0x600] sm:$0xf] }
 0x4bc   :  { %9189 = vmatpush.bf16.msrb.mxu0 %v14121_v60  ;;  %7563 = vmatpush.bf16.msrb.mxu3 %v13365_v46  ;;  %v13677_v60 = vor.u32 %v15658_v13, %v13674_v5  ;;  %v7332_v46 = vadd.f32 %v16646_v30, %v7319_v2  ;;  %v15740_v8 = vld [vmem:[#allocation11 + $0x32c] sm:$0xf0]  ;;  %v13757_v13 = vor.u32 %v15678_v49, %v13754_v4  ;;  %v15642_v5 = vld [vmem:[#allocation11 + $0x24] sm:$0xf]  ;;  %v14186_v4 = vld [vmem:[#allocation11 + $0x4b0] sm:$0xf0] }
 0x4bd   :  { %v16686_v15 = vpop.f32.mrf.mxu0  ;;  %v15730_v2 = vld [vmem:[#allocation11 + $0x2e4] sm:$0xf] }
 0x4be   :  { %9210 = vmatpush.bf16.msrb.mxu2 %v14457_v31  ;;  %9202 = vmatpush.bf16.msrb.mxu1 %v14249_v55  ;;  %v15686_v55 = vld [vmem:[#allocation11 + $0x184] sm:$0xf]  ;;  %v7345_v30 = vadd.f32 %v16660_v35, %v7332_v46 }
 0x4bf   :  { %7564 = vmatmul.bf16.vlgmr.msrb.gmra.mxu3 %v16493_v18  ;;  %v14408_v18 = vld [vmem:[#allocation11 + $0x660] sm:$0xf]  ;;  %v13789_v53 = vor.u32 %v15686_v55, %v13786_v23  ;;  %v15650_v31 = vld [vmem:[#allocation11 + $0x64] sm:$0xf]  ;;  %v16688_v40 = vpop.f32.mrf.mxu1 }
 0x4c0   :  { %9170 = vmatpush.bf16.msra.mxu3 %v14089_v10  ;;  %9190 = vmatpush.bf16.msrb.mxu0 %v14105_v44  ;;  %v14409_v54 = vor.u32 %v15844_v17, %v14408_v18  ;;  %v14393_v10 = vor.u32 %v15840_v27, %v14392_v47  ;;  %v13642_v44 = vld [vmem:[#allocation11 + $0x70] sm:$0xf0]  ;;  %v13993_v18 = vor.u32 %v15740_v8, %v13992_v38  ;;  %v15638_v47 = vld [vmem:[#allocation11 + $0x4] sm:$0xf] }
 0x4c1   :  { %v13645_v48 = vor.u32 %v15650_v31, %v13642_v44  ;;  %v13738_v17 = vld [vmem:[#allocation11 + $0x130] sm:$0xf0]  ;;  %v15826_v44 = vld [vmem:[#allocation11 + $0x5e4] sm:$0xf] }
 0x4c2   :  { %9211 = vmatpush.bf16.msrb.mxu2 %v14441_v12  ;;  %9203 = vmatpush.bf16.msrb.mxu1 %v14233_v26  ;;  %v15744_v26 = vld [vmem:[#allocation11 + $0x34c] sm:$0xf0]  ;;  %v13773_v12 = vor.u32 %v15682_v1, %v13770_v62  ;;  %v13594_v27 = vld [vmem:[#allocation11 + $0x10] sm:$0xf0]  ;;  %v15722_v62 = vld [vmem:[#allocation11 + $0x2a4] sm:$0xf] }
 0x4c3   :  { %9191 = vmatmul.bf16.vlgmr.msrb.gmra.mxu0 %v16677_v6  ;;  %v14009_v16 = vor.u32 %v15744_v26, %v14008_v51  ;;  %v13722_v31 = vld [vmem:[#allocation11 + $0x110] sm:$0xf0]  ;;  %v15786_v49 = vld [vmem:[#allocation11 + $0x4a4] sm:$0xf] }
 0x4c4   :  { %9235 = vmatpush.bf16.msra.mxu0 %v13709_v20  ;;  %9171 = vmatpush.bf16.msra.mxu3 %v14073_v43  ;;  %v7357_v20 = vpop.f32.mrf.mxu3  ;;  %v14377_v43 = vor.u32 %v15836_v59, %v14376_v52  ;;  %v14346_v1 = vld [vmem:[#allocation11 + $0x5f0] sm:$0xf0]  ;;  %v15818_v8 = vld [vmem:[#allocation11 + $0x5a4] sm:$0xf] }
 0x4c5   :  { %v7358_v61 = vadd.f32 %v7357_v20, %v7345_v30  ;;  %v7424_v19 = vpop.f32.mrf.mxu0  ;;  %v13930_v51 = vld [vmem:[#allocation11 + $0x2b0] sm:$0xf0]  ;;  %v14349_v59 = vor.u32 %v15826_v44, %v14346_v1  ;;  %v15790_v20 = vld [vmem:[#allocation11 + $0x4c4] sm:$0xf] }
 0x4c6   :  { %9248 = vmatpush.bf16.msra.mxu1 %v13837_v33  ;;  %9212 = vmatpush.bf16.msrb.mxu2 %v14425_v14  ;;  %v7398_v33 = vpop.f32.mrf.mxu2  ;;  %v13610_v14 = vld [vmem:[#allocation11 + $0x30] sm:$0xf0]  ;;  %v4168_v19 = vperm.slane %v16662_v39, 7  ;;  %v15806_v1 = vld [vmem:[#allocation11 + $0x544] sm:$0xf] }
 0x4c7   :  { %v7574_v35 = vmax.f32 %v7358_v61, 0.0  ;;  %v7437_v58 = vpop.f32.mrf.mxu1  ;;  %v13613_v55 = vor.u32 %v15642_v5, %v13610_v14  ;;  %v14202_v33 = vld [vmem:[#allocation11 + $0x4d0] sm:$0xf0]  ;;  %v15782_v14 = vld [vmem:[#allocation11 + $0x484] sm:$0xf] }
 0x4c8   :  { %9236 = vmatpush.bf16.msra.mxu0 %v13693_v50  ;;  %9172 = vmatpush.bf16.msra.mxu3 %v14057_v42  ;;  %v15832_v50 = vld [vmem:[#allocation11 + $0x60c] sm:$0xf0]  ;;  %v15674_v42 = vld [vmem:[#allocation11 + $0x124] sm:$0xf]  ;;  %v13914_v61 = vld [vmem:[#allocation11 + $0x290] sm:$0xf0] }
 0x4c9   :  { %v14361_v34 = vor.u32 %v15832_v50, %v14360_v29  ;;  %v16691_v9 = vpack.c.bf16 %v7574_v35, %v7574_v35  ;;  %v13741_v23 = vor.u32 %v15674_v42, %v13738_v17  ;;  %v14314_v35 = vld [vmem:[#allocation11 + $0x5b0] sm:$0xf0]  ;;  %v15714_v29 = vld [vmem:[#allocation11 + $0x264] sm:$0xf] }
 0x4ca   :  { %9249 = vmatpush.bf16.msra.mxu1 %v13821_v24  ;;  %9213 = vmatpush.bf16.msrb.mxu2 %v14409_v54  ;;  %v13629_v24 = vor.u32 %v15646_v0, %v13626_v32  ;;  %v13962_v54 = vld [vmem:[#allocation11 + $0x2f0] sm:$0xf0]  ;;  %v14317_v5 = vor.u32 %v15818_v8, %v14314_v35  ;;  %v15814_v58 = vld [vmem:[#allocation11 + $0x584] sm:$0xf]  ;;  %v15888_v8 = vld [vmem:[#allocation11 + $0x7cc] sm:$0xf0] }
 0x4cb   :  { %v13965_v37 = vor.u32 %v15730_v2, %v13962_v54  ;;  %9204 = vmatmul.bf16.vlgmr.msrb.gmra.mxu1 %v16691_v9  ;;  %v14330_v0 = vld [vmem:[#allocation11 + $0x5d0] sm:$0xf0]  ;;  %v15710_v17 = vld [vmem:[#allocation11 + $0x244] sm:$0xf] }
 0x4cc   :  { %9237 = vmatpush.bf16.msra.mxu0 %v13677_v60  ;;  %9173 = vmatpush.bf16.msra.mxu3 %v14041_v28  ;;  %v13976_v60 = vld [vmem:[#allocation11 + $0x300] sm:$0xf]  ;;  %v7572_v28 = vmax.f32 %v16621_v36, 0.0  ;;  %v7359_v11 = vpop.f32.mrf.mxu3  ;;  %v13597_v36 = vor.u32 %v15638_v47, %v13594_v27  ;;  %v13898_v50 = vld [vmem:[#allocation11 + $0x270] sm:$0xf0] }
 0x4cd   :  { %v14170_v42 = vld [vmem:[#allocation11 + $0x490] sm:$0xf0] }
 0x4ce   :  { %9250 = vmatpush.bf16.msra.mxu1 %v13805_v7  ;;  %9214 = vmatpush.bf16.msrb.mxu2 %v14393_v10  ;;  %v15736_v7 = vld [vmem:[#allocation11 + $0x30c] sm:$0xf0]  ;;  %v15794_v10 = vld [vmem:[#allocation11 + $0x4e4] sm:$0xf]  ;;  %v16695_v52 = vpack.c.bf16 %v7572_v28, %v7572_v28  ;;  %v13882_v2 = vld [vmem:[#allocation11 + $0x250] sm:$0xf0]  ;;  %v14173_v54 = vor.u32 %v15782_v14, %v14170_v42 }
 0x4cf   :  { %v13977_v46 = vor.u32 %v15736_v7, %v13976_v60  ;;  %v14154_v28 = vld [vmem:[#allocation11 + $0x470] sm:$0xf0]  ;;  %v13885_v11 = vor.u32 %v15710_v17, %v13882_v2  ;;  %v13712_v42 = vld [vmem:[#allocation11 + $0xe8] sm:$0xf]  ;;  %v14568_v17 = vld [vmem:[#allocation11 + $0x7a0] sm:$0xf] }
 0x4d0   :  { %9238 = vmatpush.bf16.msra.mxu0 %v13661_v56  ;;  %9174 = vmatpush.bf16.msra.mxu3 %v14025_v57  ;;  %v15670_v56 = vld [vmem:[#allocation11 + $0x104] sm:$0xf]  ;;  %v14218_v57 = vld [vmem:[#allocation11 + $0x4f0] sm:$0xf0]  ;;  %v15884_v2 = vld [vmem:[#allocation11 + $0x7ac] sm:$0xf0] }
 0x4d1   :  { %v13725_v26 = vor.u32 %v15670_v56, %v13722_v31  ;;  %v14221_v30 = vor.u32 %v15794_v10, %v14218_v57  ;;  %v13866_v47 = vld [vmem:[#allocation11 + $0x230] sm:$0xf0]  ;;  %v15774_v10 = vld [vmem:[#allocation11 + $0x444] sm:$0xf] }
 0x4d2   :  { %9251 = vmatpush.bf16.msra.mxu1 %v13789_v53  ;;  %9215 = vmatpush.bf16.msrb.mxu2 %v14377_v43  ;;  %v13949_v53 = vor.u32 %v15726_v45, %v13946_v41  ;;  %v15718_v43 = vld [vmem:[#allocation11 + $0x284] sm:$0xf]  ;;  %v14282_v41 = vld [vmem:[#allocation11 + $0x570] sm:$0xf0] }
 0x4d3   :  { %v13917_v38 = vor.u32 %v15718_v43, %v13914_v61  ;;  %v15810_v45 = vld [vmem:[#allocation11 + $0x564] sm:$0xf]  ;;  %v14138_v57 = vld [vmem:[#allocation11 + $0x450] sm:$0xf0] }
 0x4d4   :  { %9239 = vmatpush.bf16.msra.mxu0 %v13645_v48  ;;  %9175 = vmatpush.bf16.msra.mxu3 %v14009_v16  ;;  %v13933_v48 = vor.u32 %v15722_v62, %v13930_v51  ;;  %v14205_v16 = vor.u32 %v15790_v20, %v14202_v33  ;;  %v14285_v31 = vor.u32 %v15810_v45, %v14282_v41  ;;  %v15702_v62 = vld [vmem:[#allocation11 + $0x204] sm:$0xf]  ;;  %v13850_v51 = vld [vmem:[#allocation11 + $0x210] sm:$0xf0]  ;;  %v15697_v45 = vld [vmem:[#allocation11 + $0x1d4] sm:$0xf0] }
 0x4d5   :  { %v14122_v33 = vld [vmem:[#allocation11 + $0x430] sm:$0xf0]  ;;  %v15802_v61 = vld [vmem:[#allocation11 + $0x524] sm:$0xf]  ;;  %v14552_v41 = vld [vmem:[#allocation11 + $0x780] sm:$0xf] }
 0x4d6   :  { %9252 = vmatpush.bf16.msra.mxu1 %v13773_v12  ;;  %9216 = vmatpush.bf16.msrb.mxu2 %v14361_v34  ;;  %v15822_v12 = vld [vmem:[#allocation11 + $0x5c4] sm:$0xf]  ;;  %v13901_v34 = vor.u32 %v15714_v29, %v13898_v50  ;;  %v14106_v50 = vld [vmem:[#allocation11 + $0x410] sm:$0xf0] }
 0x4d7   :  { %v14333_v32 = vor.u32 %v15822_v12, %v14330_v0  ;;  %v14600_v12 = vld [vmem:[#allocation11 + $0x7e0] sm:$0xf]  ;;  %v15892_v0 = vld [vmem:[#allocation11 + $0x7ec] sm:$0xf0]  ;;  %v15766_v29 = vld [vmem:[#allocation11 + $0x404] sm:$0xf] }
 0x4d8   :  { %9240 = vmatpush.bf16.msra.mxu0 %v13629_v24  ;;  %9176 = vmatpush.bf16.msra.mxu3 %v13993_v18  ;;  %v14298_v18 = vld [vmem:[#allocation11 + $0x590] sm:$0xf0] }
 0x4d9   :  { %v16699_v24 = vpop.f32.mrf.mxu2  ;;  %v14301_v7 = vor.u32 %v15814_v58, %v14298_v18  ;;  %v14234_v14 = vld [vmem:[#allocation11 + $0x510] sm:$0xf0]  ;;  %v15701_v58 = vld [vmem:[#allocation11 + $0x1f4] sm:$0xf0]  ;;  %v14109_v18 = vor.u32 %v15766_v29, %v14106_v50  ;;  %v15868_v29 = vld [vmem:[#allocation11 + $0x72c] sm:$0xf0] }
 0x4da   :  { %9253 = vmatpush.bf16.msra.mxu1 %v13757_v13  ;;  %9261 = vmatpush.bf16.msra.mxu2 %v13965_v37  ;;  %v14189_v13 = vor.u32 %v15786_v49, %v14186_v4  ;;  %v15778_v37 = vld [vmem:[#allocation11 + $0x464] sm:$0xf] }
 0x4dc   :  { %9241 = vmatpush.bf16.msra.mxu0 %v13613_v55  ;;  %9177 = vmatpush.bf16.msra.mxu3 %v13977_v46  ;;  %v15706_v46 = vld [vmem:[#allocation11 + $0x224] sm:$0xf] }
 0x4dd   :  { %v7474_v60 = vpop.f32.mrf.mxu0  ;;  %v13869_v44 = vor.u32 %v15706_v46, %v13866_v47  ;;  %v15880_v46 = vld [vmem:[#allocation11 + $0x78c] sm:$0xf0] }
 0x4de   :  { %9254 = vmatpush.bf16.msra.mxu1 %v13741_v23  ;;  %9262 = vmatpush.bf16.msra.mxu2 %v13949_v53  ;;  %v7475_v55 = vadd.f32 %v7474_v60, %v4168_v19  ;;  %v14157_v53 = vor.u32 %v15778_v37, %v14154_v28  ;;  %v13840_v19 = vld [vmem:[#allocation11 + $0x1e8] sm:$0xf] }
 0x4df   :  { %9178 = vmatmul.bf16.vlgmr.msra.gmra.mxu3 %v16695_v52  ;;  %v7487_v23 = vpop.f32.mrf.mxu1  ;;  %v16705_v27 = vpop.f32.mrf.mxu3  ;;  %v13841_v37 = vor.u32 %v15701_v58, %v13840_v19  ;;  %v13696_v28 = vld [vmem:[#allocation11 + $0xc8] sm:$0xf]  ;;  %v15649_v19 = vld [vmem:[#allocation11 + $0x54] sm:$0xf0] }
 0x4e0   :  { %9242 = vmatpush.bf16.msra.mxu0 %v13597_v36  ;;  %v16703_v39 = vadd.f32 %v7487_v23, %v7475_v55  ;;  %v14266_v36 = vld [vmem:[#allocation11 + $0x550] sm:$0xf0]  ;;  %v7397_v55 = vadd.f32 %v16683_v63, %v16665_v21  ;;  %v13824_v23 = vld [vmem:[#allocation11 + $0x1c8] sm:$0xf]  ;;  %v15693_v21 = vld [vmem:[#allocation11 + $0x1b4] sm:$0xf0] }
 0x4e1   :  { %v7450_v56 = vpop.f32.mrf.mxu2  ;;  %v14269_v20 = vor.u32 %v15806_v1, %v14266_v36  ;;  %v14536_v63 = vld [vmem:[#allocation11 + $0x760] sm:$0xf]  ;;  %v15876_v1 = vld [vmem:[#allocation11 + $0x76c] sm:$0xf0]  ;;  %v13760_v58 = vld [vmem:[#allocation11 + $0x148] sm:$0xf] }
 0x4e2   :  { %9255 = vmatpush.bf16.msra.mxu1 %v13725_v26  ;;  %9263 = vmatpush.bf16.msra.mxu2 %v13933_v48  ;;  %v14141_v26 = vor.u32 %v15774_v10, %v14138_v57  ;;  %v13853_v48 = vor.u32 %v15702_v62, %v13850_v51  ;;  %v7410_v47 = vadd.f32 %v16705_v27, %v7397_v55  ;;  %v13680_v10 = vld [vmem:[#allocation11 + $0xa8] sm:$0xf]  ;;  %v15661_v57 = vld [vmem:[#allocation11 + $0xb4] sm:$0xf0] }
 0x4e3   :  { %9243 = vmatmul.bf16.vlgmr.msra.gmra.mxu0 %v16654_v22  ;;  %v14537_v36 = vor.u32 %v15876_v1, %v14536_v63  ;;  %v13681_v62 = vor.u32 %v15661_v57, %v13680_v10  ;;  %v14458_v10 = vld [vmem:[#allocation11 + $0x6d0] sm:$0xf0]  ;;  %v15762_v57 = vld [vmem:[#allocation11 + $0x3e4] sm:$0xf]  ;;  %v13600_v1 = vld [vmem:[#allocation11 + $0x8] sm:$0xf] }
 0x4e4   :  { %9287 = vmatpush.bf16.msrb.mxu0 %v14221_v30  ;;  %v15770_v30 = vld [vmem:[#allocation11 + $0x424] sm:$0xf]  ;;  %v7423_v27 = vadd.f32 %v16686_v15, %v7410_v47 }
 0x4e5   :  { %9256 = vmatmul.bf16.vlgmr.msra.gmra.mxu1 %v16656_v3  ;;  %v14125_v4 = vor.u32 %v15770_v30, %v14122_v33  ;;  %v13664_v30 = vld [vmem:[#allocation11 + $0x88] sm:$0xf]  ;;  %v15689_v33 = vld [vmem:[#allocation11 + $0x194] sm:$0xf0]  ;;  %v15854_v47 = vld [vmem:[#allocation11 + $0x6c4] sm:$0xf] }
 0x4e6   :  { %9300 = vmatpush.bf16.msrb.mxu1 %v14349_v59  ;;  %9264 = vmatpush.bf16.msra.mxu2 %v13917_v38  ;;  %v7476_v59 = vpop.f32.mrf.mxu0  ;;  %v14584_v38 = vld [vmem:[#allocation11 + $0x7c0] sm:$0xf] }
 0x4e7   :  { %v7489_v43 = vpop.f32.mrf.mxu1  ;;  %v7411_v49 = vpop.f32.mrf.mxu3  ;;  %v15657_v59 = vld [vmem:[#allocation11 + $0x94] sm:$0xf0] }
 0x4e8   :  { %9288 = vmatpush.bf16.msrb.mxu0 %v14205_v16  ;;  %v14250_v16 = vld [vmem:[#allocation11 + $0x530] sm:$0xf0]  ;;  %v7436_v43 = vadd.f32 %v16688_v40, %v7423_v27  ;;  %v15758_v27 = vld [vmem:[#allocation11 + $0x3c4] sm:$0xf] }
 0x4e9   :  { %v14253_v35 = vor.u32 %v15802_v61, %v14250_v16  ;;  %v13648_v16 = vld [vmem:[#allocation11 + $0x68] sm:$0xf] }
 0x4ea   :  { %9301 = vmatpush.bf16.msrb.mxu1 %v14333_v32  ;;  %9265 = vmatpush.bf16.msra.mxu2 %v13901_v34  ;;  %v14601_v32 = vor.u32 %v15892_v0, %v14600_v12  ;;  %v15669_v34 = vld [vmem:[#allocation11 + $0xf4] sm:$0xf0]  ;;  %v15872_v12 = vld [vmem:[#allocation11 + $0x74c] sm:$0xf0]  ;;  %v13665_v0 = vor.u32 %v15657_v59, %v13664_v30  ;;  %v7449_v50 = vadd.f32 %v16699_v24, %v7436_v43  ;;  %v13616_v24 = vld [vmem:[#allocation11 + $0x28] sm:$0xf] }
 0x4eb   :  { %v13713_v60 = vor.u32 %v15669_v34, %v13712_v42  ;;  %v13632_v34 = vld [vmem:[#allocation11 + $0x48] sm:$0xf]  ;;  %v14461_v30 = vor.u32 %v15854_v47, %v14458_v10  ;;  %v14026_v47 = vld [vmem:[#allocation11 + $0x370] sm:$0xf0] }
 0x4ec   :  { %9289 = vmatpush.bf16.msrb.mxu0 %v14189_v13  ;;  %9222 = vmatpush.bf16.msrb.mxu3 %v14601_v32  ;;  %v15798_v13 = vld [vmem:[#allocation11 + $0x504] sm:$0xf]  ;;  %v15653_v32 = vld [vmem:[#allocation11 + $0x74] sm:$0xf0]  ;;  %v13728_v59 = vld [vmem:[#allocation11 + $0x108] sm:$0xf] }
 0x4ee   :  { %9302 = vmatpush.bf16.msrb.mxu1 %v14317_v5  ;;  %9266 = vmatpush.bf16.msra.mxu2 %v13885_v11  ;;  %v14585_v5 = vor.u32 %v15888_v8, %v14584_v38  ;;  %v15665_v11 = vld [vmem:[#allocation11 + $0xd4] sm:$0xf0]  ;;  %v13776_v38 = vld [vmem:[#allocation11 + $0x168] sm:$0xf] }
 0x4ef   :  { %v13697_v56 = vor.u32 %v15665_v11, %v13696_v28  ;;  %v15685_v8 = vld [vmem:[#allocation11 + $0x174] sm:$0xf0]  ;;  %v13633_v28 = vor.u32 %v15649_v19, %v13632_v34  ;;  %v14336_v34 = vld [vmem:[#allocation11 + $0x5c8] sm:$0xf] }
 0x4f0   :  { %9290 = vmatpush.bf16.msrb.mxu0 %v14173_v54  ;;  %9223 = vmatpush.bf16.msrb.mxu3 %v14585_v5  ;;  %v14237_v54 = vor.u32 %v15798_v13, %v14234_v14  ;;  %v13649_v13 = vor.u32 %v15653_v32, %v13648_v16  ;;  %v13777_v42 = vor.u32 %v15685_v8, %v13776_v38  ;;  %v15645_v11 = vld [vmem:[#allocation11 + $0x34] sm:$0xf0]  ;;  %v15754_v38 = vld [vmem:[#allocation11 + $0x3a4] sm:$0xf]  ;;  %v14058_v8 = vld [vmem:[#allocation11 + $0x3b0] sm:$0xf0] }
 0x4f1   :  { %v13617_v63 = vor.u32 %v15645_v11, %v13616_v24  ;;  %v15829_v16 = vld [vmem:[#allocation11 + $0x5f4] sm:$0xf0]  ;;  %v14320_v11 = vld [vmem:[#allocation11 + $0x5a8] sm:$0xf] }
 0x4f2   :  { %9303 = vmatpush.bf16.msrb.mxu1 %v14301_v7  ;;  %9267 = vmatpush.bf16.msra.mxu2 %v13869_v44  ;;  %v14569_v7 = vor.u32 %v15884_v2, %v14568_v17  ;;  %v13808_v44 = vld [vmem:[#allocation11 + $0x1a8] sm:$0xf]  ;;  %v15681_v17 = vld [vmem:[#allocation11 + $0x154] sm:$0xf0]  ;;  %v15858_v2 = vld [vmem:[#allocation11 + $0x6e4] sm:$0xf] }
 0x4f3   :  { %v15825_v19 = vld [vmem:[#allocation11 + $0x5d4] sm:$0xf0] }
 0x4f4   :  { %9291 = vmatpush.bf16.msrb.mxu0 %v14157_v53  ;;  %9224 = vmatpush.bf16.msrb.mxu3 %v14569_v7  ;;  %v14553_v53 = vor.u32 %v15880_v46, %v14552_v41  ;;  %v15864_v7 = vld [vmem:[#allocation11 + $0x70c] sm:$0xf0]  ;;  %v13744_v41 = vld [vmem:[#allocation11 + $0x128] sm:$0xf]  ;;  %v15677_v46 = vld [vmem:[#allocation11 + $0x134] sm:$0xf0] }
 0x4f5   :  { %v15789_v24 = vld [vmem:[#allocation11 + $0x4b4] sm:$0xf0] }
 0x4f6   :  { %9304 = vmatpush.bf16.msrb.mxu1 %v14285_v31  ;;  %9268 = vmatpush.bf16.msra.mxu2 %v13853_v48  ;;  %v13825_v31 = vor.u32 %v15697_v45, %v13824_v23  ;;  %v14520_v48 = vld [vmem:[#allocation11 + $0x740] sm:$0xf]  ;;  %v13761_v23 = vor.u32 %v15681_v17, %v13760_v58  ;;  %v14061_v58 = vor.u32 %v15754_v38, %v14058_v8  ;;  %v15750_v17 = vld [vmem:[#allocation11 + $0x384] sm:$0xf] }
 0x4f7   :  { %v14521_v61 = vor.u32 %v15872_v12, %v14520_v48  ;;  %v15850_v48 = vld [vmem:[#allocation11 + $0x6a4] sm:$0xf]  ;;  %v14442_v12 = vld [vmem:[#allocation11 + $0x6b0] sm:$0xf0] }
 0x4f8   :  { %9292 = vmatpush.bf16.msrb.mxu0 %v14141_v26  ;;  %9225 = vmatpush.bf16.msrb.mxu3 %v14553_v53  ;;  %v13809_v26 = vor.u32 %v15693_v21, %v13808_v44  ;;  %v14090_v44 = vld [vmem:[#allocation11 + $0x3f0] sm:$0xf0] }
 0x4f9   :  { %v16713_v51 = vpop.f32.mrf.mxu2  ;;  %v14093_v21 = vor.u32 %v15762_v57, %v14090_v44  ;;  %v15838_v57 = vld [vmem:[#allocation11 + $0x644] sm:$0xf]  ;;  %v14394_v44 = vld [vmem:[#allocation11 + $0x650] sm:$0xf0] }
 0x4fa   :  { %9305 = vmatpush.bf16.msrb.mxu1 %v14269_v20  ;;  %v13792_v20 = vld [vmem:[#allocation11 + $0x188] sm:$0xf] }
 0x4fb   :  { %v13793_v15 = vor.u32 %v15689_v33, %v13792_v20  ;;  %v15673_v20 = vld [vmem:[#allocation11 + $0x114] sm:$0xf0]  ;;  %v14074_v33 = vld [vmem:[#allocation11 + $0x3d0] sm:$0xf0] }
 0x4fc   :  { %9293 = vmatpush.bf16.msrb.mxu0 %v14125_v4  ;;  %9226 = vmatpush.bf16.msrb.mxu3 %v14537_v36  ;;  %v15641_v36 = vld [vmem:[#allocation11 + $0x14] sm:$0xf0]  ;;  %v14077_v43 = vor.u32 %v15758_v27, %v14074_v33 }
 0x4fd   :  { %v13601_v32 = vor.u32 %v15641_v36, %v13600_v1  ;;  %v14304_v1 = vld [vmem:[#allocation11 + $0x588] sm:$0xf]  ;;  %v15817_v36 = vld [vmem:[#allocation11 + $0x594] sm:$0xf0] }
 0x4fe   :  { %9306 = vmatpush.bf16.msrb.mxu1 %v14253_v35  ;;  %v14504_v35 = vld [vmem:[#allocation11 + $0x720] sm:$0xf]  ;;  %v14305_v33 = vor.u32 %v15817_v36, %v14304_v1 }
 0x4ff   :  { %v14505_v5 = vor.u32 %v15868_v29, %v14504_v35  ;;  %v7461_v40 = vpop.f32.mrf.mxu3  ;;  %v13729_v35 = vor.u32 %v15673_v20, %v13728_v59  ;;  %v14445_v29 = vor.u32 %v15850_v48, %v14442_v12  ;;  %v14397_v59 = vor.u32 %v15838_v57, %v14394_v44  ;;  %v15834_v48 = vld [vmem:[#allocation11 + $0x624] sm:$0xf]  ;;  %v14378_v12 = vld [vmem:[#allocation11 + $0x630] sm:$0xf0] }
 0x500   :  { %9294 = vmatpush.bf16.msrb.mxu0 %v14109_v18  ;;  %v16716_v49 = vpop.f32.mrf.mxu0  ;;  %9227 = vmatpush.bf16.msrb.mxu3 %v14521_v61  ;;  %v7462_v18 = vadd.f32 %v7461_v40, %v7449_v50  ;;  %v15797_v61 = vld [vmem:[#allocation11 + $0x4f4] sm:$0xf0]  ;;  %v14426_v40 = vld [vmem:[#allocation11 + $0x690] sm:$0xf0] }
 0x501   :  { %v7502_v14 = vpop.f32.mrf.mxu2 }
 0x502   :  { %9307 = vmatpush.bf16.msrb.mxu1 %v14237_v54  ;;  %v16718_v4 = vpop.f32.mrf.mxu1  ;;  %v14474_v54 = vld [vmem:[#allocation11 + $0x6f0] sm:$0xf0]  ;;  %v14208_v14 = vld [vmem:[#allocation11 + $0x4c8] sm:$0xf] }
 0x503   :  { %9295 = vmatmul.bf16.vlgmr.msrb.gmra.mxu0 %v16677_v6  ;;  %v14477_v45 = vor.u32 %v15858_v2, %v14474_v54  ;;  %v14042_v2 = vld [vmem:[#allocation11 + $0x390] sm:$0xf0] }
 0x504   :  { %9339 = vmatpush.bf16.msra.mxu0 %v13713_v60  ;;  %9228 = vmatpush.bf16.msrb.mxu3 %v14505_v5  ;;  %v14488_v60 = vld [vmem:[#allocation11 + $0x700] sm:$0xf]  ;;  %v15846_v5 = vld [vmem:[#allocation11 + $0x684] sm:$0xf] }
 0x505   :  { %9308 = vmatmul.bf16.vlgmr.msrb.gmra.mxu1 %v16691_v9  ;;  %v14489_v55 = vor.u32 %v15864_v7, %v14488_v60  ;;  %v14337_v60 = vor.u32 %v15825_v19, %v14336_v34  ;;  %v15842_v7 = vld [vmem:[#allocation11 + $0x664] sm:$0xf]  ;;  %v14362_v19 = vld [vmem:[#allocation11 + $0x610] sm:$0xf0] }
 0x506   :  { %9352 = vmatpush.bf16.msra.mxu1 %v13841_v37  ;;  %v7575_v37 = vmax.f32 %v7462_v18, 0.0  ;;  %v14429_v18 = vor.u32 %v15846_v5, %v14426_v40  ;;  %v15830_v34 = vld [vmem:[#allocation11 + $0x604] sm:$0xf] }
 0x508   :  { %9340 = vmatpush.bf16.msra.mxu0 %v13697_v56  ;;  %v16721_v56 = vpack.c.bf16 %v7575_v37, %v7575_v37  ;;  %v7528_v53 = vpop.f32.mrf.mxu0  ;;  %9229 = vmatpush.bf16.msrb.mxu3 %v14489_v55  ;;  %v14410_v37 = vld [vmem:[#allocation11 + $0x670] sm:$0xf0]  ;;  %v15821_v55 = vld [vmem:[#allocation11 + $0x5b4] sm:$0xf0] }
 0x509   :  { %v14321_v10 = vor.u32 %v15821_v55, %v14320_v11 }
 0x50a   :  { %9353 = vmatpush.bf16.msra.mxu1 %v13825_v31  ;;  %v7541_v31 = vpop.f32.mrf.mxu1  ;;  %9217 = vmatmul.bf16.vlgmr.msrb.gmra.mxu2 %v16721_v56 }
 0x50b   :  { %9313 = vmatpush.bf16.msrb.mxu2 %v14477_v45  ;;  %v14413_v45 = vor.u32 %v15842_v7, %v14410_v37  ;;  %v15733_v7 = vld [vmem:[#allocation11 + $0x2f4] sm:$0xf0]  ;;  %v14365_v37 = vor.u32 %v15830_v34, %v14362_v19  ;;  %v13826_v34 = vld [vmem:[#allocation11 + $0x1d8] sm:$0xf0] }
 0x50c   :  { %9341 = vmatpush.bf16.msra.mxu0 %v13681_v62  ;;  %v7463_v62 = vpop.f32.mrf.mxu3  ;;  %9274 = vmatpush.bf16.msra.mxu3 %v14093_v21  ;;  %v14176_v21 = vld [vmem:[#allocation11 + $0x488] sm:$0xf] }
 0x50e   :  { %9354 = vmatpush.bf16.msra.mxu1 %v13809_v26  ;;  %v13745_v26 = vor.u32 %v15677_v46, %v13744_v41  ;;  %v16726_v41 = vld [vmem:[#allocation13] sm:$0xf]  ;;  %v15746_v46 = vld [vmem:[#allocation11 + $0x364] sm:$0xf] }
 0x50f   :  { %9314 = vmatpush.bf16.msrb.mxu2 %v14461_v30  ;;  %v14029_v27 = vor.u32 %v15746_v46, %v14026_v47  ;;  %v7843_v62 = vperm.slane %v16726_v41, 0  ;;  %v14010_v30 = vld [vmem:[#allocation11 + $0x350] sm:$0xf0]  ;;  %v15773_v47 = vld [vmem:[#allocation11 + $0x434] sm:$0xf0] }
 0x510   :  { %9342 = vmatpush.bf16.msra.mxu0 %v13665_v0  ;;  %v14224_v0 = vld [vmem:[#allocation11 + $0x4e8] sm:$0xf]  ;;  %9275 = vmatpush.bf16.msra.mxu3 %v14077_v43 }
 0x511   :  { %v14225_v50 = vor.u32 %v15797_v61, %v14224_v0  ;;  %v14160_v0 = vld [vmem:[#allocation11 + $0x468] sm:$0xf]  ;;  %v15781_v61 = vld [vmem:[#allocation11 + $0x474] sm:$0xf0] }
 0x512   :  { %9355 = vmatpush.bf16.msra.mxu1 %v13793_v15  ;;  %v14352_v15 = vld [vmem:[#allocation11 + $0x5e8] sm:$0xf] }
 0x513   :  { %9315 = vmatpush.bf16.msrb.mxu2 %v14445_v29  ;;  %v15738_v29 = vld [vmem:[#allocation11 + $0x324] sm:$0xf] }
 0x514   :  { %9343 = vmatpush.bf16.msra.mxu0 %v13649_v13  ;;  %v14353_v13 = vor.u32 %v15829_v16, %v14352_v15  ;;  %9276 = vmatpush.bf16.msra.mxu3 %v14061_v58  ;;  %v14288_v15 = vld [vmem:[#allocation11 + $0x568] sm:$0xf]  ;;  %v15813_v16 = vld [vmem:[#allocation11 + $0x574] sm:$0xf0] }
 0x515   :  { %v14144_v58 = vld [vmem:[#allocation11 + $0x448] sm:$0xf] }
 0x516   :  { %9356 = vmatpush.bf16.msra.mxu1 %v13777_v42  ;;  %v15793_v42 = vld [vmem:[#allocation11 + $0x4d4] sm:$0xf0] }
 0x517   :  { %v14209_v54 = vor.u32 %v15793_v42, %v14208_v14  ;;  %9316 = vmatpush.bf16.msrb.mxu2 %v14429_v18  ;;  %v14161_v14 = vor.u32 %v15781_v61, %v14160_v0  ;;  %v14289_v42 = vor.u32 %v15813_v16, %v14288_v15  ;;  %v15777_v18 = vld [vmem:[#allocation11 + $0x454] sm:$0xf0]  ;;  %v13714_v0 = vld [vmem:[#allocation11 + $0xf8] sm:$0xf0] }
 0x518   :  { %9344 = vmatpush.bf16.msra.mxu0 %v13633_v28  ;;  %v14192_v28 = vld [vmem:[#allocation11 + $0x4a8] sm:$0xf]  ;;  %v14145_v11 = vor.u32 %v15777_v18, %v14144_v58  ;;  %v13842_v61 = vld [vmem:[#allocation11 + $0x1f8] sm:$0xf0] }
 0x519   :  { %v14193_v31 = vor.u32 %v15789_v24, %v14192_v28  ;;  %v15734_v28 = vld [vmem:[#allocation11 + $0x304] sm:$0xf]  ;;  %v13978_v24 = vld [vmem:[#allocation11 + $0x310] sm:$0xf0] }
 0x51a   :  { %9357 = vmatpush.bf16.msra.mxu1 %v13761_v23  ;;  %v14045_v23 = vor.u32 %v15750_v17, %v14042_v2  ;;  %9269 = vmatmul.bf16.vlgmr.msra.gmra.mxu2 %v16670_v25  ;;  %v14272_v17 = vld [vmem:[#allocation11 + $0x548] sm:$0xf]  ;;  %v15809_v2 = vld [vmem:[#allocation11 + $0x554] sm:$0xf0]  ;;  %v13981_v57 = vor.u32 %v15734_v28, %v13978_v24 }
 0x51b   :  { %9317 = vmatpush.bf16.msrb.mxu2 %v14413_v45  ;;  %v14273_v55 = vor.u32 %v15809_v2, %v14272_v17  ;;  %v13904_v17 = vld [vmem:[#allocation11 + $0x268] sm:$0xf] }
 0x51c   :  { %9345 = vmatpush.bf16.msra.mxu0 %v13617_v63  ;;  %v16728_v53 = vpop.f32.mrf.mxu2  ;;  %v15785_v63 = vld [vmem:[#allocation11 + $0x494] sm:$0xf0]  ;;  %9277 = vmatpush.bf16.msra.mxu3 %v14045_v23  ;;  %v14128_v23 = vld [vmem:[#allocation11 + $0x428] sm:$0xf] }
 0x51d   :  { %v14177_v20 = vor.u32 %v15785_v63, %v14176_v21  ;;  %v13952_v21 = vld [vmem:[#allocation11 + $0x2c8] sm:$0xf]  ;;  %v15729_v63 = vld [vmem:[#allocation11 + $0x2d4] sm:$0xf0]  ;;  %v14129_v36 = vor.u32 %v15773_v47, %v14128_v23 }
 0x51e   :  { %9358 = vmatpush.bf16.msra.mxu1 %v13745_v26  ;;  %v15742_v26 = vld [vmem:[#allocation11 + $0x344] sm:$0xf]  ;;  %v13888_v24 = vld [vmem:[#allocation11 + $0x248] sm:$0xf]  ;;  %v15713_v23 = vld [vmem:[#allocation11 + $0x254] sm:$0xf0] }
 0x51f   :  { %9318 = vmatpush.bf16.msrb.mxu2 %v14397_v59  ;;  %v14240_v59 = vld [vmem:[#allocation11 + $0x508] sm:$0xf] }
 0x520   :  { %9346 = vmatpush.bf16.msra.mxu0 %v13601_v32  ;;  %v9140_v43 = vpop.f32.mrf.mxu0  ;;  %9278 = vmatpush.bf16.msra.mxu3 %v14029_v27  ;;  %v14013_v32 = vor.u32 %v15742_v26, %v14010_v30  ;;  %v15769_v26 = vld [vmem:[#allocation11 + $0x414] sm:$0xf0]  ;;  %v13953_v30 = vor.u32 %v15729_v63, %v13952_v21  ;;  %v13872_v21 = vld [vmem:[#allocation11 + $0x228] sm:$0xf] }
 0x521   :  { %v9141_v38 = vadd.f32 %v9140_v43, %v7843_v62  ;;  %v14112_v62 = vld [vmem:[#allocation11 + $0x408] sm:$0xf]  ;;  %v15699_v43 = vld [vmem:[#allocation11 + $0x1ec] sm:$0xf] }
 0x522   :  { %9359 = vmatpush.bf16.msra.mxu1 %v13729_v35  ;;  %v9153_v8 = vpop.f32.mrf.mxu1  ;;  %v14381_v35 = vor.u32 %v15834_v48, %v14378_v12  ;;  %v16734_v5 = vpop.f32.mrf.mxu3  ;;  %v15725_v48 = vld [vmem:[#allocation11 + $0x2b4] sm:$0xf0]  ;;  %v15667_v12 = vld [vmem:[#allocation11 + $0xec] sm:$0xf]  ;;  %v14113_v15 = vor.u32 %v15769_v26, %v14112_v62  ;;  %v13650_v62 = vld [vmem:[#allocation11 + $0x78] sm:$0xf0] }
 0x523   :  { %9347 = vmatmul.bf16.vlgmr.msra.gmra.mxu0 %v16654_v22  ;;  %v15683_v26 = vld [vmem:[#allocation11 + $0x16c] sm:$0xf] }
 0x524   :  { %9391 = vmatpush.bf16.msrb.mxu0 %v14225_v50  ;;  %v13994_v50 = vld [vmem:[#allocation11 + $0x330] sm:$0xf0]  ;;  %v7554_v40 = vpop.f32.mrf.mxu2  ;;  %9279 = vmatpush.bf16.msra.mxu3 %v14013_v32 }
 0x525   :  { %9360 = vmatmul.bf16.vlgmr.msra.gmra.mxu1 %v16656_v3  ;;  %9319 = vmatpush.bf16.msrb.mxu2 %v14381_v35  ;;  %v13845_v35 = vor.u32 %v15699_v43, %v13842_v61  ;;  %v13698_v40 = vld [vmem:[#allocation11 + $0xd8] sm:$0xf0]  ;;  %v15647_v43 = vld [vmem:[#allocation11 + $0x4c] sm:$0xf] }
 0x526   :  { %9404 = vmatpush.bf16.msrb.mxu1 %v14353_v13  ;;  %v16732_v13 = vadd.f32 %v9153_v8, %v9141_v38  ;;  %v13717_v38 = vor.u32 %v15667_v12, %v13714_v0  ;;  %v13920_v8 = vld [vmem:[#allocation11 + $0x288] sm:$0xf]  ;;  %v15705_v0 = vld [vmem:[#allocation11 + $0x214] sm:$0xf0]  ;;  %v13634_v61 = vld [vmem:[#allocation11 + $0x58] sm:$0xf0] }
 0x528   :  { %9392 = vmatpush.bf16.msrb.mxu0 %v14209_v54  ;;  %v13997_v54 = vor.u32 %v15738_v29, %v13994_v50  ;;  %v9142_v45 = vpop.f32.mrf.mxu0  ;;  %v15721_v29 = vld [vmem:[#allocation11 + $0x294] sm:$0xf0]  ;;  %v15663_v50 = vld [vmem:[#allocation11 + $0xcc] sm:$0xf] }
 0x529   :  { %9320 = vmatpush.bf16.msrb.mxu2 %v14365_v37  ;;  %v13921_v58 = vor.u32 %v15721_v29, %v13920_v8  ;;  %v13701_v18 = vor.u32 %v15663_v50, %v13698_v40  ;;  %v15655_v45 = vld [vmem:[#allocation11 + $0x8c] sm:$0xf]  ;;  %v14602_v8 = vld [vmem:[#allocation11 + $0x7f0] sm:$0xf0]  ;;  %v15861_v29 = vld [vmem:[#allocation11 + $0x6f4] sm:$0xf0]  ;;  %v13637_v40 = vor.u32 %v15647_v43, %v13634_v61 }
 0x52a   :  { %9405 = vmatpush.bf16.msrb.mxu1 %v14337_v60  ;;  %v13968_v60 = vld [vmem:[#allocation11 + $0x2e8] sm:$0xf]  ;;  %9280 = vmatpush.bf16.msra.mxu3 %v13997_v54  ;;  %v9155_v44 = vpop.f32.mrf.mxu1  ;;  %v7515_v1 = vpop.f32.mrf.mxu3  ;;  %v15717_v54 = vld [vmem:[#allocation11 + $0x274] sm:$0xf0]  ;;  %v15823_v61 = vld [vmem:[#allocation11 + $0x5cc] sm:$0xf] }
 0x52b   :  { %v13969_v46 = vor.u32 %v15733_v7, %v13968_v60  ;;  %v15659_v60 = vld [vmem:[#allocation11 + $0xac] sm:$0xf]  ;;  %v13682_v7 = vld [vmem:[#allocation11 + $0xb8] sm:$0xf0]  ;;  %v15849_v43 = vld [vmem:[#allocation11 + $0x694] sm:$0xf0] }
 0x52c   :  { %9393 = vmatpush.bf16.msrb.mxu0 %v14193_v31  ;;  %v14256_v31 = vld [vmem:[#allocation11 + $0x528] sm:$0xf]  ;;  %9321 = vmatmul.bf16.vlgmr.msrb.gmra.mxu2 %v16721_v56  ;;  %v13685_v28 = vor.u32 %v15659_v60, %v13682_v7  ;;  %v15886_v60 = vld [vmem:[#allocation11 + $0x7c4] sm:$0xf]  ;;  %v14586_v7 = vld [vmem:[#allocation11 + $0x7d0] sm:$0xf0] }
 0x52d   :  { %9365 = vmatpush.bf16.msra.mxu2 %v13969_v46  ;;  %v13666_v46 = vld [vmem:[#allocation11 + $0x98] sm:$0xf0] }
 0x52e   :  { %9406 = vmatpush.bf16.msrb.mxu1 %v14321_v10  ;;  %v15805_v10 = vld [vmem:[#allocation11 + $0x534] sm:$0xf0]  ;;  %9281 = vmatpush.bf16.msra.mxu3 %v13981_v57  ;;  %v13889_v57 = vor.u32 %v15713_v23, %v13888_v24  ;;  %v13730_v23 = vld [vmem:[#allocation11 + $0x118] sm:$0xf0] }
 0x52f   :  { %v14257_v27 = vor.u32 %v15805_v10, %v14256_v31  ;;  %v15687_v31 = vld [vmem:[#allocation11 + $0x18c] sm:$0xf]  ;;  %v13794_v10 = vld [vmem:[#allocation11 + $0x198] sm:$0xf0] }
 0x530   :  { %9394 = vmatpush.bf16.msrb.mxu0 %v14177_v20  ;;  %v15801_v20 = vld [vmem:[#allocation11 + $0x514] sm:$0xf0]  ;;  %v13797_v1 = vor.u32 %v15687_v31, %v13794_v10  ;;  %v15882_v31 = vld [vmem:[#allocation11 + $0x7a4] sm:$0xf]  ;;  %v15795_v10 = vld [vmem:[#allocation11 + $0x4ec] sm:$0xf] }
 0x531   :  { %v14241_v16 = vor.u32 %v15801_v20, %v14240_v59  ;;  %9366 = vmatpush.bf16.msra.mxu2 %v13953_v30  ;;  %v13778_v30 = vld [vmem:[#allocation11 + $0x178] sm:$0xf0] }
 0x532   :  { %9407 = vmatpush.bf16.msrb.mxu1 %v14305_v33  ;;  %v13936_v33 = vld [vmem:[#allocation11 + $0x2a8] sm:$0xf]  ;;  %v13781_v12 = vor.u32 %v15683_v26, %v13778_v30 }
 0x533   :  { %v13937_v32 = vor.u32 %v15725_v48, %v13936_v33  ;;  %v13856_v33 = vld [vmem:[#allocation11 + $0x208] sm:$0xf] }
 0x534   :  { %9395 = vmatpush.bf16.msrb.mxu0 %v14161_v14  ;;  %v7501_v14 = vadd.f32 %v16713_v51, %v16703_v39  ;;  %v15691_v39 = vld [vmem:[#allocation11 + $0x1ac] sm:$0xf]  ;;  %v13810_v51 = vld [vmem:[#allocation11 + $0x1b8] sm:$0xf0] }
 0x535   :  { %9367 = vmatpush.bf16.msra.mxu2 %v13937_v32  ;;  %v13762_v32 = vld [vmem:[#allocation11 + $0x158] sm:$0xf0] }
 0x536   :  { %9408 = vmatpush.bf16.msrb.mxu1 %v14289_v42  ;;  %v15695_v42 = vld [vmem:[#allocation11 + $0x1cc] sm:$0xf]  ;;  %v7514_v19 = vadd.f32 %v16734_v5, %v7501_v14  ;;  %v13905_v5 = vor.u32 %v15717_v54, %v13904_v17  ;;  %v13746_v54 = vld [vmem:[#allocation11 + $0x138] sm:$0xf0] }
 0x537   :  { %v13829_v2 = vor.u32 %v15695_v42, %v13826_v34  ;;  %v15643_v34 = vld [vmem:[#allocation11 + $0x2c] sm:$0xf] }
 0x538   :  { %9396 = vmatpush.bf16.msrb.mxu0 %v14145_v11  ;;  %v7527_v37 = vadd.f32 %v16716_v49, %v7514_v19  ;;  %v13669_v49 = vor.u32 %v15655_v45, %v13666_v46  ;;  %v13618_v19 = vld [vmem:[#allocation11 + $0x38] sm:$0xf0]  ;;  %v14589_v45 = vor.u32 %v15886_v60, %v14586_v7 }
 0x539   :  { %9368 = vmatpush.bf16.msra.mxu2 %v13921_v58  ;;  %v14178_v60 = vld [vmem:[#allocation11 + $0x498] sm:$0xf0] }
 0x53a   :  { %9409 = vmatpush.bf16.msrb.mxu1 %v14273_v55  ;;  %v13813_v55 = vor.u32 %v15691_v39, %v13810_v51  ;;  %v7540_v44 = vadd.f32 %v16718_v4, %v7527_v37  ;;  %v14464_v39 = vld [vmem:[#allocation11 + $0x6c8] sm:$0xf]  ;;  %v15857_v51 = vld [vmem:[#allocation11 + $0x6d4] sm:$0xf0]  ;;  %v13621_v37 = vor.u32 %v15643_v34, %v13618_v19  ;;  %v14322_v34 = vld [vmem:[#allocation11 + $0x5b8] sm:$0xf0] }
 0x53b   :  { %v14465_v46 = vor.u32 %v15857_v51, %v14464_v39  ;;  %v14522_v39 = vld [vmem:[#allocation11 + $0x750] sm:$0xf0]  ;;  %v14400_v51 = vld [vmem:[#allocation11 + $0x648] sm:$0xf] }
 0x53c   :  { %9397 = vmatpush.bf16.msrb.mxu0 %v14129_v36  ;;  %v9166_v11 = vpop.f32.mrf.mxu2  ;;  %v15709_v36 = vld [vmem:[#allocation11 + $0x234] sm:$0xf0] }
 0x53d   :  { %v16744_v47 = vadd.f32 %v9166_v11, %v16732_v13  ;;  %9369 = vmatpush.bf16.msra.mxu2 %v13905_v5  ;;  %v7553_v13 = vadd.f32 %v16728_v53, %v7540_v44  ;;  %v13873_v59 = vor.u32 %v15709_v36, %v13872_v21  ;;  %v13857_v53 = vor.u32 %v15705_v0, %v13856_v33  ;;  %v15639_v5 = vld [vmem:[#allocation11 + $0xc] sm:$0xf]  ;;  %v13602_v11 = vld [vmem:[#allocation11 + $0x18] sm:$0xf0]  ;;  %v14448_v44 = vld [vmem:[#allocation11 + $0x6a8] sm:$0xf] }
 0x53e   :  { %9410 = vmatpush.bf16.msrb.mxu1 %v14257_v27  ;;  %v15651_v27 = vld [vmem:[#allocation11 + $0x6c] sm:$0xf]  ;;  %v15853_v21 = vld [vmem:[#allocation11 + $0x6b4] sm:$0xf0]  ;;  %v14210_v33 = vld [vmem:[#allocation11 + $0x4d8] sm:$0xf0] }
 0x53f   :  { %v13653_v20 = vor.u32 %v15651_v27, %v13650_v62  ;;  %v15827_v36 = vld [vmem:[#allocation11 + $0x5ec] sm:$0xf]  ;;  %v14354_v27 = vld [vmem:[#allocation11 + $0x5f8] sm:$0xf0]  ;;  %v14432_v0 = vld [vmem:[#allocation11 + $0x688] sm:$0xf] }
 0x540   :  { %9398 = vmatpush.bf16.msrb.mxu0 %v14113_v15  ;;  %v16747_v63 = vpop.f32.mrf.mxu0 }
 0x541   :  { %9370 = vmatpush.bf16.msra.mxu2 %v13889_v57  ;;  %v14226_v57 = vld [vmem:[#allocation11 + $0x4f8] sm:$0xf0] }
 0x542   :  { %9411 = vmatpush.bf16.msrb.mxu1 %v14241_v16  ;;  %v7565_v48 = vpop.f32.mrf.mxu3  ;;  %v15679_v16 = vld [vmem:[#allocation11 + $0x14c] sm:$0xf]  ;;  %v14229_v26 = vor.u32 %v15795_v10, %v14226_v57  ;;  %v14506_v57 = vld [vmem:[#allocation11 + $0x730] sm:$0xf0] }
 0x543   :  { %9399 = vmatmul.bf16.vlgmr.msrb.gmra.mxu0 %v16677_v6  ;;  %v7566_v15 = vadd.f32 %v7565_v48, %v7553_v13  ;;  %v13765_v42 = vor.u32 %v15679_v16, %v13762_v32  ;;  %v14449_v13 = vor.u32 %v15853_v21, %v14448_v44  ;;  %v14357_v48 = vor.u32 %v15827_v36, %v14354_v27  ;;  %v15837_v44 = vld [vmem:[#allocation11 + $0x634] sm:$0xf0]  ;;  %v15811_v21 = vld [vmem:[#allocation11 + $0x56c] sm:$0xf]  ;;  %v15862_v27 = vld [vmem:[#allocation11 + $0x704] sm:$0xf] }
 0x544   :  { %9443 = vmatpush.bf16.msra.mxu0 %v13717_v38  ;;  %v9168_v4 = vpop.f32.mrf.mxu2  ;;  %v15890_v38 = vld [vmem:[#allocation11 + $0x7e4] sm:$0xf] }
 0x545   :  { %9412 = vmatmul.bf16.vlgmr.msrb.gmra.mxu1 %v16691_v9  ;;  %v7576_v50 = vmax.f32 %v7566_v15, 0.0  ;;  %9371 = vmatpush.bf16.msra.mxu2 %v13873_v59  ;;  %v15878_v59 = vld [vmem:[#allocation11 + $0x784] sm:$0xf]  ;;  %v14338_v15 = vld [vmem:[#allocation11 + $0x5d8] sm:$0xf0] }
 0x546   :  { %9456 = vmatpush.bf16.msra.mxu1 %v13845_v35  ;;  %v14480_v35 = vld [vmem:[#allocation11 + $0x6e8] sm:$0xf] }
 0x547   :  { %v16750_v58 = vpack.c.bf16 %v7576_v50, %v7576_v50  ;;  %v14481_v17 = vor.u32 %v15861_v29, %v14480_v35  ;;  %v15787_v35 = vld [vmem:[#allocation11 + $0x4ac] sm:$0xf]  ;;  %v14194_v29 = vld [vmem:[#allocation11 + $0x4b8] sm:$0xf0]  ;;  %v14341_v50 = vor.u32 %v15823_v61, %v14338_v15  ;;  %v15833_v61 = vld [vmem:[#allocation11 + $0x614] sm:$0xf0] }
 0x548   :  { %9444 = vmatpush.bf16.msra.mxu0 %v13701_v18  ;;  %v9194_v14 = vpop.f32.mrf.mxu0  ;;  %v14605_v18 = vor.u32 %v15890_v38, %v14602_v8  ;;  %v16754_v4 = vpop.f32.mrf.mxu1  ;;  %v14433_v38 = vor.u32 %v15849_v43, %v14432_v0  ;;  %v15874_v8 = vld [vmem:[#allocation11 + $0x764] sm:$0xf]  ;;  %v14197_v19 = vor.u32 %v15787_v35, %v14194_v29  ;;  %v14368_v43 = vld [vmem:[#allocation11 + $0x608] sm:$0xf]  ;;  %v15807_v15 = vld [vmem:[#allocation11 + $0x54c] sm:$0xf] }
 0x549   :  { %9372 = vmatpush.bf16.msra.mxu2 %v13857_v53  ;;  %9230 = vmatmul.bf16.vlgmr.msrb.gmra.mxu3 %v16750_v58  ;;  %v14538_v53 = vld [vmem:[#allocation11 + $0x770] sm:$0xf0]  ;;  %v15845_v14 = vld [vmem:[#allocation11 + $0x674] sm:$0xf0] }
 0x54a   :  { %9457 = vmatpush.bf16.msra.mxu1 %v13829_v2  ;;  %v15675_v2 = vld [vmem:[#allocation11 + $0x12c] sm:$0xf]  ;;  %9326 = vmatpush.bf16.msrb.mxu3 %v14605_v18  ;;  %v14541_v18 = vor.u32 %v15874_v8, %v14538_v53  ;;  %v15765_v8 = vld [vmem:[#allocation11 + $0x3f4] sm:$0xf0]  ;;  %v13970_v53 = vld [vmem:[#allocation11 + $0x2f8] sm:$0xf0] }
 0x54b   :  { %v13749_v24 = vor.u32 %v15675_v2, %v13746_v54  ;;  %v15870_v2 = vld [vmem:[#allocation11 + $0x744] sm:$0xf]  ;;  %v15783_v54 = vld [vmem:[#allocation11 + $0x48c] sm:$0xf] }
 0x54c   :  { %9445 = vmatpush.bf16.msra.mxu0 %v13685_v28  ;;  %v7567_v28 = vpop.f32.mrf.mxu3  ;;  %9373 = vmatmul.bf16.vlgmr.msra.gmra.mxu2 %v16670_v25 }
 0x54d   :  { %9417 = vmatpush.bf16.msrb.mxu2 %v14481_v17  ;;  %v14306_v28 = vld [vmem:[#allocation11 + $0x598] sm:$0xf0] }
 0x54e   :  { %9458 = vmatpush.bf16.msra.mxu1 %v13813_v55  ;;  %v15671_v55 = vld [vmem:[#allocation11 + $0x10c] sm:$0xf]  ;;  %9327 = vmatpush.bf16.msrb.mxu3 %v14589_v45 }
 0x54f   :  { %v13733_v62 = vor.u32 %v15671_v55, %v13730_v23  ;;  %v15866_v23 = vld [vmem:[#allocation11 + $0x724] sm:$0xf]  ;;  %v15779_v45 = vld [vmem:[#allocation11 + $0x46c] sm:$0xf] }
 0x550   :  { %9446 = vmatpush.bf16.msra.mxu0 %v13669_v49  ;;  %v14570_v49 = vld [vmem:[#allocation11 + $0x7b0] sm:$0xf0] }
 0x551   :  { %9418 = vmatpush.bf16.msrb.mxu2 %v14465_v46  ;;  %v14573_v30 = vor.u32 %v15882_v31, %v14570_v49  ;;  %v14162_v46 = vld [vmem:[#allocation11 + $0x478] sm:$0xf0]  ;;  %v14384_v49 = vld [vmem:[#allocation11 + $0x628] sm:$0xf] }
 0x552   :  { %9459 = vmatpush.bf16.msra.mxu1 %v13797_v1  ;;  %v13605_v1 = vor.u32 %v15639_v5, %v13602_v11  ;;  %v15815_v5 = vld [vmem:[#allocation11 + $0x58c] sm:$0xf]  ;;  %v14525_v11 = vor.u32 %v15870_v2, %v14522_v39  ;;  %v14165_v36 = vor.u32 %v15779_v45, %v14162_v46  ;;  %v13954_v39 = vld [vmem:[#allocation11 + $0x2d8] sm:$0xf0]  ;;  %v14064_v45 = vld [vmem:[#allocation11 + $0x3a8] sm:$0xf] }
 0x553   :  { %9328 = vmatpush.bf16.msrb.mxu3 %v14573_v30  ;;  %v14309_v10 = vor.u32 %v15815_v5, %v14306_v28  ;;  %v14509_v30 = vor.u32 %v15866_v23, %v14506_v57  ;;  %v14242_v23 = vld [vmem:[#allocation11 + $0x518] sm:$0xf0]  ;;  %v15757_v46 = vld [vmem:[#allocation11 + $0x3b4] sm:$0xf0] }
 0x554   :  { %9447 = vmatpush.bf16.msra.mxu0 %v13653_v20  ;;  %v15791_v20 = vld [vmem:[#allocation11 + $0x4cc] sm:$0xf] }
 0x555   :  { %v14213_v16 = vor.u32 %v15791_v20, %v14210_v33  ;;  %9419 = vmatpush.bf16.msrb.mxu2 %v14449_v13  ;;  %v14385_v13 = vor.u32 %v15837_v44, %v14384_v49  ;;  %v15775_v20 = vld [vmem:[#allocation11 + $0x44c] sm:$0xf]  ;;  %v14146_v33 = vld [vmem:[#allocation11 + $0x458] sm:$0xf0]  ;;  %v14065_v44 = vor.u32 %v15757_v46, %v14064_v45 }
 0x556   :  { %9460 = vmatpush.bf16.msra.mxu1 %v13781_v12  ;;  %v14554_v12 = vld [vmem:[#allocation11 + $0x790] sm:$0xf0]  ;;  %v14149_v29 = vor.u32 %v15775_v20, %v14146_v33  ;;  %v15715_v20 = vld [vmem:[#allocation11 + $0x26c] sm:$0xf]  ;;  %v13906_v33 = vld [vmem:[#allocation11 + $0x278] sm:$0xf0] }
 0x557   :  { %v14557_v32 = vor.u32 %v15878_v59, %v14554_v12  ;;  %v14490_v59 = vld [vmem:[#allocation11 + $0x710] sm:$0xf0]  ;;  %v14450_v45 = vld [vmem:[#allocation11 + $0x6b8] sm:$0xf0] }
 0x558   :  { %9448 = vmatpush.bf16.msra.mxu0 %v13637_v40  ;;  %v14416_v40 = vld [vmem:[#allocation11 + $0x668] sm:$0xf] }
 0x559   :  { %9329 = vmatpush.bf16.msrb.mxu3 %v14557_v32  ;;  %9420 = vmatpush.bf16.msrb.mxu2 %v14433_v38  ;;  %v14417_v17 = vor.u32 %v15845_v14, %v14416_v40  ;;  %v14274_v32 = vld [vmem:[#allocation11 + $0x558] sm:$0xf0]  ;;  %v14096_v38 = vld [vmem:[#allocation11 + $0x3e8] sm:$0xf]  ;;  %v14493_v40 = vor.u32 %v15862_v27, %v14490_v59  ;;  %v15719_v27 = vld [vmem:[#allocation11 + $0x28c] sm:$0xf] }
 0x55a   :  { %9461 = vmatpush.bf16.msra.mxu1 %v13765_v42  ;;  %v15819_v42 = vld [vmem:[#allocation11 + $0x5ac] sm:$0xf]  ;;  %9282 = vmatmul.bf16.vlgmr.msra.gmra.mxu3 %v16695_v52  ;;  %v15749_v59 = vld [vmem:[#allocation11 + $0x374] sm:$0xf0] }
 0x55b   :  { %v14325_v7 = vor.u32 %v15819_v42, %v14322_v34  ;;  %v14277_v42 = vor.u32 %v15807_v15, %v14274_v32  ;;  %v14097_v34 = vor.u32 %v15765_v8, %v14096_v38  ;;  %v13890_v15 = vld [vmem:[#allocation11 + $0x258] sm:$0xf0] }
 0x55c   :  { %9449 = vmatpush.bf16.msra.mxu0 %v13621_v37  ;;  %v15841_v37 = vld [vmem:[#allocation11 + $0x654] sm:$0xf0] }
 0x55d   :  { %9330 = vmatpush.bf16.msrb.mxu3 %v14541_v18  ;;  %9421 = vmatpush.bf16.msrb.mxu2 %v14417_v17  ;;  %v14401_v55 = vor.u32 %v15841_v37, %v14400_v51  ;;  %v14130_v18 = vld [vmem:[#allocation11 + $0x438] sm:$0xf0]  ;;  %v15803_v17 = vld [vmem:[#allocation11 + $0x52c] sm:$0xf] }
 0x55e   :  { %9462 = vmatpush.bf16.msra.mxu1 %v13749_v24  ;;  %v14181_v24 = vor.u32 %v15783_v54, %v14178_v60  ;;  %v14080_v60 = vld [vmem:[#allocation11 + $0x3c8] sm:$0xf] }
 0x560   :  { %9450 = vmatpush.bf16.msra.mxu0 %v13605_v1  ;;  %v9244_v31 = vpop.f32.mrf.mxu0  ;;  %v14290_v1 = vld [vmem:[#allocation11 + $0x578] sm:$0xf0] }
 0x561   :  { %9331 = vmatpush.bf16.msrb.mxu3 %v14525_v11  ;;  %9422 = vmatpush.bf16.msrb.mxu2 %v14401_v55  ;;  %v14293_v12 = vor.u32 %v15811_v21, %v14290_v1  ;;  %v14114_v11 = vld [vmem:[#allocation11 + $0x418] sm:$0xf0]  ;;  %v14048_v1 = vld [vmem:[#allocation11 + $0x388] sm:$0xf] }
 0x562   :  { %9463 = vmatpush.bf16.msra.mxu1 %v13733_v62 }
 0x563   :  { %9451 = vmatmul.bf16.vlgmr.msra.gmra.mxu0 %v16654_v22  ;;  %v9207_v22 = vpop.f32.mrf.mxu1 }
 0x564   :  { %9495 = vmatpush.bf16.msrb.mxu0 %v14229_v26  ;;  %v9179_v26 = vpop.f32.mrf.mxu3  ;;  %v15727_v22 = vld [vmem:[#allocation11 + $0x2cc] sm:$0xf] }
 0x565   :  { %9464 = vmatmul.bf16.vlgmr.msra.gmra.mxu1 %v16656_v3  ;;  %v7844_v3 = vperm.slane %v16726_v41, 1  ;;  %9332 = vmatpush.bf16.msrb.mxu3 %v14509_v30  ;;  %v13957_v55 = vor.u32 %v15727_v22, %v13954_v39 }
 0x566   :  { %9508 = vmatpush.bf16.msrb.mxu1 %v14357_v48  ;;  %v9180_v48 = vadd.f32 %v9179_v26, %v16744_v47  ;;  %9423 = vmatpush.bf16.msrb.mxu2 %v14385_v13  ;;  %v14369_v47 = vor.u32 %v15833_v61, %v14368_v43  ;;  %v14032_v13 = vld [vmem:[#allocation11 + $0x368] sm:$0xf]  ;;  %v15745_v43 = vld [vmem:[#allocation11 + $0x354] sm:$0xf0]  ;;  %v15711_v61 = vld [vmem:[#allocation11 + $0x24c] sm:$0xf] }
 0x567   :  { %v9245_v62 = vadd.f32 %v9244_v31, %v7844_v3  ;;  %v15723_v31 = vld [vmem:[#allocation11 + $0x2ac] sm:$0xf]  ;;  %v13893_v8 = vor.u32 %v15711_v61, %v13890_v15  ;;  %v14512_v15 = vld [vmem:[#allocation11 + $0x728] sm:$0xf] }
 0x568   :  { %9496 = vmatpush.bf16.msrb.mxu0 %v14213_v16  ;;  %v9193_v35 = vadd.f32 %v16747_v63, %v9180_v48  ;;  %v9246_v14 = vpop.f32.mrf.mxu0  ;;  %v14258_v63 = vld [vmem:[#allocation11 + $0x538] sm:$0xf0]  ;;  %v14033_v48 = vor.u32 %v15749_v59, %v14032_v13  ;;  %v14528_v59 = vld [vmem:[#allocation11 + $0x748] sm:$0xf] }
 0x569   :  { %9333 = vmatpush.bf16.msrb.mxu3 %v14493_v40  ;;  %v14261_v5 = vor.u32 %v15803_v17, %v14258_v63  ;;  %v15737_v14 = vld [vmem:[#allocation11 + $0x314] sm:$0xf0]  ;;  %v15859_v17 = vld [vmem:[#allocation11 + $0x6ec] sm:$0xf] }
 0x56a   :  { %9509 = vmatpush.bf16.msrb.mxu1 %v14341_v50  ;;  %v15731_v50 = vld [vmem:[#allocation11 + $0x2ec] sm:$0xf]  ;;  %v16765_v2 = vadd.f32 %v16754_v4, %v9193_v35  ;;  %9424 = vmatpush.bf16.msrb.mxu2 %v14369_v47  ;;  %v14000_v35 = vld [vmem:[#allocation11 + $0x328] sm:$0xf] }
 0x56b   :  { %v9257_v0 = vpop.f32.mrf.mxu1  ;;  %v13973_v54 = vor.u32 %v15731_v50, %v13970_v53  ;;  %v15799_v4 = vld [vmem:[#allocation11 + $0x50c] sm:$0xf]  ;;  %v13984_v47 = vld [vmem:[#allocation11 + $0x308] sm:$0xf] }
 0x56c   :  { %9497 = vmatpush.bf16.msrb.mxu0 %v14197_v19  ;;  %v16761_v16 = vadd.f32 %v9257_v0, %v9245_v62  ;;  %v15771_v19 = vld [vmem:[#allocation11 + $0x42c] sm:$0xf]  ;;  %v9181_v51 = vpop.f32.mrf.mxu3  ;;  %9334 = vmatmul.bf16.vlgmr.msrb.gmra.mxu3 %v16750_v58  ;;  %v14245_v49 = vor.u32 %v15799_v4, %v14242_v23  ;;  %v13922_v62 = vld [vmem:[#allocation11 + $0x298] sm:$0xf0]  ;;  %v14016_v0 = vld [vmem:[#allocation11 + $0x348] sm:$0xf]  ;;  %v13985_v63 = vor.u32 %v15737_v14, %v13984_v47 }
 0x56d   :  { %v14133_v37 = vor.u32 %v15771_v19, %v14130_v18  ;;  %9378 = vmatpush.bf16.msra.mxu3 %v14097_v34  ;;  %9425 = vmatmul.bf16.vlgmr.msrb.gmra.mxu2 %v16721_v56  ;;  %v13925_v30 = vor.u32 %v15719_v27, %v13922_v62  ;;  %v14017_v32 = vor.u32 %v15745_v43, %v14016_v0  ;;  %v15707_v50 = vld [vmem:[#allocation11 + $0x22c] sm:$0xf]  ;;  %v13858_v34 = vld [vmem:[#allocation11 + $0x218] sm:$0xf0]  ;;  %v14608_v19 = vld [vmem:[#allocation11 + $0x7e8] sm:$0xf] }
 0x56e   :  { %9510 = vmatpush.bf16.msrb.mxu1 %v14325_v7  ;;  %v15761_v7 = vld [vmem:[#allocation11 + $0x3d4] sm:$0xf0]  ;;  %9469 = vmatpush.bf16.msra.mxu2 %v13973_v54  ;;  %v14482_v54 = vld [vmem:[#allocation11 + $0x6f8] sm:$0xf0]  ;;  %v14576_v4 = vld [vmem:[#allocation11 + $0x7a8] sm:$0xf] }
 0x56f   :  { %v14081_v3 = vor.u32 %v15761_v7, %v14080_v60  ;;  %v15893_v18 = vld [vmem:[#allocation11 + $0x7f4] sm:$0xf0]  ;;  %v14485_v51 = vor.u32 %v15859_v17, %v14482_v54  ;;  %v15851_v23 = vld [vmem:[#allocation11 + $0x6ac] sm:$0xf]  ;;  %v14496_v47 = vld [vmem:[#allocation11 + $0x708] sm:$0xf] }
 0x570   :  { %9498 = vmatpush.bf16.msrb.mxu0 %v14181_v24  ;;  %v15767_v24 = vld [vmem:[#allocation11 + $0x40c] sm:$0xf]  ;;  %v14609_v22 = vor.u32 %v15893_v18, %v14608_v19  ;;  %v15877_v27 = vld [vmem:[#allocation11 + $0x774] sm:$0xf0]  ;;  %v14098_v18 = vld [vmem:[#allocation11 + $0x3f8] sm:$0xf0] }
 0x571   :  { %v14117_v57 = vor.u32 %v15767_v24, %v14114_v11  ;;  %9379 = vmatpush.bf16.msra.mxu3 %v14081_v3  ;;  %v14466_v3 = vld [vmem:[#allocation11 + $0x6d8] sm:$0xf0]  ;;  %v15843_v62 = vld [vmem:[#allocation11 + $0x66c] sm:$0xf]  ;;  %v15865_v14 = vld [vmem:[#allocation11 + $0x714] sm:$0xf0] }
 0x572   :  { %9511 = vmatpush.bf16.msrb.mxu1 %v14309_v10  ;;  %v13938_v10 = vld [vmem:[#allocation11 + $0x2b8] sm:$0xf0]  ;;  %9470 = vmatpush.bf16.msra.mxu2 %v13957_v55  ;;  %v15885_v55 = vld [vmem:[#allocation11 + $0x7b4] sm:$0xf0]  ;;  %v15763_v19 = vld [vmem:[#allocation11 + $0x3ec] sm:$0xf]  ;;  %v14497_v17 = vor.u32 %v15865_v14, %v14496_v47 }
 0x573   :  { %v9259_v28 = vpop.f32.mrf.mxu1  ;;  %v13941_v21 = vor.u32 %v15723_v31, %v13938_v10  ;;  %v14577_v46 = vor.u32 %v15885_v55, %v14576_v4  ;;  %v14453_v31 = vor.u32 %v15851_v23, %v14450_v45  ;;  %v14560_v10 = vld [vmem:[#allocation11 + $0x788] sm:$0xf]  ;;  %v14050_v4 = vld [vmem:[#allocation11 + $0x398] sm:$0xf0]  ;;  %v15747_v45 = vld [vmem:[#allocation11 + $0x36c] sm:$0xf] }
 0x574   :  { %9499 = vmatpush.bf16.msrb.mxu0 %v14165_v36  ;;  %v15753_v36 = vld [vmem:[#allocation11 + $0x394] sm:$0xf0]  ;;  %v15855_v28 = vld [vmem:[#allocation11 + $0x6cc] sm:$0xf]  ;;  %v14530_v14 = vld [vmem:[#allocation11 + $0x758] sm:$0xf0] }
 0x575   :  { %9380 = vmatpush.bf16.msra.mxu3 %v14065_v44  ;;  %v14049_v26 = vor.u32 %v15753_v36, %v14048_v1  ;;  %v14469_v11 = vor.u32 %v15855_v28, %v14466_v3  ;;  %v14434_v44 = vld [vmem:[#allocation11 + $0x698] sm:$0xf0]  ;;  %v14544_v36 = vld [vmem:[#allocation11 + $0x768] sm:$0xf]  ;;  %v15755_v28 = vld [vmem:[#allocation11 + $0x3ac] sm:$0xf] }
 0x576   :  { %9512 = vmatpush.bf16.msrb.mxu1 %v14293_v12  ;;  %9471 = vmatpush.bf16.msra.mxu2 %v13941_v21  ;;  %v13909_v12 = vor.u32 %v15715_v20, %v13906_v33  ;;  %v15873_v20 = vld [vmem:[#allocation11 + $0x754] sm:$0xf0]  ;;  %v7845_v33 = vperm.slane %v16726_v41, 2  ;;  %v14066_v3 = vld [vmem:[#allocation11 + $0x3b8] sm:$0xf0] }
 0x577   :  { %v14529_v0 = vor.u32 %v15873_v20, %v14528_v59  ;;  %v15871_v47 = vld [vmem:[#allocation11 + $0x74c] sm:$0xf] }
 0x578   :  { %9500 = vmatpush.bf16.msrb.mxu0 %v14149_v29 }
 0x579   :  { %9381 = vmatpush.bf16.msra.mxu3 %v14049_v26  ;;  %v14418_v26 = vld [vmem:[#allocation11 + $0x678] sm:$0xf0] }
 0x57a   :  { %9513 = vmatpush.bf16.msrb.mxu1 %v14277_v42  ;;  %9472 = vmatpush.bf16.msra.mxu2 %v13925_v30  ;;  %v15703_v42 = vld [vmem:[#allocation11 + $0x20c] sm:$0xf]  ;;  %v14421_v13 = vor.u32 %v15843_v62, %v14418_v26  ;;  %v13986_v62 = vld [vmem:[#allocation11 + $0x318] sm:$0xf0] }
 0x57b   :  { %v13861_v7 = vor.u32 %v15703_v42, %v13858_v34  ;;  %v15831_v42 = vld [vmem:[#allocation11 + $0x60c] sm:$0xf]  ;;  %v14370_v34 = vld [vmem:[#allocation11 + $0x618] sm:$0xf0] }
 0x57c   :  { %9501 = vmatpush.bf16.msrb.mxu0 %v14133_v37  ;;  %v14592_v37 = vld [vmem:[#allocation11 + $0x7c8] sm:$0xf]  ;;  %v15891_v26 = vld [vmem:[#allocation11 + $0x7ec] sm:$0xf] }
 0x57d   :  { %9382 = vmatpush.bf16.msra.mxu3 %v14033_v48  ;;  %v15839_v48 = vld [vmem:[#allocation11 + $0x64c] sm:$0xf] }
 0x57e   :  { %9514 = vmatpush.bf16.msrb.mxu1 %v14261_v5  ;;  %9473 = vmatpush.bf16.msra.mxu2 %v13909_v12  ;;  %v15889_v5 = vld [vmem:[#allocation11 + $0x7d4] sm:$0xf0]  ;;  %v14402_v12 = vld [vmem:[#allocation11 + $0x658] sm:$0xf0] }
 0x57f   :  { %v14593_v24 = vor.u32 %v15889_v5, %v14592_v37  ;;  %v14405_v61 = vor.u32 %v15839_v48, %v14402_v12  ;;  %v15887_v12 = vld [vmem:[#allocation11 + $0x7cc] sm:$0xf] }
 0x580   :  { %9502 = vmatpush.bf16.msrb.mxu0 %v14117_v57  ;;  %v16771_v38 = vpop.f32.mrf.mxu0  ;;  %v15881_v57 = vld [vmem:[#allocation11 + $0x794] sm:$0xf0] }
 0x581   :  { %9383 = vmatpush.bf16.msra.mxu3 %v14017_v32  ;;  %v14561_v21 = vor.u32 %v15881_v57, %v14560_v10  ;;  %v15869_v32 = vld [vmem:[#allocation11 + $0x734] sm:$0xf0]  ;;  %v14018_v10 = vld [vmem:[#allocation11 + $0x358] sm:$0xf0] }
 0x582   :  { %9515 = vmatpush.bf16.msrb.mxu1 %v14245_v49  ;;  %v16773_v29 = vpop.f32.mrf.mxu1  ;;  %9474 = vmatpush.bf16.msra.mxu2 %v13893_v8  ;;  %v15847_v49 = vld [vmem:[#allocation11 + $0x68c] sm:$0xf] }
 0x583   :  { %9503 = vmatmul.bf16.vlgmr.msrb.gmra.mxu0 %v16677_v6  ;;  %v15741_v6 = vld [vmem:[#allocation11 + $0x334] sm:$0xf0]  ;;  %v14437_v1 = vor.u32 %v15847_v49, %v14434_v44  ;;  %v15739_v44 = vld [vmem:[#allocation11 + $0x32c] sm:$0xf] }
 0x584   :  { %v14001_v53 = vor.u32 %v15741_v6, %v14000_v35  ;;  %v15835_v6 = vld [vmem:[#allocation11 + $0x62c] sm:$0xf] }
 0x585   :  { %9516 = vmatmul.bf16.vlgmr.msrb.gmra.mxu1 %v16691_v9  ;;  %v13874_v9 = vld [vmem:[#allocation11 + $0x238] sm:$0xf0] }
 0x586   :  { %v13877_v40 = vor.u32 %v15707_v50, %v13874_v9  ;;  %9384 = vmatpush.bf16.msra.mxu3 %v14001_v53  ;;  %v14386_v50 = vld [vmem:[#allocation11 + $0x638] sm:$0xf0] }
 0x587   :  { %v14389_v41 = vor.u32 %v15835_v6, %v14386_v50  ;;  %v15875_v50 = vld [vmem:[#allocation11 + $0x76c] sm:$0xf] }
 0x588   :  { %9475 = vmatpush.bf16.msra.mxu2 %v13877_v40  ;;  %v9298_v60 = vpop.f32.mrf.mxu0  ;;  %v14513_v40 = vor.u32 %v15869_v32, %v14512_v15  ;;  %v14578_v15 = vld [vmem:[#allocation11 + $0x7b8] sm:$0xf0] }
 0x589   :  { %v14101_v60 = vor.u32 %v15763_v19, %v14098_v18  ;;  %v15936_v19 = vld [vmem:[#allocation13] sm:$0xf] }
 0x58a   :  { %v9311_v39 = vpop.f32.mrf.mxu1  ;;  %9385 = vmatpush.bf16.msra.mxu3 %v13985_v63  ;;  %v14373_v63 = vor.u32 %v15831_v42, %v14370_v34 }
 0x58b   :  { %v14082_v39 = vld [vmem:[#allocation11 + $0x3d8] sm:$0xf0] }
 0x58c   :  { %9476 = vmatpush.bf16.msra.mxu2 %v13861_v7 }
 0x58d   :  { %9386 = vmatmul.bf16.vlgmr.msra.gmra.mxu3 %v16695_v52  ;;  %v16777_v30 = vpop.f32.mrf.mxu2 }
 0x58e   :  { %9430 = vmatpush.bf16.msrb.mxu3 %v14609_v22  ;;  %v15759_v22 = vld [vmem:[#allocation11 + $0x3cc] sm:$0xf] }
 0x58f   :  { %9477 = vmatmul.bf16.vlgmr.msra.gmra.mxu2 %v16670_v25  ;;  %v14545_v25 = vor.u32 %v15877_v27, %v14544_v36  ;;  %v14085_v5 = vor.u32 %v15759_v22, %v14082_v39  ;;  %v15735_v27 = vld [vmem:[#allocation11 + $0x30c] sm:$0xf] }
 0x590   :  { %9521 = vmatpush.bf16.msrb.mxu2 %v14485_v51  ;;  %v13989_v59 = vor.u32 %v15735_v27, %v13986_v62  ;;  %v15899_v27 = vld [vmem:[#allocation14 + $0x28] sm:$0xff]  ;;  %v15898_v62 = vld [vmem:[#allocation14 + $0x20] sm:$0xff] }
 0x592   :  { %9431 = vmatpush.bf16.msrb.mxu3 %v14593_v24  ;;  %v14069_v24 = vor.u32 %v15755_v28, %v14066_v3 }
 0x594   :  { %9522 = vmatpush.bf16.msrb.mxu2 %v14469_v11  ;;  %v15751_v11 = vld [vmem:[#allocation11 + $0x38c] sm:$0xf] }
 0x595   :  { %v9220_v53 = vpop.f32.mrf.mxu2  ;;  %v14053_v23 = vor.u32 %v15751_v11, %v14050_v4 }
 0x596   :  { %9432 = vmatpush.bf16.msrb.mxu3 %v14577_v46  ;;  %v14034_v46 = vld [vmem:[#allocation11 + $0x378] sm:$0xf0] }
 0x597   :  { %v14546_v53 = vld [vmem:[#allocation11 + $0x778] sm:$0xf0] }
 0x598   :  { %9523 = vmatpush.bf16.msrb.mxu2 %v14453_v31  ;;  %v14037_v31 = vor.u32 %v15747_v45, %v14034_v46 }
 0x59a   :  { %9433 = vmatpush.bf16.msrb.mxu3 %v14561_v21  ;;  %v14002_v21 = vld [vmem:[#allocation11 + $0x338] sm:$0xf0] }
 0x59b   :  { %v14005_v36 = vor.u32 %v15739_v44, %v14002_v21 }
 0x59c   :  { %9524 = vmatpush.bf16.msrb.mxu2 %v14437_v1 }
 0x59d   :  { %v9270_v51 = vpop.f32.mrf.mxu2 }
 0x59e   :  { %9434 = vmatpush.bf16.msrb.mxu3 %v14545_v25  ;;  %v16783_v37 = vadd.f32 %v9270_v51, %v16761_v16  ;;  %v15743_v16 = vld [vmem:[#allocation11 + $0x34c] sm:$0xf]  ;;  %v14610_v25 = vld [vmem:[#allocation11 + $0x7f8] sm:$0xf0] }
 0x59f   :  { %v14021_v49 = vor.u32 %v15743_v16, %v14018_v10  ;;  %v14613_v20 = vor.u32 %v15891_v26, %v14610_v25  ;;  %v15863_v51 = vld [vmem:[#allocation11 + $0x70c] sm:$0xf] }
 0x5a0   :  { %9525 = vmatpush.bf16.msrb.mxu2 %v14421_v13  ;;  %v9348_v43 = vpop.f32.mrf.mxu0 }
 0x5a1   :  { %v9349_v8 = vadd.f32 %v9348_v43, %v7845_v33 }
 0x5a2   :  { %v9361_v35 = vpop.f32.mrf.mxu1  ;;  %9435 = vmatpush.bf16.msrb.mxu3 %v14529_v0  ;;  %v14594_v0 = vld [vmem:[#allocation11 + $0x7d8] sm:$0xf0] }
 0x5a3   :  { %v16780_v9 = vadd.f32 %v9361_v35, %v9349_v8  ;;  %v14597_v43 = vor.u32 %v15887_v12, %v14594_v0  ;;  %v15879_v8 = vld [vmem:[#allocation11 + $0x78c] sm:$0xf]  ;;  %v14562_v35 = vld [vmem:[#allocation11 + $0x798] sm:$0xf0]  ;;  %v15894_v0 = vld [vmem:[#allocation14] sm:$0xff] }
 0x5a4   :  { %9526 = vmatpush.bf16.msrb.mxu2 %v14405_v61  ;;  %v15883_v61 = vld [vmem:[#allocation11 + $0x7ac] sm:$0xf]  ;;  %v14565_v6 = vor.u32 %v15879_v8, %v14562_v35 }
 0x5a5   :  { %v9272_v55 = vpop.f32.mrf.mxu2  ;;  %v14581_v32 = vor.u32 %v15883_v61, %v14578_v15  ;;  %v15895_v12 = vld [vmem:[#allocation14 + $0x8] sm:$0xff] }
 0x5a6   :  { %9436 = vmatpush.bf16.msrb.mxu3 %v14513_v40  ;;  %v14549_v40 = vor.u32 %v15875_v50, %v14546_v53 }
 0x5a8   :  { %9527 = vmatpush.bf16.msrb.mxu2 %v14389_v41  ;;  %v9350_v54 = vpop.f32.mrf.mxu0  ;;  %v9219_v41 = vadd.f32 %v16777_v30, %v16765_v2 }
 0x5aa   :  { %v9363_v7 = vpop.f32.mrf.mxu1  ;;  %9437 = vmatpush.bf16.msrb.mxu3 %v14497_v17  ;;  %v14533_v17 = vor.u32 %v15871_v47, %v14530_v14  ;;  %v15908_v47 = vld [vmem:[#allocation14 + $0x70] sm:$0xff] }
 0x5ac   :  { %9528 = vmatpush.bf16.msrb.mxu2 %v14373_v63  ;;  %v15867_v63 = vld [vmem:[#allocation11 + $0x72c] sm:$0xf] }
 0x5ad   :  { %9438 = vmatmul.bf16.vlgmr.msrb.gmra.mxu3 %v16750_v58 }
 0x5ae   :  { %9482 = vmatpush.bf16.msra.mxu3 %v14101_v60  ;;  %v14514_v60 = vld [vmem:[#allocation11 + $0x738] sm:$0xf0] }
 0x5af   :  { %9529 = vmatmul.bf16.vlgmr.msrb.gmra.mxu2 %v16721_v56  ;;  %v16787_v57 = vpop.f32.mrf.mxu2  ;;  %v14517_v22 = vor.u32 %v15867_v63, %v14514_v60  ;;  %v15905_v60 = vld [vmem:[#allocation14 + $0x58] sm:$0xff] }
 0x5b2   :  { %9483 = vmatpush.bf16.msra.mxu3 %v14085_v5  ;;  %v14498_v5 = vld [vmem:[#allocation11 + $0x718] sm:$0xf0] }
 0x5b6   :  { %9484 = vmatpush.bf16.msra.mxu3 %v14069_v24  ;;  %v14501_v24 = vor.u32 %v15863_v51, %v14498_v5 }
 0x5b7   :  { %v9324_v13 = vpop.f32.mrf.mxu2 }
 0x5b8   :  { %v15897_v13 = vld [vmem:[#allocation14 + $0x18] sm:$0xff] }
 0x5ba   :  { %9485 = vmatpush.bf16.msra.mxu3 %v14053_v23 }
 0x5be   :  { %9486 = vmatpush.bf16.msra.mxu3 %v14037_v31 }
 0x5c0   :  { %v16789_v56 = vpop.f32.mrf.mxu0 }
 0x5c2   :  { %v16791_v1 = vpop.f32.mrf.mxu1  ;;  %9487 = vmatpush.bf16.msra.mxu3 %v14021_v49 }
 0x5c6   :  { %9488 = vmatpush.bf16.msra.mxu3 %v14005_v36 }
 0x5c8   :  { %v9402_v33 = vpop.f32.mrf.mxu0 }
 0x5ca   :  { %v9415_v48 = vpop.f32.mrf.mxu1  ;;  %9489 = vmatpush.bf16.msra.mxu3 %v13989_v59 }
 0x5cc   :  { %v9231_v42 = vpop.f32.mrf.mxu3 }
 0x5cd   :  { %9490 = vmatmul.bf16.vlgmr.msra.gmra.mxu3 %v16695_v52  ;;  %v16796_v34 = vadd.f32 %v9231_v42, %v9219_v41  ;;  %v7846_v52 = vperm.slane %v15936_v19, 3  ;;  %v9553_v41 = vld [vmem:[#allocation2] sm:$0xff] }
 0x5ce   :  { %9534 = vmatpush.bf16.msrb.mxu3 %v14613_v20  ;;  %v15896_v20 = vld [vmem:[#allocation14 + $0x10] sm:$0xff] }
 0x5cf   :  { %v9374_v18 = vpop.f32.mrf.mxu2  ;;  %9721 = vst [vmem:[%s16844_s11] sm:$0xff] %v16796_v34 }
 0x5d0   :  { %v9375_v54 = vadd.f32 %v9374_v18, %v16780_v9 }
 0x5d2   :  { %9535 = vmatpush.bf16.msrb.mxu3 %v14597_v43 }
 0x5d4   :  { %v9233_v28 = vpop.f32.mrf.mxu3 }
 0x5d6   :  { %9536 = vmatpush.bf16.msrb.mxu3 %v14581_v32 }
 0x5d7   :  { %v9376_v3 = vpop.f32.mrf.mxu2 }
 0x5da   :  { %9537 = vmatpush.bf16.msrb.mxu3 %v14565_v6 }
 0x5dd   :  { %v9283_v55 = vpop.f32.mrf.mxu3 }
 0x5de   :  { %9538 = vmatpush.bf16.msrb.mxu3 %v14549_v40  ;;  %v9284_v9 = vadd.f32 %v9283_v55, %v16783_v37  ;;  %v15901_v37 = vld [vmem:[#allocation14 + $0x38] sm:$0xff]  ;;  %v9555_v55 = vunpack.c.h.bf16 %v9553_v41 }
 0x5df   :  { %9694 = vmatpush.bf16.msra.mxu0 %v15901_v37  ;;  %v15909_v40 = vld [vmem:[#allocation14 + $0x78] sm:$0xff] }
 0x5e0   :  { %v9452_v2 = vpop.f32.mrf.mxu0  ;;  %v9297_v23 = vadd.f32 %v16771_v38, %v9284_v9  ;;  %9707 = vmatpush.bf16.msra.mxu1 %v15909_v40 }
 0x5e1   :  { %v9453_v30 = vadd.f32 %v9452_v2, %v7846_v52  ;;  %v15904_v2 = vld [vmem:[#allocation14 + $0x50] sm:$0xff] }
 0x5e2   :  { %v9465_v7 = vpop.f32.mrf.mxu1  ;;  %9539 = vmatpush.bf16.msrb.mxu3 %v14533_v17  ;;  %v9310_v46 = vadd.f32 %v16773_v29, %v9297_v23  ;;  %v15900_v29 = vld [vmem:[#allocation14 + $0x30] sm:$0xff] }
 0x5e3   :  { %v9466_v39 = vadd.f32 %v9465_v7, %v9453_v30  ;;  %9695 = vmatpush.bf16.msra.mxu0 %v15900_v29  ;;  %v15903_v7 = vld [vmem:[#allocation14 + $0x48] sm:$0xff] }
 0x5e4   :  { %v9323_v31 = vadd.f32 %v16787_v57, %v9310_v46  ;;  %9708 = vmatpush.bf16.msra.mxu1 %v15908_v47 }
 0x5e5   :  { %v9285_v45 = vpop.f32.mrf.mxu3 }
 0x5e6   :  { %9540 = vmatpush.bf16.msrb.mxu3 %v14517_v22  ;;  %v15902_v22 = vld [vmem:[#allocation14 + $0x40] sm:$0xff] }
 0x5e7   :  { %9696 = vmatpush.bf16.msra.mxu0 %v15899_v27 }
 0x5e8   :  { %v9454_v11 = vpop.f32.mrf.mxu0 }
 0x5ea   :  { %v9467_v4 = vpop.f32.mrf.mxu1  ;;  %9541 = vmatpush.bf16.msrb.mxu3 %v14501_v24 }
 0x5eb   :  { %9697 = vmatpush.bf16.msra.mxu0 %v15898_v62 }
 0x5ed   :  { %9542 = vmatmul.bf16.vlgmr.msrb.gmra.mxu3 %v16750_v58 }
 0x5ef   :  { %v9335_v10 = vpop.f32.mrf.mxu3  ;;  %9698 = vmatpush.bf16.msra.mxu0 %v15897_v13 }
 0x5f0   :  { %v9426_v16 = vpop.f32.mrf.mxu2  ;;  %v16808_v49 = vadd.f32 %v9335_v10, %v9323_v31  ;;  %v15926_v10 = vld [vmem:[#allocation16] ss:$0 sm:$0xff] }
 0x5f2   :  { %9722 = vst [vmem:[%s16844_s11 + $0x8] sm:$0xff] %v16808_v49 }
 0x5f3   :  { %9699 = vmatpush.bf16.msra.mxu0 %v15896_v20 }
 0x5f7   :  { %v9337_v21 = vpop.f32.mrf.mxu3  ;;  %9700 = vmatpush.bf16.msra.mxu0 %v15895_v12 }
 0x5f8   :  { %v9428_v38 = vpop.f32.mrf.mxu2 }
 0x5fb   :  { %9701 = vmatpush.bf16.msra.mxu0 %v15894_v0 }
 0x600   :  { %v16810_v44 = vpop.f32.mrf.mxu0 }
 0x602   :  { %v16816_v58 = vpop.f32.mrf.mxu1 }
 0x608   :  { %v9506_v36 = vpop.f32.mrf.mxu0 }
 0x60a   :  { %v9519_v57 = vpop.f32.mrf.mxu1 }
 0x610   :  { %v9387_v26 = vpop.f32.mrf.mxu3 }
 0x611   :  { %v9388_v43 = vadd.f32 %v9387_v26, %v9375_v54  ;;  %v15906_v54 = vld [vmem:[#allocation14 + $0x60] sm:$0xff] }
 0x612   :  { %v9478_v25 = vpop.f32.mrf.mxu2 }
 0x613   :  { %v9479_v59 = vadd.f32 %v9478_v25, %v9466_v39  ;;  %v9401_v61 = vadd.f32 %v16789_v56, %v9388_v43  ;;  %v9554_v56 = vunpack.c.l.bf16 %v9553_v41 }
 0x615   :  { %v9414_v15 = vadd.f32 %v16791_v1, %v9401_v61  ;;  %v15907_v1 = vld [vmem:[#allocation14 + $0x68] sm:$0xff] }
 0x616   :  { %9709 = vmatpush.bf16.msra.mxu1 %v15907_v1 }
 0x617   :  { %v9427_v32 = vadd.f32 %v9426_v16, %v9414_v15 }
 0x618   :  { %v9389_v33 = vpop.f32.mrf.mxu3 }
 0x61a   :  { %v9480_v48 = vpop.f32.mrf.mxu2  ;;  %9710 = vmatpush.bf16.msra.mxu1 %v15906_v54 }
 0x61e   :  { %9711 = vmatpush.bf16.msra.mxu1 %v15905_v60 }
 0x622   :  { %9712 = vmatpush.bf16.msra.mxu1 %v15904_v2 }
 0x626   :  { %9713 = vmatpush.bf16.msra.mxu1 %v15903_v7 }
 0x62a   :  { %9714 = vmatpush.bf16.msra.mxu1 %v15902_v22 }
 0x630   :  { %v9439_v8 = vpop.f32.mrf.mxu3 }
 0x631   :  { %v9440_v35 = vadd.f32 %v9439_v8, %v9427_v32 }
 0x632   :  { %v9530_v6 = vpop.f32.mrf.mxu2 }
 0x633   :  { %v9547_v50 = vmul.f32 0.5, %v9440_v35  ;;  %9723 = vst [vmem:[%s16844_s11 + $0x10] sm:$0xff] %v9440_v35 }
 0x635   :  { %v9549_v53 = vmul.f32 1.442695, %v9547_v50 }
 0x637   :  { %15927 = vpow2.f32 %v9549_v53 }
 0x638   :  { %v9441_v14 = vpop.f32.mrf.mxu3 }
 0x63a   :  { %v9532_v42 = vpop.f32.mrf.mxu2 }
 0x63d   :  { %v15928_v19 = vpop.eup %15927 }
 0x63e   :  { %v9556_v52 = vmul.f32 %v15928_v19, %v9554_v56 }
 0x640   :  { %v9558_v18 = vadd.f32 %v9556_v52, %v16796_v34 }
 0x642   :  { %v9560_v17 = vpack.c.bf16 %v9558_v18, %v9558_v18 }
 0x644   :  { %9702 = vmatmul.bf16.vlgmr.msra.gmra.mxu0 %v9560_v17 }
 0x650   :  { %v9491_v63 = vpop.f32.mrf.mxu3 }
 0x651   :  { %v9492_v39 = vadd.f32 %v9491_v63, %v9479_v59 }
 0x653   :  { %v9505_v51 = vadd.f32 %v16810_v44, %v9492_v39 }
 0x655   :  { %v9518_v5 = vadd.f32 %v16816_v58, %v9505_v51 }
 0x657   :  { %v9531_v34 = vadd.f32 %v9530_v6, %v9518_v5 }
 0x658   :  { %v9493_v30 = vpop.f32.mrf.mxu3 }
 0x670   :  { %v9543_v28 = vpop.f32.mrf.mxu3 }
 0x671   :  { %v9544_v3 = vadd.f32 %v9543_v28, %v9531_v34 }
 0x673   :  { %v9548_v24 = vmul.f32 0.5, %v9544_v3  ;;  %9724 = vst [vmem:[%s16844_s11 + $0x18] sm:$0xff] %v9544_v3 }
 0x675   :  { %v9551_v11 = vmul.f32 1.442695, %v9548_v24 }
 0x677   :  { %15929 = vpow2.f32 %v9551_v11 }
 0x678   :  { %v9545_v4 = vpop.f32.mrf.mxu3 }
 0x67d   :  { %v15930_v9 = vpop.eup %15929 }
 0x67e   :  { %v9557_v23 = vmul.f32 %v15930_v9, %v9555_v55 }
 0x680   :  { %v9559_v45 = vadd.f32 %v9557_v23, %v16808_v49 }
 0x682   :  { %v9561_v46 = vpack.c.bf16 %v9559_v45, %v9559_v45 }
 0x684   :  { %9715 = vmatmul.bf16.vlgmr.msra.gmra.mxu1 %v9561_v46 }
 0x6c1   :  { %v9703_v31 = vpop.f32.mrf.mxu0 }
 0x6c2   :  { %v9704_v44 = vadd.f32 %v15926_v10, %v9703_v31 }
 0x6c9   :  { %v9705_v16 = vpop.f32.mrf.mxu0 }
 0x701   :  { %v9716_v58 = vpop.f32.mrf.mxu1 }
 0x702   :  { %v9717_v37 = vadd.f32 %v9716_v58, %v9704_v44 }
 0x704   :  { %9720 = vst [vmem:[#allocation17] sm:$0xff] %v9717_v37 }
 0x705   :  { %9735 = dma.vmem_to_hbm [thread:$0]  %s9731_s1, 128, %s9733_s15, [#allocation4]  }
 0x709   :  { %v9718_v38 = vpop.f32.mrf.mxu1 }
 0x70a   :  { %16187 = dma.done.wait [#allocation4], 128  }
 0x70b   :  { %16188 = vsyncadd [#allocation4], 4294967168 }
 0x70c   :  { %9744 = vsyncpa [#allocation3], 1 }
 0x70d   :  { %9745 = vsyncpa [#allocation6], 1 }
 0x70e   :  { %9746 = vsyncpa [#allocation9], 1 }
 0x70f   :  { %9747 = vsyncpa [#allocation12], 1 }
 0x710   :  { %9748 = vsyncpa [#allocation15], 1 }
 0x711   :  { %9749 = vsyncpa [#allocation4], 1 }

</bundles_post_ra>
